<compile_context>
chip_gen: v6e
topology: v6e:2x2x1
jax: 0.10.0
libtpu: 0.0.40
codegen_flags: <defaults>
</compile_context>

<pallas_src>
import functools
import math

import jax
import jax.numpy as jnp
from jax import lax
from jax.experimental import pallas as pl
from jax.experimental.pallas import tpu as pltpu


def _convT_phase_kernel(x_ref, w_ref, o_ref, *, H, W, Cout,
                        activation, negative_slope):
    """One batch element of ConvTranspose2d(k=4, s=2, p=1) [+ LeakyReLU].

    x_ref: (1, Cin, H, W)         NCHW input block
    w_ref: (2, 2, 4*Cout, Cin)    [rh, dh] -> per-row-tap matrices; the 4*Cout
                                  rows stack the 4 (rw, dw) column taps.
    o_ref: (1, Cout, 2H, 2W)      NCHW output block
    """
    f32 = jnp.float32
    Wo = 2 * W

    # Placement matrices: column tap (rw, dw) sends its column b of the per-tap
    # result to output column ow = 2*b + (2 - 2*dw - rw).  Doing this with a 0/1
    # matmul performs both the column-tap alignment and the even/odd column
    # interleave with dense lane-width-Wo results (exact in f32: multiply by 1.0,
    # one term per output column).
    b_ix = lax.broadcasted_iota(jnp.int32, (W, Wo), 0)
    o_ix = lax.broadcasted_iota(jnp.int32, (W, Wo), 1)
    G = []
    for rw in (0, 1):
        for dw in (0, 1):
            shift = 2 - 2 * dw - rw
            G.append((o_ix == 2 * b_ix + shift).astype(f32))

    # Hoist the (tiny) weight matrices out of the unrolled row loop.
    wmat = [[w_ref[rh, dh] for dh in (0, 1)] for rh in (0, 1)]  # (4*Cout, Cin)

    for rh in (0, 1):                       # output-row parity (phase)
        for a in range(H):                  # output row oh = 2*a + rh
            r0 = a + rh - 1                 # input row for row tap dh=0
            r1 = a + rh                     # input row for row tap dh=1
            # Channel contraction for both row taps (boundary rows contribute 0).
            t = jnp.zeros((4 * Cout, W), f32)
            if 0 <= r0 < H:
                t = t + jnp.dot(wmat[rh][0], x_ref[0, :, r0, :],
                                preferred_element_type=f32)
            if 0 <= r1 < H:
                t = t + jnp.dot(wmat[rh][1], x_ref[0, :, r1, :],
                                preferred_element_type=f32)
            # Scatter the 4 column taps into the full-width output row (MXU).
            acc = jnp.zeros((Cout, Wo), f32)
            for i in range(4):
                acc = acc + jnp.dot(t[i * Cout:(i + 1) * Cout, :], G[i],
                                    preferred_element_type=f32)
            if activation:
                acc = jnp.where(acc >= 0, acc, negative_slope * acc)
            o_ref[0, :, 2 * a + rh, :] = acc.astype(o_ref.dtype)


def upsample_fractional_conv2d(x_nchw, w_t, *, kernel_size=4, stride=2,
                               negative_slope=0.2, activation=False):
    """Matches nn.ConvTranspose2d(Cin, Cout, 4, 2, padding=1, bias=False)
    [+ optional LeakyReLU].  x_nchw: (N, Cin, H, W); w_t: (Cin, Cout, K, K)."""
    N, Cin, H, W = x_nchw.shape
    Cin_w, Cout, K, K2 = w_t.shape
    assert Cin == Cin_w and K == K2 == kernel_size
    assert kernel_size == 4 and stride == 2, "specialized to module defaults k=4, s=2"
    Ho, Wo = 2 * H, 2 * W

    # Sub-pixel identity used by the kernel:
    #   out[n, co, 2a+rh, 2b+rw] =
    #     sum_{ci,dh,dw} x[n, ci, a+rh-1+dh, b+rw-1+dw] * w[ci, co, 3-rh-2dh, 3-rw-2dw]
    # Weight re-pack (tiny):
    #   wd[rh, dh, (2*rw+dw)*Cout + co, ci] = w[ci, co, 3-rh-2dh, 3-rw-2dw]
    kh_idx = jnp.array([[3 - rh - 2 * dh for dh in (0, 1)] for rh in (0, 1)])  # (2,2)
    kw_idx = jnp.array([3 - rw - 2 * dw for rw in (0, 1) for dw in (0, 1)])    # (4,)
    wsel = w_t[:, :, kh_idx][:, :, :, :, kw_idx]          # (ci, co, rh, dh, i)
    wd = jnp.transpose(wsel, (2, 3, 4, 1, 0)).reshape(2, 2, 4 * Cout, Cin)

    kernel = functools.partial(_convT_phase_kernel, H=H, W=W, Cout=Cout,
                               activation=activation,
                               negative_slope=negative_slope)

    return pl.pallas_call(
        kernel,
        out_shape=jax.ShapeDtypeStruct((N, Cout, Ho, Wo), x_nchw.dtype),
        grid=(N,),
        in_specs=[
            pl.BlockSpec((1, Cin, H, W), lambda n: (n, 0, 0, 0)),
            pl.BlockSpec((2, 2, 4 * Cout, Cin), lambda n: (0, 0, 0, 0)),
        ],
        out_specs=pl.BlockSpec((1, Cout, Ho, Wo), lambda n: (n, 0, 0, 0)),
        compiler_params=pltpu.CompilerParams(
            dimension_semantics=("parallel",)),
    )(x_nchw, wd)


def _reference(x_nchw, w_t, *, stride, negative_slope, activation):
    """Pure-JAX reference: transposed conv via lhs-dilated convolution."""
    Cin, Cout, K, _ = w_t.shape
    s = stride
    pad = K - 1 - (s - 1)
    w_oihw = jnp.transpose(w_t, (1, 0, 2, 3))[:, :, ::-1, ::-1]  # (Cout,Cin,K,K)
    y = lax.conv_general_dilated(
        x_nchw, w_oihw, window_strides=(1, 1),
        padding=[(pad, pad), (pad, pad)], lhs_dilation=(s, s),
        dimension_numbers=("NCHW", "OIHW", "NCHW"))
    if activation:
        y = jnp.where(y >= 0, y, negative_slope * y)
    return y


if __name__ == "__main__":
    key = jax.random.PRNGKey(0)
    kx, kw = jax.random.split(key)

    N, Cin, H, W = 2, 4, 16, 16
    Cout, K, S = 8, 4, 2
    negative_slope = 0.2
    activation = True

    x = jax.random.normal(kx, (N, Cin, H, W), jnp.float32)
    # ConvTranspose2d weight shape: (in_channels, out_channels, kH, kW).
    # Deterministic synthetic init (uniform, fan-in scaled), not a checkpoint.
    bound = 1.0 / math.sqrt(Cin * K * K)
    w_t = jax.random.uniform(kw, (Cin, Cout, K, K), jnp.float32,
                             minval=-bound, maxval=bound)

    out = upsample_fractional_conv2d(
        x, w_t, kernel_size=K, stride=S,
        negative_slope=negative_slope, activation=activation)
    out = jax.block_until_ready(out)

    ref = _reference(x, w_t, stride=S, negative_slope=negative_slope,
                     activation=activation)
    assert out.shape == (N, Cout, 2 * H, 2 * W), out.shape
    assert jnp.allclose(out, ref, atol=1e-4, rtol=1e-4), "mismatch vs reference"

    print("KERNEL_OK")
</pallas_src>

<mosaic_0001>
module attributes {stable_mosaic.version = 11 : i64} {
  func.func @_convT_phase_kernel(%arg0: i32, %arg1: memref<1x4x16x16xf32, #tpu.memory_space<vmem>>, %arg2: memref<2x2x32x4xf32, #tpu.memory_space<vmem>>, %arg3: memref<1x8x32x32xf32, #tpu.memory_space<vmem>>) attributes {dimension_semantics = [#tpu.dimension_semantics<parallel>], iteration_bounds = array<i64: 2>, scalar_prefetch = 0 : i64, scratch_operands = 0 : i64, tpu.core_type = #tpu.core_type<tc>, window_params = [{transform_indices = @transform_0, window_bounds = array<i64: 1, 4, 16, 16>}, {pipeline_mode = #tpu.pipeline_mode<synchronous>, transform_indices = @transform_1, window_bounds = array<i64: 2, 2, 32, 4>}, {transform_indices = @transform_2, window_bounds = array<i64: 1, 8, 32, 32>}]} {
    %0 = tpu.iota {dimensions = array<i32: 0>} : vector<16x32xi32>
    %1 = tpu.iota {dimensions = array<i32: 1>} : vector<16x32xi32>
    %c2_i32 = arith.constant 2 : i32
    %2 = vector.broadcast %c2_i32 : i32 to vector<16x32xi32>
    %3 = arith.muli %2, %0 : vector<16x32xi32>
    %c2_i32_0 = arith.constant 2 : i32
    %4 = vector.broadcast %c2_i32_0 : i32 to vector<16x32xi32>
    %5 = arith.addi %3, %4 : vector<16x32xi32>
    %6 = arith.cmpi eq, %1, %5 : vector<16x32xi32>
    %7 = arith.extui %6 : vector<16x32xi1> to vector<16x32xi32>
    %8 = arith.sitofp %7 : vector<16x32xi32> to vector<16x32xf32>
    %c2_i32_1 = arith.constant 2 : i32
    %9 = vector.broadcast %c2_i32_1 : i32 to vector<16x32xi32>
    %10 = arith.muli %9, %0 : vector<16x32xi32>
    %c0_i32 = arith.constant 0 : i32
    %11 = vector.broadcast %c0_i32 : i32 to vector<16x32xi32>
    %12 = arith.addi %10, %11 : vector<16x32xi32>
    %13 = arith.cmpi eq, %1, %12 : vector<16x32xi32>
    %14 = arith.extui %13 : vector<16x32xi1> to vector<16x32xi32>
    %15 = arith.sitofp %14 : vector<16x32xi32> to vector<16x32xf32>
    %c2_i32_2 = arith.constant 2 : i32
    %16 = vector.broadcast %c2_i32_2 : i32 to vector<16x32xi32>
    %17 = arith.muli %16, %0 : vector<16x32xi32>
    %c1_i32 = arith.constant 1 : i32
    %18 = vector.broadcast %c1_i32 : i32 to vector<16x32xi32>
    %19 = arith.addi %17, %18 : vector<16x32xi32>
    %20 = arith.cmpi eq, %1, %19 : vector<16x32xi32>
    %21 = arith.extui %20 : vector<16x32xi1> to vector<16x32xi32>
    %22 = arith.sitofp %21 : vector<16x32xi32> to vector<16x32xf32>
    %c2_i32_3 = arith.constant 2 : i32
    %23 = vector.broadcast %c2_i32_3 : i32 to vector<16x32xi32>
    %24 = arith.muli %23, %0 : vector<16x32xi32>
    %c-1_i32 = arith.constant -1 : i32
    %25 = vector.broadcast %c-1_i32 : i32 to vector<16x32xi32>
    %26 = arith.addi %24, %25 : vector<16x32xi32>
    %27 = arith.cmpi eq, %1, %26 : vector<16x32xi32>
    %28 = arith.extui %27 : vector<16x32xi1> to vector<16x32xi32>
    %29 = arith.sitofp %28 : vector<16x32xi32> to vector<16x32xf32>
    %c0 = arith.constant 0 : index
    %c0_4 = arith.constant 0 : index
    %c0_5 = arith.constant 0 : index
    %c0_6 = arith.constant 0 : index
    %30 = vector.load %arg2[%c0, %c0_4, %c0_5, %c0_6] : memref<2x2x32x4xf32, #tpu.memory_space<vmem>>, vector<1x1x32x4xf32>
    %31 = vector.shape_cast %30 : vector<1x1x32x4xf32> to vector<32x4xf32>
    %c0_7 = arith.constant 0 : index
    %c1 = arith.constant 1 : index
    %c0_8 = arith.constant 0 : index
    %c0_9 = arith.constant 0 : index
    %32 = vector.load %arg2[%c0_7, %c1, %c0_8, %c0_9] : memref<2x2x32x4xf32, #tpu.memory_space<vmem>>, vector<1x1x32x4xf32>
    %33 = vector.shape_cast %32 : vector<1x1x32x4xf32> to vector<32x4xf32>
    %c1_10 = arith.constant 1 : index
    %c0_11 = arith.constant 0 : index
    %c0_12 = arith.constant 0 : index
    %c0_13 = arith.constant 0 : index
    %34 = vector.load %arg2[%c1_10, %c0_11, %c0_12, %c0_13] : memref<2x2x32x4xf32, #tpu.memory_space<vmem>>, vector<1x1x32x4xf32>
    %35 = vector.shape_cast %34 : vector<1x1x32x4xf32> to vector<32x4xf32>
    %c1_14 = arith.constant 1 : index
    %c1_15 = arith.constant 1 : index
    %c0_16 = arith.constant 0 : index
    %c0_17 = arith.constant 0 : index
    %36 = vector.load %arg2[%c1_14, %c1_15, %c0_16, %c0_17] : memref<2x2x32x4xf32, #tpu.memory_space<vmem>>, vector<1x1x32x4xf32>
    %37 = vector.shape_cast %36 : vector<1x1x32x4xf32> to vector<32x4xf32>
    %cst = arith.constant 0.000000e+00 : f32
    %38 = vector.broadcast %cst : f32 to vector<32x16xf32>
    %c0_18 = arith.constant 0 : index
    %c0_19 = arith.constant 0 : index
    %c0_20 = arith.constant 0 : index
    %c0_21 = arith.constant 0 : index
    %39 = vector.load %arg1[%c0_18, %c0_19, %c0_20, %c0_21] : memref<1x4x16x16xf32, #tpu.memory_space<vmem>>, vector<1x4x1x16xf32>
    %40 = vector.shape_cast %39 : vector<1x4x1x16xf32> to vector<4x16xf32>
    %cst_22 = arith.constant dense<0.000000e+00> : vector<32x16xf32>
    %41 = tpu.matmul %33, %40, %cst_22 {dimension_numbers = #tpu.dot_dimension_numbers<[1], [0], [0], [1], [0, 0, 1, 1], [], []>} : vector<32x4xf32>, vector<4x16xf32>, vector<32x16xf32> -> vector<32x16xf32>
    %42 = arith.addf %38, %41 : vector<32x16xf32>
    %cst_23 = arith.constant 0.000000e+00 : f32
    %43 = vector.broadcast %cst_23 : f32 to vector<8x32xf32>
    %44 = vector.extract_strided_slice %42 {offsets = [0, 0], sizes = [8, 16], strides = [1, 1]} : vector<32x16xf32> to vector<8x16xf32>
    %cst_24 = arith.constant dense<0.000000e+00> : vector<8x32xf32>
    %45 = tpu.matmul %44, %8, %cst_24 {dimension_numbers = #tpu.dot_dimension_numbers<[1], [0], [0], [1], [0, 0, 1, 1], [], []>} : vector<8x16xf32>, vector<16x32xf32>, vector<8x32xf32> -> vector<8x32xf32>
    %46 = arith.addf %43, %45 : vector<8x32xf32>
    %47 = vector.extract_strided_slice %42 {offsets = [8, 0], sizes = [8, 16], strides = [1, 1]} : vector<32x16xf32> to vector<8x16xf32>
    %cst_25 = arith.constant dense<0.000000e+00> : vector<8x32xf32>
    %48 = tpu.matmul %47, %15, %cst_25 {dimension_numbers = #tpu.dot_dimension_numbers<[1], [0], [0], [1], [0, 0, 1, 1], [], []>} : vector<8x16xf32>, vector<16x32xf32>, vector<8x32xf32> -> vector<8x32xf32>
    %49 = arith.addf %46, %48 : vector<8x32xf32>
    %50 = vector.extract_strided_slice %42 {offsets = [16, 0], sizes = [8, 16], strides = [1, 1]} : vector<32x16xf32> to vector<8x16xf32>
    %cst_26 = arith.constant dense<0.000000e+00> : vector<8x32xf32>
    %51 = tpu.matmul %50, %22, %cst_26 {dimension_numbers = #tpu.dot_dimension_numbers<[1], [0], [0], [1], [0, 0, 1, 1], [], []>} : vector<8x16xf32>, vector<16x32xf32>, vector<8x32xf32> -> vector<8x32xf32>
    %52 = arith.addf %49, %51 : vector<8x32xf32>
    %53 = vector.extract_strided_slice %42 {offsets = [24, 0], sizes = [8, 16], strides = [1, 1]} : vector<32x16xf32> to vector<8x16xf32>
    %cst_27 = arith.constant dense<0.000000e+00> : vector<8x32xf32>
    %54 = tpu.matmul %53, %29, %cst_27 {dimension_numbers = #tpu.dot_dimension_numbers<[1], [0], [0], [1], [0, 0, 1, 1], [], []>} : vector<8x16xf32>, vector<16x32xf32>, vector<8x32xf32> -> vector<8x32xf32>
    %55 = arith.addf %52, %54 : vector<8x32xf32>
    %cst_28 = arith.constant 0.000000e+00 : f32
    %56 = vector.broadcast %cst_28 : f32 to vector<8x32xf32>
    %57 = arith.cmpf oge, %55, %56 : vector<8x32xf32>
    %cst_29 = arith.constant 2.000000e-01 : f32
    %58 = vector.broadcast %cst_29 : f32 to vector<8x32xf32>
    %59 = arith.mulf %58, %55 : vector<8x32xf32>
    %60 = arith.select %57, %55, %59 : vector<8x32xi1>, vector<8x32xf32>
    %c0_30 = arith.constant 0 : index
    %c0_31 = arith.constant 0 : index
    %c0_32 = arith.constant 0 : index
    %c0_33 = arith.constant 0 : index
    %61 = vector.load %arg3[%c0_30, %c0_31, %c0_32, %c0_33] : memref<1x8x32x32xf32, #tpu.memory_space<vmem>>, vector<1x8x1x32xf32>
    %62 = vector.shape_cast %61 : vector<1x8x1x32xf32> to vector<8x32xf32>
    %63 = vector.shape_cast %60 : vector<8x32xf32> to vector<1x8x1x32xf32>
    tpu.vector_store %arg3[%c0_30, %c0_31, %c0_32, %c0_33], %63 {strides = array<i32>} : memref<1x8x32x32xf32, #tpu.memory_space<vmem>>, vector<1x8x1x32xf32>,
    %cst_34 = arith.constant 0.000000e+00 : f32
    %64 = vector.broadcast %cst_34 : f32 to vector<32x16xf32>
    %c0_35 = arith.constant 0 : index
    %c0_36 = arith.constant 0 : index
    %c0_37 = arith.constant 0 : index
    %c0_38 = arith.constant 0 : index
    %65 = vector.load %arg1[%c0_35, %c0_36, %c0_37, %c0_38] : memref<1x4x16x16xf32, #tpu.memory_space<vmem>>, vector<1x4x1x16xf32>
    %66 = vector.shape_cast %65 : vector<1x4x1x16xf32> to vector<4x16xf32>
    %cst_39 = arith.constant dense<0.000000e+00> : vector<32x16xf32>
    %67 = tpu.matmul %31, %66, %cst_39 {dimension_numbers = #tpu.dot_dimension_numbers<[1], [0], [0], [1], [0, 0, 1, 1], [], []>} : vector<32x4xf32>, vector<4x16xf32>, vector<32x16xf32> -> vector<32x16xf32>
    %68 = arith.addf %64, %67 : vector<32x16xf32>
    %c0_40 = arith.constant 0 : index
    %c0_41 = arith.constant 0 : index
    %c1_42 = arith.constant 1 : index
    %c0_43 = arith.constant 0 : index
    %69 = vector.load %arg1[%c0_40, %c0_41, %c1_42, %c0_43] : memref<1x4x16x16xf32, #tpu.memory_space<vmem>>, vector<1x4x1x16xf32>
    %70 = vector.shape_cast %69 : vector<1x4x1x16xf32> to vector<4x16xf32>
    %cst_44 = arith.constant dense<0.000000e+00> : vector<32x16xf32>
    %71 = tpu.matmul %33, %70, %cst_44 {dimension_numbers = #tpu.dot_dimension_numbers<[1], [0], [0], [1], [0, 0, 1, 1], [], []>} : vector<32x4xf32>, vector<4x16xf32>, vector<32x16xf32> -> vector<32x16xf32>
    %72 = arith.addf %68, %71 : vector<32x16xf32>
    %cst_45 = arith.constant 0.000000e+00 : f32
    %73 = vector.broadcast %cst_45 : f32 to vector<8x32xf32>
    %74 = vector.extract_strided_slice %72 {offsets = [0, 0], sizes = [8, 16], strides = [1, 1]} : vector<32x16xf32> to vector<8x16xf32>
    %cst_46 = arith.constant dense<0.000000e+00> : vector<8x32xf32>
    %75 = tpu.matmul %74, %8, %cst_46 {dimension_numbers = #tpu.dot_dimension_numbers<[1], [0], [0], [1], [0, 0, 1, 1], [], []>} : vector<8x16xf32>, vector<16x32xf32>, vector<8x32xf32> -> vector<8x32xf32>
    %76 = arith.addf %73, %75 : vector<8x32xf32>
    %77 = vector.extract_strided_slice %72 {offsets = [8, 0], sizes = [8, 16], strides = [1, 1]} : vector<32x16xf32> to vector<8x16xf32>
    %cst_47 = arith.constant dense<0.000000e+00> : vector<8x32xf32>
    %78 = tpu.matmul %77, %15, %cst_47 {dimension_numbers = #tpu.dot_dimension_numbers<[1], [0], [0], [1], [0, 0, 1, 1], [], []>} : vector<8x16xf32>, vector<16x32xf32>, vector<8x32xf32> -> vector<8x32xf32>
    %79 = arith.addf %76, %78 : vector<8x32xf32>
    %80 = vector.extract_strided_slice %72 {offsets = [16, 0], sizes = [8, 16], strides = [1, 1]} : vector<32x16xf32> to vector<8x16xf32>
    %cst_48 = arith.constant dense<0.000000e+00> : vector<8x32xf32>
    %81 = tpu.matmul %80, %22, %cst_48 {dimension_numbers = #tpu.dot_dimension_numbers<[1], [0], [0], [1], [0, 0, 1, 1], [], []>} : vector<8x16xf32>, vector<16x32xf32>, vector<8x32xf32> -> vector<8x32xf32>
    %82 = arith.addf %79, %81 : vector<8x32xf32>
    %83 = vector.extract_strided_slice %72 {offsets = [24, 0], sizes = [8, 16], strides = [1, 1]} : vector<32x16xf32> to vector<8x16xf32>
    %cst_49 = arith.constant dense<0.000000e+00> : vector<8x32xf32>
    %84 = tpu.matmul %83, %29, %cst_49 {dimension_numbers = #tpu.dot_dimension_numbers<[1], [0], [0], [1], [0, 0, 1, 1], [], []>} : vector<8x16xf32>, vector<16x32xf32>, vector<8x32xf32> -> vector<8x32xf32>
    %85 = arith.addf %82, %84 : vector<8x32xf32>
    %cst_50 = arith.constant 0.000000e+00 : f32
    %86 = vector.broadcast %cst_50 : f32 to vector<8x32xf32>
    %87 = arith.cmpf oge, %85, %86 : vector<8x32xf32>
    %cst_51 = arith.constant 2.000000e-01 : f32
    %88 = vector.broadcast %cst_51 : f32 to vector<8x32xf32>
    %89 = arith.mulf %88, %85 : vector<8x32xf32>
    %90 = arith.select %87, %85, %89 : vector<8x32xi1>, vector<8x32xf32>
    %c0_52 = arith.constant 0 : index
    %c0_53 = arith.constant 0 : index
    %c2 = arith.constant 2 : index
    %c0_54 = arith.constant 0 : index
    %91 = vector.load %arg3[%c0_52, %c0_53, %c2, %c0_54] : memref<1x8x32x32xf32, #tpu.memory_space<vmem>>, vector<1x8x1x32xf32>
    %92 = vector.shape_cast %91 : vector<1x8x1x32xf32> to vector<8x32xf32>
    %93 = vector.shape_cast %90 : vector<8x32xf32> to vector<1x8x1x32xf32>
    tpu.vector_store %arg3[%c0_52, %c0_53, %c2, %c0_54], %93 {strides = array<i32>} : memref<1x8x32x32xf32, #tpu.memory_space<vmem>>, vector<1x8x1x32xf32>,
    %cst_55 = arith.constant 0.000000e+00 : f32
    %94 = vector.broadcast %cst_55 : f32 to vector<32x16xf32>
    %c0_56 = arith.constant 0 : index
    %c0_57 = arith.constant 0 : index
    %c1_58 = arith.constant 1 : index
    %c0_59 = arith.constant 0 : index
    %95 = vector.load %arg1[%c0_56, %c0_57, %c1_58, %c0_59] : memref<1x4x16x16xf32, #tpu.memory_space<vmem>>, vector<1x4x1x16xf32>
    %96 = vector.shape_cast %95 : vector<1x4x1x16xf32> to vector<4x16xf32>
    %cst_60 = arith.constant dense<0.000000e+00> : vector<32x16xf32>
    %97 = tpu.matmul %31, %96, %cst_60 {dimension_numbers = #tpu.dot_dimension_numbers<[1], [0], [0], [1], [0, 0, 1, 1], [], []>} : vector<32x4xf32>, vector<4x16xf32>, vector<32x16xf32> -> vector<32x16xf32>
    %98 = arith.addf %94, %97 : vector<32x16xf32>
    %c0_61 = arith.constant 0 : index
    %c0_62 = arith.constant 0 : index
    %c2_63 = arith.constant 2 : index
    %c0_64 = arith.constant 0 : index
    %99 = vector.load %arg1[%c0_61, %c0_62, %c2_63, %c0_64] : memref<1x4x16x16xf32, #tpu.memory_space<vmem>>, vector<1x4x1x16xf32>
    %100 = vector.shape_cast %99 : vector<1x4x1x16xf32> to vector<4x16xf32>
    %cst_65 = arith.constant dense<0.000000e+00> : vector<32x16xf32>
    %101 = tpu.matmul %33, %100, %cst_65 {dimension_numbers = #tpu.dot_dimension_numbers<[1], [0], [0], [1], [0, 0, 1, 1], [], []>} : vector<32x4xf32>, vector<4x16xf32>, vector<32x16xf32> -> vector<32x16xf32>
    %102 = arith.addf %98, %101 : vector<32x16xf32>
    %cst_66 = arith.constant 0.000000e+00 : f32
    %103 = vector.broadcast %cst_66 : f32 to vector<8x32xf32>
    %104 = vector.extract_strided_slice %102 {offsets = [0, 0], sizes = [8, 16], strides = [1, 1]} : vector<32x16xf32> to vector<8x16xf32>
    %cst_67 = arith.constant dense<0.000000e+00> : vector<8x32xf32>
    %105 = tpu.matmul %104, %8, %cst_67 {dimension_numbers = #tpu.dot_dimension_numbers<[1], [0], [0], [1], [0, 0, 1, 1], [], []>} : vector<8x16xf32>, vector<16x32xf32>, vector<8x32xf32> -> vector<8x32xf32>
    %106 = arith.addf %103, %105 : vector<8x32xf32>
    %107 = vector.extract_strided_slice %102 {offsets = [8, 0], sizes = [8, 16], strides = [1, 1]} : vector<32x16xf32> to vector<8x16xf32>
    %cst_68 = arith.constant dense<0.000000e+00> : vector<8x32xf32>
    %108 = tpu.matmul %107, %15, %cst_68 {dimension_numbers = #tpu.dot_dimension_numbers<[1], [0], [0], [1], [0, 0, 1, 1], [], []>} : vector<8x16xf32>, vector<16x32xf32>, vector<8x32xf32> -> vector<8x32xf32>
    %109 = arith.addf %106, %108 : vector<8x32xf32>
    %110 = vector.extract_strided_slice %102 {offsets = [16, 0], sizes = [8, 16], strides = [1, 1]} : vector<32x16xf32> to vector<8x16xf32>
    %cst_69 = arith.constant dense<0.000000e+00> : vector<8x32xf32>
    %111 = tpu.matmul %110, %22, %cst_69 {dimension_numbers = #tpu.dot_dimension_numbers<[1], [0], [0], [1], [0, 0, 1, 1], [], []>} : vector<8x16xf32>, vector<16x32xf32>, vector<8x32xf32> -> vector<8x32xf32>
    %112 = arith.addf %109, %111 : vector<8x32xf32>
    %113 = vector.extract_strided_slice %102 {offsets = [24, 0], sizes = [8, 16], strides = [1, 1]} : vector<32x16xf32> to vector<8x16xf32>
    %cst_70 = arith.constant dense<0.000000e+00> : vector<8x32xf32>
    %114 = tpu.matmul %113, %29, %cst_70 {dimension_numbers = #tpu.dot_dimension_numbers<[1], [0], [0], [1], [0, 0, 1, 1], [], []>} : vector<8x16xf32>, vector<16x32xf32>, vector<8x32xf32> -> vector<8x32xf32>
    %115 = arith.addf %112, %114 : vector<8x32xf32>
    %cst_71 = arith.constant 0.000000e+00 : f32
    %116 = vector.broadcast %cst_71 : f32 to vector<8x32xf32>
    %117 = arith.cmpf oge, %115, %116 : vector<8x32xf32>
    %cst_72 = arith.constant 2.000000e-01 : f32
    %118 = vector.broadcast %cst_72 : f32 to vector<8x32xf32>
    %119 = arith.mulf %118, %115 : vector<8x32xf32>
    %120 = arith.select %117, %115, %119 : vector<8x32xi1>, vector<8x32xf32>
    %c0_73 = arith.constant 0 : index
    %c0_74 = arith.constant 0 : index
    %c4 = arith.constant 4 : index
    %c0_75 = arith.constant 0 : index
    %121 = vector.load %arg3[%c0_73, %c0_74, %c4, %c0_75] : memref<1x8x32x32xf32, #tpu.memory_space<vmem>>, vector<1x8x1x32xf32>
    %122 = vector.shape_cast %121 : vector<1x8x1x32xf32> to vector<8x32xf32>
    %123 = vector.shape_cast %120 : vector<8x32xf32> to vector<1x8x1x32xf32>
    tpu.vector_store %arg3[%c0_73, %c0_74, %c4, %c0_75], %123 {strides = array<i32>} : memref<1x8x32x32xf32, #tpu.memory_space<vmem>>, vector<1x8x1x32xf32>,
    %cst_76 = arith.constant 0.000000e+00 : f32
    %124 = vector.broadcast %cst_76 : f32 to vector<32x16xf32>
    %c0_77 = arith.constant 0 : index
    %c0_78 = arith.constant 0 : index
    %c2_79 = arith.constant 2 : index
    %c0_80 = arith.constant 0 : index
    %125 = vector.load %arg1[%c0_77, %c0_78, %c2_79, %c0_80] : memref<1x4x16x16xf32, #tpu.memory_space<vmem>>, vector<1x4x1x16xf32>
    %126 = vector.shape_cast %125 : vector<1x4x1x16xf32> to vector<4x16xf32>
    %cst_81 = arith.constant dense<0.000000e+00> : vector<32x16xf32>
    %127 = tpu.matmul %31, %126, %cst_81 {dimension_numbers = #tpu.dot_dimension_numbers<[1], [0], [0], [1], [0, 0, 1, 1], [], []>} : vector<32x4xf32>, vector<4x16xf32>, vector<32x16xf32> -> vector<32x16xf32>
    %128 = arith.addf %124, %127 : vector<32x16xf32>
    %c0_82 = arith.constant 0 : index
    %c0_83 = arith.constant 0 : index
    %c3 = arith.constant 3 : index
    %c0_84 = arith.constant 0 : index
    %129 = vector.load %arg1[%c0_82, %c0_83, %c3, %c0_84] : memref<1x4x16x16xf32, #tpu.memory_space<vmem>>, vector<1x4x1x16xf32>
    %130 = vector.shape_cast %129 : vector<1x4x1x16xf32> to vector<4x16xf32>
    %cst_85 = arith.constant dense<0.000000e+00> : vector<32x16xf32>
    %131 = tpu.matmul %33, %130, %cst_85 {dimension_numbers = #tpu.dot_dimension_numbers<[1], [0], [0], [1], [0, 0, 1, 1], [], []>} : vector<32x4xf32>, vector<4x16xf32>, vector<32x16xf32> -> vector<32x16xf32>
    %132 = arith.addf %128, %131 : vector<32x16xf32>
    %cst_86 = arith.constant 0.000000e+00 : f32
    %133 = vector.broadcast %cst_86 : f32 to vector<8x32xf32>
    %134 = vector.extract_strided_slice %132 {offsets = [0, 0], sizes = [8, 16], strides = [1, 1]} : vector<32x16xf32> to vector<8x16xf32>
    %cst_87 = arith.constant dense<0.000000e+00> : vector<8x32xf32>
    %135 = tpu.matmul %134, %8, %cst_87 {dimension_numbers = #tpu.dot_dimension_numbers<[1], [0], [0], [1], [0, 0, 1, 1], [], []>} : vector<8x16xf32>, vector<16x32xf32>, vector<8x32xf32> -> vector<8x32xf32>
    %136 = arith.addf %133, %135 : vector<8x32xf32>
    %137 = vector.extract_strided_slice %132 {offsets = [8, 0], sizes = [8, 16], strides = [1, 1]} : vector<32x16xf32> to vector<8x16xf32>
    %cst_88 = arith.constant dense<0.000000e+00> : vector<8x32xf32>
    %138 = tpu.matmul %137, %15, %cst_88 {dimension_numbers = #tpu.dot_dimension_numbers<[1], [0], [0], [1], [0, 0, 1, 1], [], []>} : vector<8x16xf32>, vector<16x32xf32>, vector<8x32xf32> -> vector<8x32xf32>
    %139 = arith.addf %136, %138 : vector<8x32xf32>
    %140 = vector.extract_strided_slice %132 {offsets = [16, 0], sizes = [8, 16], strides = [1, 1]} : vector<32x16xf32> to vector<8x16xf32>
    %cst_89 = arith.constant dense<0.000000e+00> : vector<8x32xf32>
    %141 = tpu.matmul %140, %22, %cst_89 {dimension_numbers = #tpu.dot_dimension_numbers<[1], [0], [0], [1], [0, 0, 1, 1], [], []>} : vector<8x16xf32>, vector<16x32xf32>, vector<8x32xf32> -> vector<8x32xf32>
    %142 = arith.addf %139, %141 : vector<8x32xf32>
    %143 = vector.extract_strided_slice %132 {offsets = [24, 0], sizes = [8, 16], strides = [1, 1]} : vector<32x16xf32> to vector<8x16xf32>
    %cst_90 = arith.constant dense<0.000000e+00> : vector<8x32xf32>
    %144 = tpu.matmul %143, %29, %cst_90 {dimension_numbers = #tpu.dot_dimension_numbers<[1], [0], [0], [1], [0, 0, 1, 1], [], []>} : vector<8x16xf32>, vector<16x32xf32>, vector<8x32xf32> -> vector<8x32xf32>
    %145 = arith.addf %142, %144 : vector<8x32xf32>
    %cst_91 = arith.constant 0.000000e+00 : f32
    %146 = vector.broadcast %cst_91 : f32 to vector<8x32xf32>
    %147 = arith.cmpf oge, %145, %146 : vector<8x32xf32>
    %cst_92 = arith.constant 2.000000e-01 : f32
    %148 = vector.broadcast %cst_92 : f32 to vector<8x32xf32>
    %149 = arith.mulf %148, %145 : vector<8x32xf32>
    %150 = arith.select %147, %145, %149 : vector<8x32xi1>, vector<8x32xf32>
    %c0_93 = arith.constant 0 : index
    %c0_94 = arith.constant 0 : index
    %c6 = arith.constant 6 : index
    %c0_95 = arith.constant 0 : index
    %151 = vector.load %arg3[%c0_93, %c0_94, %c6, %c0_95] : memref<1x8x32x32xf32, #tpu.memory_space<vmem>>, vector<1x8x1x32xf32>
    %152 = vector.shape_cast %151 : vector<1x8x1x32xf32> to vector<8x32xf32>
    %153 = vector.shape_cast %150 : vector<8x32xf32> to vector<1x8x1x32xf32>
    tpu.vector_store %arg3[%c0_93, %c0_94, %c6, %c0_95], %153 {strides = array<i32>} : memref<1x8x32x32xf32, #tpu.memory_space<vmem>>, vector<1x8x1x32xf32>,
    %cst_96 = arith.constant 0.000000e+00 : f32
    %154 = vector.broadcast %cst_96 : f32 to vector<32x16xf32>
    %c0_97 = arith.constant 0 : index
    %c0_98 = arith.constant 0 : index
    %c3_99 = arith.constant 3 : index
    %c0_100 = arith.constant 0 : index
    %155 = vector.load %arg1[%c0_97, %c0_98, %c3_99, %c0_100] : memref<1x4x16x16xf32, #tpu.memory_space<vmem>>, vector<1x4x1x16xf32>
    %156 = vector.shape_cast %155 : vector<1x4x1x16xf32> to vector<4x16xf32>
    %cst_101 = arith.constant dense<0.000000e+00> : vector<32x16xf32>
    %157 = tpu.matmul %31, %156, %cst_101 {dimension_numbers = #tpu.dot_dimension_numbers<[1], [0], [0], [1], [0, 0, 1, 1], [], []>} : vector<32x4xf32>, vector<4x16xf32>, vector<32x16xf32> -> vector<32x16xf32>
    %158 = arith.addf %154, %157 : vector<32x16xf32>
    %c0_102 = arith.constant 0 : index
    %c0_103 = arith.constant 0 : index
    %c4_104 = arith.constant 4 : index
    %c0_105 = arith.constant 0 : index
    %159 = vector.load %arg1[%c0_102, %c0_103, %c4_104, %c0_105] : memref<1x4x16x16xf32, #tpu.memory_space<vmem>>, vector<1x4x1x16xf32>
    %160 = vector.shape_cast %159 : vector<1x4x1x16xf32> to vector<4x16xf32>
    %cst_106 = arith.constant dense<0.000000e+00> : vector<32x16xf32>
    %161 = tpu.matmul %33, %160, %cst_106 {dimension_numbers = #tpu.dot_dimension_numbers<[1], [0], [0], [1], [0, 0, 1, 1], [], []>} : vector<32x4xf32>, vector<4x16xf32>, vector<32x16xf32> -> vector<32x16xf32>
    %162 = arith.addf %158, %161 : vector<32x16xf32>
    %cst_107 = arith.constant 0.000000e+00 : f32
    %163 = vector.broadcast %cst_107 : f32 to vector<8x32xf32>
    %164 = vector.extract_strided_slice %162 {offsets = [0, 0], sizes = [8, 16], strides = [1, 1]} : vector<32x16xf32> to vector<8x16xf32>
    %cst_108 = arith.constant dense<0.000000e+00> : vector<8x32xf32>
    %165 = tpu.matmul %164, %8, %cst_108 {dimension_numbers = #tpu.dot_dimension_numbers<[1], [0], [0], [1], [0, 0, 1, 1], [], []>} : vector<8x16xf32>, vector<16x32xf32>, vector<8x32xf32> -> vector<8x32xf32>
    %166 = arith.addf %163, %165 : vector<8x32xf32>
    %167 = vector.extract_strided_slice %162 {offsets = [8, 0], sizes = [8, 16], strides = [1, 1]} : vector<32x16xf32> to vector<8x16xf32>
    %cst_109 = arith.constant dense<0.000000e+00> : vector<8x32xf32>
    %168 = tpu.matmul %167, %15, %cst_109 {dimension_numbers = #tpu.dot_dimension_numbers<[1], [0], [0], [1], [0, 0, 1, 1], [], []>} : vector<8x16xf32>, vector<16x32xf32>, vector<8x32xf32> -> vector<8x32xf32>
    %169 = arith.addf %166, %168 : vector<8x32xf32>
    %170 = vector.extract_strided_slice %162 {offsets = [16, 0], sizes = [8, 16], strides = [1, 1]} : vector<32x16xf32> to vector<8x16xf32>
    %cst_110 = arith.constant dense<0.000000e+00> : vector<8x32xf32>
    %171 = tpu.matmul %170, %22, %cst_110 {dimension_numbers = #tpu.dot_dimension_numbers<[1], [0], [0], [1], [0, 0, 1, 1], [], []>} : vector<8x16xf32>, vector<16x32xf32>, vector<8x32xf32> -> vector<8x32xf32>
    %172 = arith.addf %169, %171 : vector<8x32xf32>
    %173 = vector.extract_strided_slice %162 {offsets = [24, 0], sizes = [8, 16], strides = [1, 1]} : vector<32x16xf32> to vector<8x16xf32>
    %cst_111 = arith.constant dense<0.000000e+00> : vector<8x32xf32>
    %174 = tpu.matmul %173, %29, %cst_111 {dimension_numbers = #tpu.dot_dimension_numbers<[1], [0], [0], [1], [0, 0, 1, 1], [], []>} : vector<8x16xf32>, vector<16x32xf32>, vector<8x32xf32> -> vector<8x32xf32>
    %175 = arith.addf %172, %174 : vector<8x32xf32>
    %cst_112 = arith.constant 0.000000e+00 : f32
    %176 = vector.broadcast %cst_112 : f32 to vector<8x32xf32>
    %177 = arith.cmpf oge, %175, %176 : vector<8x32xf32>
    %cst_113 = arith.constant 2.000000e-01 : f32
    %178 = vector.broadcast %cst_113 : f32 to vector<8x32xf32>
    %179 = arith.mulf %178, %175 : vector<8x32xf32>
    %180 = arith.select %177, %175, %179 : vector<8x32xi1>, vector<8x32xf32>
    %c0_114 = arith.constant 0 : index
    %c0_115 = arith.constant 0 : index
    %c8 = arith.constant 8 : index
    %c0_116 = arith.constant 0 : index
    %181 = vector.load %arg3[%c0_114, %c0_115, %c8, %c0_116] : memref<1x8x32x32xf32, #tpu.memory_space<vmem>>, vector<1x8x1x32xf32>
    %182 = vector.shape_cast %181 : vector<1x8x1x32xf32> to vector<8x32xf32>
    %183 = vector.shape_cast %180 : vector<8x32xf32> to vector<1x8x1x32xf32>
    tpu.vector_store %arg3[%c0_114, %c0_115, %c8, %c0_116], %183 {strides = array<i32>} : memref<1x8x32x32xf32, #tpu.memory_space<vmem>>, vector<1x8x1x32xf32>,
    %cst_117 = arith.constant 0.000000e+00 : f32
    %184 = vector.broadcast %cst_117 : f32 to vector<32x16xf32>
    %c0_118 = arith.constant 0 : index
    %c0_119 = arith.constant 0 : index
    %c4_120 = arith.constant 4 : index
    %c0_121 = arith.constant 0 : index
    %185 = vector.load %arg1[%c0_118, %c0_119, %c4_120, %c0_121] : memref<1x4x16x16xf32, #tpu.memory_space<vmem>>, vector<1x4x1x16xf32>
    %186 = vector.shape_cast %185 : vector<1x4x1x16xf32> to vector<4x16xf32>
    %cst_122 = arith.constant dense<0.000000e+00> : vector<32x16xf32>
    %187 = tpu.matmul %31, %186, %cst_122 {dimension_numbers = #tpu.dot_dimension_numbers<[1], [0], [0], [1], [0, 0, 1, 1], [], []>} : vector<32x4xf32>, vector<4x16xf32>, vector<32x16xf32> -> vector<32x16xf32>
    %188 = arith.addf %184, %187 : vector<32x16xf32>
    %c0_123 = arith.constant 0 : index
    %c0_124 = arith.constant 0 : index
    %c5 = arith.constant 5 : index
    %c0_125 = arith.constant 0 : index
    %189 = vector.load %arg1[%c0_123, %c0_124, %c5, %c0_125] : memref<1x4x16x16xf32, #tpu.memory_space<vmem>>, vector<1x4x1x16xf32>
    %190 = vector.shape_cast %189 : vector<1x4x1x16xf32> to vector<4x16xf32>
    %cst_126 = arith.constant dense<0.000000e+00> : vector<32x16xf32>
    %191 = tpu.matmul %33, %190, %cst_126 {dimension_numbers = #tpu.dot_dimension_numbers<[1], [0], [0], [1], [0, 0, 1, 1], [], []>} : vector<32x4xf32>, vector<4x16xf32>, vector<32x16xf32> -> vector<32x16xf32>
    %192 = arith.addf %188, %191 : vector<32x16xf32>
    %cst_127 = arith.constant 0.000000e+00 : f32
    %193 = vector.broadcast %cst_127 : f32 to vector<8x32xf32>
    %194 = vector.extract_strided_slice %192 {offsets = [0, 0], sizes = [8, 16], strides = [1, 1]} : vector<32x16xf32> to vector<8x16xf32>
    %cst_128 = arith.constant dense<0.000000e+00> : vector<8x32xf32>
    %195 = tpu.matmul %194, %8, %cst_128 {dimension_numbers = #tpu.dot_dimension_numbers<[1], [0], [0], [1], [0, 0, 1, 1], [], []>} : vector<8x16xf32>, vector<16x32xf32>, vector<8x32xf32> -> vector<8x32xf32>
    %196 = arith.addf %193, %195 : vector<8x32xf32>
    %197 = vector.extract_strided_slice %192 {offsets = [8, 0], sizes = [8, 16], strides = [1, 1]} : vector<32x16xf32> to vector<8x16xf32>
    %cst_129 = arith.constant dense<0.000000e+00> : vector<8x32xf32>
    %198 = tpu.matmul %197, %15, %cst_129 {dimension_numbers = #tpu.dot_dimension_numbers<[1], [0], [0], [1], [0, 0, 1, 1], [], []>} : vector<8x16xf32>, vector<16x32xf32>, vector<8x32xf32> -> vector<8x32xf32>
    %199 = arith.addf %196, %198 : vector<8x32xf32>
    %200 = vector.extract_strided_slice %192 {offsets = [16, 0], sizes = [8, 16], strides = [1, 1]} : vector<32x16xf32> to vector<8x16xf32>
    %cst_130 = arith.constant dense<0.000000e+00> : vector<8x32xf32>
    %201 = tpu.matmul %200, %22, %cst_130 {dimension_numbers = #tpu.dot_dimension_numbers<[1], [0], [0], [1], [0, 0, 1, 1], [], []>} : vector<8x16xf32>, vector<16x32xf32>, vector<8x32xf32> -> vector<8x32xf32>
    %202 = arith.addf %199, %201 : vector<8x32xf32>
    %203 = vector.extract_strided_slice %192 {offsets = [24, 0], sizes = [8, 16], strides = [1, 1]} : vector<32x16xf32> to vector<8x16xf32>
    %cst_131 = arith.constant dense<0.000000e+00> : vector<8x32xf32>
    %204 = tpu.matmul %203, %29, %cst_131 {dimension_numbers = #tpu.dot_dimension_numbers<[1], [0], [0], [1], [0, 0, 1, 1], [], []>} : vector<8x16xf32>, vector<16x32xf32>, vector<8x32xf32> -> vector<8x32xf32>
    %205 = arith.addf %202, %204 : vector<8x32xf32>
    %cst_132 = arith.constant 0.000000e+00 : f32
    %206 = vector.broadcast %cst_132 : f32 to vector<8x32xf32>
    %207 = arith.cmpf oge, %205, %206 : vector<8x32xf32>
    %cst_133 = arith.constant 2.000000e-01 : f32
    %208 = vector.broadcast %cst_133 : f32 to vector<8x32xf32>
    %209 = arith.mulf %208, %205 : vector<8x32xf32>
    %210 = arith.select %207, %205, %209 : vector<8x32xi1>, vector<8x32xf32>
    %c0_134 = arith.constant 0 : index
    %c0_135 = arith.constant 0 : index
    %c10 = arith.constant 10 : index
    %c0_136 = arith.constant 0 : index
    %211 = vector.load %arg3[%c0_134, %c0_135, %c10, %c0_136] : memref<1x8x32x32xf32, #tpu.memory_space<vmem>>, vector<1x8x1x32xf32>
    %212 = vector.shape_cast %211 : vector<1x8x1x32xf32> to vector<8x32xf32>
    %213 = vector.shape_cast %210 : vector<8x32xf32> to vector<1x8x1x32xf32>
    tpu.vector_store %arg3[%c0_134, %c0_135, %c10, %c0_136], %213 {strides = array<i32>} : memref<1x8x32x32xf32, #tpu.memory_space<vmem>>, vector<1x8x1x32xf32>,
    %cst_137 = arith.constant 0.000000e+00 : f32
    %214 = vector.broadcast %cst_137 : f32 to vector<32x16xf32>
    %c0_138 = arith.constant 0 : index
    %c0_139 = arith.constant 0 : index
    %c5_140 = arith.constant 5 : index
    %c0_141 = arith.constant 0 : index
    %215 = vector.load %arg1[%c0_138, %c0_139, %c5_140, %c0_141] : memref<1x4x16x16xf32, #tpu.memory_space<vmem>>, vector<1x4x1x16xf32>
    %216 = vector.shape_cast %215 : vector<1x4x1x16xf32> to vector<4x16xf32>
    %cst_142 = arith.constant dense<0.000000e+00> : vector<32x16xf32>
    %217 = tpu.matmul %31, %216, %cst_142 {dimension_numbers = #tpu.dot_dimension_numbers<[1], [0], [0], [1], [0, 0, 1, 1], [], []>} : vector<32x4xf32>, vector<4x16xf32>, vector<32x16xf32> -> vector<32x16xf32>
    %218 = arith.addf %214, %217 : vector<32x16xf32>
    %c0_143 = arith.constant 0 : index
    %c0_144 = arith.constant 0 : index
    %c6_145 = arith.constant 6 : index
    %c0_146 = arith.constant 0 : index
    %219 = vector.load %arg1[%c0_143, %c0_144, %c6_145, %c0_146] : memref<1x4x16x16xf32, #tpu.memory_space<vmem>>, vector<1x4x1x16xf32>
    %220 = vector.shape_cast %219 : vector<1x4x1x16xf32> to vector<4x16xf32>
    %cst_147 = arith.constant dense<0.000000e+00> : vector<32x16xf32>
    %221 = tpu.matmul %33, %220, %cst_147 {dimension_numbers = #tpu.dot_dimension_numbers<[1], [0], [0], [1], [0, 0, 1, 1], [], []>} : vector<32x4xf32>, vector<4x16xf32>, vector<32x16xf32> -> vector<32x16xf32>
    %222 = arith.addf %218, %221 : vector<32x16xf32>
    %cst_148 = arith.constant 0.000000e+00 : f32
    %223 = vector.broadcast %cst_148 : f32 to vector<8x32xf32>
    %224 = vector.extract_strided_slice %222 {offsets = [0, 0], sizes = [8, 16], strides = [1, 1]} : vector<32x16xf32> to vector<8x16xf32>
    %cst_149 = arith.constant dense<0.000000e+00> : vector<8x32xf32>
    %225 = tpu.matmul %224, %8, %cst_149 {dimension_numbers = #tpu.dot_dimension_numbers<[1], [0], [0], [1], [0, 0, 1, 1], [], []>} : vector<8x16xf32>, vector<16x32xf32>, vector<8x32xf32> -> vector<8x32xf32>
    %226 = arith.addf %223, %225 : vector<8x32xf32>
    %227 = vector.extract_strided_slice %222 {offsets = [8, 0], sizes = [8, 16], strides = [1, 1]} : vector<32x16xf32> to vector<8x16xf32>
    %cst_150 = arith.constant dense<0.000000e+00> : vector<8x32xf32>
    %228 = tpu.matmul %227, %15, %cst_150 {dimension_numbers = #tpu.dot_dimension_numbers<[1], [0], [0], [1], [0, 0, 1, 1], [], []>} : vector<8x16xf32>, vector<16x32xf32>, vector<8x32xf32> -> vector<8x32xf32>
    %229 = arith.addf %226, %228 : vector<8x32xf32>
    %230 = vector.extract_strided_slice %222 {offsets = [16, 0], sizes = [8, 16], strides = [1, 1]} : vector<32x16xf32> to vector<8x16xf32>
    %cst_151 = arith.constant dense<0.000000e+00> : vector<8x32xf32>
    %231 = tpu.matmul %230, %22, %cst_151 {dimension_numbers = #tpu.dot_dimension_numbers<[1], [0], [0], [1], [0, 0, 1, 1], [], []>} : vector<8x16xf32>, vector<16x32xf32>, vector<8x32xf32> -> vector<8x32xf32>
    %232 = arith.addf %229, %231 : vector<8x32xf32>
    %233 = vector.extract_strided_slice %222 {offsets = [24, 0], sizes = [8, 16], strides = [1, 1]} : vector<32x16xf32> to vector<8x16xf32>
    %cst_152 = arith.constant dense<0.000000e+00> : vector<8x32xf32>
    %234 = tpu.matmul %233, %29, %cst_152 {dimension_numbers = #tpu.dot_dimension_numbers<[1], [0], [0], [1], [0, 0, 1, 1], [], []>} : vector<8x16xf32>, vector<16x32xf32>, vector<8x32xf32> -> vector<8x32xf32>
    %235 = arith.addf %232, %234 : vector<8x32xf32>
    %cst_153 = arith.constant 0.000000e+00 : f32
    %236 = vector.broadcast %cst_153 : f32 to vector<8x32xf32>
    %237 = arith.cmpf oge, %235, %236 : vector<8x32xf32>
    %cst_154 = arith.constant 2.000000e-01 : f32
    %238 = vector.broadcast %cst_154 : f32 to vector<8x32xf32>
    %239 = arith.mulf %238, %235 : vector<8x32xf32>
    %240 = arith.select %237, %235, %239 : vector<8x32xi1>, vector<8x32xf32>
    %c0_155 = arith.constant 0 : index
    %c0_156 = arith.constant 0 : index
    %c12 = arith.constant 12 : index
    %c0_157 = arith.constant 0 : index
    %241 = vector.load %arg3[%c0_155, %c0_156, %c12, %c0_157] : memref<1x8x32x32xf32, #tpu.memory_space<vmem>>, vector<1x8x1x32xf32>
    %242 = vector.shape_cast %241 : vector<1x8x1x32xf32> to vector<8x32xf32>
    %243 = vector.shape_cast %240 : vector<8x32xf32> to vector<1x8x1x32xf32>
    tpu.vector_store %arg3[%c0_155, %c0_156, %c12, %c0_157], %243 {strides = array<i32>} : memref<1x8x32x32xf32, #tpu.memory_space<vmem>>, vector<1x8x1x32xf32>,
    %cst_158 = arith.constant 0.000000e+00 : f32
    %244 = vector.broadcast %cst_158 : f32 to vector<32x16xf32>
    %c0_159 = arith.constant 0 : index
    %c0_160 = arith.constant 0 : index
    %c6_161 = arith.constant 6 : index
    %c0_162 = arith.constant 0 : index
    %245 = vector.load %arg1[%c0_159, %c0_160, %c6_161, %c0_162] : memref<1x4x16x16xf32, #tpu.memory_space<vmem>>, vector<1x4x1x16xf32>
    %246 = vector.shape_cast %245 : vector<1x4x1x16xf32> to vector<4x16xf32>
    %cst_163 = arith.constant dense<0.000000e+00> : vector<32x16xf32>
    %247 = tpu.matmul %31, %246, %cst_163 {dimension_numbers = #tpu.dot_dimension_numbers<[1], [0], [0], [1], [0, 0, 1, 1], [], []>} : vector<32x4xf32>, vector<4x16xf32>, vector<32x16xf32> -> vector<32x16xf32>
    %248 = arith.addf %244, %247 : vector<32x16xf32>
    %c0_164 = arith.constant 0 : index
    %c0_165 = arith.constant 0 : index
    %c7 = arith.constant 7 : index
    %c0_166 = arith.constant 0 : index
    %249 = vector.load %arg1[%c0_164, %c0_165, %c7, %c0_166] : memref<1x4x16x16xf32, #tpu.memory_space<vmem>>, vector<1x4x1x16xf32>
    %250 = vector.shape_cast %249 : vector<1x4x1x16xf32> to vector<4x16xf32>
    %cst_167 = arith.constant dense<0.000000e+00> : vector<32x16xf32>
    %251 = tpu.matmul %33, %250, %cst_167 {dimension_numbers = #tpu.dot_dimension_numbers<[1], [0], [0], [1], [0, 0, 1, 1], [], []>} : vector<32x4xf32>, vector<4x16xf32>, vector<32x16xf32> -> vector<32x16xf32>
    %252 = arith.addf %248, %251 : vector<32x16xf32>
    %cst_168 = arith.constant 0.000000e+00 : f32
    %253 = vector.broadcast %cst_168 : f32 to vector<8x32xf32>
    %254 = vector.extract_strided_slice %252 {offsets = [0, 0], sizes = [8, 16], strides = [1, 1]} : vector<32x16xf32> to vector<8x16xf32>
    %cst_169 = arith.constant dense<0.000000e+00> : vector<8x32xf32>
    %255 = tpu.matmul %254, %8, %cst_169 {dimension_numbers = #tpu.dot_dimension_numbers<[1], [0], [0], [1], [0, 0, 1, 1], [], []>} : vector<8x16xf32>, vector<16x32xf32>, vector<8x32xf32> -> vector<8x32xf32>
    %256 = arith.addf %253, %255 : vector<8x32xf32>
    %257 = vector.extract_strided_slice %252 {offsets = [8, 0], sizes = [8, 16], strides = [1, 1]} : vector<32x16xf32> to vector<8x16xf32>
    %cst_170 = arith.constant dense<0.000000e+00> : vector<8x32xf32>
    %258 = tpu.matmul %257, %15, %cst_170 {dimension_numbers = #tpu.dot_dimension_numbers<[1], [0], [0], [1], [0, 0, 1, 1], [], []>} : vector<8x16xf32>, vector<16x32xf32>, vector<8x32xf32> -> vector<8x32xf32>
    %259 = arith.addf %256, %258 : vector<8x32xf32>
    %260 = vector.extract_strided_slice %252 {offsets = [16, 0], sizes = [8, 16], strides = [1, 1]} : vector<32x16xf32> to vector<8x16xf32>
    %cst_171 = arith.constant dense<0.000000e+00> : vector<8x32xf32>
    %261 = tpu.matmul %260, %22, %cst_171 {dimension_numbers = #tpu.dot_dimension_numbers<[1], [0], [0], [1], [0, 0, 1, 1], [], []>} : vector<8x16xf32>, vector<16x32xf32>, vector<8x32xf32> -> vector<8x32xf32>
    %262 = arith.addf %259, %261 : vector<8x32xf32>
    %263 = vector.extract_strided_slice %252 {offsets = [24, 0], sizes = [8, 16], strides = [1, 1]} : vector<32x16xf32> to vector<8x16xf32>
    %cst_172 = arith.constant dense<0.000000e+00> : vector<8x32xf32>
    %264 = tpu.matmul %263, %29, %cst_172 {dimension_numbers = #tpu.dot_dimension_numbers<[1], [0], [0], [1], [0, 0, 1, 1], [], []>} : vector<8x16xf32>, vector<16x32xf32>, vector<8x32xf32> -> vector<8x32xf32>
    %265 = arith.addf %262, %264 : vector<8x32xf32>
    %cst_173 = arith.constant 0.000000e+00 : f32
    %266 = vector.broadcast %cst_173 : f32 to vector<8x32xf32>
    %267 = arith.cmpf oge, %265, %266 : vector<8x32xf32>
    %cst_174 = arith.constant 2.000000e-01 : f32
    %268 = vector.broadcast %cst_174 : f32 to vector<8x32xf32>
    %269 = arith.mulf %268, %265 : vector<8x32xf32>
    %270 = arith.select %267, %265, %269 : vector<8x32xi1>, vector<8x32xf32>
    %c0_175 = arith.constant 0 : index
    %c0_176 = arith.constant 0 : index
    %c14 = arith.constant 14 : index
    %c0_177 = arith.constant 0 : index
    %271 = vector.load %arg3[%c0_175, %c0_176, %c14, %c0_177] : memref<1x8x32x32xf32, #tpu.memory_space<vmem>>, vector<1x8x1x32xf32>
    %272 = vector.shape_cast %271 : vector<1x8x1x32xf32> to vector<8x32xf32>
    %273 = vector.shape_cast %270 : vector<8x32xf32> to vector<1x8x1x32xf32>
    tpu.vector_store %arg3[%c0_175, %c0_176, %c14, %c0_177], %273 {strides = array<i32>} : memref<1x8x32x32xf32, #tpu.memory_space<vmem>>, vector<1x8x1x32xf32>,
    %cst_178 = arith.constant 0.000000e+00 : f32
    %274 = vector.broadcast %cst_178 : f32 to vector<32x16xf32>
    %c0_179 = arith.constant 0 : index
    %c0_180 = arith.constant 0 : index
    %c7_181 = arith.constant 7 : index
    %c0_182 = arith.constant 0 : index
    %275 = vector.load %arg1[%c0_179, %c0_180, %c7_181, %c0_182] : memref<1x4x16x16xf32, #tpu.memory_space<vmem>>, vector<1x4x1x16xf32>
    %276 = vector.shape_cast %275 : vector<1x4x1x16xf32> to vector<4x16xf32>
    %cst_183 = arith.constant dense<0.000000e+00> : vector<32x16xf32>
    %277 = tpu.matmul %31, %276, %cst_183 {dimension_numbers = #tpu.dot_dimension_numbers<[1], [0], [0], [1], [0, 0, 1, 1], [], []>} : vector<32x4xf32>, vector<4x16xf32>, vector<32x16xf32> -> vector<32x16xf32>
    %278 = arith.addf %274, %277 : vector<32x16xf32>
    %c0_184 = arith.constant 0 : index
    %c0_185 = arith.constant 0 : index
    %c8_186 = arith.constant 8 : index
    %c0_187 = arith.constant 0 : index
    %279 = vector.load %arg1[%c0_184, %c0_185, %c8_186, %c0_187] : memref<1x4x16x16xf32, #tpu.memory_space<vmem>>, vector<1x4x1x16xf32>
    %280 = vector.shape_cast %279 : vector<1x4x1x16xf32> to vector<4x16xf32>
    %cst_188 = arith.constant dense<0.000000e+00> : vector<32x16xf32>
    %281 = tpu.matmul %33, %280, %cst_188 {dimension_numbers = #tpu.dot_dimension_numbers<[1], [0], [0], [1], [0, 0, 1, 1], [], []>} : vector<32x4xf32>, vector<4x16xf32>, vector<32x16xf32> -> vector<32x16xf32>
    %282 = arith.addf %278, %281 : vector<32x16xf32>
    %cst_189 = arith.constant 0.000000e+00 : f32
    %283 = vector.broadcast %cst_189 : f32 to vector<8x32xf32>
    %284 = vector.extract_strided_slice %282 {offsets = [0, 0], sizes = [8, 16], strides = [1, 1]} : vector<32x16xf32> to vector<8x16xf32>
    %cst_190 = arith.constant dense<0.000000e+00> : vector<8x32xf32>
    %285 = tpu.matmul %284, %8, %cst_190 {dimension_numbers = #tpu.dot_dimension_numbers<[1], [0], [0], [1], [0, 0, 1, 1], [], []>} : vector<8x16xf32>, vector<16x32xf32>, vector<8x32xf32> -> vector<8x32xf32>
    %286 = arith.addf %283, %285 : vector<8x32xf32>
    %287 = vector.extract_strided_slice %282 {offsets = [8, 0], sizes = [8, 16], strides = [1, 1]} : vector<32x16xf32> to vector<8x16xf32>
    %cst_191 = arith.constant dense<0.000000e+00> : vector<8x32xf32>
    %288 = tpu.matmul %287, %15, %cst_191 {dimension_numbers = #tpu.dot_dimension_numbers<[1], [0], [0], [1], [0, 0, 1, 1], [], []>} : vector<8x16xf32>, vector<16x32xf32>, vector<8x32xf32> -> vector<8x32xf32>
    %289 = arith.addf %286, %288 : vector<8x32xf32>
    %290 = vector.extract_strided_slice %282 {offsets = [16, 0], sizes = [8, 16], strides = [1, 1]} : vector<32x16xf32> to vector<8x16xf32>
    %cst_192 = arith.constant dense<0.000000e+00> : vector<8x32xf32>
    %291 = tpu.matmul %290, %22, %cst_192 {dimension_numbers = #tpu.dot_dimension_numbers<[1], [0], [0], [1], [0, 0, 1, 1], [], []>} : vector<8x16xf32>, vector<16x32xf32>, vector<8x32xf32> -> vector<8x32xf32>
    %292 = arith.addf %289, %291 : vector<8x32xf32>
    %293 = vector.extract_strided_slice %282 {offsets = [24, 0], sizes = [8, 16], strides = [1, 1]} : vector<32x16xf32> to vector<8x16xf32>
    %cst_193 = arith.constant dense<0.000000e+00> : vector<8x32xf32>
    %294 = tpu.matmul %293, %29, %cst_193 {dimension_numbers = #tpu.dot_dimension_numbers<[1], [0], [0], [1], [0, 0, 1, 1], [], []>} : vector<8x16xf32>, vector<16x32xf32>, vector<8x32xf32> -> vector<8x32xf32>
    %295 = arith.addf %292, %294 : vector<8x32xf32>
    %cst_194 = arith.constant 0.000000e+00 : f32
    %296 = vector.broadcast %cst_194 : f32 to vector<8x32xf32>
    %297 = arith.cmpf oge, %295, %296 : vector<8x32xf32>
    %cst_195 = arith.constant 2.000000e-01 : f32
    %298 = vector.broadcast %cst_195 : f32 to vector<8x32xf32>
    %299 = arith.mulf %298, %295 : vector<8x32xf32>
    %300 = arith.select %297, %295, %299 : vector<8x32xi1>, vector<8x32xf32>
    %c0_196 = arith.constant 0 : index
    %c0_197 = arith.constant 0 : index
    %c16 = arith.constant 16 : index
    %c0_198 = arith.constant 0 : index
    %301 = vector.load %arg3[%c0_196, %c0_197, %c16, %c0_198] : memref<1x8x32x32xf32, #tpu.memory_space<vmem>>, vector<1x8x1x32xf32>
    %302 = vector.shape_cast %301 : vector<1x8x1x32xf32> to vector<8x32xf32>
    %303 = vector.shape_cast %300 : vector<8x32xf32> to vector<1x8x1x32xf32>
    tpu.vector_store %arg3[%c0_196, %c0_197, %c16, %c0_198], %303 {strides = array<i32>} : memref<1x8x32x32xf32, #tpu.memory_space<vmem>>, vector<1x8x1x32xf32>,
    %cst_199 = arith.constant 0.000000e+00 : f32
    %304 = vector.broadcast %cst_199 : f32 to vector<32x16xf32>
    %c0_200 = arith.constant 0 : index
    %c0_201 = arith.constant 0 : index
    %c8_202 = arith.constant 8 : index
    %c0_203 = arith.constant 0 : index
    %305 = vector.load %arg1[%c0_200, %c0_201, %c8_202, %c0_203] : memref<1x4x16x16xf32, #tpu.memory_space<vmem>>, vector<1x4x1x16xf32>
    %306 = vector.shape_cast %305 : vector<1x4x1x16xf32> to vector<4x16xf32>
    %cst_204 = arith.constant dense<0.000000e+00> : vector<32x16xf32>
    %307 = tpu.matmul %31, %306, %cst_204 {dimension_numbers = #tpu.dot_dimension_numbers<[1], [0], [0], [1], [0, 0, 1, 1], [], []>} : vector<32x4xf32>, vector<4x16xf32>, vector<32x16xf32> -> vector<32x16xf32>
    %308 = arith.addf %304, %307 : vector<32x16xf32>
    %c0_205 = arith.constant 0 : index
    %c0_206 = arith.constant 0 : index
    %c9 = arith.constant 9 : index
    %c0_207 = arith.constant 0 : index
    %309 = vector.load %arg1[%c0_205, %c0_206, %c9, %c0_207] : memref<1x4x16x16xf32, #tpu.memory_space<vmem>>, vector<1x4x1x16xf32>
    %310 = vector.shape_cast %309 : vector<1x4x1x16xf32> to vector<4x16xf32>
    %cst_208 = arith.constant dense<0.000000e+00> : vector<32x16xf32>
    %311 = tpu.matmul %33, %310, %cst_208 {dimension_numbers = #tpu.dot_dimension_numbers<[1], [0], [0], [1], [0, 0, 1, 1], [], []>} : vector<32x4xf32>, vector<4x16xf32>, vector<32x16xf32> -> vector<32x16xf32>
    %312 = arith.addf %308, %311 : vector<32x16xf32>
    %cst_209 = arith.constant 0.000000e+00 : f32
    %313 = vector.broadcast %cst_209 : f32 to vector<8x32xf32>
    %314 = vector.extract_strided_slice %312 {offsets = [0, 0], sizes = [8, 16], strides = [1, 1]} : vector<32x16xf32> to vector<8x16xf32>
    %cst_210 = arith.constant dense<0.000000e+00> : vector<8x32xf32>
    %315 = tpu.matmul %314, %8, %cst_210 {dimension_numbers = #tpu.dot_dimension_numbers<[1], [0], [0], [1], [0, 0, 1, 1], [], []>} : vector<8x16xf32>, vector<16x32xf32>, vector<8x32xf32> -> vector<8x32xf32>
    %316 = arith.addf %313, %315 : vector<8x32xf32>
    %317 = vector.extract_strided_slice %312 {offsets = [8, 0], sizes = [8, 16], strides = [1, 1]} : vector<32x16xf32> to vector<8x16xf32>
    %cst_211 = arith.constant dense<0.000000e+00> : vector<8x32xf32>
    %318 = tpu.matmul %317, %15, %cst_211 {dimension_numbers = #tpu.dot_dimension_numbers<[1], [0], [0], [1], [0, 0, 1, 1], [], []>} : vector<8x16xf32>, vector<16x32xf32>, vector<8x32xf32> -> vector<8x32xf32>
    %319 = arith.addf %316, %318 : vector<8x32xf32>
    %320 = vector.extract_strided_slice %312 {offsets = [16, 0], sizes = [8, 16], strides = [1, 1]} : vector<32x16xf32> to vector<8x16xf32>
    %cst_212 = arith.constant dense<0.000000e+00> : vector<8x32xf32>
    %321 = tpu.matmul %320, %22, %cst_212 {dimension_numbers = #tpu.dot_dimension_numbers<[1], [0], [0], [1], [0, 0, 1, 1], [], []>} : vector<8x16xf32>, vector<16x32xf32>, vector<8x32xf32> -> vector<8x32xf32>
    %322 = arith.addf %319, %321 : vector<8x32xf32>
    %323 = vector.extract_strided_slice %312 {offsets = [24, 0], sizes = [8, 16], strides = [1, 1]} : vector<32x16xf32> to vector<8x16xf32>
    %cst_213 = arith.constant dense<0.000000e+00> : vector<8x32xf32>
    %324 = tpu.matmul %323, %29, %cst_213 {dimension_numbers = #tpu.dot_dimension_numbers<[1], [0], [0], [1], [0, 0, 1, 1], [], []>} : vector<8x16xf32>, vector<16x32xf32>, vector<8x32xf32> -> vector<8x32xf32>
    %325 = arith.addf %322, %324 : vector<8x32xf32>
    %cst_214 = arith.constant 0.000000e+00 : f32
    %326 = vector.broadcast %cst_214 : f32 to vector<8x32xf32>
    %327 = arith.cmpf oge, %325, %326 : vector<8x32xf32>
    %cst_215 = arith.constant 2.000000e-01 : f32
    %328 = vector.broadcast %cst_215 : f32 to vector<8x32xf32>
    %329 = arith.mulf %328, %325 : vector<8x32xf32>
    %330 = arith.select %327, %325, %329 : vector<8x32xi1>, vector<8x32xf32>
    %c0_216 = arith.constant 0 : index
    %c0_217 = arith.constant 0 : index
    %c18 = arith.constant 18 : index
    %c0_218 = arith.constant 0 : index
    %331 = vector.load %arg3[%c0_216, %c0_217, %c18, %c0_218] : memref<1x8x32x32xf32, #tpu.memory_space<vmem>>, vector<1x8x1x32xf32>
    %332 = vector.shape_cast %331 : vector<1x8x1x32xf32> to vector<8x32xf32>
    %333 = vector.shape_cast %330 : vector<8x32xf32> to vector<1x8x1x32xf32>
    tpu.vector_store %arg3[%c0_216, %c0_217, %c18, %c0_218], %333 {strides = array<i32>} : memref<1x8x32x32xf32, #tpu.memory_space<vmem>>, vector<1x8x1x32xf32>,
    %cst_219 = arith.constant 0.000000e+00 : f32
    %334 = vector.broadcast %cst_219 : f32 to vector<32x16xf32>
    %c0_220 = arith.constant 0 : index
    %c0_221 = arith.constant 0 : index
    %c9_222 = arith.constant 9 : index
    %c0_223 = arith.constant 0 : index
    %335 = vector.load %arg1[%c0_220, %c0_221, %c9_222, %c0_223] : memref<1x4x16x16xf32, #tpu.memory_space<vmem>>, vector<1x4x1x16xf32>
    %336 = vector.shape_cast %335 : vector<1x4x1x16xf32> to vector<4x16xf32>
    %cst_224 = arith.constant dense<0.000000e+00> : vector<32x16xf32>
    %337 = tpu.matmul %31, %336, %cst_224 {dimension_numbers = #tpu.dot_dimension_numbers<[1], [0], [0], [1], [0, 0, 1, 1], [], []>} : vector<32x4xf32>, vector<4x16xf32>, vector<32x16xf32> -> vector<32x16xf32>
    %338 = arith.addf %334, %337 : vector<32x16xf32>
    %c0_225 = arith.constant 0 : index
    %c0_226 = arith.constant 0 : index
    %c10_227 = arith.constant 10 : index
    %c0_228 = arith.constant 0 : index
    %339 = vector.load %arg1[%c0_225, %c0_226, %c10_227, %c0_228] : memref<1x4x16x16xf32, #tpu.memory_space<vmem>>, vector<1x4x1x16xf32>
    %340 = vector.shape_cast %339 : vector<1x4x1x16xf32> to vector<4x16xf32>
    %cst_229 = arith.constant dense<0.000000e+00> : vector<32x16xf32>
    %341 = tpu.matmul %33, %340, %cst_229 {dimension_numbers = #tpu.dot_dimension_numbers<[1], [0], [0], [1], [0, 0, 1, 1], [], []>} : vector<32x4xf32>, vector<4x16xf32>, vector<32x16xf32> -> vector<32x16xf32>
    %342 = arith.addf %338, %341 : vector<32x16xf32>
    %cst_230 = arith.constant 0.000000e+00 : f32
    %343 = vector.broadcast %cst_230 : f32 to vector<8x32xf32>
    %344 = vector.extract_strided_slice %342 {offsets = [0, 0], sizes = [8, 16], strides = [1, 1]} : vector<32x16xf32> to vector<8x16xf32>
    %cst_231 = arith.constant dense<0.000000e+00> : vector<8x32xf32>
    %345 = tpu.matmul %344, %8, %cst_231 {dimension_numbers = #tpu.dot_dimension_numbers<[1], [0], [0], [1], [0, 0, 1, 1], [], []>} : vector<8x16xf32>, vector<16x32xf32>, vector<8x32xf32> -> vector<8x32xf32>
    %346 = arith.addf %343, %345 : vector<8x32xf32>
    %347 = vector.extract_strided_slice %342 {offsets = [8, 0], sizes = [8, 16], strides = [1, 1]} : vector<32x16xf32> to vector<8x16xf32>
    %cst_232 = arith.constant dense<0.000000e+00> : vector<8x32xf32>
    %348 = tpu.matmul %347, %15, %cst_232 {dimension_numbers = #tpu.dot_dimension_numbers<[1], [0], [0], [1], [0, 0, 1, 1], [], []>} : vector<8x16xf32>, vector<16x32xf32>, vector<8x32xf32> -> vector<8x32xf32>
    %349 = arith.addf %346, %348 : vector<8x32xf32>
    %350 = vector.extract_strided_slice %342 {offsets = [16, 0], sizes = [8, 16], strides = [1, 1]} : vector<32x16xf32> to vector<8x16xf32>
    %cst_233 = arith.constant dense<0.000000e+00> : vector<8x32xf32>
    %351 = tpu.matmul %350, %22, %cst_233 {dimension_numbers = #tpu.dot_dimension_numbers<[1], [0], [0], [1], [0, 0, 1, 1], [], []>} : vector<8x16xf32>, vector<16x32xf32>, vector<8x32xf32> -> vector<8x32xf32>
    %352 = arith.addf %349, %351 : vector<8x32xf32>
    %353 = vector.extract_strided_slice %342 {offsets = [24, 0], sizes = [8, 16], strides = [1, 1]} : vector<32x16xf32> to vector<8x16xf32>
    %cst_234 = arith.constant dense<0.000000e+00> : vector<8x32xf32>
    %354 = tpu.matmul %353, %29, %cst_234 {dimension_numbers = #tpu.dot_dimension_numbers<[1], [0], [0], [1], [0, 0, 1, 1], [], []>} : vector<8x16xf32>, vector<16x32xf32>, vector<8x32xf32> -> vector<8x32xf32>
    %355 = arith.addf %352, %354 : vector<8x32xf32>
    %cst_235 = arith.constant 0.000000e+00 : f32
    %356 = vector.broadcast %cst_235 : f32 to vector<8x32xf32>
    %357 = arith.cmpf oge, %355, %356 : vector<8x32xf32>
    %cst_236 = arith.constant 2.000000e-01 : f32
    %358 = vector.broadcast %cst_236 : f32 to vector<8x32xf32>
    %359 = arith.mulf %358, %355 : vector<8x32xf32>
    %360 = arith.select %357, %355, %359 : vector<8x32xi1>, vector<8x32xf32>
    %c0_237 = arith.constant 0 : index
    %c0_238 = arith.constant 0 : index
    %c20 = arith.constant 20 : index
    %c0_239 = arith.constant 0 : index
    %361 = vector.load %arg3[%c0_237, %c0_238, %c20, %c0_239] : memref<1x8x32x32xf32, #tpu.memory_space<vmem>>, vector<1x8x1x32xf32>
    %362 = vector.shape_cast %361 : vector<1x8x1x32xf32> to vector<8x32xf32>
    %363 = vector.shape_cast %360 : vector<8x32xf32> to vector<1x8x1x32xf32>
    tpu.vector_store %arg3[%c0_237, %c0_238, %c20, %c0_239], %363 {strides = array<i32>} : memref<1x8x32x32xf32, #tpu.memory_space<vmem>>, vector<1x8x1x32xf32>,
    %cst_240 = arith.constant 0.000000e+00 : f32
    %364 = vector.broadcast %cst_240 : f32 to vector<32x16xf32>
    %c0_241 = arith.constant 0 : index
    %c0_242 = arith.constant 0 : index
    %c10_243 = arith.constant 10 : index
    %c0_244 = arith.constant 0 : index
    %365 = vector.load %arg1[%c0_241, %c0_242, %c10_243, %c0_244] : memref<1x4x16x16xf32, #tpu.memory_space<vmem>>, vector<1x4x1x16xf32>
    %366 = vector.shape_cast %365 : vector<1x4x1x16xf32> to vector<4x16xf32>
    %cst_245 = arith.constant dense<0.000000e+00> : vector<32x16xf32>
    %367 = tpu.matmul %31, %366, %cst_245 {dimension_numbers = #tpu.dot_dimension_numbers<[1], [0], [0], [1], [0, 0, 1, 1], [], []>} : vector<32x4xf32>, vector<4x16xf32>, vector<32x16xf32> -> vector<32x16xf32>
    %368 = arith.addf %364, %367 : vector<32x16xf32>
    %c0_246 = arith.constant 0 : index
    %c0_247 = arith.constant 0 : index
    %c11 = arith.constant 11 : index
    %c0_248 = arith.constant 0 : index
    %369 = vector.load %arg1[%c0_246, %c0_247, %c11, %c0_248] : memref<1x4x16x16xf32, #tpu.memory_space<vmem>>, vector<1x4x1x16xf32>
    %370 = vector.shape_cast %369 : vector<1x4x1x16xf32> to vector<4x16xf32>
    %cst_249 = arith.constant dense<0.000000e+00> : vector<32x16xf32>
    %371 = tpu.matmul %33, %370, %cst_249 {dimension_numbers = #tpu.dot_dimension_numbers<[1], [0], [0], [1], [0, 0, 1, 1], [], []>} : vector<32x4xf32>, vector<4x16xf32>, vector<32x16xf32> -> vector<32x16xf32>
    %372 = arith.addf %368, %371 : vector<32x16xf32>
    %cst_250 = arith.constant 0.000000e+00 : f32
    %373 = vector.broadcast %cst_250 : f32 to vector<8x32xf32>
    %374 = vector.extract_strided_slice %372 {offsets = [0, 0], sizes = [8, 16], strides = [1, 1]} : vector<32x16xf32> to vector<8x16xf32>
    %cst_251 = arith.constant dense<0.000000e+00> : vector<8x32xf32>
    %375 = tpu.matmul %374, %8, %cst_251 {dimension_numbers = #tpu.dot_dimension_numbers<[1], [0], [0], [1], [0, 0, 1, 1], [], []>} : vector<8x16xf32>, vector<16x32xf32>, vector<8x32xf32> -> vector<8x32xf32>
    %376 = arith.addf %373, %375 : vector<8x32xf32>
    %377 = vector.extract_strided_slice %372 {offsets = [8, 0], sizes = [8, 16], strides = [1, 1]} : vector<32x16xf32> to vector<8x16xf32>
    %cst_252 = arith.constant dense<0.000000e+00> : vector<8x32xf32>
    %378 = tpu.matmul %377, %15, %cst_252 {dimension_numbers = #tpu.dot_dimension_numbers<[1], [0], [0], [1], [0, 0, 1, 1], [], []>} : vector<8x16xf32>, vector<16x32xf32>, vector<8x32xf32> -> vector<8x32xf32>
    %379 = arith.addf %376, %378 : vector<8x32xf32>
    %380 = vector.extract_strided_slice %372 {offsets = [16, 0], sizes = [8, 16], strides = [1, 1]} : vector<32x16xf32> to vector<8x16xf32>
    %cst_253 = arith.constant dense<0.000000e+00> : vector<8x32xf32>
    %381 = tpu.matmul %380, %22, %cst_253 {dimension_numbers = #tpu.dot_dimension_numbers<[1], [0], [0], [1], [0, 0, 1, 1], [], []>} : vector<8x16xf32>, vector<16x32xf32>, vector<8x32xf32> -> vector<8x32xf32>
    %382 = arith.addf %379, %381 : vector<8x32xf32>
    %383 = vector.extract_strided_slice %372 {offsets = [24, 0], sizes = [8, 16], strides = [1, 1]} : vector<32x16xf32> to vector<8x16xf32>
    %cst_254 = arith.constant dense<0.000000e+00> : vector<8x32xf32>
    %384 = tpu.matmul %383, %29, %cst_254 {dimension_numbers = #tpu.dot_dimension_numbers<[1], [0], [0], [1], [0, 0, 1, 1], [], []>} : vector<8x16xf32>, vector<16x32xf32>, vector<8x32xf32> -> vector<8x32xf32>
    %385 = arith.addf %382, %384 : vector<8x32xf32>
    %cst_255 = arith.constant 0.000000e+00 : f32
    %386 = vector.broadcast %cst_255 : f32 to vector<8x32xf32>
    %387 = arith.cmpf oge, %385, %386 : vector<8x32xf32>
    %cst_256 = arith.constant 2.000000e-01 : f32
    %388 = vector.broadcast %cst_256 : f32 to vector<8x32xf32>
    %389 = arith.mulf %388, %385 : vector<8x32xf32>
    %390 = arith.select %387, %385, %389 : vector<8x32xi1>, vector<8x32xf32>
    %c0_257 = arith.constant 0 : index
    %c0_258 = arith.constant 0 : index
    %c22 = arith.constant 22 : index
    %c0_259 = arith.constant 0 : index
    %391 = vector.load %arg3[%c0_257, %c0_258, %c22, %c0_259] : memref<1x8x32x32xf32, #tpu.memory_space<vmem>>, vector<1x8x1x32xf32>
    %392 = vector.shape_cast %391 : vector<1x8x1x32xf32> to vector<8x32xf32>
    %393 = vector.shape_cast %390 : vector<8x32xf32> to vector<1x8x1x32xf32>
    tpu.vector_store %arg3[%c0_257, %c0_258, %c22, %c0_259], %393 {strides = array<i32>} : memref<1x8x32x32xf32, #tpu.memory_space<vmem>>, vector<1x8x1x32xf32>,
    %cst_260 = arith.constant 0.000000e+00 : f32
    %394 = vector.broadcast %cst_260 : f32 to vector<32x16xf32>
    %c0_261 = arith.constant 0 : index
    %c0_262 = arith.constant 0 : index
    %c11_263 = arith.constant 11 : index
    %c0_264 = arith.constant 0 : index
    %395 = vector.load %arg1[%c0_261, %c0_262, %c11_263, %c0_264] : memref<1x4x16x16xf32, #tpu.memory_space<vmem>>, vector<1x4x1x16xf32>
    %396 = vector.shape_cast %395 : vector<1x4x1x16xf32> to vector<4x16xf32>
    %cst_265 = arith.constant dense<0.000000e+00> : vector<32x16xf32>
    %397 = tpu.matmul %31, %396, %cst_265 {dimension_numbers = #tpu.dot_dimension_numbers<[1], [0], [0], [1], [0, 0, 1, 1], [], []>} : vector<32x4xf32>, vector<4x16xf32>, vector<32x16xf32> -> vector<32x16xf32>
    %398 = arith.addf %394, %397 : vector<32x16xf32>
    %c0_266 = arith.constant 0 : index
    %c0_267 = arith.constant 0 : index
    %c12_268 = arith.constant 12 : index
    %c0_269 = arith.constant 0 : index
    %399 = vector.load %arg1[%c0_266, %c0_267, %c12_268, %c0_269] : memref<1x4x16x16xf32, #tpu.memory_space<vmem>>, vector<1x4x1x16xf32>
    %400 = vector.shape_cast %399 : vector<1x4x1x16xf32> to vector<4x16xf32>
    %cst_270 = arith.constant dense<0.000000e+00> : vector<32x16xf32>
    %401 = tpu.matmul %33, %400, %cst_270 {dimension_numbers = #tpu.dot_dimension_numbers<[1], [0], [0], [1], [0, 0, 1, 1], [], []>} : vector<32x4xf32>, vector<4x16xf32>, vector<32x16xf32> -> vector<32x16xf32>
    %402 = arith.addf %398, %401 : vector<32x16xf32>
    %cst_271 = arith.constant 0.000000e+00 : f32
    %403 = vector.broadcast %cst_271 : f32 to vector<8x32xf32>
    %404 = vector.extract_strided_slice %402 {offsets = [0, 0], sizes = [8, 16], strides = [1, 1]} : vector<32x16xf32> to vector<8x16xf32>
    %cst_272 = arith.constant dense<0.000000e+00> : vector<8x32xf32>
    %405 = tpu.matmul %404, %8, %cst_272 {dimension_numbers = #tpu.dot_dimension_numbers<[1], [0], [0], [1], [0, 0, 1, 1], [], []>} : vector<8x16xf32>, vector<16x32xf32>, vector<8x32xf32> -> vector<8x32xf32>
    %406 = arith.addf %403, %405 : vector<8x32xf32>
    %407 = vector.extract_strided_slice %402 {offsets = [8, 0], sizes = [8, 16], strides = [1, 1]} : vector<32x16xf32> to vector<8x16xf32>
    %cst_273 = arith.constant dense<0.000000e+00> : vector<8x32xf32>
    %408 = tpu.matmul %407, %15, %cst_273 {dimension_numbers = #tpu.dot_dimension_numbers<[1], [0], [0], [1], [0, 0, 1, 1], [], []>} : vector<8x16xf32>, vector<16x32xf32>, vector<8x32xf32> -> vector<8x32xf32>
    %409 = arith.addf %406, %408 : vector<8x32xf32>
    %410 = vector.extract_strided_slice %402 {offsets = [16, 0], sizes = [8, 16], strides = [1, 1]} : vector<32x16xf32> to vector<8x16xf32>
    %cst_274 = arith.constant dense<0.000000e+00> : vector<8x32xf32>
    %411 = tpu.matmul %410, %22, %cst_274 {dimension_numbers = #tpu.dot_dimension_numbers<[1], [0], [0], [1], [0, 0, 1, 1], [], []>} : vector<8x16xf32>, vector<16x32xf32>, vector<8x32xf32> -> vector<8x32xf32>
    %412 = arith.addf %409, %411 : vector<8x32xf32>
    %413 = vector.extract_strided_slice %402 {offsets = [24, 0], sizes = [8, 16], strides = [1, 1]} : vector<32x16xf32> to vector<8x16xf32>
    %cst_275 = arith.constant dense<0.000000e+00> : vector<8x32xf32>
    %414 = tpu.matmul %413, %29, %cst_275 {dimension_numbers = #tpu.dot_dimension_numbers<[1], [0], [0], [1], [0, 0, 1, 1], [], []>} : vector<8x16xf32>, vector<16x32xf32>, vector<8x32xf32> -> vector<8x32xf32>
    %415 = arith.addf %412, %414 : vector<8x32xf32>
    %cst_276 = arith.constant 0.000000e+00 : f32
    %416 = vector.broadcast %cst_276 : f32 to vector<8x32xf32>
    %417 = arith.cmpf oge, %415, %416 : vector<8x32xf32>
    %cst_277 = arith.constant 2.000000e-01 : f32
    %418 = vector.broadcast %cst_277 : f32 to vector<8x32xf32>
    %419 = arith.mulf %418, %415 : vector<8x32xf32>
    %420 = arith.select %417, %415, %419 : vector<8x32xi1>, vector<8x32xf32>
    %c0_278 = arith.constant 0 : index
    %c0_279 = arith.constant 0 : index
    %c24 = arith.constant 24 : index
    %c0_280 = arith.constant 0 : index
    %421 = vector.load %arg3[%c0_278, %c0_279, %c24, %c0_280] : memref<1x8x32x32xf32, #tpu.memory_space<vmem>>, vector<1x8x1x32xf32>
    %422 = vector.shape_cast %421 : vector<1x8x1x32xf32> to vector<8x32xf32>
    %423 = vector.shape_cast %420 : vector<8x32xf32> to vector<1x8x1x32xf32>
    tpu.vector_store %arg3[%c0_278, %c0_279, %c24, %c0_280], %423 {strides = array<i32>} : memref<1x8x32x32xf32, #tpu.memory_space<vmem>>, vector<1x8x1x32xf32>,
    %cst_281 = arith.constant 0.000000e+00 : f32
    %424 = vector.broadcast %cst_281 : f32 to vector<32x16xf32>
    %c0_282 = arith.constant 0 : index
    %c0_283 = arith.constant 0 : index
    %c12_284 = arith.constant 12 : index
    %c0_285 = arith.constant 0 : index
    %425 = vector.load %arg1[%c0_282, %c0_283, %c12_284, %c0_285] : memref<1x4x16x16xf32, #tpu.memory_space<vmem>>, vector<1x4x1x16xf32>
    %426 = vector.shape_cast %425 : vector<1x4x1x16xf32> to vector<4x16xf32>
    %cst_286 = arith.constant dense<0.000000e+00> : vector<32x16xf32>
    %427 = tpu.matmul %31, %426, %cst_286 {dimension_numbers = #tpu.dot_dimension_numbers<[1], [0], [0], [1], [0, 0, 1, 1], [], []>} : vector<32x4xf32>, vector<4x16xf32>, vector<32x16xf32> -> vector<32x16xf32>
    %428 = arith.addf %424, %427 : vector<32x16xf32>
    %c0_287 = arith.constant 0 : index
    %c0_288 = arith.constant 0 : index
    %c13 = arith.constant 13 : index
    %c0_289 = arith.constant 0 : index
    %429 = vector.load %arg1[%c0_287, %c0_288, %c13, %c0_289] : memref<1x4x16x16xf32, #tpu.memory_space<vmem>>, vector<1x4x1x16xf32>
    %430 = vector.shape_cast %429 : vector<1x4x1x16xf32> to vector<4x16xf32>
    %cst_290 = arith.constant dense<0.000000e+00> : vector<32x16xf32>
    %431 = tpu.matmul %33, %430, %cst_290 {dimension_numbers = #tpu.dot_dimension_numbers<[1], [0], [0], [1], [0, 0, 1, 1], [], []>} : vector<32x4xf32>, vector<4x16xf32>, vector<32x16xf32> -> vector<32x16xf32>
    %432 = arith.addf %428, %431 : vector<32x16xf32>
    %cst_291 = arith.constant 0.000000e+00 : f32
    %433 = vector.broadcast %cst_291 : f32 to vector<8x32xf32>
    %434 = vector.extract_strided_slice %432 {offsets = [0, 0], sizes = [8, 16], strides = [1, 1]} : vector<32x16xf32> to vector<8x16xf32>
    %cst_292 = arith.constant dense<0.000000e+00> : vector<8x32xf32>
    %435 = tpu.matmul %434, %8, %cst_292 {dimension_numbers = #tpu.dot_dimension_numbers<[1], [0], [0], [1], [0, 0, 1, 1], [], []>} : vector<8x16xf32>, vector<16x32xf32>, vector<8x32xf32> -> vector<8x32xf32>
    %436 = arith.addf %433, %435 : vector<8x32xf32>
    %437 = vector.extract_strided_slice %432 {offsets = [8, 0], sizes = [8, 16], strides = [1, 1]} : vector<32x16xf32> to vector<8x16xf32>
    %cst_293 = arith.constant dense<0.000000e+00> : vector<8x32xf32>
    %438 = tpu.matmul %437, %15, %cst_293 {dimension_numbers = #tpu.dot_dimension_numbers<[1], [0], [0], [1], [0, 0, 1, 1], [], []>} : vector<8x16xf32>, vector<16x32xf32>, vector<8x32xf32> -> vector<8x32xf32>
    %439 = arith.addf %436, %438 : vector<8x32xf32>
    %440 = vector.extract_strided_slice %432 {offsets = [16, 0], sizes = [8, 16], strides = [1, 1]} : vector<32x16xf32> to vector<8x16xf32>
    %cst_294 = arith.constant dense<0.000000e+00> : vector<8x32xf32>
    %441 = tpu.matmul %440, %22, %cst_294 {dimension_numbers = #tpu.dot_dimension_numbers<[1], [0], [0], [1], [0, 0, 1, 1], [], []>} : vector<8x16xf32>, vector<16x32xf32>, vector<8x32xf32> -> vector<8x32xf32>
    %442 = arith.addf %439, %441 : vector<8x32xf32>
    %443 = vector.extract_strided_slice %432 {offsets = [24, 0], sizes = [8, 16], strides = [1, 1]} : vector<32x16xf32> to vector<8x16xf32>
    %cst_295 = arith.constant dense<0.000000e+00> : vector<8x32xf32>
    %444 = tpu.matmul %443, %29, %cst_295 {dimension_numbers = #tpu.dot_dimension_numbers<[1], [0], [0], [1], [0, 0, 1, 1], [], []>} : vector<8x16xf32>, vector<16x32xf32>, vector<8x32xf32> -> vector<8x32xf32>
    %445 = arith.addf %442, %444 : vector<8x32xf32>
    %cst_296 = arith.constant 0.000000e+00 : f32
    %446 = vector.broadcast %cst_296 : f32 to vector<8x32xf32>
    %447 = arith.cmpf oge, %445, %446 : vector<8x32xf32>
    %cst_297 = arith.constant 2.000000e-01 : f32
    %448 = vector.broadcast %cst_297 : f32 to vector<8x32xf32>
    %449 = arith.mulf %448, %445 : vector<8x32xf32>
    %450 = arith.select %447, %445, %449 : vector<8x32xi1>, vector<8x32xf32>
    %c0_298 = arith.constant 0 : index
    %c0_299 = arith.constant 0 : index
    %c26 = arith.constant 26 : index
    %c0_300 = arith.constant 0 : index
    %451 = vector.load %arg3[%c0_298, %c0_299, %c26, %c0_300] : memref<1x8x32x32xf32, #tpu.memory_space<vmem>>, vector<1x8x1x32xf32>
    %452 = vector.shape_cast %451 : vector<1x8x1x32xf32> to vector<8x32xf32>
    %453 = vector.shape_cast %450 : vector<8x32xf32> to vector<1x8x1x32xf32>
    tpu.vector_store %arg3[%c0_298, %c0_299, %c26, %c0_300], %453 {strides = array<i32>} : memref<1x8x32x32xf32, #tpu.memory_space<vmem>>, vector<1x8x1x32xf32>,
    %cst_301 = arith.constant 0.000000e+00 : f32
    %454 = vector.broadcast %cst_301 : f32 to vector<32x16xf32>
    %c0_302 = arith.constant 0 : index
    %c0_303 = arith.constant 0 : index
    %c13_304 = arith.constant 13 : index
    %c0_305 = arith.constant 0 : index
    %455 = vector.load %arg1[%c0_302, %c0_303, %c13_304, %c0_305] : memref<1x4x16x16xf32, #tpu.memory_space<vmem>>, vector<1x4x1x16xf32>
    %456 = vector.shape_cast %455 : vector<1x4x1x16xf32> to vector<4x16xf32>
    %cst_306 = arith.constant dense<0.000000e+00> : vector<32x16xf32>
    %457 = tpu.matmul %31, %456, %cst_306 {dimension_numbers = #tpu.dot_dimension_numbers<[1], [0], [0], [1], [0, 0, 1, 1], [], []>} : vector<32x4xf32>, vector<4x16xf32>, vector<32x16xf32> -> vector<32x16xf32>
    %458 = arith.addf %454, %457 : vector<32x16xf32>
    %c0_307 = arith.constant 0 : index
    %c0_308 = arith.constant 0 : index
    %c14_309 = arith.constant 14 : index
    %c0_310 = arith.constant 0 : index
    %459 = vector.load %arg1[%c0_307, %c0_308, %c14_309, %c0_310] : memref<1x4x16x16xf32, #tpu.memory_space<vmem>>, vector<1x4x1x16xf32>
    %460 = vector.shape_cast %459 : vector<1x4x1x16xf32> to vector<4x16xf32>
    %cst_311 = arith.constant dense<0.000000e+00> : vector<32x16xf32>
    %461 = tpu.matmul %33, %460, %cst_311 {dimension_numbers = #tpu.dot_dimension_numbers<[1], [0], [0], [1], [0, 0, 1, 1], [], []>} : vector<32x4xf32>, vector<4x16xf32>, vector<32x16xf32> -> vector<32x16xf32>
    %462 = arith.addf %458, %461 : vector<32x16xf32>
    %cst_312 = arith.constant 0.000000e+00 : f32
    %463 = vector.broadcast %cst_312 : f32 to vector<8x32xf32>
    %464 = vector.extract_strided_slice %462 {offsets = [0, 0], sizes = [8, 16], strides = [1, 1]} : vector<32x16xf32> to vector<8x16xf32>
    %cst_313 = arith.constant dense<0.000000e+00> : vector<8x32xf32>
    %465 = tpu.matmul %464, %8, %cst_313 {dimension_numbers = #tpu.dot_dimension_numbers<[1], [0], [0], [1], [0, 0, 1, 1], [], []>} : vector<8x16xf32>, vector<16x32xf32>, vector<8x32xf32> -> vector<8x32xf32>
    %466 = arith.addf %463, %465 : vector<8x32xf32>
    %467 = vector.extract_strided_slice %462 {offsets = [8, 0], sizes = [8, 16], strides = [1, 1]} : vector<32x16xf32> to vector<8x16xf32>
    %cst_314 = arith.constant dense<0.000000e+00> : vector<8x32xf32>
    %468 = tpu.matmul %467, %15, %cst_314 {dimension_numbers = #tpu.dot_dimension_numbers<[1], [0], [0], [1], [0, 0, 1, 1], [], []>} : vector<8x16xf32>, vector<16x32xf32>, vector<8x32xf32> -> vector<8x32xf32>
    %469 = arith.addf %466, %468 : vector<8x32xf32>
    %470 = vector.extract_strided_slice %462 {offsets = [16, 0], sizes = [8, 16], strides = [1, 1]} : vector<32x16xf32> to vector<8x16xf32>
    %cst_315 = arith.constant dense<0.000000e+00> : vector<8x32xf32>
    %471 = tpu.matmul %470, %22, %cst_315 {dimension_numbers = #tpu.dot_dimension_numbers<[1], [0], [0], [1], [0, 0, 1, 1], [], []>} : vector<8x16xf32>, vector<16x32xf32>, vector<8x32xf32> -> vector<8x32xf32>
    %472 = arith.addf %469, %471 : vector<8x32xf32>
    %473 = vector.extract_strided_slice %462 {offsets = [24, 0], sizes = [8, 16], strides = [1, 1]} : vector<32x16xf32> to vector<8x16xf32>
    %cst_316 = arith.constant dense<0.000000e+00> : vector<8x32xf32>
    %474 = tpu.matmul %473, %29, %cst_316 {dimension_numbers = #tpu.dot_dimension_numbers<[1], [0], [0], [1], [0, 0, 1, 1], [], []>} : vector<8x16xf32>, vector<16x32xf32>, vector<8x32xf32> -> vector<8x32xf32>
    %475 = arith.addf %472, %474 : vector<8x32xf32>
    %cst_317 = arith.constant 0.000000e+00 : f32
    %476 = vector.broadcast %cst_317 : f32 to vector<8x32xf32>
    %477 = arith.cmpf oge, %475, %476 : vector<8x32xf32>
    %cst_318 = arith.constant 2.000000e-01 : f32
    %478 = vector.broadcast %cst_318 : f32 to vector<8x32xf32>
    %479 = arith.mulf %478, %475 : vector<8x32xf32>
    %480 = arith.select %477, %475, %479 : vector<8x32xi1>, vector<8x32xf32>
    %c0_319 = arith.constant 0 : index
    %c0_320 = arith.constant 0 : index
    %c28 = arith.constant 28 : index
    %c0_321 = arith.constant 0 : index
    %481 = vector.load %arg3[%c0_319, %c0_320, %c28, %c0_321] : memref<1x8x32x32xf32, #tpu.memory_space<vmem>>, vector<1x8x1x32xf32>
    %482 = vector.shape_cast %481 : vector<1x8x1x32xf32> to vector<8x32xf32>
    %483 = vector.shape_cast %480 : vector<8x32xf32> to vector<1x8x1x32xf32>
    tpu.vector_store %arg3[%c0_319, %c0_320, %c28, %c0_321], %483 {strides = array<i32>} : memref<1x8x32x32xf32, #tpu.memory_space<vmem>>, vector<1x8x1x32xf32>,
    %cst_322 = arith.constant 0.000000e+00 : f32
    %484 = vector.broadcast %cst_322 : f32 to vector<32x16xf32>
    %c0_323 = arith.constant 0 : index
    %c0_324 = arith.constant 0 : index
    %c14_325 = arith.constant 14 : index
    %c0_326 = arith.constant 0 : index
    %485 = vector.load %arg1[%c0_323, %c0_324, %c14_325, %c0_326] : memref<1x4x16x16xf32, #tpu.memory_space<vmem>>, vector<1x4x1x16xf32>
    %486 = vector.shape_cast %485 : vector<1x4x1x16xf32> to vector<4x16xf32>
    %cst_327 = arith.constant dense<0.000000e+00> : vector<32x16xf32>
    %487 = tpu.matmul %31, %486, %cst_327 {dimension_numbers = #tpu.dot_dimension_numbers<[1], [0], [0], [1], [0, 0, 1, 1], [], []>} : vector<32x4xf32>, vector<4x16xf32>, vector<32x16xf32> -> vector<32x16xf32>
    %488 = arith.addf %484, %487 : vector<32x16xf32>
    %c0_328 = arith.constant 0 : index
    %c0_329 = arith.constant 0 : index
    %c15 = arith.constant 15 : index
    %c0_330 = arith.constant 0 : index
    %489 = vector.load %arg1[%c0_328, %c0_329, %c15, %c0_330] : memref<1x4x16x16xf32, #tpu.memory_space<vmem>>, vector<1x4x1x16xf32>
    %490 = vector.shape_cast %489 : vector<1x4x1x16xf32> to vector<4x16xf32>
    %cst_331 = arith.constant dense<0.000000e+00> : vector<32x16xf32>
    %491 = tpu.matmul %33, %490, %cst_331 {dimension_numbers = #tpu.dot_dimension_numbers<[1], [0], [0], [1], [0, 0, 1, 1], [], []>} : vector<32x4xf32>, vector<4x16xf32>, vector<32x16xf32> -> vector<32x16xf32>
    %492 = arith.addf %488, %491 : vector<32x16xf32>
    %cst_332 = arith.constant 0.000000e+00 : f32
    %493 = vector.broadcast %cst_332 : f32 to vector<8x32xf32>
    %494 = vector.extract_strided_slice %492 {offsets = [0, 0], sizes = [8, 16], strides = [1, 1]} : vector<32x16xf32> to vector<8x16xf32>
    %cst_333 = arith.constant dense<0.000000e+00> : vector<8x32xf32>
    %495 = tpu.matmul %494, %8, %cst_333 {dimension_numbers = #tpu.dot_dimension_numbers<[1], [0], [0], [1], [0, 0, 1, 1], [], []>} : vector<8x16xf32>, vector<16x32xf32>, vector<8x32xf32> -> vector<8x32xf32>
    %496 = arith.addf %493, %495 : vector<8x32xf32>
    %497 = vector.extract_strided_slice %492 {offsets = [8, 0], sizes = [8, 16], strides = [1, 1]} : vector<32x16xf32> to vector<8x16xf32>
    %cst_334 = arith.constant dense<0.000000e+00> : vector<8x32xf32>
    %498 = tpu.matmul %497, %15, %cst_334 {dimension_numbers = #tpu.dot_dimension_numbers<[1], [0], [0], [1], [0, 0, 1, 1], [], []>} : vector<8x16xf32>, vector<16x32xf32>, vector<8x32xf32> -> vector<8x32xf32>
    %499 = arith.addf %496, %498 : vector<8x32xf32>
    %500 = vector.extract_strided_slice %492 {offsets = [16, 0], sizes = [8, 16], strides = [1, 1]} : vector<32x16xf32> to vector<8x16xf32>
    %cst_335 = arith.constant dense<0.000000e+00> : vector<8x32xf32>
    %501 = tpu.matmul %500, %22, %cst_335 {dimension_numbers = #tpu.dot_dimension_numbers<[1], [0], [0], [1], [0, 0, 1, 1], [], []>} : vector<8x16xf32>, vector<16x32xf32>, vector<8x32xf32> -> vector<8x32xf32>
    %502 = arith.addf %499, %501 : vector<8x32xf32>
    %503 = vector.extract_strided_slice %492 {offsets = [24, 0], sizes = [8, 16], strides = [1, 1]} : vector<32x16xf32> to vector<8x16xf32>
    %cst_336 = arith.constant dense<0.000000e+00> : vector<8x32xf32>
    %504 = tpu.matmul %503, %29, %cst_336 {dimension_numbers = #tpu.dot_dimension_numbers<[1], [0], [0], [1], [0, 0, 1, 1], [], []>} : vector<8x16xf32>, vector<16x32xf32>, vector<8x32xf32> -> vector<8x32xf32>
    %505 = arith.addf %502, %504 : vector<8x32xf32>
    %cst_337 = arith.constant 0.000000e+00 : f32
    %506 = vector.broadcast %cst_337 : f32 to vector<8x32xf32>
    %507 = arith.cmpf oge, %505, %506 : vector<8x32xf32>
    %cst_338 = arith.constant 2.000000e-01 : f32
    %508 = vector.broadcast %cst_338 : f32 to vector<8x32xf32>
    %509 = arith.mulf %508, %505 : vector<8x32xf32>
    %510 = arith.select %507, %505, %509 : vector<8x32xi1>, vector<8x32xf32>
    %c0_339 = arith.constant 0 : index
    %c0_340 = arith.constant 0 : index
    %c30 = arith.constant 30 : index
    %c0_341 = arith.constant 0 : index
    %511 = vector.load %arg3[%c0_339, %c0_340, %c30, %c0_341] : memref<1x8x32x32xf32, #tpu.memory_space<vmem>>, vector<1x8x1x32xf32>
    %512 = vector.shape_cast %511 : vector<1x8x1x32xf32> to vector<8x32xf32>
    %513 = vector.shape_cast %510 : vector<8x32xf32> to vector<1x8x1x32xf32>
    tpu.vector_store %arg3[%c0_339, %c0_340, %c30, %c0_341], %513 {strides = array<i32>} : memref<1x8x32x32xf32, #tpu.memory_space<vmem>>, vector<1x8x1x32xf32>,
    %cst_342 = arith.constant 0.000000e+00 : f32
    %514 = vector.broadcast %cst_342 : f32 to vector<32x16xf32>
    %c0_343 = arith.constant 0 : index
    %c0_344 = arith.constant 0 : index
    %c0_345 = arith.constant 0 : index
    %c0_346 = arith.constant 0 : index
    %515 = vector.load %arg1[%c0_343, %c0_344, %c0_345, %c0_346] : memref<1x4x16x16xf32, #tpu.memory_space<vmem>>, vector<1x4x1x16xf32>
    %516 = vector.shape_cast %515 : vector<1x4x1x16xf32> to vector<4x16xf32>
    %cst_347 = arith.constant dense<0.000000e+00> : vector<32x16xf32>
    %517 = tpu.matmul %35, %516, %cst_347 {dimension_numbers = #tpu.dot_dimension_numbers<[1], [0], [0], [1], [0, 0, 1, 1], [], []>} : vector<32x4xf32>, vector<4x16xf32>, vector<32x16xf32> -> vector<32x16xf32>
    %518 = arith.addf %514, %517 : vector<32x16xf32>
    %c0_348 = arith.constant 0 : index
    %c0_349 = arith.constant 0 : index
    %c1_350 = arith.constant 1 : index
    %c0_351 = arith.constant 0 : index
    %519 = vector.load %arg1[%c0_348, %c0_349, %c1_350, %c0_351] : memref<1x4x16x16xf32, #tpu.memory_space<vmem>>, vector<1x4x1x16xf32>
    %520 = vector.shape_cast %519 : vector<1x4x1x16xf32> to vector<4x16xf32>
    %cst_352 = arith.constant dense<0.000000e+00> : vector<32x16xf32>
    %521 = tpu.matmul %37, %520, %cst_352 {dimension_numbers = #tpu.dot_dimension_numbers<[1], [0], [0], [1], [0, 0, 1, 1], [], []>} : vector<32x4xf32>, vector<4x16xf32>, vector<32x16xf32> -> vector<32x16xf32>
    %522 = arith.addf %518, %521 : vector<32x16xf32>
    %cst_353 = arith.constant 0.000000e+00 : f32
    %523 = vector.broadcast %cst_353 : f32 to vector<8x32xf32>
    %524 = vector.extract_strided_slice %522 {offsets = [0, 0], sizes = [8, 16], strides = [1, 1]} : vector<32x16xf32> to vector<8x16xf32>
    %cst_354 = arith.constant dense<0.000000e+00> : vector<8x32xf32>
    %525 = tpu.matmul %524, %8, %cst_354 {dimension_numbers = #tpu.dot_dimension_numbers<[1], [0], [0], [1], [0, 0, 1, 1], [], []>} : vector<8x16xf32>, vector<16x32xf32>, vector<8x32xf32> -> vector<8x32xf32>
    %526 = arith.addf %523, %525 : vector<8x32xf32>
    %527 = vector.extract_strided_slice %522 {offsets = [8, 0], sizes = [8, 16], strides = [1, 1]} : vector<32x16xf32> to vector<8x16xf32>
    %cst_355 = arith.constant dense<0.000000e+00> : vector<8x32xf32>
    %528 = tpu.matmul %527, %15, %cst_355 {dimension_numbers = #tpu.dot_dimension_numbers<[1], [0], [0], [1], [0, 0, 1, 1], [], []>} : vector<8x16xf32>, vector<16x32xf32>, vector<8x32xf32> -> vector<8x32xf32>
    %529 = arith.addf %526, %528 : vector<8x32xf32>
    %530 = vector.extract_strided_slice %522 {offsets = [16, 0], sizes = [8, 16], strides = [1, 1]} : vector<32x16xf32> to vector<8x16xf32>
    %cst_356 = arith.constant dense<0.000000e+00> : vector<8x32xf32>
    %531 = tpu.matmul %530, %22, %cst_356 {dimension_numbers = #tpu.dot_dimension_numbers<[1], [0], [0], [1], [0, 0, 1, 1], [], []>} : vector<8x16xf32>, vector<16x32xf32>, vector<8x32xf32> -> vector<8x32xf32>
    %532 = arith.addf %529, %531 : vector<8x32xf32>
    %533 = vector.extract_strided_slice %522 {offsets = [24, 0], sizes = [8, 16], strides = [1, 1]} : vector<32x16xf32> to vector<8x16xf32>
    %cst_357 = arith.constant dense<0.000000e+00> : vector<8x32xf32>
    %534 = tpu.matmul %533, %29, %cst_357 {dimension_numbers = #tpu.dot_dimension_numbers<[1], [0], [0], [1], [0, 0, 1, 1], [], []>} : vector<8x16xf32>, vector<16x32xf32>, vector<8x32xf32> -> vector<8x32xf32>
    %535 = arith.addf %532, %534 : vector<8x32xf32>
    %cst_358 = arith.constant 0.000000e+00 : f32
    %536 = vector.broadcast %cst_358 : f32 to vector<8x32xf32>
    %537 = arith.cmpf oge, %535, %536 : vector<8x32xf32>
    %cst_359 = arith.constant 2.000000e-01 : f32
    %538 = vector.broadcast %cst_359 : f32 to vector<8x32xf32>
    %539 = arith.mulf %538, %535 : vector<8x32xf32>
    %540 = arith.select %537, %535, %539 : vector<8x32xi1>, vector<8x32xf32>
    %c0_360 = arith.constant 0 : index
    %c0_361 = arith.constant 0 : index
    %c1_362 = arith.constant 1 : index
    %c0_363 = arith.constant 0 : index
    %541 = vector.load %arg3[%c0_360, %c0_361, %c1_362, %c0_363] : memref<1x8x32x32xf32, #tpu.memory_space<vmem>>, vector<1x8x1x32xf32>
    %542 = vector.shape_cast %541 : vector<1x8x1x32xf32> to vector<8x32xf32>
    %543 = vector.shape_cast %540 : vector<8x32xf32> to vector<1x8x1x32xf32>
    tpu.vector_store %arg3[%c0_360, %c0_361, %c1_362, %c0_363], %543 {strides = array<i32>} : memref<1x8x32x32xf32, #tpu.memory_space<vmem>>, vector<1x8x1x32xf32>,
    %cst_364 = arith.constant 0.000000e+00 : f32
    %544 = vector.broadcast %cst_364 : f32 to vector<32x16xf32>
    %c0_365 = arith.constant 0 : index
    %c0_366 = arith.constant 0 : index
    %c1_367 = arith.constant 1 : index
    %c0_368 = arith.constant 0 : index
    %545 = vector.load %arg1[%c0_365, %c0_366, %c1_367, %c0_368] : memref<1x4x16x16xf32, #tpu.memory_space<vmem>>, vector<1x4x1x16xf32>
    %546 = vector.shape_cast %545 : vector<1x4x1x16xf32> to vector<4x16xf32>
    %cst_369 = arith.constant dense<0.000000e+00> : vector<32x16xf32>
    %547 = tpu.matmul %35, %546, %cst_369 {dimension_numbers = #tpu.dot_dimension_numbers<[1], [0], [0], [1], [0, 0, 1, 1], [], []>} : vector<32x4xf32>, vector<4x16xf32>, vector<32x16xf32> -> vector<32x16xf32>
    %548 = arith.addf %544, %547 : vector<32x16xf32>
    %c0_370 = arith.constant 0 : index
    %c0_371 = arith.constant 0 : index
    %c2_372 = arith.constant 2 : index
    %c0_373 = arith.constant 0 : index
    %549 = vector.load %arg1[%c0_370, %c0_371, %c2_372, %c0_373] : memref<1x4x16x16xf32, #tpu.memory_space<vmem>>, vector<1x4x1x16xf32>
    %550 = vector.shape_cast %549 : vector<1x4x1x16xf32> to vector<4x16xf32>
    %cst_374 = arith.constant dense<0.000000e+00> : vector<32x16xf32>
    %551 = tpu.matmul %37, %550, %cst_374 {dimension_numbers = #tpu.dot_dimension_numbers<[1], [0], [0], [1], [0, 0, 1, 1], [], []>} : vector<32x4xf32>, vector<4x16xf32>, vector<32x16xf32> -> vector<32x16xf32>
    %552 = arith.addf %548, %551 : vector<32x16xf32>
    %cst_375 = arith.constant 0.000000e+00 : f32
    %553 = vector.broadcast %cst_375 : f32 to vector<8x32xf32>
    %554 = vector.extract_strided_slice %552 {offsets = [0, 0], sizes = [8, 16], strides = [1, 1]} : vector<32x16xf32> to vector<8x16xf32>
    %cst_376 = arith.constant dense<0.000000e+00> : vector<8x32xf32>
    %555 = tpu.matmul %554, %8, %cst_376 {dimension_numbers = #tpu.dot_dimension_numbers<[1], [0], [0], [1], [0, 0, 1, 1], [], []>} : vector<8x16xf32>, vector<16x32xf32>, vector<8x32xf32> -> vector<8x32xf32>
    %556 = arith.addf %553, %555 : vector<8x32xf32>
    %557 = vector.extract_strided_slice %552 {offsets = [8, 0], sizes = [8, 16], strides = [1, 1]} : vector<32x16xf32> to vector<8x16xf32>
    %cst_377 = arith.constant dense<0.000000e+00> : vector<8x32xf32>
    %558 = tpu.matmul %557, %15, %cst_377 {dimension_numbers = #tpu.dot_dimension_numbers<[1], [0], [0], [1], [0, 0, 1, 1], [], []>} : vector<8x16xf32>, vector<16x32xf32>, vector<8x32xf32> -> vector<8x32xf32>
    %559 = arith.addf %556, %558 : vector<8x32xf32>
    %560 = vector.extract_strided_slice %552 {offsets = [16, 0], sizes = [8, 16], strides = [1, 1]} : vector<32x16xf32> to vector<8x16xf32>
    %cst_378 = arith.constant dense<0.000000e+00> : vector<8x32xf32>
    %561 = tpu.matmul %560, %22, %cst_378 {dimension_numbers = #tpu.dot_dimension_numbers<[1], [0], [0], [1], [0, 0, 1, 1], [], []>} : vector<8x16xf32>, vector<16x32xf32>, vector<8x32xf32> -> vector<8x32xf32>
    %562 = arith.addf %559, %561 : vector<8x32xf32>
    %563 = vector.extract_strided_slice %552 {offsets = [24, 0], sizes = [8, 16], strides = [1, 1]} : vector<32x16xf32> to vector<8x16xf32>
    %cst_379 = arith.constant dense<0.000000e+00> : vector<8x32xf32>
    %564 = tpu.matmul %563, %29, %cst_379 {dimension_numbers = #tpu.dot_dimension_numbers<[1], [0], [0], [1], [0, 0, 1, 1], [], []>} : vector<8x16xf32>, vector<16x32xf32>, vector<8x32xf32> -> vector<8x32xf32>
    %565 = arith.addf %562, %564 : vector<8x32xf32>
    %cst_380 = arith.constant 0.000000e+00 : f32
    %566 = vector.broadcast %cst_380 : f32 to vector<8x32xf32>
    %567 = arith.cmpf oge, %565, %566 : vector<8x32xf32>
    %cst_381 = arith.constant 2.000000e-01 : f32
    %568 = vector.broadcast %cst_381 : f32 to vector<8x32xf32>
    %569 = arith.mulf %568, %565 : vector<8x32xf32>
    %570 = arith.select %567, %565, %569 : vector<8x32xi1>, vector<8x32xf32>
    %c0_382 = arith.constant 0 : index
    %c0_383 = arith.constant 0 : index
    %c3_384 = arith.constant 3 : index
    %c0_385 = arith.constant 0 : index
    %571 = vector.load %arg3[%c0_382, %c0_383, %c3_384, %c0_385] : memref<1x8x32x32xf32, #tpu.memory_space<vmem>>, vector<1x8x1x32xf32>
    %572 = vector.shape_cast %571 : vector<1x8x1x32xf32> to vector<8x32xf32>
    %573 = vector.shape_cast %570 : vector<8x32xf32> to vector<1x8x1x32xf32>
    tpu.vector_store %arg3[%c0_382, %c0_383, %c3_384, %c0_385], %573 {strides = array<i32>} : memref<1x8x32x32xf32, #tpu.memory_space<vmem>>, vector<1x8x1x32xf32>,
    %cst_386 = arith.constant 0.000000e+00 : f32
    %574 = vector.broadcast %cst_386 : f32 to vector<32x16xf32>
    %c0_387 = arith.constant 0 : index
    %c0_388 = arith.constant 0 : index
    %c2_389 = arith.constant 2 : index
    %c0_390 = arith.constant 0 : index
    %575 = vector.load %arg1[%c0_387, %c0_388, %c2_389, %c0_390] : memref<1x4x16x16xf32, #tpu.memory_space<vmem>>, vector<1x4x1x16xf32>
    %576 = vector.shape_cast %575 : vector<1x4x1x16xf32> to vector<4x16xf32>
    %cst_391 = arith.constant dense<0.000000e+00> : vector<32x16xf32>
    %577 = tpu.matmul %35, %576, %cst_391 {dimension_numbers = #tpu.dot_dimension_numbers<[1], [0], [0], [1], [0, 0, 1, 1], [], []>} : vector<32x4xf32>, vector<4x16xf32>, vector<32x16xf32> -> vector<32x16xf32>
    %578 = arith.addf %574, %577 : vector<32x16xf32>
    %c0_392 = arith.constant 0 : index
    %c0_393 = arith.constant 0 : index
    %c3_394 = arith.constant 3 : index
    %c0_395 = arith.constant 0 : index
    %579 = vector.load %arg1[%c0_392, %c0_393, %c3_394, %c0_395] : memref<1x4x16x16xf32, #tpu.memory_space<vmem>>, vector<1x4x1x16xf32>
    %580 = vector.shape_cast %579 : vector<1x4x1x16xf32> to vector<4x16xf32>
    %cst_396 = arith.constant dense<0.000000e+00> : vector<32x16xf32>
    %581 = tpu.matmul %37, %580, %cst_396 {dimension_numbers = #tpu.dot_dimension_numbers<[1], [0], [0], [1], [0, 0, 1, 1], [], []>} : vector<32x4xf32>, vector<4x16xf32>, vector<32x16xf32> -> vector<32x16xf32>
    %582 = arith.addf %578, %581 : vector<32x16xf32>
    %cst_397 = arith.constant 0.000000e+00 : f32
    %583 = vector.broadcast %cst_397 : f32 to vector<8x32xf32>
    %584 = vector.extract_strided_slice %582 {offsets = [0, 0], sizes = [8, 16], strides = [1, 1]} : vector<32x16xf32> to vector<8x16xf32>
    %cst_398 = arith.constant dense<0.000000e+00> : vector<8x32xf32>
    %585 = tpu.matmul %584, %8, %cst_398 {dimension_numbers = #tpu.dot_dimension_numbers<[1], [0], [0], [1], [0, 0, 1, 1], [], []>} : vector<8x16xf32>, vector<16x32xf32>, vector<8x32xf32> -> vector<8x32xf32>
    %586 = arith.addf %583, %585 : vector<8x32xf32>
    %587 = vector.extract_strided_slice %582 {offsets = [8, 0], sizes = [8, 16], strides = [1, 1]} : vector<32x16xf32> to vector<8x16xf32>
    %cst_399 = arith.constant dense<0.000000e+00> : vector<8x32xf32>
    %588 = tpu.matmul %587, %15, %cst_399 {dimension_numbers = #tpu.dot_dimension_numbers<[1], [0], [0], [1], [0, 0, 1, 1], [], []>} : vector<8x16xf32>, vector<16x32xf32>, vector<8x32xf32> -> vector<8x32xf32>
    %589 = arith.addf %586, %588 : vector<8x32xf32>
    %590 = vector.extract_strided_slice %582 {offsets = [16, 0], sizes = [8, 16], strides = [1, 1]} : vector<32x16xf32> to vector<8x16xf32>
    %cst_400 = arith.constant dense<0.000000e+00> : vector<8x32xf32>
    %591 = tpu.matmul %590, %22, %cst_400 {dimension_numbers = #tpu.dot_dimension_numbers<[1], [0], [0], [1], [0, 0, 1, 1], [], []>} : vector<8x16xf32>, vector<16x32xf32>, vector<8x32xf32> -> vector<8x32xf32>
    %592 = arith.addf %589, %591 : vector<8x32xf32>
    %593 = vector.extract_strided_slice %582 {offsets = [24, 0], sizes = [8, 16], strides = [1, 1]} : vector<32x16xf32> to vector<8x16xf32>
    %cst_401 = arith.constant dense<0.000000e+00> : vector<8x32xf32>
    %594 = tpu.matmul %593, %29, %cst_401 {dimension_numbers = #tpu.dot_dimension_numbers<[1], [0], [0], [1], [0, 0, 1, 1], [], []>} : vector<8x16xf32>, vector<16x32xf32>, vector<8x32xf32> -> vector<8x32xf32>
    %595 = arith.addf %592, %594 : vector<8x32xf32>
    %cst_402 = arith.constant 0.000000e+00 : f32
    %596 = vector.broadcast %cst_402 : f32 to vector<8x32xf32>
    %597 = arith.cmpf oge, %595, %596 : vector<8x32xf32>
    %cst_403 = arith.constant 2.000000e-01 : f32
    %598 = vector.broadcast %cst_403 : f32 to vector<8x32xf32>
    %599 = arith.mulf %598, %595 : vector<8x32xf32>
    %600 = arith.select %597, %595, %599 : vector<8x32xi1>, vector<8x32xf32>
    %c0_404 = arith.constant 0 : index
    %c0_405 = arith.constant 0 : index
    %c5_406 = arith.constant 5 : index
    %c0_407 = arith.constant 0 : index
    %601 = vector.load %arg3[%c0_404, %c0_405, %c5_406, %c0_407] : memref<1x8x32x32xf32, #tpu.memory_space<vmem>>, vector<1x8x1x32xf32>
    %602 = vector.shape_cast %601 : vector<1x8x1x32xf32> to vector<8x32xf32>
    %603 = vector.shape_cast %600 : vector<8x32xf32> to vector<1x8x1x32xf32>
    tpu.vector_store %arg3[%c0_404, %c0_405, %c5_406, %c0_407], %603 {strides = array<i32>} : memref<1x8x32x32xf32, #tpu.memory_space<vmem>>, vector<1x8x1x32xf32>,
    %cst_408 = arith.constant 0.000000e+00 : f32
    %604 = vector.broadcast %cst_408 : f32 to vector<32x16xf32>
    %c0_409 = arith.constant 0 : index
    %c0_410 = arith.constant 0 : index
    %c3_411 = arith.constant 3 : index
    %c0_412 = arith.constant 0 : index
    %605 = vector.load %arg1[%c0_409, %c0_410, %c3_411, %c0_412] : memref<1x4x16x16xf32, #tpu.memory_space<vmem>>, vector<1x4x1x16xf32>
    %606 = vector.shape_cast %605 : vector<1x4x1x16xf32> to vector<4x16xf32>
    %cst_413 = arith.constant dense<0.000000e+00> : vector<32x16xf32>
    %607 = tpu.matmul %35, %606, %cst_413 {dimension_numbers = #tpu.dot_dimension_numbers<[1], [0], [0], [1], [0, 0, 1, 1], [], []>} : vector<32x4xf32>, vector<4x16xf32>, vector<32x16xf32> -> vector<32x16xf32>
    %608 = arith.addf %604, %607 : vector<32x16xf32>
    %c0_414 = arith.constant 0 : index
    %c0_415 = arith.constant 0 : index
    %c4_416 = arith.constant 4 : index
    %c0_417 = arith.constant 0 : index
    %609 = vector.load %arg1[%c0_414, %c0_415, %c4_416, %c0_417] : memref<1x4x16x16xf32, #tpu.memory_space<vmem>>, vector<1x4x1x16xf32>
    %610 = vector.shape_cast %609 : vector<1x4x1x16xf32> to vector<4x16xf32>
    %cst_418 = arith.constant dense<0.000000e+00> : vector<32x16xf32>
    %611 = tpu.matmul %37, %610, %cst_418 {dimension_numbers = #tpu.dot_dimension_numbers<[1], [0], [0], [1], [0, 0, 1, 1], [], []>} : vector<32x4xf32>, vector<4x16xf32>, vector<32x16xf32> -> vector<32x16xf32>
    %612 = arith.addf %608, %611 : vector<32x16xf32>
    %cst_419 = arith.constant 0.000000e+00 : f32
    %613 = vector.broadcast %cst_419 : f32 to vector<8x32xf32>
    %614 = vector.extract_strided_slice %612 {offsets = [0, 0], sizes = [8, 16], strides = [1, 1]} : vector<32x16xf32> to vector<8x16xf32>
    %cst_420 = arith.constant dense<0.000000e+00> : vector<8x32xf32>
    %615 = tpu.matmul %614, %8, %cst_420 {dimension_numbers = #tpu.dot_dimension_numbers<[1], [0], [0], [1], [0, 0, 1, 1], [], []>} : vector<8x16xf32>, vector<16x32xf32>, vector<8x32xf32> -> vector<8x32xf32>
    %616 = arith.addf %613, %615 : vector<8x32xf32>
    %617 = vector.extract_strided_slice %612 {offsets = [8, 0], sizes = [8, 16], strides = [1, 1]} : vector<32x16xf32> to vector<8x16xf32>
    %cst_421 = arith.constant dense<0.000000e+00> : vector<8x32xf32>
    %618 = tpu.matmul %617, %15, %cst_421 {dimension_numbers = #tpu.dot_dimension_numbers<[1], [0], [0], [1], [0, 0, 1, 1], [], []>} : vector<8x16xf32>, vector<16x32xf32>, vector<8x32xf32> -> vector<8x32xf32>
    %619 = arith.addf %616, %618 : vector<8x32xf32>
    %620 = vector.extract_strided_slice %612 {offsets = [16, 0], sizes = [8, 16], strides = [1, 1]} : vector<32x16xf32> to vector<8x16xf32>
    %cst_422 = arith.constant dense<0.000000e+00> : vector<8x32xf32>
    %621 = tpu.matmul %620, %22, %cst_422 {dimension_numbers = #tpu.dot_dimension_numbers<[1], [0], [0], [1], [0, 0, 1, 1], [], []>} : vector<8x16xf32>, vector<16x32xf32>, vector<8x32xf32> -> vector<8x32xf32>
    %622 = arith.addf %619, %621 : vector<8x32xf32>
    %623 = vector.extract_strided_slice %612 {offsets = [24, 0], sizes = [8, 16], strides = [1, 1]} : vector<32x16xf32> to vector<8x16xf32>
    %cst_423 = arith.constant dense<0.000000e+00> : vector<8x32xf32>
    %624 = tpu.matmul %623, %29, %cst_423 {dimension_numbers = #tpu.dot_dimension_numbers<[1], [0], [0], [1], [0, 0, 1, 1], [], []>} : vector<8x16xf32>, vector<16x32xf32>, vector<8x32xf32> -> vector<8x32xf32>
    %625 = arith.addf %622, %624 : vector<8x32xf32>
    %cst_424 = arith.constant 0.000000e+00 : f32
    %626 = vector.broadcast %cst_424 : f32 to vector<8x32xf32>
    %627 = arith.cmpf oge, %625, %626 : vector<8x32xf32>
    %cst_425 = arith.constant 2.000000e-01 : f32
    %628 = vector.broadcast %cst_425 : f32 to vector<8x32xf32>
    %629 = arith.mulf %628, %625 : vector<8x32xf32>
    %630 = arith.select %627, %625, %629 : vector<8x32xi1>, vector<8x32xf32>
    %c0_426 = arith.constant 0 : index
    %c0_427 = arith.constant 0 : index
    %c7_428 = arith.constant 7 : index
    %c0_429 = arith.constant 0 : index
    %631 = vector.load %arg3[%c0_426, %c0_427, %c7_428, %c0_429] : memref<1x8x32x32xf32, #tpu.memory_space<vmem>>, vector<1x8x1x32xf32>
    %632 = vector.shape_cast %631 : vector<1x8x1x32xf32> to vector<8x32xf32>
    %633 = vector.shape_cast %630 : vector<8x32xf32> to vector<1x8x1x32xf32>
    tpu.vector_store %arg3[%c0_426, %c0_427, %c7_428, %c0_429], %633 {strides = array<i32>} : memref<1x8x32x32xf32, #tpu.memory_space<vmem>>, vector<1x8x1x32xf32>,
    %cst_430 = arith.constant 0.000000e+00 : f32
    %634 = vector.broadcast %cst_430 : f32 to vector<32x16xf32>
    %c0_431 = arith.constant 0 : index
    %c0_432 = arith.constant 0 : index
    %c4_433 = arith.constant 4 : index
    %c0_434 = arith.constant 0 : index
    %635 = vector.load %arg1[%c0_431, %c0_432, %c4_433, %c0_434] : memref<1x4x16x16xf32, #tpu.memory_space<vmem>>, vector<1x4x1x16xf32>
    %636 = vector.shape_cast %635 : vector<1x4x1x16xf32> to vector<4x16xf32>
    %cst_435 = arith.constant dense<0.000000e+00> : vector<32x16xf32>
    %637 = tpu.matmul %35, %636, %cst_435 {dimension_numbers = #tpu.dot_dimension_numbers<[1], [0], [0], [1], [0, 0, 1, 1], [], []>} : vector<32x4xf32>, vector<4x16xf32>, vector<32x16xf32> -> vector<32x16xf32>
    %638 = arith.addf %634, %637 : vector<32x16xf32>
    %c0_436 = arith.constant 0 : index
    %c0_437 = arith.constant 0 : index
    %c5_438 = arith.constant 5 : index
    %c0_439 = arith.constant 0 : index
    %639 = vector.load %arg1[%c0_436, %c0_437, %c5_438, %c0_439] : memref<1x4x16x16xf32, #tpu.memory_space<vmem>>, vector<1x4x1x16xf32>
    %640 = vector.shape_cast %639 : vector<1x4x1x16xf32> to vector<4x16xf32>
    %cst_440 = arith.constant dense<0.000000e+00> : vector<32x16xf32>
    %641 = tpu.matmul %37, %640, %cst_440 {dimension_numbers = #tpu.dot_dimension_numbers<[1], [0], [0], [1], [0, 0, 1, 1], [], []>} : vector<32x4xf32>, vector<4x16xf32>, vector<32x16xf32> -> vector<32x16xf32>
    %642 = arith.addf %638, %641 : vector<32x16xf32>
    %cst_441 = arith.constant 0.000000e+00 : f32
    %643 = vector.broadcast %cst_441 : f32 to vector<8x32xf32>
    %644 = vector.extract_strided_slice %642 {offsets = [0, 0], sizes = [8, 16], strides = [1, 1]} : vector<32x16xf32> to vector<8x16xf32>
    %cst_442 = arith.constant dense<0.000000e+00> : vector<8x32xf32>
    %645 = tpu.matmul %644, %8, %cst_442 {dimension_numbers = #tpu.dot_dimension_numbers<[1], [0], [0], [1], [0, 0, 1, 1], [], []>} : vector<8x16xf32>, vector<16x32xf32>, vector<8x32xf32> -> vector<8x32xf32>
    %646 = arith.addf %643, %645 : vector<8x32xf32>
    %647 = vector.extract_strided_slice %642 {offsets = [8, 0], sizes = [8, 16], strides = [1, 1]} : vector<32x16xf32> to vector<8x16xf32>
    %cst_443 = arith.constant dense<0.000000e+00> : vector<8x32xf32>
    %648 = tpu.matmul %647, %15, %cst_443 {dimension_numbers = #tpu.dot_dimension_numbers<[1], [0], [0], [1], [0, 0, 1, 1], [], []>} : vector<8x16xf32>, vector<16x32xf32>, vector<8x32xf32> -> vector<8x32xf32>
    %649 = arith.addf %646, %648 : vector<8x32xf32>
    %650 = vector.extract_strided_slice %642 {offsets = [16, 0], sizes = [8, 16], strides = [1, 1]} : vector<32x16xf32> to vector<8x16xf32>
    %cst_444 = arith.constant dense<0.000000e+00> : vector<8x32xf32>
    %651 = tpu.matmul %650, %22, %cst_444 {dimension_numbers = #tpu.dot_dimension_numbers<[1], [0], [0], [1], [0, 0, 1, 1], [], []>} : vector<8x16xf32>, vector<16x32xf32>, vector<8x32xf32> -> vector<8x32xf32>
    %652 = arith.addf %649, %651 : vector<8x32xf32>
    %653 = vector.extract_strided_slice %642 {offsets = [24, 0], sizes = [8, 16], strides = [1, 1]} : vector<32x16xf32> to vector<8x16xf32>
    %cst_445 = arith.constant dense<0.000000e+00> : vector<8x32xf32>
    %654 = tpu.matmul %653, %29, %cst_445 {dimension_numbers = #tpu.dot_dimension_numbers<[1], [0], [0], [1], [0, 0, 1, 1], [], []>} : vector<8x16xf32>, vector<16x32xf32>, vector<8x32xf32> -> vector<8x32xf32>
    %655 = arith.addf %652, %654 : vector<8x32xf32>
    %cst_446 = arith.constant 0.000000e+00 : f32
    %656 = vector.broadcast %cst_446 : f32 to vector<8x32xf32>
    %657 = arith.cmpf oge, %655, %656 : vector<8x32xf32>
    %cst_447 = arith.constant 2.000000e-01 : f32
    %658 = vector.broadcast %cst_447 : f32 to vector<8x32xf32>
    %659 = arith.mulf %658, %655 : vector<8x32xf32>
    %660 = arith.select %657, %655, %659 : vector<8x32xi1>, vector<8x32xf32>
    %c0_448 = arith.constant 0 : index
    %c0_449 = arith.constant 0 : index
    %c9_450 = arith.constant 9 : index
    %c0_451 = arith.constant 0 : index
    %661 = vector.load %arg3[%c0_448, %c0_449, %c9_450, %c0_451] : memref<1x8x32x32xf32, #tpu.memory_space<vmem>>, vector<1x8x1x32xf32>
    %662 = vector.shape_cast %661 : vector<1x8x1x32xf32> to vector<8x32xf32>
    %663 = vector.shape_cast %660 : vector<8x32xf32> to vector<1x8x1x32xf32>
    tpu.vector_store %arg3[%c0_448, %c0_449, %c9_450, %c0_451], %663 {strides = array<i32>} : memref<1x8x32x32xf32, #tpu.memory_space<vmem>>, vector<1x8x1x32xf32>,
    %cst_452 = arith.constant 0.000000e+00 : f32
    %664 = vector.broadcast %cst_452 : f32 to vector<32x16xf32>
    %c0_453 = arith.constant 0 : index
    %c0_454 = arith.constant 0 : index
    %c5_455 = arith.constant 5 : index
    %c0_456 = arith.constant 0 : index
    %665 = vector.load %arg1[%c0_453, %c0_454, %c5_455, %c0_456] : memref<1x4x16x16xf32, #tpu.memory_space<vmem>>, vector<1x4x1x16xf32>
    %666 = vector.shape_cast %665 : vector<1x4x1x16xf32> to vector<4x16xf32>
    %cst_457 = arith.constant dense<0.000000e+00> : vector<32x16xf32>
    %667 = tpu.matmul %35, %666, %cst_457 {dimension_numbers = #tpu.dot_dimension_numbers<[1], [0], [0], [1], [0, 0, 1, 1], [], []>} : vector<32x4xf32>, vector<4x16xf32>, vector<32x16xf32> -> vector<32x16xf32>
    %668 = arith.addf %664, %667 : vector<32x16xf32>
    %c0_458 = arith.constant 0 : index
    %c0_459 = arith.constant 0 : index
    %c6_460 = arith.constant 6 : index
    %c0_461 = arith.constant 0 : index
    %669 = vector.load %arg1[%c0_458, %c0_459, %c6_460, %c0_461] : memref<1x4x16x16xf32, #tpu.memory_space<vmem>>, vector<1x4x1x16xf32>
    %670 = vector.shape_cast %669 : vector<1x4x1x16xf32> to vector<4x16xf32>
    %cst_462 = arith.constant dense<0.000000e+00> : vector<32x16xf32>
    %671 = tpu.matmul %37, %670, %cst_462 {dimension_numbers = #tpu.dot_dimension_numbers<[1], [0], [0], [1], [0, 0, 1, 1], [], []>} : vector<32x4xf32>, vector<4x16xf32>, vector<32x16xf32> -> vector<32x16xf32>
    %672 = arith.addf %668, %671 : vector<32x16xf32>
    %cst_463 = arith.constant 0.000000e+00 : f32
    %673 = vector.broadcast %cst_463 : f32 to vector<8x32xf32>
    %674 = vector.extract_strided_slice %672 {offsets = [0, 0], sizes = [8, 16], strides = [1, 1]} : vector<32x16xf32> to vector<8x16xf32>
    %cst_464 = arith.constant dense<0.000000e+00> : vector<8x32xf32>
    %675 = tpu.matmul %674, %8, %cst_464 {dimension_numbers = #tpu.dot_dimension_numbers<[1], [0], [0], [1], [0, 0, 1, 1], [], []>} : vector<8x16xf32>, vector<16x32xf32>, vector<8x32xf32> -> vector<8x32xf32>
    %676 = arith.addf %673, %675 : vector<8x32xf32>
    %677 = vector.extract_strided_slice %672 {offsets = [8, 0], sizes = [8, 16], strides = [1, 1]} : vector<32x16xf32> to vector<8x16xf32>
    %cst_465 = arith.constant dense<0.000000e+00> : vector<8x32xf32>
    %678 = tpu.matmul %677, %15, %cst_465 {dimension_numbers = #tpu.dot_dimension_numbers<[1], [0], [0], [1], [0, 0, 1, 1], [], []>} : vector<8x16xf32>, vector<16x32xf32>, vector<8x32xf32> -> vector<8x32xf32>
    %679 = arith.addf %676, %678 : vector<8x32xf32>
    %680 = vector.extract_strided_slice %672 {offsets = [16, 0], sizes = [8, 16], strides = [1, 1]} : vector<32x16xf32> to vector<8x16xf32>
    %cst_466 = arith.constant dense<0.000000e+00> : vector<8x32xf32>
    %681 = tpu.matmul %680, %22, %cst_466 {dimension_numbers = #tpu.dot_dimension_numbers<[1], [0], [0], [1], [0, 0, 1, 1], [], []>} : vector<8x16xf32>, vector<16x32xf32>, vector<8x32xf32> -> vector<8x32xf32>
    %682 = arith.addf %679, %681 : vector<8x32xf32>
    %683 = vector.extract_strided_slice %672 {offsets = [24, 0], sizes = [8, 16], strides = [1, 1]} : vector<32x16xf32> to vector<8x16xf32>
    %cst_467 = arith.constant dense<0.000000e+00> : vector<8x32xf32>
    %684 = tpu.matmul %683, %29, %cst_467 {dimension_numbers = #tpu.dot_dimension_numbers<[1], [0], [0], [1], [0, 0, 1, 1], [], []>} : vector<8x16xf32>, vector<16x32xf32>, vector<8x32xf32> -> vector<8x32xf32>
    %685 = arith.addf %682, %684 : vector<8x32xf32>
    %cst_468 = arith.constant 0.000000e+00 : f32
    %686 = vector.broadcast %cst_468 : f32 to vector<8x32xf32>
    %687 = arith.cmpf oge, %685, %686 : vector<8x32xf32>
    %cst_469 = arith.constant 2.000000e-01 : f32
    %688 = vector.broadcast %cst_469 : f32 to vector<8x32xf32>
    %689 = arith.mulf %688, %685 : vector<8x32xf32>
    %690 = arith.select %687, %685, %689 : vector<8x32xi1>, vector<8x32xf32>
    %c0_470 = arith.constant 0 : index
    %c0_471 = arith.constant 0 : index
    %c11_472 = arith.constant 11 : index
    %c0_473 = arith.constant 0 : index
    %691 = vector.load %arg3[%c0_470, %c0_471, %c11_472, %c0_473] : memref<1x8x32x32xf32, #tpu.memory_space<vmem>>, vector<1x8x1x32xf32>
    %692 = vector.shape_cast %691 : vector<1x8x1x32xf32> to vector<8x32xf32>
    %693 = vector.shape_cast %690 : vector<8x32xf32> to vector<1x8x1x32xf32>
    tpu.vector_store %arg3[%c0_470, %c0_471, %c11_472, %c0_473], %693 {strides = array<i32>} : memref<1x8x32x32xf32, #tpu.memory_space<vmem>>, vector<1x8x1x32xf32>,
    %cst_474 = arith.constant 0.000000e+00 : f32
    %694 = vector.broadcast %cst_474 : f32 to vector<32x16xf32>
    %c0_475 = arith.constant 0 : index
    %c0_476 = arith.constant 0 : index
    %c6_477 = arith.constant 6 : index
    %c0_478 = arith.constant 0 : index
    %695 = vector.load %arg1[%c0_475, %c0_476, %c6_477, %c0_478] : memref<1x4x16x16xf32, #tpu.memory_space<vmem>>, vector<1x4x1x16xf32>
    %696 = vector.shape_cast %695 : vector<1x4x1x16xf32> to vector<4x16xf32>
    %cst_479 = arith.constant dense<0.000000e+00> : vector<32x16xf32>
    %697 = tpu.matmul %35, %696, %cst_479 {dimension_numbers = #tpu.dot_dimension_numbers<[1], [0], [0], [1], [0, 0, 1, 1], [], []>} : vector<32x4xf32>, vector<4x16xf32>, vector<32x16xf32> -> vector<32x16xf32>
    %698 = arith.addf %694, %697 : vector<32x16xf32>
    %c0_480 = arith.constant 0 : index
    %c0_481 = arith.constant 0 : index
    %c7_482 = arith.constant 7 : index
    %c0_483 = arith.constant 0 : index
    %699 = vector.load %arg1[%c0_480, %c0_481, %c7_482, %c0_483] : memref<1x4x16x16xf32, #tpu.memory_space<vmem>>, vector<1x4x1x16xf32>
    %700 = vector.shape_cast %699 : vector<1x4x1x16xf32> to vector<4x16xf32>
    %cst_484 = arith.constant dense<0.000000e+00> : vector<32x16xf32>
    %701 = tpu.matmul %37, %700, %cst_484 {dimension_numbers = #tpu.dot_dimension_numbers<[1], [0], [0], [1], [0, 0, 1, 1], [], []>} : vector<32x4xf32>, vector<4x16xf32>, vector<32x16xf32> -> vector<32x16xf32>
    %702 = arith.addf %698, %701 : vector<32x16xf32>
    %cst_485 = arith.constant 0.000000e+00 : f32
    %703 = vector.broadcast %cst_485 : f32 to vector<8x32xf32>
    %704 = vector.extract_strided_slice %702 {offsets = [0, 0], sizes = [8, 16], strides = [1, 1]} : vector<32x16xf32> to vector<8x16xf32>
    %cst_486 = arith.constant dense<0.000000e+00> : vector<8x32xf32>
    %705 = tpu.matmul %704, %8, %cst_486 {dimension_numbers = #tpu.dot_dimension_numbers<[1], [0], [0], [1], [0, 0, 1, 1], [], []>} : vector<8x16xf32>, vector<16x32xf32>, vector<8x32xf32> -> vector<8x32xf32>
    %706 = arith.addf %703, %705 : vector<8x32xf32>
    %707 = vector.extract_strided_slice %702 {offsets = [8, 0], sizes = [8, 16], strides = [1, 1]} : vector<32x16xf32> to vector<8x16xf32>
    %cst_487 = arith.constant dense<0.000000e+00> : vector<8x32xf32>
    %708 = tpu.matmul %707, %15, %cst_487 {dimension_numbers = #tpu.dot_dimension_numbers<[1], [0], [0], [1], [0, 0, 1, 1], [], []>} : vector<8x16xf32>, vector<16x32xf32>, vector<8x32xf32> -> vector<8x32xf32>
    %709 = arith.addf %706, %708 : vector<8x32xf32>
    %710 = vector.extract_strided_slice %702 {offsets = [16, 0], sizes = [8, 16], strides = [1, 1]} : vector<32x16xf32> to vector<8x16xf32>
    %cst_488 = arith.constant dense<0.000000e+00> : vector<8x32xf32>
    %711 = tpu.matmul %710, %22, %cst_488 {dimension_numbers = #tpu.dot_dimension_numbers<[1], [0], [0], [1], [0, 0, 1, 1], [], []>} : vector<8x16xf32>, vector<16x32xf32>, vector<8x32xf32> -> vector<8x32xf32>
    %712 = arith.addf %709, %711 : vector<8x32xf32>
    %713 = vector.extract_strided_slice %702 {offsets = [24, 0], sizes = [8, 16], strides = [1, 1]} : vector<32x16xf32> to vector<8x16xf32>
    %cst_489 = arith.constant dense<0.000000e+00> : vector<8x32xf32>
    %714 = tpu.matmul %713, %29, %cst_489 {dimension_numbers = #tpu.dot_dimension_numbers<[1], [0], [0], [1], [0, 0, 1, 1], [], []>} : vector<8x16xf32>, vector<16x32xf32>, vector<8x32xf32> -> vector<8x32xf32>
    %715 = arith.addf %712, %714 : vector<8x32xf32>
    %cst_490 = arith.constant 0.000000e+00 : f32
    %716 = vector.broadcast %cst_490 : f32 to vector<8x32xf32>
    %717 = arith.cmpf oge, %715, %716 : vector<8x32xf32>
    %cst_491 = arith.constant 2.000000e-01 : f32
    %718 = vector.broadcast %cst_491 : f32 to vector<8x32xf32>
    %719 = arith.mulf %718, %715 : vector<8x32xf32>
    %720 = arith.select %717, %715, %719 : vector<8x32xi1>, vector<8x32xf32>
    %c0_492 = arith.constant 0 : index
    %c0_493 = arith.constant 0 : index
    %c13_494 = arith.constant 13 : index
    %c0_495 = arith.constant 0 : index
    %721 = vector.load %arg3[%c0_492, %c0_493, %c13_494, %c0_495] : memref<1x8x32x32xf32, #tpu.memory_space<vmem>>, vector<1x8x1x32xf32>
    %722 = vector.shape_cast %721 : vector<1x8x1x32xf32> to vector<8x32xf32>
    %723 = vector.shape_cast %720 : vector<8x32xf32> to vector<1x8x1x32xf32>
    tpu.vector_store %arg3[%c0_492, %c0_493, %c13_494, %c0_495], %723 {strides = array<i32>} : memref<1x8x32x32xf32, #tpu.memory_space<vmem>>, vector<1x8x1x32xf32>,
    %cst_496 = arith.constant 0.000000e+00 : f32
    %724 = vector.broadcast %cst_496 : f32 to vector<32x16xf32>
    %c0_497 = arith.constant 0 : index
    %c0_498 = arith.constant 0 : index
    %c7_499 = arith.constant 7 : index
    %c0_500 = arith.constant 0 : index
    %725 = vector.load %arg1[%c0_497, %c0_498, %c7_499, %c0_500] : memref<1x4x16x16xf32, #tpu.memory_space<vmem>>, vector<1x4x1x16xf32>
    %726 = vector.shape_cast %725 : vector<1x4x1x16xf32> to vector<4x16xf32>
    %cst_501 = arith.constant dense<0.000000e+00> : vector<32x16xf32>
    %727 = tpu.matmul %35, %726, %cst_501 {dimension_numbers = #tpu.dot_dimension_numbers<[1], [0], [0], [1], [0, 0, 1, 1], [], []>} : vector<32x4xf32>, vector<4x16xf32>, vector<32x16xf32> -> vector<32x16xf32>
    %728 = arith.addf %724, %727 : vector<32x16xf32>
    %c0_502 = arith.constant 0 : index
    %c0_503 = arith.constant 0 : index
    %c8_504 = arith.constant 8 : index
    %c0_505 = arith.constant 0 : index
    %729 = vector.load %arg1[%c0_502, %c0_503, %c8_504, %c0_505] : memref<1x4x16x16xf32, #tpu.memory_space<vmem>>, vector<1x4x1x16xf32>
    %730 = vector.shape_cast %729 : vector<1x4x1x16xf32> to vector<4x16xf32>
    %cst_506 = arith.constant dense<0.000000e+00> : vector<32x16xf32>
    %731 = tpu.matmul %37, %730, %cst_506 {dimension_numbers = #tpu.dot_dimension_numbers<[1], [0], [0], [1], [0, 0, 1, 1], [], []>} : vector<32x4xf32>, vector<4x16xf32>, vector<32x16xf32> -> vector<32x16xf32>
    %732 = arith.addf %728, %731 : vector<32x16xf32>
    %cst_507 = arith.constant 0.000000e+00 : f32
    %733 = vector.broadcast %cst_507 : f32 to vector<8x32xf32>
    %734 = vector.extract_strided_slice %732 {offsets = [0, 0], sizes = [8, 16], strides = [1, 1]} : vector<32x16xf32> to vector<8x16xf32>
    %cst_508 = arith.constant dense<0.000000e+00> : vector<8x32xf32>
    %735 = tpu.matmul %734, %8, %cst_508 {dimension_numbers = #tpu.dot_dimension_numbers<[1], [0], [0], [1], [0, 0, 1, 1], [], []>} : vector<8x16xf32>, vector<16x32xf32>, vector<8x32xf32> -> vector<8x32xf32>
    %736 = arith.addf %733, %735 : vector<8x32xf32>
    %737 = vector.extract_strided_slice %732 {offsets = [8, 0], sizes = [8, 16], strides = [1, 1]} : vector<32x16xf32> to vector<8x16xf32>
    %cst_509 = arith.constant dense<0.000000e+00> : vector<8x32xf32>
    %738 = tpu.matmul %737, %15, %cst_509 {dimension_numbers = #tpu.dot_dimension_numbers<[1], [0], [0], [1], [0, 0, 1, 1], [], []>} : vector<8x16xf32>, vector<16x32xf32>, vector<8x32xf32> -> vector<8x32xf32>
    %739 = arith.addf %736, %738 : vector<8x32xf32>
    %740 = vector.extract_strided_slice %732 {offsets = [16, 0], sizes = [8, 16], strides = [1, 1]} : vector<32x16xf32> to vector<8x16xf32>
    %cst_510 = arith.constant dense<0.000000e+00> : vector<8x32xf32>
    %741 = tpu.matmul %740, %22, %cst_510 {dimension_numbers = #tpu.dot_dimension_numbers<[1], [0], [0], [1], [0, 0, 1, 1], [], []>} : vector<8x16xf32>, vector<16x32xf32>, vector<8x32xf32> -> vector<8x32xf32>
    %742 = arith.addf %739, %741 : vector<8x32xf32>
    %743 = vector.extract_strided_slice %732 {offsets = [24, 0], sizes = [8, 16], strides = [1, 1]} : vector<32x16xf32> to vector<8x16xf32>
    %cst_511 = arith.constant dense<0.000000e+00> : vector<8x32xf32>
    %744 = tpu.matmul %743, %29, %cst_511 {dimension_numbers = #tpu.dot_dimension_numbers<[1], [0], [0], [1], [0, 0, 1, 1], [], []>} : vector<8x16xf32>, vector<16x32xf32>, vector<8x32xf32> -> vector<8x32xf32>
    %745 = arith.addf %742, %744 : vector<8x32xf32>
    %cst_512 = arith.constant 0.000000e+00 : f32
    %746 = vector.broadcast %cst_512 : f32 to vector<8x32xf32>
    %747 = arith.cmpf oge, %745, %746 : vector<8x32xf32>
    %cst_513 = arith.constant 2.000000e-01 : f32
    %748 = vector.broadcast %cst_513 : f32 to vector<8x32xf32>
    %749 = arith.mulf %748, %745 : vector<8x32xf32>
    %750 = arith.select %747, %745, %749 : vector<8x32xi1>, vector<8x32xf32>
    %c0_514 = arith.constant 0 : index
    %c0_515 = arith.constant 0 : index
    %c15_516 = arith.constant 15 : index
    %c0_517 = arith.constant 0 : index
    %751 = vector.load %arg3[%c0_514, %c0_515, %c15_516, %c0_517] : memref<1x8x32x32xf32, #tpu.memory_space<vmem>>, vector<1x8x1x32xf32>
    %752 = vector.shape_cast %751 : vector<1x8x1x32xf32> to vector<8x32xf32>
    %753 = vector.shape_cast %750 : vector<8x32xf32> to vector<1x8x1x32xf32>
    tpu.vector_store %arg3[%c0_514, %c0_515, %c15_516, %c0_517], %753 {strides = array<i32>} : memref<1x8x32x32xf32, #tpu.memory_space<vmem>>, vector<1x8x1x32xf32>,
    %cst_518 = arith.constant 0.000000e+00 : f32
    %754 = vector.broadcast %cst_518 : f32 to vector<32x16xf32>
    %c0_519 = arith.constant 0 : index
    %c0_520 = arith.constant 0 : index
    %c8_521 = arith.constant 8 : index
    %c0_522 = arith.constant 0 : index
    %755 = vector.load %arg1[%c0_519, %c0_520, %c8_521, %c0_522] : memref<1x4x16x16xf32, #tpu.memory_space<vmem>>, vector<1x4x1x16xf32>
    %756 = vector.shape_cast %755 : vector<1x4x1x16xf32> to vector<4x16xf32>
    %cst_523 = arith.constant dense<0.000000e+00> : vector<32x16xf32>
    %757 = tpu.matmul %35, %756, %cst_523 {dimension_numbers = #tpu.dot_dimension_numbers<[1], [0], [0], [1], [0, 0, 1, 1], [], []>} : vector<32x4xf32>, vector<4x16xf32>, vector<32x16xf32> -> vector<32x16xf32>
    %758 = arith.addf %754, %757 : vector<32x16xf32>
    %c0_524 = arith.constant 0 : index
    %c0_525 = arith.constant 0 : index
    %c9_526 = arith.constant 9 : index
    %c0_527 = arith.constant 0 : index
    %759 = vector.load %arg1[%c0_524, %c0_525, %c9_526, %c0_527] : memref<1x4x16x16xf32, #tpu.memory_space<vmem>>, vector<1x4x1x16xf32>
    %760 = vector.shape_cast %759 : vector<1x4x1x16xf32> to vector<4x16xf32>
    %cst_528 = arith.constant dense<0.000000e+00> : vector<32x16xf32>
    %761 = tpu.matmul %37, %760, %cst_528 {dimension_numbers = #tpu.dot_dimension_numbers<[1], [0], [0], [1], [0, 0, 1, 1], [], []>} : vector<32x4xf32>, vector<4x16xf32>, vector<32x16xf32> -> vector<32x16xf32>
    %762 = arith.addf %758, %761 : vector<32x16xf32>
    %cst_529 = arith.constant 0.000000e+00 : f32
    %763 = vector.broadcast %cst_529 : f32 to vector<8x32xf32>
    %764 = vector.extract_strided_slice %762 {offsets = [0, 0], sizes = [8, 16], strides = [1, 1]} : vector<32x16xf32> to vector<8x16xf32>
    %cst_530 = arith.constant dense<0.000000e+00> : vector<8x32xf32>
    %765 = tpu.matmul %764, %8, %cst_530 {dimension_numbers = #tpu.dot_dimension_numbers<[1], [0], [0], [1], [0, 0, 1, 1], [], []>} : vector<8x16xf32>, vector<16x32xf32>, vector<8x32xf32> -> vector<8x32xf32>
    %766 = arith.addf %763, %765 : vector<8x32xf32>
    %767 = vector.extract_strided_slice %762 {offsets = [8, 0], sizes = [8, 16], strides = [1, 1]} : vector<32x16xf32> to vector<8x16xf32>
    %cst_531 = arith.constant dense<0.000000e+00> : vector<8x32xf32>
    %768 = tpu.matmul %767, %15, %cst_531 {dimension_numbers = #tpu.dot_dimension_numbers<[1], [0], [0], [1], [0, 0, 1, 1], [], []>} : vector<8x16xf32>, vector<16x32xf32>, vector<8x32xf32> -> vector<8x32xf32>
    %769 = arith.addf %766, %768 : vector<8x32xf32>
    %770 = vector.extract_strided_slice %762 {offsets = [16, 0], sizes = [8, 16], strides = [1, 1]} : vector<32x16xf32> to vector<8x16xf32>
    %cst_532 = arith.constant dense<0.000000e+00> : vector<8x32xf32>
    %771 = tpu.matmul %770, %22, %cst_532 {dimension_numbers = #tpu.dot_dimension_numbers<[1], [0], [0], [1], [0, 0, 1, 1], [], []>} : vector<8x16xf32>, vector<16x32xf32>, vector<8x32xf32> -> vector<8x32xf32>
    %772 = arith.addf %769, %771 : vector<8x32xf32>
    %773 = vector.extract_strided_slice %762 {offsets = [24, 0], sizes = [8, 16], strides = [1, 1]} : vector<32x16xf32> to vector<8x16xf32>
    %cst_533 = arith.constant dense<0.000000e+00> : vector<8x32xf32>
    %774 = tpu.matmul %773, %29, %cst_533 {dimension_numbers = #tpu.dot_dimension_numbers<[1], [0], [0], [1], [0, 0, 1, 1], [], []>} : vector<8x16xf32>, vector<16x32xf32>, vector<8x32xf32> -> vector<8x32xf32>
    %775 = arith.addf %772, %774 : vector<8x32xf32>
    %cst_534 = arith.constant 0.000000e+00 : f32
    %776 = vector.broadcast %cst_534 : f32 to vector<8x32xf32>
    %777 = arith.cmpf oge, %775, %776 : vector<8x32xf32>
    %cst_535 = arith.constant 2.000000e-01 : f32
    %778 = vector.broadcast %cst_535 : f32 to vector<8x32xf32>
    %779 = arith.mulf %778, %775 : vector<8x32xf32>
    %780 = arith.select %777, %775, %779 : vector<8x32xi1>, vector<8x32xf32>
    %c0_536 = arith.constant 0 : index
    %c0_537 = arith.constant 0 : index
    %c17 = arith.constant 17 : index
    %c0_538 = arith.constant 0 : index
    %781 = vector.load %arg3[%c0_536, %c0_537, %c17, %c0_538] : memref<1x8x32x32xf32, #tpu.memory_space<vmem>>, vector<1x8x1x32xf32>
    %782 = vector.shape_cast %781 : vector<1x8x1x32xf32> to vector<8x32xf32>
    %783 = vector.shape_cast %780 : vector<8x32xf32> to vector<1x8x1x32xf32>
    tpu.vector_store %arg3[%c0_536, %c0_537, %c17, %c0_538], %783 {strides = array<i32>} : memref<1x8x32x32xf32, #tpu.memory_space<vmem>>, vector<1x8x1x32xf32>,
    %cst_539 = arith.constant 0.000000e+00 : f32
    %784 = vector.broadcast %cst_539 : f32 to vector<32x16xf32>
    %c0_540 = arith.constant 0 : index
    %c0_541 = arith.constant 0 : index
    %c9_542 = arith.constant 9 : index
    %c0_543 = arith.constant 0 : index
    %785 = vector.load %arg1[%c0_540, %c0_541, %c9_542, %c0_543] : memref<1x4x16x16xf32, #tpu.memory_space<vmem>>, vector<1x4x1x16xf32>
    %786 = vector.shape_cast %785 : vector<1x4x1x16xf32> to vector<4x16xf32>
    %cst_544 = arith.constant dense<0.000000e+00> : vector<32x16xf32>
    %787 = tpu.matmul %35, %786, %cst_544 {dimension_numbers = #tpu.dot_dimension_numbers<[1], [0], [0], [1], [0, 0, 1, 1], [], []>} : vector<32x4xf32>, vector<4x16xf32>, vector<32x16xf32> -> vector<32x16xf32>
    %788 = arith.addf %784, %787 : vector<32x16xf32>
    %c0_545 = arith.constant 0 : index
    %c0_546 = arith.constant 0 : index
    %c10_547 = arith.constant 10 : index
    %c0_548 = arith.constant 0 : index
    %789 = vector.load %arg1[%c0_545, %c0_546, %c10_547, %c0_548] : memref<1x4x16x16xf32, #tpu.memory_space<vmem>>, vector<1x4x1x16xf32>
    %790 = vector.shape_cast %789 : vector<1x4x1x16xf32> to vector<4x16xf32>
    %cst_549 = arith.constant dense<0.000000e+00> : vector<32x16xf32>
    %791 = tpu.matmul %37, %790, %cst_549 {dimension_numbers = #tpu.dot_dimension_numbers<[1], [0], [0], [1], [0, 0, 1, 1], [], []>} : vector<32x4xf32>, vector<4x16xf32>, vector<32x16xf32> -> vector<32x16xf32>
    %792 = arith.addf %788, %791 : vector<32x16xf32>
    %cst_550 = arith.constant 0.000000e+00 : f32
    %793 = vector.broadcast %cst_550 : f32 to vector<8x32xf32>
    %794 = vector.extract_strided_slice %792 {offsets = [0, 0], sizes = [8, 16], strides = [1, 1]} : vector<32x16xf32> to vector<8x16xf32>
    %cst_551 = arith.constant dense<0.000000e+00> : vector<8x32xf32>
    %795 = tpu.matmul %794, %8, %cst_551 {dimension_numbers = #tpu.dot_dimension_numbers<[1], [0], [0], [1], [0, 0, 1, 1], [], []>} : vector<8x16xf32>, vector<16x32xf32>, vector<8x32xf32> -> vector<8x32xf32>
    %796 = arith.addf %793, %795 : vector<8x32xf32>
    %797 = vector.extract_strided_slice %792 {offsets = [8, 0], sizes = [8, 16], strides = [1, 1]} : vector<32x16xf32> to vector<8x16xf32>
    %cst_552 = arith.constant dense<0.000000e+00> : vector<8x32xf32>
    %798 = tpu.matmul %797, %15, %cst_552 {dimension_numbers = #tpu.dot_dimension_numbers<[1], [0], [0], [1], [0, 0, 1, 1], [], []>} : vector<8x16xf32>, vector<16x32xf32>, vector<8x32xf32> -> vector<8x32xf32>
    %799 = arith.addf %796, %798 : vector<8x32xf32>
    %800 = vector.extract_strided_slice %792 {offsets = [16, 0], sizes = [8, 16], strides = [1, 1]} : vector<32x16xf32> to vector<8x16xf32>
    %cst_553 = arith.constant dense<0.000000e+00> : vector<8x32xf32>
    %801 = tpu.matmul %800, %22, %cst_553 {dimension_numbers = #tpu.dot_dimension_numbers<[1], [0], [0], [1], [0, 0, 1, 1], [], []>} : vector<8x16xf32>, vector<16x32xf32>, vector<8x32xf32> -> vector<8x32xf32>
    %802 = arith.addf %799, %801 : vector<8x32xf32>
    %803 = vector.extract_strided_slice %792 {offsets = [24, 0], sizes = [8, 16], strides = [1, 1]} : vector<32x16xf32> to vector<8x16xf32>
    %cst_554 = arith.constant dense<0.000000e+00> : vector<8x32xf32>
    %804 = tpu.matmul %803, %29, %cst_554 {dimension_numbers = #tpu.dot_dimension_numbers<[1], [0], [0], [1], [0, 0, 1, 1], [], []>} : vector<8x16xf32>, vector<16x32xf32>, vector<8x32xf32> -> vector<8x32xf32>
    %805 = arith.addf %802, %804 : vector<8x32xf32>
    %cst_555 = arith.constant 0.000000e+00 : f32
    %806 = vector.broadcast %cst_555 : f32 to vector<8x32xf32>
    %807 = arith.cmpf oge, %805, %806 : vector<8x32xf32>
    %cst_556 = arith.constant 2.000000e-01 : f32
    %808 = vector.broadcast %cst_556 : f32 to vector<8x32xf32>
    %809 = arith.mulf %808, %805 : vector<8x32xf32>
    %810 = arith.select %807, %805, %809 : vector<8x32xi1>, vector<8x32xf32>
    %c0_557 = arith.constant 0 : index
    %c0_558 = arith.constant 0 : index
    %c19 = arith.constant 19 : index
    %c0_559 = arith.constant 0 : index
    %811 = vector.load %arg3[%c0_557, %c0_558, %c19, %c0_559] : memref<1x8x32x32xf32, #tpu.memory_space<vmem>>, vector<1x8x1x32xf32>
    %812 = vector.shape_cast %811 : vector<1x8x1x32xf32> to vector<8x32xf32>
    %813 = vector.shape_cast %810 : vector<8x32xf32> to vector<1x8x1x32xf32>
    tpu.vector_store %arg3[%c0_557, %c0_558, %c19, %c0_559], %813 {strides = array<i32>} : memref<1x8x32x32xf32, #tpu.memory_space<vmem>>, vector<1x8x1x32xf32>,
    %cst_560 = arith.constant 0.000000e+00 : f32
    %814 = vector.broadcast %cst_560 : f32 to vector<32x16xf32>
    %c0_561 = arith.constant 0 : index
    %c0_562 = arith.constant 0 : index
    %c10_563 = arith.constant 10 : index
    %c0_564 = arith.constant 0 : index
    %815 = vector.load %arg1[%c0_561, %c0_562, %c10_563, %c0_564] : memref<1x4x16x16xf32, #tpu.memory_space<vmem>>, vector<1x4x1x16xf32>
    %816 = vector.shape_cast %815 : vector<1x4x1x16xf32> to vector<4x16xf32>
    %cst_565 = arith.constant dense<0.000000e+00> : vector<32x16xf32>
    %817 = tpu.matmul %35, %816, %cst_565 {dimension_numbers = #tpu.dot_dimension_numbers<[1], [0], [0], [1], [0, 0, 1, 1], [], []>} : vector<32x4xf32>, vector<4x16xf32>, vector<32x16xf32> -> vector<32x16xf32>
    %818 = arith.addf %814, %817 : vector<32x16xf32>
    %c0_566 = arith.constant 0 : index
    %c0_567 = arith.constant 0 : index
    %c11_568 = arith.constant 11 : index
    %c0_569 = arith.constant 0 : index
    %819 = vector.load %arg1[%c0_566, %c0_567, %c11_568, %c0_569] : memref<1x4x16x16xf32, #tpu.memory_space<vmem>>, vector<1x4x1x16xf32>
    %820 = vector.shape_cast %819 : vector<1x4x1x16xf32> to vector<4x16xf32>
    %cst_570 = arith.constant dense<0.000000e+00> : vector<32x16xf32>
    %821 = tpu.matmul %37, %820, %cst_570 {dimension_numbers = #tpu.dot_dimension_numbers<[1], [0], [0], [1], [0, 0, 1, 1], [], []>} : vector<32x4xf32>, vector<4x16xf32>, vector<32x16xf32> -> vector<32x16xf32>
    %822 = arith.addf %818, %821 : vector<32x16xf32>
    %cst_571 = arith.constant 0.000000e+00 : f32
    %823 = vector.broadcast %cst_571 : f32 to vector<8x32xf32>
    %824 = vector.extract_strided_slice %822 {offsets = [0, 0], sizes = [8, 16], strides = [1, 1]} : vector<32x16xf32> to vector<8x16xf32>
    %cst_572 = arith.constant dense<0.000000e+00> : vector<8x32xf32>
    %825 = tpu.matmul %824, %8, %cst_572 {dimension_numbers = #tpu.dot_dimension_numbers<[1], [0], [0], [1], [0, 0, 1, 1], [], []>} : vector<8x16xf32>, vector<16x32xf32>, vector<8x32xf32> -> vector<8x32xf32>
    %826 = arith.addf %823, %825 : vector<8x32xf32>
    %827 = vector.extract_strided_slice %822 {offsets = [8, 0], sizes = [8, 16], strides = [1, 1]} : vector<32x16xf32> to vector<8x16xf32>
    %cst_573 = arith.constant dense<0.000000e+00> : vector<8x32xf32>
    %828 = tpu.matmul %827, %15, %cst_573 {dimension_numbers = #tpu.dot_dimension_numbers<[1], [0], [0], [1], [0, 0, 1, 1], [], []>} : vector<8x16xf32>, vector<16x32xf32>, vector<8x32xf32> -> vector<8x32xf32>
    %829 = arith.addf %826, %828 : vector<8x32xf32>
    %830 = vector.extract_strided_slice %822 {offsets = [16, 0], sizes = [8, 16], strides = [1, 1]} : vector<32x16xf32> to vector<8x16xf32>
    %cst_574 = arith.constant dense<0.000000e+00> : vector<8x32xf32>
    %831 = tpu.matmul %830, %22, %cst_574 {dimension_numbers = #tpu.dot_dimension_numbers<[1], [0], [0], [1], [0, 0, 1, 1], [], []>} : vector<8x16xf32>, vector<16x32xf32>, vector<8x32xf32> -> vector<8x32xf32>
    %832 = arith.addf %829, %831 : vector<8x32xf32>
    %833 = vector.extract_strided_slice %822 {offsets = [24, 0], sizes = [8, 16], strides = [1, 1]} : vector<32x16xf32> to vector<8x16xf32>
    %cst_575 = arith.constant dense<0.000000e+00> : vector<8x32xf32>
    %834 = tpu.matmul %833, %29, %cst_575 {dimension_numbers = #tpu.dot_dimension_numbers<[1], [0], [0], [1], [0, 0, 1, 1], [], []>} : vector<8x16xf32>, vector<16x32xf32>, vector<8x32xf32> -> vector<8x32xf32>
    %835 = arith.addf %832, %834 : vector<8x32xf32>
    %cst_576 = arith.constant 0.000000e+00 : f32
    %836 = vector.broadcast %cst_576 : f32 to vector<8x32xf32>
    %837 = arith.cmpf oge, %835, %836 : vector<8x32xf32>
    %cst_577 = arith.constant 2.000000e-01 : f32
    %838 = vector.broadcast %cst_577 : f32 to vector<8x32xf32>
    %839 = arith.mulf %838, %835 : vector<8x32xf32>
    %840 = arith.select %837, %835, %839 : vector<8x32xi1>, vector<8x32xf32>
    %c0_578 = arith.constant 0 : index
    %c0_579 = arith.constant 0 : index
    %c21 = arith.constant 21 : index
    %c0_580 = arith.constant 0 : index
    %841 = vector.load %arg3[%c0_578, %c0_579, %c21, %c0_580] : memref<1x8x32x32xf32, #tpu.memory_space<vmem>>, vector<1x8x1x32xf32>
    %842 = vector.shape_cast %841 : vector<1x8x1x32xf32> to vector<8x32xf32>
    %843 = vector.shape_cast %840 : vector<8x32xf32> to vector<1x8x1x32xf32>
    tpu.vector_store %arg3[%c0_578, %c0_579, %c21, %c0_580], %843 {strides = array<i32>} : memref<1x8x32x32xf32, #tpu.memory_space<vmem>>, vector<1x8x1x32xf32>,
    %cst_581 = arith.constant 0.000000e+00 : f32
    %844 = vector.broadcast %cst_581 : f32 to vector<32x16xf32>
    %c0_582 = arith.constant 0 : index
    %c0_583 = arith.constant 0 : index
    %c11_584 = arith.constant 11 : index
    %c0_585 = arith.constant 0 : index
    %845 = vector.load %arg1[%c0_582, %c0_583, %c11_584, %c0_585] : memref<1x4x16x16xf32, #tpu.memory_space<vmem>>, vector<1x4x1x16xf32>
    %846 = vector.shape_cast %845 : vector<1x4x1x16xf32> to vector<4x16xf32>
    %cst_586 = arith.constant dense<0.000000e+00> : vector<32x16xf32>
    %847 = tpu.matmul %35, %846, %cst_586 {dimension_numbers = #tpu.dot_dimension_numbers<[1], [0], [0], [1], [0, 0, 1, 1], [], []>} : vector<32x4xf32>, vector<4x16xf32>, vector<32x16xf32> -> vector<32x16xf32>
    %848 = arith.addf %844, %847 : vector<32x16xf32>
    %c0_587 = arith.constant 0 : index
    %c0_588 = arith.constant 0 : index
    %c12_589 = arith.constant 12 : index
    %c0_590 = arith.constant 0 : index
    %849 = vector.load %arg1[%c0_587, %c0_588, %c12_589, %c0_590] : memref<1x4x16x16xf32, #tpu.memory_space<vmem>>, vector<1x4x1x16xf32>
    %850 = vector.shape_cast %849 : vector<1x4x1x16xf32> to vector<4x16xf32>
    %cst_591 = arith.constant dense<0.000000e+00> : vector<32x16xf32>
    %851 = tpu.matmul %37, %850, %cst_591 {dimension_numbers = #tpu.dot_dimension_numbers<[1], [0], [0], [1], [0, 0, 1, 1], [], []>} : vector<32x4xf32>, vector<4x16xf32>, vector<32x16xf32> -> vector<32x16xf32>
    %852 = arith.addf %848, %851 : vector<32x16xf32>
    %cst_592 = arith.constant 0.000000e+00 : f32
    %853 = vector.broadcast %cst_592 : f32 to vector<8x32xf32>
    %854 = vector.extract_strided_slice %852 {offsets = [0, 0], sizes = [8, 16], strides = [1, 1]} : vector<32x16xf32> to vector<8x16xf32>
    %cst_593 = arith.constant dense<0.000000e+00> : vector<8x32xf32>
    %855 = tpu.matmul %854, %8, %cst_593 {dimension_numbers = #tpu.dot_dimension_numbers<[1], [0], [0], [1], [0, 0, 1, 1], [], []>} : vector<8x16xf32>, vector<16x32xf32>, vector<8x32xf32> -> vector<8x32xf32>
    %856 = arith.addf %853, %855 : vector<8x32xf32>
    %857 = vector.extract_strided_slice %852 {offsets = [8, 0], sizes = [8, 16], strides = [1, 1]} : vector<32x16xf32> to vector<8x16xf32>
    %cst_594 = arith.constant dense<0.000000e+00> : vector<8x32xf32>
    %858 = tpu.matmul %857, %15, %cst_594 {dimension_numbers = #tpu.dot_dimension_numbers<[1], [0], [0], [1], [0, 0, 1, 1], [], []>} : vector<8x16xf32>, vector<16x32xf32>, vector<8x32xf32> -> vector<8x32xf32>
    %859 = arith.addf %856, %858 : vector<8x32xf32>
    %860 = vector.extract_strided_slice %852 {offsets = [16, 0], sizes = [8, 16], strides = [1, 1]} : vector<32x16xf32> to vector<8x16xf32>
    %cst_595 = arith.constant dense<0.000000e+00> : vector<8x32xf32>
    %861 = tpu.matmul %860, %22, %cst_595 {dimension_numbers = #tpu.dot_dimension_numbers<[1], [0], [0], [1], [0, 0, 1, 1], [], []>} : vector<8x16xf32>, vector<16x32xf32>, vector<8x32xf32> -> vector<8x32xf32>
    %862 = arith.addf %859, %861 : vector<8x32xf32>
    %863 = vector.extract_strided_slice %852 {offsets = [24, 0], sizes = [8, 16], strides = [1, 1]} : vector<32x16xf32> to vector<8x16xf32>
    %cst_596 = arith.constant dense<0.000000e+00> : vector<8x32xf32>
    %864 = tpu.matmul %863, %29, %cst_596 {dimension_numbers = #tpu.dot_dimension_numbers<[1], [0], [0], [1], [0, 0, 1, 1], [], []>} : vector<8x16xf32>, vector<16x32xf32>, vector<8x32xf32> -> vector<8x32xf32>
    %865 = arith.addf %862, %864 : vector<8x32xf32>
    %cst_597 = arith.constant 0.000000e+00 : f32
    %866 = vector.broadcast %cst_597 : f32 to vector<8x32xf32>
    %867 = arith.cmpf oge, %865, %866 : vector<8x32xf32>
    %cst_598 = arith.constant 2.000000e-01 : f32
    %868 = vector.broadcast %cst_598 : f32 to vector<8x32xf32>
    %869 = arith.mulf %868, %865 : vector<8x32xf32>
    %870 = arith.select %867, %865, %869 : vector<8x32xi1>, vector<8x32xf32>
    %c0_599 = arith.constant 0 : index
    %c0_600 = arith.constant 0 : index
    %c23 = arith.constant 23 : index
    %c0_601 = arith.constant 0 : index
    %871 = vector.load %arg3[%c0_599, %c0_600, %c23, %c0_601] : memref<1x8x32x32xf32, #tpu.memory_space<vmem>>, vector<1x8x1x32xf32>
    %872 = vector.shape_cast %871 : vector<1x8x1x32xf32> to vector<8x32xf32>
    %873 = vector.shape_cast %870 : vector<8x32xf32> to vector<1x8x1x32xf32>
    tpu.vector_store %arg3[%c0_599, %c0_600, %c23, %c0_601], %873 {strides = array<i32>} : memref<1x8x32x32xf32, #tpu.memory_space<vmem>>, vector<1x8x1x32xf32>,
    %cst_602 = arith.constant 0.000000e+00 : f32
    %874 = vector.broadcast %cst_602 : f32 to vector<32x16xf32>
    %c0_603 = arith.constant 0 : index
    %c0_604 = arith.constant 0 : index
    %c12_605 = arith.constant 12 : index
    %c0_606 = arith.constant 0 : index
    %875 = vector.load %arg1[%c0_603, %c0_604, %c12_605, %c0_606] : memref<1x4x16x16xf32, #tpu.memory_space<vmem>>, vector<1x4x1x16xf32>
    %876 = vector.shape_cast %875 : vector<1x4x1x16xf32> to vector<4x16xf32>
    %cst_607 = arith.constant dense<0.000000e+00> : vector<32x16xf32>
    %877 = tpu.matmul %35, %876, %cst_607 {dimension_numbers = #tpu.dot_dimension_numbers<[1], [0], [0], [1], [0, 0, 1, 1], [], []>} : vector<32x4xf32>, vector<4x16xf32>, vector<32x16xf32> -> vector<32x16xf32>
    %878 = arith.addf %874, %877 : vector<32x16xf32>
    %c0_608 = arith.constant 0 : index
    %c0_609 = arith.constant 0 : index
    %c13_610 = arith.constant 13 : index
    %c0_611 = arith.constant 0 : index
    %879 = vector.load %arg1[%c0_608, %c0_609, %c13_610, %c0_611] : memref<1x4x16x16xf32, #tpu.memory_space<vmem>>, vector<1x4x1x16xf32>
    %880 = vector.shape_cast %879 : vector<1x4x1x16xf32> to vector<4x16xf32>
    %cst_612 = arith.constant dense<0.000000e+00> : vector<32x16xf32>
    %881 = tpu.matmul %37, %880, %cst_612 {dimension_numbers = #tpu.dot_dimension_numbers<[1], [0], [0], [1], [0, 0, 1, 1], [], []>} : vector<32x4xf32>, vector<4x16xf32>, vector<32x16xf32> -> vector<32x16xf32>
    %882 = arith.addf %878, %881 : vector<32x16xf32>
    %cst_613 = arith.constant 0.000000e+00 : f32
    %883 = vector.broadcast %cst_613 : f32 to vector<8x32xf32>
    %884 = vector.extract_strided_slice %882 {offsets = [0, 0], sizes = [8, 16], strides = [1, 1]} : vector<32x16xf32> to vector<8x16xf32>
    %cst_614 = arith.constant dense<0.000000e+00> : vector<8x32xf32>
    %885 = tpu.matmul %884, %8, %cst_614 {dimension_numbers = #tpu.dot_dimension_numbers<[1], [0], [0], [1], [0, 0, 1, 1], [], []>} : vector<8x16xf32>, vector<16x32xf32>, vector<8x32xf32> -> vector<8x32xf32>
    %886 = arith.addf %883, %885 : vector<8x32xf32>
    %887 = vector.extract_strided_slice %882 {offsets = [8, 0], sizes = [8, 16], strides = [1, 1]} : vector<32x16xf32> to vector<8x16xf32>
    %cst_615 = arith.constant dense<0.000000e+00> : vector<8x32xf32>
    %888 = tpu.matmul %887, %15, %cst_615 {dimension_numbers = #tpu.dot_dimension_numbers<[1], [0], [0], [1], [0, 0, 1, 1], [], []>} : vector<8x16xf32>, vector<16x32xf32>, vector<8x32xf32> -> vector<8x32xf32>
    %889 = arith.addf %886, %888 : vector<8x32xf32>
    %890 = vector.extract_strided_slice %882 {offsets = [16, 0], sizes = [8, 16], strides = [1, 1]} : vector<32x16xf32> to vector<8x16xf32>
    %cst_616 = arith.constant dense<0.000000e+00> : vector<8x32xf32>
    %891 = tpu.matmul %890, %22, %cst_616 {dimension_numbers = #tpu.dot_dimension_numbers<[1], [0], [0], [1], [0, 0, 1, 1], [], []>} : vector<8x16xf32>, vector<16x32xf32>, vector<8x32xf32> -> vector<8x32xf32>
    %892 = arith.addf %889, %891 : vector<8x32xf32>
    %893 = vector.extract_strided_slice %882 {offsets = [24, 0], sizes = [8, 16], strides = [1, 1]} : vector<32x16xf32> to vector<8x16xf32>
    %cst_617 = arith.constant dense<0.000000e+00> : vector<8x32xf32>
    %894 = tpu.matmul %893, %29, %cst_617 {dimension_numbers = #tpu.dot_dimension_numbers<[1], [0], [0], [1], [0, 0, 1, 1], [], []>} : vector<8x16xf32>, vector<16x32xf32>, vector<8x32xf32> -> vector<8x32xf32>
    %895 = arith.addf %892, %894 : vector<8x32xf32>
    %cst_618 = arith.constant 0.000000e+00 : f32
    %896 = vector.broadcast %cst_618 : f32 to vector<8x32xf32>
    %897 = arith.cmpf oge, %895, %896 : vector<8x32xf32>
    %cst_619 = arith.constant 2.000000e-01 : f32
    %898 = vector.broadcast %cst_619 : f32 to vector<8x32xf32>
    %899 = arith.mulf %898, %895 : vector<8x32xf32>
    %900 = arith.select %897, %895, %899 : vector<8x32xi1>, vector<8x32xf32>
    %c0_620 = arith.constant 0 : index
    %c0_621 = arith.constant 0 : index
    %c25 = arith.constant 25 : index
    %c0_622 = arith.constant 0 : index
    %901 = vector.load %arg3[%c0_620, %c0_621, %c25, %c0_622] : memref<1x8x32x32xf32, #tpu.memory_space<vmem>>, vector<1x8x1x32xf32>
    %902 = vector.shape_cast %901 : vector<1x8x1x32xf32> to vector<8x32xf32>
    %903 = vector.shape_cast %900 : vector<8x32xf32> to vector<1x8x1x32xf32>
    tpu.vector_store %arg3[%c0_620, %c0_621, %c25, %c0_622], %903 {strides = array<i32>} : memref<1x8x32x32xf32, #tpu.memory_space<vmem>>, vector<1x8x1x32xf32>,
    %cst_623 = arith.constant 0.000000e+00 : f32
    %904 = vector.broadcast %cst_623 : f32 to vector<32x16xf32>
    %c0_624 = arith.constant 0 : index
    %c0_625 = arith.constant 0 : index
    %c13_626 = arith.constant 13 : index
    %c0_627 = arith.constant 0 : index
    %905 = vector.load %arg1[%c0_624, %c0_625, %c13_626, %c0_627] : memref<1x4x16x16xf32, #tpu.memory_space<vmem>>, vector<1x4x1x16xf32>
    %906 = vector.shape_cast %905 : vector<1x4x1x16xf32> to vector<4x16xf32>
    %cst_628 = arith.constant dense<0.000000e+00> : vector<32x16xf32>
    %907 = tpu.matmul %35, %906, %cst_628 {dimension_numbers = #tpu.dot_dimension_numbers<[1], [0], [0], [1], [0, 0, 1, 1], [], []>} : vector<32x4xf32>, vector<4x16xf32>, vector<32x16xf32> -> vector<32x16xf32>
    %908 = arith.addf %904, %907 : vector<32x16xf32>
    %c0_629 = arith.constant 0 : index
    %c0_630 = arith.constant 0 : index
    %c14_631 = arith.constant 14 : index
    %c0_632 = arith.constant 0 : index
    %909 = vector.load %arg1[%c0_629, %c0_630, %c14_631, %c0_632] : memref<1x4x16x16xf32, #tpu.memory_space<vmem>>, vector<1x4x1x16xf32>
    %910 = vector.shape_cast %909 : vector<1x4x1x16xf32> to vector<4x16xf32>
    %cst_633 = arith.constant dense<0.000000e+00> : vector<32x16xf32>
    %911 = tpu.matmul %37, %910, %cst_633 {dimension_numbers = #tpu.dot_dimension_numbers<[1], [0], [0], [1], [0, 0, 1, 1], [], []>} : vector<32x4xf32>, vector<4x16xf32>, vector<32x16xf32> -> vector<32x16xf32>
    %912 = arith.addf %908, %911 : vector<32x16xf32>
    %cst_634 = arith.constant 0.000000e+00 : f32
    %913 = vector.broadcast %cst_634 : f32 to vector<8x32xf32>
    %914 = vector.extract_strided_slice %912 {offsets = [0, 0], sizes = [8, 16], strides = [1, 1]} : vector<32x16xf32> to vector<8x16xf32>
    %cst_635 = arith.constant dense<0.000000e+00> : vector<8x32xf32>
    %915 = tpu.matmul %914, %8, %cst_635 {dimension_numbers = #tpu.dot_dimension_numbers<[1], [0], [0], [1], [0, 0, 1, 1], [], []>} : vector<8x16xf32>, vector<16x32xf32>, vector<8x32xf32> -> vector<8x32xf32>
    %916 = arith.addf %913, %915 : vector<8x32xf32>
    %917 = vector.extract_strided_slice %912 {offsets = [8, 0], sizes = [8, 16], strides = [1, 1]} : vector<32x16xf32> to vector<8x16xf32>
    %cst_636 = arith.constant dense<0.000000e+00> : vector<8x32xf32>
    %918 = tpu.matmul %917, %15, %cst_636 {dimension_numbers = #tpu.dot_dimension_numbers<[1], [0], [0], [1], [0, 0, 1, 1], [], []>} : vector<8x16xf32>, vector<16x32xf32>, vector<8x32xf32> -> vector<8x32xf32>
    %919 = arith.addf %916, %918 : vector<8x32xf32>
    %920 = vector.extract_strided_slice %912 {offsets = [16, 0], sizes = [8, 16], strides = [1, 1]} : vector<32x16xf32> to vector<8x16xf32>
    %cst_637 = arith.constant dense<0.000000e+00> : vector<8x32xf32>
    %921 = tpu.matmul %920, %22, %cst_637 {dimension_numbers = #tpu.dot_dimension_numbers<[1], [0], [0], [1], [0, 0, 1, 1], [], []>} : vector<8x16xf32>, vector<16x32xf32>, vector<8x32xf32> -> vector<8x32xf32>
    %922 = arith.addf %919, %921 : vector<8x32xf32>
    %923 = vector.extract_strided_slice %912 {offsets = [24, 0], sizes = [8, 16], strides = [1, 1]} : vector<32x16xf32> to vector<8x16xf32>
    %cst_638 = arith.constant dense<0.000000e+00> : vector<8x32xf32>
    %924 = tpu.matmul %923, %29, %cst_638 {dimension_numbers = #tpu.dot_dimension_numbers<[1], [0], [0], [1], [0, 0, 1, 1], [], []>} : vector<8x16xf32>, vector<16x32xf32>, vector<8x32xf32> -> vector<8x32xf32>
    %925 = arith.addf %922, %924 : vector<8x32xf32>
    %cst_639 = arith.constant 0.000000e+00 : f32
    %926 = vector.broadcast %cst_639 : f32 to vector<8x32xf32>
    %927 = arith.cmpf oge, %925, %926 : vector<8x32xf32>
    %cst_640 = arith.constant 2.000000e-01 : f32
    %928 = vector.broadcast %cst_640 : f32 to vector<8x32xf32>
    %929 = arith.mulf %928, %925 : vector<8x32xf32>
    %930 = arith.select %927, %925, %929 : vector<8x32xi1>, vector<8x32xf32>
    %c0_641 = arith.constant 0 : index
    %c0_642 = arith.constant 0 : index
    %c27 = arith.constant 27 : index
    %c0_643 = arith.constant 0 : index
    %931 = vector.load %arg3[%c0_641, %c0_642, %c27, %c0_643] : memref<1x8x32x32xf32, #tpu.memory_space<vmem>>, vector<1x8x1x32xf32>
    %932 = vector.shape_cast %931 : vector<1x8x1x32xf32> to vector<8x32xf32>
    %933 = vector.shape_cast %930 : vector<8x32xf32> to vector<1x8x1x32xf32>
    tpu.vector_store %arg3[%c0_641, %c0_642, %c27, %c0_643], %933 {strides = array<i32>} : memref<1x8x32x32xf32, #tpu.memory_space<vmem>>, vector<1x8x1x32xf32>,
    %cst_644 = arith.constant 0.000000e+00 : f32
    %934 = vector.broadcast %cst_644 : f32 to vector<32x16xf32>
    %c0_645 = arith.constant 0 : index
    %c0_646 = arith.constant 0 : index
    %c14_647 = arith.constant 14 : index
    %c0_648 = arith.constant 0 : index
    %935 = vector.load %arg1[%c0_645, %c0_646, %c14_647, %c0_648] : memref<1x4x16x16xf32, #tpu.memory_space<vmem>>, vector<1x4x1x16xf32>
    %936 = vector.shape_cast %935 : vector<1x4x1x16xf32> to vector<4x16xf32>
    %cst_649 = arith.constant dense<0.000000e+00> : vector<32x16xf32>
    %937 = tpu.matmul %35, %936, %cst_649 {dimension_numbers = #tpu.dot_dimension_numbers<[1], [0], [0], [1], [0, 0, 1, 1], [], []>} : vector<32x4xf32>, vector<4x16xf32>, vector<32x16xf32> -> vector<32x16xf32>
    %938 = arith.addf %934, %937 : vector<32x16xf32>
    %c0_650 = arith.constant 0 : index
    %c0_651 = arith.constant 0 : index
    %c15_652 = arith.constant 15 : index
    %c0_653 = arith.constant 0 : index
    %939 = vector.load %arg1[%c0_650, %c0_651, %c15_652, %c0_653] : memref<1x4x16x16xf32, #tpu.memory_space<vmem>>, vector<1x4x1x16xf32>
    %940 = vector.shape_cast %939 : vector<1x4x1x16xf32> to vector<4x16xf32>
    %cst_654 = arith.constant dense<0.000000e+00> : vector<32x16xf32>
    %941 = tpu.matmul %37, %940, %cst_654 {dimension_numbers = #tpu.dot_dimension_numbers<[1], [0], [0], [1], [0, 0, 1, 1], [], []>} : vector<32x4xf32>, vector<4x16xf32>, vector<32x16xf32> -> vector<32x16xf32>
    %942 = arith.addf %938, %941 : vector<32x16xf32>
    %cst_655 = arith.constant 0.000000e+00 : f32
    %943 = vector.broadcast %cst_655 : f32 to vector<8x32xf32>
    %944 = vector.extract_strided_slice %942 {offsets = [0, 0], sizes = [8, 16], strides = [1, 1]} : vector<32x16xf32> to vector<8x16xf32>
    %cst_656 = arith.constant dense<0.000000e+00> : vector<8x32xf32>
    %945 = tpu.matmul %944, %8, %cst_656 {dimension_numbers = #tpu.dot_dimension_numbers<[1], [0], [0], [1], [0, 0, 1, 1], [], []>} : vector<8x16xf32>, vector<16x32xf32>, vector<8x32xf32> -> vector<8x32xf32>
    %946 = arith.addf %943, %945 : vector<8x32xf32>
    %947 = vector.extract_strided_slice %942 {offsets = [8, 0], sizes = [8, 16], strides = [1, 1]} : vector<32x16xf32> to vector<8x16xf32>
    %cst_657 = arith.constant dense<0.000000e+00> : vector<8x32xf32>
    %948 = tpu.matmul %947, %15, %cst_657 {dimension_numbers = #tpu.dot_dimension_numbers<[1], [0], [0], [1], [0, 0, 1, 1], [], []>} : vector<8x16xf32>, vector<16x32xf32>, vector<8x32xf32> -> vector<8x32xf32>
    %949 = arith.addf %946, %948 : vector<8x32xf32>
    %950 = vector.extract_strided_slice %942 {offsets = [16, 0], sizes = [8, 16], strides = [1, 1]} : vector<32x16xf32> to vector<8x16xf32>
    %cst_658 = arith.constant dense<0.000000e+00> : vector<8x32xf32>
    %951 = tpu.matmul %950, %22, %cst_658 {dimension_numbers = #tpu.dot_dimension_numbers<[1], [0], [0], [1], [0, 0, 1, 1], [], []>} : vector<8x16xf32>, vector<16x32xf32>, vector<8x32xf32> -> vector<8x32xf32>
    %952 = arith.addf %949, %951 : vector<8x32xf32>
    %953 = vector.extract_strided_slice %942 {offsets = [24, 0], sizes = [8, 16], strides = [1, 1]} : vector<32x16xf32> to vector<8x16xf32>
    %cst_659 = arith.constant dense<0.000000e+00> : vector<8x32xf32>
    %954 = tpu.matmul %953, %29, %cst_659 {dimension_numbers = #tpu.dot_dimension_numbers<[1], [0], [0], [1], [0, 0, 1, 1], [], []>} : vector<8x16xf32>, vector<16x32xf32>, vector<8x32xf32> -> vector<8x32xf32>
    %955 = arith.addf %952, %954 : vector<8x32xf32>
    %cst_660 = arith.constant 0.000000e+00 : f32
    %956 = vector.broadcast %cst_660 : f32 to vector<8x32xf32>
    %957 = arith.cmpf oge, %955, %956 : vector<8x32xf32>
    %cst_661 = arith.constant 2.000000e-01 : f32
    %958 = vector.broadcast %cst_661 : f32 to vector<8x32xf32>
    %959 = arith.mulf %958, %955 : vector<8x32xf32>
    %960 = arith.select %957, %955, %959 : vector<8x32xi1>, vector<8x32xf32>
    %c0_662 = arith.constant 0 : index
    %c0_663 = arith.constant 0 : index
    %c29 = arith.constant 29 : index
    %c0_664 = arith.constant 0 : index
    %961 = vector.load %arg3[%c0_662, %c0_663, %c29, %c0_664] : memref<1x8x32x32xf32, #tpu.memory_space<vmem>>, vector<1x8x1x32xf32>
    %962 = vector.shape_cast %961 : vector<1x8x1x32xf32> to vector<8x32xf32>
    %963 = vector.shape_cast %960 : vector<8x32xf32> to vector<1x8x1x32xf32>
    tpu.vector_store %arg3[%c0_662, %c0_663, %c29, %c0_664], %963 {strides = array<i32>} : memref<1x8x32x32xf32, #tpu.memory_space<vmem>>, vector<1x8x1x32xf32>,
    %cst_665 = arith.constant 0.000000e+00 : f32
    %964 = vector.broadcast %cst_665 : f32 to vector<32x16xf32>
    %c0_666 = arith.constant 0 : index
    %c0_667 = arith.constant 0 : index
    %c15_668 = arith.constant 15 : index
    %c0_669 = arith.constant 0 : index
    %965 = vector.load %arg1[%c0_666, %c0_667, %c15_668, %c0_669] : memref<1x4x16x16xf32, #tpu.memory_space<vmem>>, vector<1x4x1x16xf32>
    %966 = vector.shape_cast %965 : vector<1x4x1x16xf32> to vector<4x16xf32>
    %cst_670 = arith.constant dense<0.000000e+00> : vector<32x16xf32>
    %967 = tpu.matmul %35, %966, %cst_670 {dimension_numbers = #tpu.dot_dimension_numbers<[1], [0], [0], [1], [0, 0, 1, 1], [], []>} : vector<32x4xf32>, vector<4x16xf32>, vector<32x16xf32> -> vector<32x16xf32>
    %968 = arith.addf %964, %967 : vector<32x16xf32>
    %cst_671 = arith.constant 0.000000e+00 : f32
    %969 = vector.broadcast %cst_671 : f32 to vector<8x32xf32>
    %970 = vector.extract_strided_slice %968 {offsets = [0, 0], sizes = [8, 16], strides = [1, 1]} : vector<32x16xf32> to vector<8x16xf32>
    %cst_672 = arith.constant dense<0.000000e+00> : vector<8x32xf32>
    %971 = tpu.matmul %970, %8, %cst_672 {dimension_numbers = #tpu.dot_dimension_numbers<[1], [0], [0], [1], [0, 0, 1, 1], [], []>} : vector<8x16xf32>, vector<16x32xf32>, vector<8x32xf32> -> vector<8x32xf32>
    %972 = arith.addf %969, %971 : vector<8x32xf32>
    %973 = vector.extract_strided_slice %968 {offsets = [8, 0], sizes = [8, 16], strides = [1, 1]} : vector<32x16xf32> to vector<8x16xf32>
    %cst_673 = arith.constant dense<0.000000e+00> : vector<8x32xf32>
    %974 = tpu.matmul %973, %15, %cst_673 {dimension_numbers = #tpu.dot_dimension_numbers<[1], [0], [0], [1], [0, 0, 1, 1], [], []>} : vector<8x16xf32>, vector<16x32xf32>, vector<8x32xf32> -> vector<8x32xf32>
    %975 = arith.addf %972, %974 : vector<8x32xf32>
    %976 = vector.extract_strided_slice %968 {offsets = [16, 0], sizes = [8, 16], strides = [1, 1]} : vector<32x16xf32> to vector<8x16xf32>
    %cst_674 = arith.constant dense<0.000000e+00> : vector<8x32xf32>
    %977 = tpu.matmul %976, %22, %cst_674 {dimension_numbers = #tpu.dot_dimension_numbers<[1], [0], [0], [1], [0, 0, 1, 1], [], []>} : vector<8x16xf32>, vector<16x32xf32>, vector<8x32xf32> -> vector<8x32xf32>
    %978 = arith.addf %975, %977 : vector<8x32xf32>
    %979 = vector.extract_strided_slice %968 {offsets = [24, 0], sizes = [8, 16], strides = [1, 1]} : vector<32x16xf32> to vector<8x16xf32>
    %cst_675 = arith.constant dense<0.000000e+00> : vector<8x32xf32>
    %980 = tpu.matmul %979, %29, %cst_675 {dimension_numbers = #tpu.dot_dimension_numbers<[1], [0], [0], [1], [0, 0, 1, 1], [], []>} : vector<8x16xf32>, vector<16x32xf32>, vector<8x32xf32> -> vector<8x32xf32>
    %981 = arith.addf %978, %980 : vector<8x32xf32>
    %cst_676 = arith.constant 0.000000e+00 : f32
    %982 = vector.broadcast %cst_676 : f32 to vector<8x32xf32>
    %983 = arith.cmpf oge, %981, %982 : vector<8x32xf32>
    %cst_677 = arith.constant 2.000000e-01 : f32
    %984 = vector.broadcast %cst_677 : f32 to vector<8x32xf32>
    %985 = arith.mulf %984, %981 : vector<8x32xf32>
    %986 = arith.select %983, %981, %985 : vector<8x32xi1>, vector<8x32xf32>
    %c0_678 = arith.constant 0 : index
    %c0_679 = arith.constant 0 : index
    %c31 = arith.constant 31 : index
    %c0_680 = arith.constant 0 : index
    %987 = vector.load %arg3[%c0_678, %c0_679, %c31, %c0_680] : memref<1x8x32x32xf32, #tpu.memory_space<vmem>>, vector<1x8x1x32xf32>
    %988 = vector.shape_cast %987 : vector<1x8x1x32xf32> to vector<8x32xf32>
    %989 = vector.shape_cast %986 : vector<8x32xf32> to vector<1x8x1x32xf32>
    tpu.vector_store %arg3[%c0_678, %c0_679, %c31, %c0_680], %989 {strides = array<i32>} : memref<1x8x32x32xf32, #tpu.memory_space<vmem>>, vector<1x8x1x32xf32>,
    return
  }
  func.func @transform_0(%arg0: i32) -> (i32, i32, i32, i32) {
    %c0_i32 = arith.constant 0 : i32
    %c0_i32_0 = arith.constant 0 : i32
    %c0_i32_1 = arith.constant 0 : i32
    %c0_i32_2 = arith.constant 0 : i32
    return %arg0, %c0_i32, %c0_i32_0, %c0_i32_1 : i32, i32, i32, i32
  }
  func.func @transform_1(%arg0: i32) -> (i32, i32, i32, i32) {
    %c0_i32 = arith.constant 0 : i32
    %c0_i32_0 = arith.constant 0 : i32
    %c0_i32_1 = arith.constant 0 : i32
    %c0_i32_2 = arith.constant 0 : i32
    %c0_i32_3 = arith.constant 0 : i32
    return %c0_i32, %c0_i32_0, %c0_i32_1, %c0_i32_2 : i32, i32, i32, i32
  }
  func.func @transform_2(%arg0: i32) -> (i32, i32, i32, i32) {
    %c0_i32 = arith.constant 0 : i32
    %c0_i32_0 = arith.constant 0 : i32
    %c0_i32_1 = arith.constant 0 : i32
    %c0_i32_2 = arith.constant 0 : i32
    return %arg0, %c0_i32, %c0_i32_0, %c0_i32_1 : i32, i32, i32, i32
  }
}

</mosaic_0001>

<bundles_post_ra>
// kernel: tpu_custom_call.1
= control target key start
LH: loop header
LB: loop body
LE: loop exit
PB: predicated region body
PF: predicated region fallthrough
CT: control target
= control target key end

     0   :  { %7 = vsyncpa [#allocation3], 0  ;;  %s24757_s0 = inlined_call_operand.vmem [shape: f32[2,4,16,16], index: 0, kind: input, shape index: {}]   ;;  %s24758_s1 = inlined_call_operand.vmem [shape: f32[2,2,32,4], index: 1, kind: input, shape index: {}]   ;;  %s24759_s2 = inlined_call_operand.hbm [shape: f32[2,8,32,32], index: 2, kind: output, shape index: {}]  }
   0x1   :  { %9 = vsyncpa [#allocation3 + $0x1], 0  ;;  %s21183_s9 = smov 0   ;;  %s21185_s10 = smov 0  }
   0x2   :  { %s21187_s11 = smov 0   ;;  %s21189_s12 = smov 0  }
   0x3 LB: > { %s21204_s13 = sadd.s32 4294967295, %s21159_s12   ;;  %s18207_s14 = sadd.s32 4294967294, %s21159_s12   ;;  %s21159_s12 = sphi %s21189_s12, %s25756_s12   ;;  %s21155_s11 = sphi %s21187_s11, %s25755_s11   ;;  %s21151_s10 = sphi %s21185_s10, %s25754_s10   ;;  %s21147_s9 = sphi %s21183_s9, %s25753_s9  }
   0x4   : > { %s21208_s15 = sadd.s32 1, %s21159_s12   ;;  %s69_s16 = sadd.s32 1, %s21155_s11 }
   0x5   : > { %s66_s17 = ssub.s32 %s21159_s12, %s21208_s15  ;;  %p79_p0 = scmp.ne.s32.totalorder %s21155_s11, %s21151_s10 }
   0x6   : > { %p67_p1 = scmp.eq.s32.totalorder %s66_s17, 0  ;;  %p80_p2 = scmp.eq.s32.totalorder %s21204_s13, 1 }
   0x7   : > { %p85_p3 = scmp.ne.s32.totalorder %s21151_s10, %s21147_s9  ;;  %p86_p4 = scmp.eq.s32.totalorder %s18207_s14, 1 }
   0x8   : > { %s21219_s18 = scalar_select %p67_p1, %s21155_s11, %s69_s16  }
   0x9   : > { %p21221_p5 = por %p80_p2, %p79_p0  ;;  %p21225_p6 = por %p86_p4, %p85_p3 }
   0xa   : > { %p18210_p7 = scmp.ge.s32.totalorder %s21159_s12, 1  ;;  %p115_p8 = scmp.lt.s32.totalorder %s21159_s12, 3 }
   0xc   : > { %p116_p9 = pnand %p18210_p7, %p115_p8 }
   0xd   : > { %p137_p10 = scmp.lt.s32.totalorder (!%p116_p9), %s21204_s13, 1  ;;  %s21165_s6 = smov (!%p116_p9), [#allocation2]  }
   0xe   : > { %119 = sbr.rel (%p116_p9) target bundleno = 6898 (0x1af2), region = 28  ;;  %s21103_s7 = sshll.u32 (!%p116_p9), %s21165_s6, 4  ;;  %s21104_s7 = int_to_ptr.vmem [resolvable:$false] %s21103_s7 }
   0xf   : > { %s21105_s8 = scalar_lea.vmem (!%p116_p9), %s21104_s7, 8192 }
  0x13   : > { %v21235_v0 = vld [vmem:[%s24758_s1 + $0x20] sm:$0xff]  ;;  %vm24760_vm0 = vcmask 31744   ;;  %v142_v1 = vlaneseq  ;;  %s138_s23 = scalar_select %p137_p10, %s21204_s13, 1  ;;  %v21161_v2 = vmov 0.0   ;;  %vm24766_vm1 = vcmask 1041409   ;;  %v21278_v21 = vld [vmem:[%s24758_s1 + $0x28] sm:$0xff] }
  0x14   : > { %19631 = vmatprep.mubr.msk.f32.mxu0 %vm24760_vm0, %v21235_v0  ;;  %19637 = vmatprep.subr.mxu1 %v21161_v2  ;;  %vm24762_vm2 = vcmask 1042434   ;;  %vm24761_vm3 = vcmask 1043459   ;;  %vm24764_vm4 = vcmask 1043456   ;;  %v21162_v19 = vmov 1.0   ;;  %v21285_v22 = vld [vmem:[%s24758_s1 + $0x30] sm:$0xff]  ;;  %v21300_v23 = vld [vmem:[%s24758_s1 + $0x38] sm:$0xff] }
  0x15   : > { %v21241_v3 = vshrl.u32 %v142_v1, 7  ;;  %s18933_s24 = sshll.u32 %s138_s23, 6  ;;  %v21249_v5 = vand.u32 127, %v142_v1  ;;  %vm24767_vm7 = vmmov 0   ;;  %v24786_v30 = vmov 0  ;;  %v21389_v60 = vld [vmem:[%s24758_s1] sm:$0xff] }
  0x16   : > { %s21246_s27 = scalar_lea.vmem %s24757_s0, %s18933_s24  ;;  %19641 = vmatprep.mubr.msk.f32.mxu1 %vm24767_vm7, %v21161_v2  ;;  %vm24763_vm10 = vcmask 130048   ;;  %v24792_v54 = vmov 0  ;;  %v24794_v57 = vmov 0  ;;  %v21399_v61 = vld [vmem:[%s24758_s1 + $0x8] sm:$0xff]  ;;  %v21408_v62 = vld [vmem:[%s24758_s1 + $0x10] sm:$0xff]  ;;  %v21421_v63 = vld [vmem:[%s24758_s1 + $0x18] sm:$0xff] }
  0x17   : > { %v144_v4 = vadd.s32 8, %v21241_v3  ;;  %v21252_v6 = vmul.u32 2, %v21241_v3  ;;  %v198_v7 = vld [vmem:[%s21246_s27] sm:$0x1]  ;;  %v199_v8 = vld [vmem:[%s21246_s27 + $0x10] sm:$0x1] }
  0x18   : > { %v200_v9 = vld [vmem:[%s21246_s27 + $0x20] sm:$0x1]  ;;  %v201_v10 = vld [vmem:[%s21246_s27 + $0x30] sm:$0x1]  ;;  %v206_v11 = vrot.slane %v199_v8, 7  ;;  %s134_s23 = sand.u32 1, %s21151_s10  }
  0x19   : > { %v209_v12 = vrot.slane %v200_v9, 6  ;;  %v148_v13 = vmul.u32 2, %v144_v4  ;;  %v212_v14 = vrot.slane %v201_v10, 5  ;;  %vm21266_vm6 = vcmp.eq.s32.totalorder %v21249_v5, %v21252_v6  ;;  %v686_v27 = vld [vmem:[%s21246_s27 + $0x11] sm:$0x1]  ;;  %s18211_s24 = sshll.u32 %s134_s23, 8 }
  0x1a   : > { %v208_v15 = vsel %vm24766_vm1, %v206_v11, %v198_v7  ;;  %v163_v26 = vadd.s32 1, %v21252_v6  ;;  %v687_v28 = vld [vmem:[%s21246_s27 + $0x21] sm:$0x1]  ;;  %v693_v29 = vrot.slane %v686_v27, 7  ;;  %v688_v32 = vld [vmem:[%s21246_s27 + $0x31] sm:$0x1] }
  0x1b   : > { %vm21260_vm5 = vcmp.eq.s32.totalorder %v21249_v5, %v148_v13  ;;  %v211_v18 = vsel %vm24762_vm2, %v209_v12, %v208_v15  ;;  %v164_v24 = vadd.s32 1, %v148_v13  ;;  %v685_v31 = vld [vmem:[%s21246_s27 + $0x1] sm:$0x1]  ;;  %v695_v33 = vrot.slane %v687_v28, 6  ;;  %v682_v38 = vld [vmem:[%s21246_s27 + $0x10] sm:$0x1] }
  0x1c   : > { %19638 = vmatpush3.msk.msra.mxu1 %vm21260_vm5, %v21162_v19  ;;  %v214_v20 = vsel %vm24761_vm3, %v212_v14, %v211_v18  ;;  %vm21321_vm9 = vcmp.eq.s32.totalorder %v21249_v5, %v163_v26  ;;  %v694_v34 = vsel %vm24766_vm1, %v693_v29, %v685_v31  ;;  %v697_v35 = vrot.slane %v688_v32, 5  ;;  %v683_v40 = vld [vmem:[%s21246_s27 + $0x20] sm:$0x1]  ;;  %v684_v46 = vld [vmem:[%s21246_s27 + $0x30] sm:$0x1]  ;;  %s21480_s25 = scalar_lea.vmem [#allocation2], %s18211_s24 }
  0x1d   : > { %19639 = vmatprep.subr.mxu1 %v21161_v2  ;;  %19629 = vmatprep.subr.msk.mxu0 %vm24764_vm4, %v214_v20  ;;  %vm21309_vm8 = vcmp.eq.s32.totalorder %v21249_v5, %v164_v24  ;;  %v24787_v30 = vsel %vm21321_vm9, 4294967295, %v24786_v30  ;;  %v696_v36 = vsel %vm24762_vm2, %v695_v33, %v694_v34  ;;  %v150_v39 = vadd.s32 2, %v148_v13  ;;  %v681_v43 = vld [vmem:[%s21246_s27] sm:$0x1]  ;;  %v1263_v8 = vld [vmem:[%s21246_s27 + $0x12] sm:$0x1] }
  0x1e   : > { %19640 = vmatpush3.msk.msra.mxu1 %vm21266_vm6, %v21162_v19  ;;  %19630 = vmatpush3.msk.msra.mxu0 %vm24764_vm4, %v214_v20  ;;  %v698_v37 = vsel %vm24761_vm3, %v697_v35, %v696_v36  ;;  %v790_v41 = vrot.slane %v682_v38, 7  ;;  %v149_v42 = vadd.s32 2, %v21252_v6  ;;  %v172_v45 = vadd.s32 4294967295, %v148_v13  ;;  %v1259_v9 = vld [vmem:[%s21246_s27 + $0x11] sm:$0x1]  ;;  %s18145_s29 = sshll.u32 %s21480_s25, 4  ;;  %s24705_s29 = int_to_ptr.vmem [resolvable:$true] %s18145_s29 }
  0x1f   : > { %19644 = vmatprep.subr.mxu1 %v21161_v2  ;;  %19632 = vmatmul.mubr.msk.f32.vlgmr.msra.gmra.mxu0 %vm24760_vm0, %v21278_v21  ;;  %vm21339_vm11 = vcmp.eq.s32.totalorder %v21249_v5, %v150_v39  ;;  %v792_v47 = vrot.slane %v683_v40, 6  ;;  %v171_v51 = vadd.s32 4294967295, %v21252_v6  ;;  %v794_v53 = vrot.slane %v684_v46, 5  ;;  %v1264_v15 = vld [vmem:[%s21246_s27 + $0x22] sm:$0x1]  ;;  %s21099_s5 = scalar_lea.vmem %s24705_s29, 4096  ;;  %p21106_p0 = scmp.lt.s32.totalorder %s24705_s29, %s21104_s7 }
  0x20   : > { %19651 = vmatprep.subr.mxu0 %v21161_v2  ;;  %19634 = vmatprep.mubr.msk.f32.mxu0 %vm24760_vm0, %v21285_v22  ;;  %v791_v49 = vsel %vm24766_vm1, %v790_v41, %v681_v43  ;;  %vm21347_vm12 = vcmp.eq.s32.totalorder %v21249_v5, %v149_v42  ;;  %vm21359_vm13 = vcmp.eq.s32.totalorder %v21249_v5, %v172_v45  ;;  %v21164_v4 = vmov 1966171168   ;;  %v1260_v20 = vld [vmem:[%s21246_s27 + $0x21] sm:$0x1]  ;;  %v1262_v28 = vld [vmem:[%s21246_s27 + $0x2] sm:$0x1]  ;;  %p21100_p11 = scmp.ne.s32.totalorder %s24705_s29, %s21099_s5  ;;  %p21107_p1 = scmp.lt.s32.totalorder %s21105_s8, %s21099_s5 }
  0x21   : > { %19652 = vmatpush3.msk.msra.mxu0 %vm21309_vm8, %v21162_v19  ;;  %v24793_v54 = vsel %vm21359_vm13, 4294967295, %v24792_v54  ;;  %v793_v55 = vsel %vm24762_vm2, %v792_v47, %v791_v49  ;;  %vm21370_vm14 = vcmp.eq.s32.totalorder %v21249_v5, %v171_v51  ;;  %v617_v5 = vunpack.c.l.s4 %v21164_v4  ;;  %v1258_v29 = vld [vmem:[%s21246_s27 + $0x1] sm:$0x1]  ;;  %v1265_v35 = vld [vmem:[%s21246_s27 + $0x32] sm:$0x1] }
  0x22   : > { %19653 = vmatprep.subr.mxu0 %v21161_v2  ;;  %v24795_v57 = vsel %vm21370_vm14, 4294967295, %v24794_v57  ;;  %v795_v59 = vsel %vm24761_vm3, %v794_v53, %v793_v55  ;;  %v1270_v18 = vrot.slane %v1263_v8, 7  ;;  %v1367_v24 = vrot.slane %v1259_v9, 7  ;;  %p21101_p12 = pnand %p21100_p11, %p21221_p5  ;;  %p21108_p2 = por %p21107_p1, %p21106_p0 }
  0x23   : > { %19635 = vmatmul.mubr.msk.f32.gmra.mxu0 %vm24760_vm0, %v21300_v23  ;;  %v618_v11 = vunpack.c.0.s8 %v617_v5  ;;  %v1272_v36 = vrot.slane %v1264_v15, 6  ;;  %v1369_v38 = vrot.slane %v1260_v20, 6 }
  0x24   : > { %19655 = vmatprep.mubr.msk.f32.mxu0 %vm24767_vm7, %v21161_v2  ;;  %19654 = vmatpush3.msk.msra.mxu0 %vm21321_vm9, %v21162_v19  ;;  %v1271_v40 = vsel %vm24766_vm1, %v1270_v18, %v1262_v28  ;;  %v1368_v41 = vsel %vm24766_vm1, %v1367_v24, %v1258_v29  ;;  %v1828_v29 = vld [vmem:[%s21246_s27 + $0x13] sm:$0x1]  ;;  %p21102_p13 = pneg %p21101_p12 }
  0x25   : > { %19665 = vmatprep.subr.msk.mxu0 %vm24764_vm4, %v698_v37  ;;  %v21455_v32 = vsub.s32 %v618_v11, %v21241_v3  ;;  %v1274_v3 = vrot.slane %v1265_v35, 5  ;;  %v1273_v53 = vsel %vm24762_vm2, %v1272_v36, %v1271_v40  ;;  %v1370_v55 = vsel %vm24762_vm2, %v1369_v38, %v1368_v41  ;;  %v1829_v35 = vld [vmem:[%s21246_s27 + $0x23] sm:$0x1] }
  0x26   : > { %v1835_v36 = vrot.slane %v1828_v29, 7  ;;  %v1827_v41 = vld [vmem:[%s21246_s27 + $0x3] sm:$0x1]  ;;  %p21109_p3 = pnand %p21108_p2, %p21102_p13 }
  0x27   : > { %v1275_v5 = vsel %vm24761_vm3, %v1274_v3, %v1273_v53 }
  0xdf   : > { %v19633_v48 = vpop.f32.mrf.mxu0 }
  0xe0   : > { %19642 = vmatmul.mubr.msk.f32.vlgmr.msra.gmra.mxu1 %vm24763_vm10, %v19633_v48 }
  0xe1   : > { %19645 = vmatpush3.msk.msra.mxu1 %vm21339_vm11, %v21162_v19  ;;  %v297_v52 = vpop.f32.mrf.mxu0  ;;  %19648 = vmatprep.mubr.msk.f32.mxu1 %vm24767_vm7, %v21161_v2 }
  0xe2   : > { %19646 = vmatprep.subr.mxu1 %v21161_v2 }
  0xe3   : > { %19647 = vmatpush3.msk.msra.mxu1 %vm21347_vm12, %v21162_v19  ;;  %v19636_v56 = vpop.f32.mrf.mxu0 }
  0xe4   : > { %19658 = vmatprep.subr.mxu1 %v21161_v2  ;;  %19649 = vmatmul.mubr.msk.f32.vlgmr.msra.gmra.mxu1 %vm24763_vm10, %v297_v52 }
  0xe5   : > { %19659 = vmatpush3.msk.msra.mxu1 %vm21359_vm13, %v21162_v19  ;;  %v307_v58 = vpop.f32.mrf.mxu0  ;;  %19662 = vmatprep.mubr.msk.f32.mxu1 %vm24767_vm7, %v21161_v2 }
  0xe6   : > { %19660 = vmatprep.subr.mxu1 %v21161_v2  ;;  %19656 = vmatmul.mubr.msk.f32.vlgmr.msra.gmra.mxu0 %vm24763_vm10, %v307_v58 }
  0xe7   : > { %19661 = vmatpush3.msk.msra.mxu1 %vm21370_vm14, %v21162_v19  ;;  %19666 = vmatpush3.msk.msra.mxu0 %vm24764_vm4, %v698_v37  ;;  %v1261_v37 = vld [vmem:[%s21246_s27 + $0x31] sm:$0x1] }
  0xe8   : > { %19673 = vmatprep.subr.msk.mxu1 %vm24764_vm4, %v795_v59  ;;  %19663 = vmatmul.mubr.msk.f32.vlgmr.msra.gmra.mxu1 %vm24763_vm10, %v19636_v56  ;;  %v1371_v47 = vrot.slane %v1261_v37, 5  ;;  %v1825_v37 = vld [vmem:[%s21246_s27 + $0x22] sm:$0x1] }
  0xe9   : > { %19674 = vmatpush3.msk.msra.mxu1 %vm24764_vm4, %v795_v59  ;;  %19667 = vmatprep.mubr.msk.f32.mxu0 %vm24760_vm0, %v21235_v0 }
  0xea   : > { %19668 = vmatmul.mubr.msk.f32.vlgmr.msra.gmra.mxu0 %vm24760_vm0, %v21278_v21  ;;  %19675 = vmatprep.mubr.msk.f32.mxu1 %vm24760_vm0, %v21389_v60 }
  0xeb   : > { %19670 = vmatprep.mubr.msk.f32.mxu0 %vm24760_vm0, %v21285_v22  ;;  %19681 = vmatprep.subr.mxu0 %v21161_v2 }
  0xec   : > { %19676 = vmatmul.mubr.msk.f32.vlgmr.msra.gmra.mxu1 %vm24760_vm0, %v21399_v61  ;;  %19688 = vmatprep.subr.mxu1 %v21161_v2 }
  0xed   : > { %19678 = vmatprep.mubr.msk.f32.mxu1 %vm24760_vm0, %v21408_v62  ;;  %19682 = vmatpush3.msk.msra.mxu0 %vm21260_vm5, %v21162_v19 }
  0xee   : > { %19671 = vmatmul.mubr.msk.f32.gmra.mxu0 %vm24760_vm0, %v21300_v23  ;;  %19689 = vmatpush3.msk.msra.mxu1 %vm21339_vm11, %v21162_v19 }
  0xef   : > { %19683 = vmatprep.subr.mxu0 %v21161_v2  ;;  %19690 = vmatprep.subr.mxu1 %v21161_v2 }
  0xf0   : > { %19679 = vmatmul.mubr.msk.f32.gmra.mxu1 %vm24760_vm0, %v21421_v63  ;;  %19684 = vmatpush3.msk.msra.mxu0 %vm21266_vm6, %v21162_v19  ;;  %vm24765_vm0 = vcmask 253952  }
  0xf1   : > { %19691 = vmatpush3.msk.msra.mxu1 %vm21347_vm12, %v21162_v19  ;;  %19685 = vmatprep.mubr.msk.f32.mxu0 %vm24767_vm7, %v21161_v2 }
  0xf2   : > { %19692 = vmatprep.mubr.msk.f32.mxu1 %vm24767_vm7, %v21161_v2  ;;  %19695 = vmatprep.subr.mxu0 %v21161_v2 }
  0xf3   : > { %19702 = vmatprep.subr.mxu1 %v21161_v2 }
 0x1a0   : > { %v386_v1 = vpop.f32.mrf.mxu1 }
 0x1a2   : > { %v19643_v6 = vpop.f32.mrf.mxu1 }
 0x1a3   : > { %v1372_v6 = vsel %vm24761_vm3, %v1371_v47, %v1370_v55  ;;  %v1837_v47 = vrot.slane %v1829_v35, 6 }
 0x1a4   : > { %v459_v7 = vpop.f32.mrf.mxu1 }
 0x1a5   : > { %v460_v10 = vadd.f32 %v459_v7, %v386_v1 }
 0x1a6   : > { %v19650_v12 = vpop.f32.mrf.mxu1  ;;  %v532_v13 = vpop.f32.mrf.mxu0 }
 0x1a7   : > { %v536_v14 = vadd.f32 %v532_v13, %v460_v10 }
 0x1a8   : > { %v19657_v26 = vpop.f32.mrf.mxu0  ;;  %v606_v27 = vpop.f32.mrf.mxu1 }
 0x1a9   : > { %v610_v31 = vadd.f32 %v606_v27, %v536_v14 }
 0x1aa   : > { %v19664_v33 = vpop.f32.mrf.mxu1  ;;  %v19669_v34 = vpop.f32.mrf.mxu0 }
 0x1ab   : > { %vm611_vm15 = vcmp.ge.f32.partialorder %v610_v31, 0.0  ;;  %v612_v39 = vmul.f32 0.2, %v610_v31 }
 0x1ac   : > { %v767_v42 = vpop.f32.mrf.mxu0  ;;  %v19677_v43 = vpop.f32.mrf.mxu1 }
 0x1ad   : > { %v613_v45 = vsel %vm611_vm15, %v610_v31, %v612_v39  ;;  %v882_v46 = vadd.f32 %v19677_v43, %v19669_v34  ;;  %vm24796_vm15 = vcmask 31744   ;;  %v1824_v31 = vld [vmem:[%s21246_s27 + $0x12] sm:$0x1] }
 0x1ae   : > { %v615_v48 = vcombine.high %v613_v45, %v613_v45  ;;  %v622_v49 = vrot.slane %v613_v45, %v21455_v32  ;;  %v19672_v51 = vpop.f32.mrf.mxu0  ;;  %v876_v52 = vpop.f32.mrf.mxu1  ;;  %vm24797_vm3 = vmmov %vm24796_vm15  ;;  %v1932_v38 = vrot.slane %v1824_v31, 7  ;;  %v1830_v45 = vld [vmem:[%s21246_s27 + $0x33] sm:$0x1] }
 0x1af   : > { %v877_v56 = vadd.f32 %v876_v52, %v767_v42  ;;  %19686 = vmatmul.mubr.msk.f32.vlgmr.msra.gmra.mxu0 %vm24763_vm10, %v882_v46  ;;  %vm24798_vm2 = vmmov %vm24797_vm3  ;;  %v1823_v42 = vld [vmem:[%s21246_s27 + $0x2] sm:$0x1]  ;;  %v1836_v52 = vsel %vm24766_vm1, %v1835_v36, %v1827_v41 }
 0x1b0   : > { %v629_v58 = vrot.slane %v615_v48, %v21455_v32  ;;  %v630_v59 = vcombine.high %v622_v49, %v622_v49  ;;  %v638_v1 = vrot.slane %v622_v49, %v21455_v32  ;;  %v19680_v4 = vpop.f32.mrf.mxu1  ;;  %19696 = vmatpush3.msk.msra.mxu0 %vm21309_vm8, %v21162_v19  ;;  %19699 = vmatprep.mubr.msk.f32.mxu0 %vm24767_vm7, %v21161_v2  ;;  %v777_v11 = vpop.f32.mrf.mxu0  ;;  %v1826_v48 = vld [vmem:[%s21246_s27 + $0x32] sm:$0x1]  ;;  %v1934_v49 = vrot.slane %v1825_v37, 6 }
 0x1b1   : > { %19693 = vmatmul.mubr.msk.f32.vlgmr.msra.gmra.mxu1 %vm24763_vm10, %v877_v56  ;;  %19697 = vmatprep.subr.mxu0 %v21161_v2  ;;  %v892_v13 = vadd.f32 %v19680_v4, %v19672_v51  ;;  %v1933_v53 = vsel %vm24766_vm1, %v1932_v38, %v1823_v42  ;;  %v1936_v4 = vrot.slane %v1826_v48, 5  ;;  %v2394_v48 = vld [vmem:[%s21246_s27 + $0x24] sm:$0x1] }
 0x1b2   : > { %v631_v7 = vcombine.high %v629_v58, %v629_v58  ;;  %v645_v8 = vrot.slane %v629_v58, %v21455_v32  ;;  %v652_v9 = vrot.slane %v630_v59, %v21455_v32  ;;  %v660_v10 = vcombine.high %v638_v1, %v638_v1  ;;  %673 = vst.msk [vmem:[%s21480_s25] sm:$0x1] %vm24765_vm0, %v638_v1  ;;  %v886_v12 = vpop.f32.mrf.mxu1 }
 0x1b3   : > { %19703 = vmatpush3.msk.msra.mxu1 %vm21359_vm13, %v21162_v19  ;;  %v887_v14 = vadd.f32 %v886_v12, %v777_v11  ;;  %19698 = vmatpush3.msk.msra.mxu0 %vm21321_vm9, %v21162_v19  ;;  %v1839_v58 = vrot.slane %v1830_v45, 5  ;;  %v2393_v45 = vld [vmem:[%s21246_s27 + $0x14] sm:$0x1] }
 0x1b4   : > { %19704 = vmatprep.subr.mxu1 %v21161_v2  ;;  %v659_v15 = vrot.slane %v631_v7, %v21455_v32  ;;  %v661_v18 = vcombine.high %v645_v8, %v645_v8  ;;  %v662_v20 = vcombine.high %v652_v9, %v652_v9  ;;  %674 = vst.msk [vmem:[%s21480_s25 + $0x20] sm:$0x1] %vm24765_vm0, %v652_v9  ;;  %675 = vst.msk [vmem:[%s21480_s25 + $0x40] sm:$0x1] %vm24765_vm0, %v660_v10 }
 0x1b5   : > { %677 = vst.msk [vmem:[%s21480_s25 + $0x80] sm:$0x1] %vm24765_vm0, %v645_v8  ;;  %19705 = vmatpush3.msk.msra.mxu1 %vm21370_vm14, %v21162_v19  ;;  %19706 = vmatprep.mubr.msk.f32.mxu1 %vm24767_vm7, %v21161_v2 }
 0x1b6   : > { %19709 = vmatprep.subr.msk.mxu0 %vm24764_vm4, %v1275_v5  ;;  %19717 = vmatprep.subr.msk.mxu1 %vm24764_vm4, %v1372_v6  ;;  %v663_v24 = vcombine.high %v659_v15, %v659_v15  ;;  %676 = vst.msk [vmem:[%s21480_s25 + $0x60] sm:$0x1] %vm24765_vm0, %v662_v20  ;;  %678 = vst.msk [vmem:[%s21480_s25 + $0xa0] sm:$0x1] %vm24765_vm0, %v659_v15 }
 0x1b7   : > { %679 = vst.msk [vmem:[%s21480_s25 + $0xc0] sm:$0x1] %vm24765_vm0, %v661_v18  ;;  %19700 = vmatmul.mubr.msk.f32.vlgmr.msra.gmra.mxu0 %vm24763_vm10, %v887_v14  ;;  %19707 = vmatmul.mubr.msk.f32.vlgmr.msra.gmra.mxu1 %vm24763_vm10, %v892_v13  ;;  %vm24799_vm10 = vmmov %vm24798_vm2 }
 0x1b8   : > { %19710 = vmatpush3.msk.msra.mxu0 %vm24764_vm4, %v1275_v5  ;;  %19718 = vmatpush3.msk.msra.mxu1 %vm24764_vm4, %v1372_v6  ;;  %680 = vst.msk [vmem:[%s21480_s25 + $0xe0] sm:$0x1] %vm24765_vm0, %v663_v24  ;;  %vm24800_vm4 = vmmov %vm24798_vm2 }
 0x1b9   : > { %19711 = vmatprep.mubr.msk.f32.mxu0 %vm24796_vm15, %v21235_v0  ;;  %19719 = vmatprep.mubr.msk.f32.mxu1 %vm24797_vm3, %v21389_v60  ;;  %vm24801_vm0 = vmmov %vm24798_vm2  ;;  %vm24805_vm15 = vcmask 130048  }
 0x1ba   : > { %19725 = vmatprep.subr.mxu0 %v21161_v2  ;;  %19732 = vmatprep.subr.mxu1 %v21161_v2 }
 0x1bb   : > { %19712 = vmatmul.mubr.msk.f32.vlgmr.msra.gmra.mxu0 %vm24798_vm2, %v21278_v21  ;;  %19720 = vmatmul.mubr.msk.f32.vlgmr.msra.gmra.mxu1 %vm24799_vm10, %v21399_v61  ;;  %vm24802_vm2 = vmmov %vm24801_vm0 }
 0x1bc   : > { %19714 = vmatprep.mubr.msk.f32.mxu0 %vm24800_vm4, %v21285_v22  ;;  %19722 = vmatprep.mubr.msk.f32.mxu1 %vm24801_vm0, %v21408_v62  ;;  %vm24803_vm4 = vcmask 1042434  }
 0x1bd   : > { %19726 = vmatpush3.msk.msra.mxu0 %vm21260_vm5, %v21162_v19  ;;  %19733 = vmatpush3.msk.msra.mxu1 %vm21339_vm11, %v21162_v19  ;;  %v1838_v7 = vsel %vm24803_vm4, %v1837_v47, %v1836_v52  ;;  %vm24804_vm10 = vmmov %vm24803_vm4  ;;  %vm24809_vm4 = vcmask 253952  }
 0x1be   : > { %19727 = vmatprep.subr.mxu0 %v21161_v2  ;;  %19734 = vmatprep.subr.mxu1 %v21161_v2  ;;  %v1935_v8 = vsel %vm24804_vm10, %v1934_v49, %v1933_v53  ;;  %vm24810_vm10 = vcmask 1043456   ;;  %v2400_v49 = vrot.slane %v2393_v45, 7 }
 0x1bf   : > { %19715 = vmatmul.mubr.msk.f32.gmra.mxu0 %vm24802_vm2, %v21300_v23  ;;  %19723 = vmatmul.mubr.msk.f32.gmra.mxu1 %vm24801_vm0, %v21421_v63  ;;  %vm24806_vm2 = vmmov %vm24805_vm15  ;;  %vm24807_vm0 = vcmask 1043459  }
 0x1c0   : > { %19728 = vmatpush3.msk.msra.mxu0 %vm21266_vm6, %v21162_v19  ;;  %19735 = vmatpush3.msk.msra.mxu1 %vm21347_vm12, %v21162_v19  ;;  %v1840_v15 = vsel %vm24807_vm0, %v1839_v58, %v1838_v7  ;;  %v2388_v58 = vld [vmem:[%s21246_s27 + $0x3] sm:$0x1]  ;;  %v2391_v7 = vld [vmem:[%s21246_s27 + $0x33] sm:$0x1] }
 0x1c1   : > { %19729 = vmatprep.mubr.msk.f32.mxu0 %vm24767_vm7, %v21161_v2  ;;  %19736 = vmatprep.mubr.msk.f32.mxu1 %vm24767_vm7, %v21161_v2 }
 0x1c2   : > { %19739 = vmatprep.subr.mxu0 %v21161_v2  ;;  %19746 = vmatprep.subr.mxu1 %v21161_v2 }
 0x26f   : > { %v964_v26 = vpop.f32.mrf.mxu0 }
 0x271   : > { %v19687_v27 = vpop.f32.mrf.mxu0  ;;  %v1037_v28 = vpop.f32.mrf.mxu1 }
 0x272   : > { %v1038_v34 = vadd.f32 %v1037_v28, %v964_v26 }
 0x273   : > { %v19694_v33 = vpop.f32.mrf.mxu1 }
 0x277   : > { %v1110_v39 = vpop.f32.mrf.mxu0  ;;  %v1184_v40 = vpop.f32.mrf.mxu1 }
 0x278   : > { %v1114_v43 = vadd.f32 %v1110_v39, %v1038_v34 }
 0x279   : > { %v19701_v46 = vpop.f32.mrf.mxu0  ;;  %v19708_v3 = vpop.f32.mrf.mxu1 }
 0x27a   : > { %v1188_v51 = vadd.f32 %v1184_v40, %v1114_v43  ;;  %v2389_v46 = vld [vmem:[%s21246_s27 + $0x13] sm:$0x1] }
 0x27b   : > { %v19713_v55 = vpop.f32.mrf.mxu0  ;;  %v19721_v56 = vpop.f32.mrf.mxu1  ;;  %v2497_v52 = vrot.slane %v2389_v46, 7 }
 0x27c   : > { %vm1189_vm3 = vcmp.ge.f32.partialorder %v1188_v51, 0.0  ;;  %v1190_v59 = vmul.f32 0.2, %v1188_v51  ;;  %v1447_v1 = vadd.f32 %v19721_v56, %v19713_v55  ;;  %v2392_v56 = vld [vmem:[%s21246_s27 + $0x4] sm:$0x1] }
 0x27d   : > { %v1344_v5 = vpop.f32.mrf.mxu0  ;;  %v1441_v6 = vpop.f32.mrf.mxu1 }
 0x27e   : > { %v1191_v9 = vsel %vm1189_vm3, %v1188_v51, %v1190_v59  ;;  %v1442_v10 = vadd.f32 %v1441_v6, %v1344_v5  ;;  %19730 = vmatmul.mubr.msk.f32.vlgmr.msra.gmra.mxu0 %vm24805_vm15, %v1447_v1  ;;  %vm24808_vm3 = vmmov %vm24807_vm0  ;;  %v2390_v51 = vld [vmem:[%s21246_s27 + $0x23] sm:$0x1]  ;;  %v2395_v1 = vld [vmem:[%s21246_s27 + $0x34] sm:$0x1]  ;;  %v2402_v6 = vrot.slane %v2394_v48, 6 }
 0x27f   : > { %v1193_v11 = vcombine.high %v1191_v9, %v1191_v9  ;;  %v1200_v12 = vrot.slane %v1191_v9, %v21455_v32  ;;  %v19716_v13 = vpop.f32.mrf.mxu0  ;;  %v19724_v14 = vpop.f32.mrf.mxu1  ;;  %19740 = vmatpush3.msk.msra.mxu0 %vm21309_vm8, %v21162_v19  ;;  %19743 = vmatprep.mubr.msk.f32.mxu0 %vm24767_vm7, %v21161_v2  ;;  %v1937_v18 = vsel %vm24808_vm3, %v1936_v4, %v1935_v8  ;;  %vm24811_vm15 = vmmov %vm24810_vm10  ;;  %v2499_v8 = vrot.slane %v2390_v51, 6 }
 0x280   : > { %19737 = vmatmul.mubr.msk.f32.vlgmr.msra.gmra.mxu1 %vm24806_vm2, %v1442_v10  ;;  %19741 = vmatprep.subr.mxu0 %v21161_v2  ;;  %v1457_v29 = vadd.f32 %v19724_v14, %v19716_v13  ;;  %vm24812_vm2 = vmmov %vm24809_vm4  ;;  %v2404_v14 = vrot.slane %v2395_v1, 5  ;;  %v2954_v1 = vld [vmem:[%s21246_s27 + $0x14] sm:$0x1] }
 0x281   : > { %v1207_v20 = vrot.slane %v1193_v11, %v21455_v32  ;;  %v1208_v24 = vcombine.high %v1200_v12, %v1200_v12  ;;  %v1216_v26 = vrot.slane %v1200_v12, %v21455_v32  ;;  %19747 = vmatpush3.msk.msra.mxu1 %vm21359_vm13, %v21162_v19  ;;  %v1354_v27 = vpop.f32.mrf.mxu0  ;;  %v1451_v28 = vpop.f32.mrf.mxu1  ;;  %19742 = vmatpush3.msk.msra.mxu0 %vm21321_vm9, %v21162_v19  ;;  %vm24813_vm0 = vmmov %vm24812_vm2 }
 0x282   : > { %v1452_v31 = vadd.f32 %v1451_v28, %v1354_v27  ;;  %19748 = vmatprep.subr.mxu1 %v21161_v2  ;;  %19750 = vmatprep.mubr.msk.f32.mxu1 %vm24767_vm7, %v21161_v2  ;;  %vm24814_vm3 = vmmov %vm24813_vm0 }
 0x283   : > { %v1209_v33 = vcombine.high %v1207_v20, %v1207_v20  ;;  %v1223_v34 = vrot.slane %v1207_v20, %v21455_v32  ;;  %v1230_v35 = vrot.slane %v1208_v24, %v21455_v32  ;;  %v1238_v36 = vcombine.high %v1216_v26, %v1216_v26  ;;  %1250 = vst.msk [vmem:[%s21480_s25 + $0x2] sm:$0x1] %vm24809_vm4, %v1216_v26  ;;  %vm24817_vm7 = vmmov %vm24810_vm10 }
 0x284   : > { %19749 = vmatpush3.msk.msra.mxu1 %vm21370_vm14, %v21162_v19  ;;  %19753 = vmatprep.subr.msk.mxu0 %vm24810_vm10, %v1840_v15  ;;  %vm24815_vm4 = vcmask 130048   ;;  %vm24818_vm10 = vmmov %vm24817_vm7  ;;  %v2501_v20 = vrot.slane %v2391_v7, 5 }
 0x285   : > { %19761 = vmatprep.subr.msk.mxu1 %vm24811_vm15, %v1937_v18  ;;  %v1237_v37 = vrot.slane %v1209_v33, %v21455_v32  ;;  %v1239_v38 = vcombine.high %v1223_v34, %v1223_v34  ;;  %v1240_v39 = vcombine.high %v1230_v35, %v1230_v35  ;;  %1251 = vst.msk [vmem:[%s21480_s25 + $0x22] sm:$0x1] %vm24812_vm2, %v1230_v35  ;;  %vm24816_vm1 = vmmov %vm24815_vm4  ;;  %vm24822_vm2 = vcmask 31744  }
 0x286   : > { %1252 = vst.msk [vmem:[%s21480_s25 + $0x42] sm:$0x1] %vm24813_vm0, %v1238_v36  ;;  %19744 = vmatmul.mubr.msk.f32.vlgmr.msra.gmra.mxu0 %vm24815_vm4, %v1452_v31  ;;  %19751 = vmatmul.mubr.msk.f32.vlgmr.msra.gmra.mxu1 %vm24816_vm1, %v1457_v29  ;;  %vm24819_vm15 = vmmov %vm24813_vm0 }
 0x287   : > { %1254 = vst.msk [vmem:[%s21480_s25 + $0x82] sm:$0x1] %vm24814_vm3, %v1223_v34  ;;  %19754 = vmatpush3.msk.msra.mxu0 %vm24817_vm7, %v1840_v15  ;;  %19762 = vmatpush3.msk.msra.mxu1 %vm24818_vm10, %v1937_v18  ;;  %v1241_v40 = vcombine.high %v1237_v37, %v1237_v37  ;;  %vm24820_vm14 = vmmov %vm24813_vm0 }
 0x288   : > { %1253 = vst.msk [vmem:[%s21480_s25 + $0x62] sm:$0x1] %vm24819_vm15, %v1240_v39  ;;  %vm24821_vm9 = vmmov %vm24813_vm0  ;;  %19755 = vmatprep.mubr.msk.f32.mxu0 %vm24822_vm2, %v21235_v0  ;;  %19769 = vmatprep.subr.mxu0 %v21161_v2  ;;  %vm24831_vm15 = vmmov 0  }
 0x289   : > { %1255 = vst.msk [vmem:[%s21480_s25 + $0xa2] sm:$0x1] %vm24820_vm14, %v1237_v37  ;;  %vm24823_vm0 = vmmov %vm24822_vm2  ;;  %19776 = vmatprep.subr.mxu1 %v21161_v2  ;;  %vm24832_vm2 = vcmask 1041409  }
 0x28a   : > { %1256 = vst.msk [vmem:[%s21480_s25 + $0xc2] sm:$0x1] %vm24821_vm9, %v1239_v38  ;;  %19763 = vmatprep.mubr.msk.f32.mxu1 %vm24823_vm0, %v21389_v60  ;;  %vm24824_vm1 = vmmov %vm24814_vm3  ;;  %v2401_v10 = vsel %vm24832_vm2, %v2400_v49, %v2392_v56 }
 0x28b   : > { %1257 = vst.msk [vmem:[%s21480_s25 + $0xe2] sm:$0x1] %vm24824_vm1, %v1241_v40  ;;  %vm24825_vm7 = vmmov %vm24823_vm0 }
 0x28c   : > { %19756 = vmatmul.mubr.msk.f32.vlgmr.msra.gmra.mxu0 %vm24825_vm7, %v21278_v21  ;;  %vm24826_vm3 = vmmov %vm24823_vm0  ;;  %vm24834_vm7 = vcmask 1042434  }
 0x28d   : > { %19764 = vmatmul.mubr.msk.f32.vlgmr.msra.gmra.mxu1 %vm24826_vm3, %v21399_v61  ;;  %vm24827_vm9 = vmmov %vm24823_vm0  ;;  %19770 = vmatpush3.msk.msra.mxu0 %vm21260_vm5, %v21162_v19  ;;  %v2403_v27 = vsel %vm24834_vm7, %v2402_v6, %v2401_v10  ;;  %v2959_v6 = vld [vmem:[%s21246_s27 + $0x25] sm:$0x1] }
 0x28e   : > { %19758 = vmatprep.mubr.msk.f32.mxu0 %vm24827_vm9, %v21285_v22  ;;  %vm24828_vm14 = vmmov %vm24823_vm0  ;;  %19777 = vmatpush3.msk.msra.mxu1 %vm21339_vm11, %v21162_v19  ;;  %vm24836_vm9 = vcmask 130048  }
 0x28f   : > { %19766 = vmatprep.mubr.msk.f32.mxu1 %vm24828_vm14, %v21408_v62  ;;  %19771 = vmatprep.subr.mxu0 %v21161_v2  ;;  %vm24829_vm4 = vmmov %vm24823_vm0 }
 0x290   : > { %19778 = vmatprep.subr.mxu1 %v21161_v2  ;;  %19759 = vmatmul.mubr.msk.f32.gmra.mxu0 %vm24829_vm4, %v21300_v23  ;;  %vm24830_vm10 = vmmov %vm24823_vm0  ;;  %vm24838_vm4 = vcmask 1043459  }
 0x291   : > { %19767 = vmatmul.mubr.msk.f32.gmra.mxu1 %vm24830_vm10, %v21421_v63  ;;  %19772 = vmatpush3.msk.msra.mxu0 %vm21266_vm6, %v21162_v19  ;;  %vm24833_vm0 = vmmov %vm24832_vm2  ;;  %v2405_v37 = vsel %vm24838_vm4, %v2404_v14, %v2403_v27  ;;  %vm24840_vm2 = vnez %v24787_v30 }
 0x292   : > { %19779 = vmatpush3.msk.msra.mxu1 %vm21347_vm12, %v21162_v19  ;;  %19773 = vmatprep.mubr.msk.f32.mxu0 %vm24831_vm15, %v21161_v2  ;;  %v2498_v11 = vsel %vm24833_vm0, %v2497_v52, %v2388_v58  ;;  %vm24835_vm3 = vmmov %vm24834_vm7  ;;  %vm24841_vm0 = vcmask 253952   ;;  %vm24843_vm7 = vcmask 1043456  }
 0x293   : > { %19780 = vmatprep.mubr.msk.f32.mxu1 %vm24831_vm15, %v21161_v2  ;;  %19783 = vmatprep.subr.mxu0 %v21161_v2  ;;  %v2500_v28 = vsel %vm24835_vm3, %v2499_v8, %v2498_v11  ;;  %vm24837_vm14 = vmmov %vm24836_vm9  ;;  %v2955_v8 = vld [vmem:[%s21246_s27 + $0x24] sm:$0x1] }
 0x294   : > { %19790 = vmatprep.subr.mxu1 %v21161_v2  ;;  %vm24839_vm10 = vmmov %vm24838_vm4  ;;  %v3064_v27 = vrot.slane %v2955_v8, 6 }
 0x295   : > { %v2502_v38 = vsel %vm24839_vm10, %v2501_v20, %v2500_v28  ;;  %vm24844_vm3 = vmmov %vm24843_vm7  ;;  %vm24848_vm10 = vcmask 130048  }
 0x296   : > { %vm24847_vm4 = vmmov %vm24841_vm0 }
 0x33e   : > { %v1529_v41 = vpop.f32.mrf.mxu0 }
 0x340   : > { %v19731_v42 = vpop.f32.mrf.mxu0  ;;  %v1602_v43 = vpop.f32.mrf.mxu1 }
 0x341   : > { %v1603_v47 = vadd.f32 %v1602_v43, %v1529_v41 }
 0x342   : > { %v19738_v3 = vpop.f32.mrf.mxu1 }
 0x346   : > { %v1675_v53 = vpop.f32.mrf.mxu0  ;;  %v1749_v55 = vpop.f32.mrf.mxu1 }
 0x347   : > { %v1679_v59 = vadd.f32 %v1675_v53, %v1603_v47 }
 0x348   : > { %v19745_v4 = vpop.f32.mrf.mxu0  ;;  %v19752_v5 = vpop.f32.mrf.mxu1 }
 0x349   : > { %v1753_v9 = vadd.f32 %v1749_v55, %v1679_v59  ;;  %v2958_v59 = vld [vmem:[%s21246_s27 + $0x15] sm:$0x1] }
 0x34a   : > { %v2965_v7 = vrot.slane %v2958_v59, 7 }
 0x34b   : > { %vm1754_vm1 = vcmp.ge.f32.partialorder %v1753_v9, 0.0  ;;  %v1755_v15 = vmul.f32 0.2, %v1753_v9 }
 0x34c   : > { %v19757_v12 = vpop.f32.mrf.mxu0 }
 0x34d   : > { %v19765_v13 = vpop.f32.mrf.mxu1  ;;  %v1756_v29 = vsel %vm1754_vm1, %v1753_v9, %v1755_v15  ;;  %vm24842_vm1 = vnez %v24795_v57  ;;  %v3062_v9 = vrot.slane %v2954_v1, 7  ;;  %v2960_v15 = vld [vmem:[%s21246_s27 + $0x35] sm:$0x1] }
 0x34e   : > { %v2012_v18 = vadd.f32 %v19765_v13, %v19757_v12  ;;  %v1909_v24 = vpop.f32.mrf.mxu0  ;;  %v1758_v33 = vcombine.high %v1756_v29, %v1756_v29  ;;  %v1765_v34 = vrot.slane %v1756_v29, %v21455_v32  ;;  %v2957_v12 = vld [vmem:[%s21246_s27 + $0x5] sm:$0x1]  ;;  %v2953_v13 = vld [vmem:[%s21246_s27 + $0x4] sm:$0x1] }
 0x34f   : > { %v2006_v26 = vpop.f32.mrf.mxu1 }
 0x350   : > { %v2007_v31 = vadd.f32 %v2006_v26, %v1909_v24  ;;  %19774 = vmatmul.mubr.msk.f32.vlgmr.msra.gmra.mxu0 %vm24836_vm9, %v2012_v18  ;;  %v19760_v35 = vpop.f32.mrf.mxu0  ;;  %v1772_v39 = vrot.slane %v1758_v33, %v21455_v32  ;;  %v1773_v40 = vcombine.high %v1765_v34, %v1765_v34  ;;  %v1781_v41 = vrot.slane %v1765_v34, %v21455_v32  ;;  %vm24845_vm9 = vmmov %vm24841_vm0  ;;  %v2956_v26 = vld [vmem:[%s21246_s27 + $0x34] sm:$0x1] }
 0x351   : > { %v19768_v36 = vpop.f32.mrf.mxu1  ;;  %19784 = vmatpush3.msk.msra.mxu0 %vm21309_vm8, %v21162_v19  ;;  %19787 = vmatprep.mubr.msk.f32.mxu0 %vm24831_vm15, %v21161_v2  ;;  %v2967_v24 = vrot.slane %v2959_v6, 6 }
 0x352   : > { %19781 = vmatmul.mubr.msk.f32.vlgmr.msra.gmra.mxu1 %vm24837_vm14, %v2007_v31  ;;  %19785 = vmatprep.subr.mxu0 %v21161_v2  ;;  %v1919_v42 = vpop.f32.mrf.mxu0  ;;  %v2022_v45 = vadd.f32 %v19768_v36, %v19760_v35  ;;  %v1774_v3 = vcombine.high %v1772_v39, %v1772_v39  ;;  %v1788_v47 = vrot.slane %v1772_v39, %v21455_v32  ;;  %vm24846_vm14 = vmmov %vm24841_vm0  ;;  %v2969_v35 = vrot.slane %v2960_v15, 5 }
 0x353   : > { %19791 = vmatpush3.msk.msra.mxu1 %vm21359_vm13, %v21162_v19  ;;  %v2016_v43 = vpop.f32.mrf.mxu1  ;;  %19786 = vmatpush3.msk.msra.mxu0 %vm24840_vm2, %v21162_v19  ;;  %v1795_v48 = vrot.slane %v1773_v40, %v21455_v32  ;;  %v1803_v49 = vcombine.high %v1781_v41, %v1781_v41  ;;  %1815 = vst.msk [vmem:[%s21480_s25 + $0x4] sm:$0x1] %vm24841_vm0, %v1781_v41  ;;  %vm24849_vm0 = vmmov %vm24848_vm10 }
 0x354   : > { %v2017_v46 = vadd.f32 %v2016_v43, %v1919_v42  ;;  %19792 = vmatprep.subr.mxu1 %v21161_v2  ;;  %19794 = vmatprep.mubr.msk.f32.mxu1 %vm24831_vm15, %v21161_v2  ;;  %v1802_v51 = vrot.slane %v1774_v3, %v21455_v32  ;;  %v1804_v52 = vcombine.high %v1788_v47, %v1788_v47 }
 0x355   : > { %19793 = vmatpush3.msk.msra.mxu1 %vm24842_vm1, %v21162_v19  ;;  %19797 = vmatprep.subr.msk.mxu0 %vm24843_vm7, %v2405_v37  ;;  %v1805_v53 = vcombine.high %v1795_v48, %v1795_v48  ;;  %1816 = vst.msk [vmem:[%s21480_s25 + $0x24] sm:$0x1] %vm24845_vm9, %v1795_v48  ;;  %vm24850_vm1 = vmmov %vm24844_vm3  ;;  %vm24855_vm9 = vcmask 31744  }
 0x356   : > { %19805 = vmatprep.subr.msk.mxu1 %vm24844_vm3, %v2502_v38  ;;  %1817 = vst.msk [vmem:[%s21480_s25 + $0x44] sm:$0x1] %vm24846_vm14, %v1803_v49  ;;  %19788 = vmatmul.mubr.msk.f32.vlgmr.msra.gmra.mxu0 %vm24848_vm10, %v2017_v46  ;;  %vm24851_vm7 = vmmov %vm24850_vm1  ;;  %v1806_v55 = vcombine.high %v1802_v51, %v1802_v51 }
 0x357   : > { %1819 = vst.msk [vmem:[%s21480_s25 + $0x84] sm:$0x1] %vm24847_vm4, %v1788_v47  ;;  %19795 = vmatmul.mubr.msk.f32.vlgmr.msra.gmra.mxu1 %vm24849_vm0, %v2022_v45  ;;  %19798 = vmatpush3.msk.msra.mxu0 %vm24850_vm1, %v2405_v37  ;;  %vm24852_vm3 = vmmov %vm24847_vm4 }
 0x358   : > { %19806 = vmatpush3.msk.msra.mxu1 %vm24851_vm7, %v2502_v38  ;;  %1818 = vst.msk [vmem:[%s21480_s25 + $0x64] sm:$0x1] %vm24852_vm3, %v1805_v53  ;;  %vm24853_vm2 = vmmov %vm24852_vm3  ;;  %19799 = vmatprep.mubr.msk.f32.mxu0 %vm24855_vm9, %v21235_v0  ;;  %vm24864_vm3 = vcmask 1041409   ;;  %v3066_v38 = vrot.slane %v2956_v26, 5  ;;  %v3518_v26 = vld [vmem:[%s21246_s27 + $0x5] sm:$0x1] }
 0x359   : > { %1820 = vst.msk [vmem:[%s21480_s25 + $0xa4] sm:$0x1] %vm24853_vm2, %v1802_v51  ;;  %vm24854_vm13 = vmmov %vm24853_vm2  ;;  %19813 = vmatprep.subr.mxu0 %v21161_v2  ;;  %19820 = vmatprep.subr.mxu1 %v21161_v2  ;;  %v2966_v29 = vsel %vm24864_vm3, %v2965_v7, %v2957_v12  ;;  %v3524_v12 = vld [vmem:[%s21246_s27 + $0x26] sm:$0x1] }
 0x35a   : > { %1821 = vst.msk [vmem:[%s21480_s25 + $0xc4] sm:$0x1] %vm24854_vm13, %v1804_v52  ;;  %vm24856_vm14 = vmmov %vm24855_vm9 }
 0x35b   : > { %19807 = vmatprep.mubr.msk.f32.mxu1 %vm24856_vm14, %v21389_v60  ;;  %vm24857_vm1 = vmmov %vm24853_vm2 }
 0x35c   : > { %1822 = vst.msk [vmem:[%s21480_s25 + $0xe4] sm:$0x1] %vm24857_vm1, %v1806_v55  ;;  %vm24858_vm4 = vmmov %vm24855_vm9  ;;  %vm24866_vm1 = vcmask 1042434  }
 0x35d   : > { %19800 = vmatmul.mubr.msk.f32.vlgmr.msra.gmra.mxu0 %vm24858_vm4, %v21278_v21  ;;  %vm24859_vm10 = vmmov %vm24858_vm4  ;;  %v2968_v41 = vsel %vm24866_vm1, %v2967_v24, %v2966_v29  ;;  %v3522_v24 = vld [vmem:[%s21246_s27 + $0x6] sm:$0x1] }
 0x35e   : > { %19808 = vmatmul.mubr.msk.f32.vlgmr.msra.gmra.mxu1 %vm24859_vm10, %v21399_v61  ;;  %vm24860_vm13 = vmmov %vm24858_vm4  ;;  %19814 = vmatpush3.msk.msra.mxu0 %vm21260_vm5, %v21162_v19  ;;  %vm24868_vm10 = vcmask 130048  }
 0x35f   : > { %19802 = vmatprep.mubr.msk.f32.mxu0 %vm24860_vm13, %v21285_v22  ;;  %vm24861_vm2 = vmmov %vm24858_vm4  ;;  %19821 = vmatpush3.msk.msra.mxu1 %vm21339_vm11, %v21162_v19 }
 0x360   : > { %19810 = vmatprep.mubr.msk.f32.mxu1 %vm24861_vm2, %v21408_v62  ;;  %19815 = vmatprep.subr.mxu0 %v21161_v2  ;;  %vm24862_vm0 = vmmov %vm24861_vm2  ;;  %vm24870_vm2 = vcmask 1043459  }
 0x361   : > { %19822 = vmatprep.subr.mxu1 %v21161_v2  ;;  %19803 = vmatmul.mubr.msk.f32.gmra.mxu0 %vm24862_vm0, %v21300_v23  ;;  %vm24863_vm7 = vmmov %vm24862_vm0  ;;  %v2970_v49 = vsel %vm24870_vm2, %v2969_v35, %v2968_v41 }
 0x362   : > { %19811 = vmatmul.mubr.msk.f32.gmra.mxu1 %vm24863_vm7, %v21421_v63  ;;  %19816 = vmatpush3.msk.msra.mxu0 %vm21266_vm6, %v21162_v19  ;;  %vm24865_vm9 = vmmov %vm24864_vm3  ;;  %vm24872_vm7 = vnez %v24793_v54  ;;  %vm24873_vm3 = vnez %v24787_v30 }
 0x363   : > { %19823 = vmatpush3.msk.msra.mxu1 %vm21347_vm12, %v21162_v19  ;;  %19817 = vmatprep.mubr.msk.f32.mxu0 %vm24831_vm15, %v21161_v2  ;;  %v3063_v31 = vsel %vm24865_vm9, %v3062_v9, %v2953_v13  ;;  %vm24867_vm4 = vmmov %vm24866_vm1  ;;  %vm24874_vm9 = vcmask 253952   ;;  %vm24876_vm1 = vcmask 1043456  }
 0x364   : > { %19824 = vmatprep.mubr.msk.f32.mxu1 %vm24831_vm15, %v21161_v2  ;;  %19827 = vmatprep.subr.mxu0 %v21161_v2  ;;  %v3065_v42 = vsel %vm24867_vm4, %v3064_v27, %v3063_v31  ;;  %vm24869_vm13 = vmmov %vm24868_vm10 }
 0x365   : > { %19834 = vmatprep.subr.mxu1 %v21161_v2  ;;  %vm24871_vm0 = vmmov %vm24870_vm2 }
 0x366   : > { %v3067_v51 = vsel %vm24871_vm0, %v3066_v38, %v3065_v42  ;;  %vm24877_vm4 = vmmov %vm24876_vm1  ;;  %vm24881_vm0 = vcmask 130048  }
 0x367   : > { %vm24880_vm2 = vmmov %vm24874_vm9 }
 0x410   : > { %v2094_v0 = vpop.f32.mrf.mxu0 }
 0x412   : > { %v19775_v56 = vpop.f32.mrf.mxu0  ;;  %v2167_v58 = vpop.f32.mrf.mxu1 }
 0x413   : > { %v2168_v5 = vadd.f32 %v2167_v58, %v2094_v0 }
 0x414   : > { %v19782_v4 = vpop.f32.mrf.mxu1 }
 0x416   : > { %v2240_v10 = vpop.f32.mrf.mxu0 }
 0x417   : > { %v2314_v11 = vpop.f32.mrf.mxu1  ;;  %v2244_v14 = vadd.f32 %v2240_v10, %v2168_v5 }
 0x418   : > { %v19789_v18 = vpop.f32.mrf.mxu0 }
 0x419   : > { %v19796_v20 = vpop.f32.mrf.mxu1  ;;  %v2318_v28 = vadd.f32 %v2314_v11, %v2244_v14  ;;  %v21818_v11 = vld [vmem:[%s24758_s1 + $0x20] sm:$0xff] }
 0x41a   : > { %v3520_v14 = vld [vmem:[%s21246_s27 + $0x25] sm:$0x1] }
 0x41b   : > { %vm2319_vm14 = vcmp.ge.f32.partialorder %v2318_v28, 0.0  ;;  %v2320_v36 = vmul.f32 0.2, %v2318_v28  ;;  %v3629_v35 = vrot.slane %v3520_v14, 6  ;;  %v21950_v14 = vld [vmem:[%s24758_s1 + $0x30] sm:$0xff] }
 0x41d   : > { %v19801_v33 = vpop.f32.mrf.mxu0  ;;  %v2321_v43 = vsel %vm2319_vm14, %v2318_v28, %v2320_v36  ;;  %vm24875_vm14 = vnez %v24795_v57  ;;  %v3525_v28 = vld [vmem:[%s21246_s27 + $0x36] sm:$0x1] }
 0x41e   : > { %v19809_v34 = vpop.f32.mrf.mxu1  ;;  %v2323_v46 = vcombine.high %v2321_v43, %v2321_v43  ;;  %v2330_v3 = vrot.slane %v2321_v43, %v21455_v32  ;;  %v3534_v41 = vrot.slane %v3525_v28, 5  ;;  %v4088_v28 = vld [vmem:[%s21246_s27 + $0x17] sm:$0x1] }
 0x41f   : > { %v2577_v37 = vadd.f32 %v19809_v34, %v19801_v33  ;;  %v2474_v39 = vpop.f32.mrf.mxu0  ;;  %v3532_v33 = vrot.slane %v3524_v12, 6  ;;  %v3521_v34 = vld [vmem:[%s21246_s27 + $0x35] sm:$0x1]  ;;  %v21936_v12 = vld [vmem:[%s24758_s1 + $0x28] sm:$0xff] }
 0x420   : > { %v2571_v40 = vpop.f32.mrf.mxu1  ;;  %v2337_v52 = vrot.slane %v2323_v46, %v21455_v32  ;;  %v2338_v53 = vcombine.high %v2330_v3, %v2330_v3  ;;  %v2346_v55 = vrot.slane %v2330_v3, %v21455_v32 }
 0x421   : > { %v2572_v45 = vadd.f32 %v2571_v40, %v2474_v39  ;;  %19818 = vmatmul.mubr.msk.f32.vlgmr.msra.gmra.mxu0 %vm24868_vm10, %v2577_v37  ;;  %v19804_v47 = vpop.f32.mrf.mxu0  ;;  %vm24878_vm10 = vmmov %vm24874_vm9 }
 0x422   : > { %v19812_v48 = vpop.f32.mrf.mxu1  ;;  %19828 = vmatpush3.msk.msra.mxu0 %vm21309_vm8, %v21162_v19  ;;  %19831 = vmatprep.mubr.msk.f32.mxu0 %vm24831_vm15, %v21161_v2  ;;  %v2339_v1 = vcombine.high %v2337_v52, %v2337_v52  ;;  %v2353_v4 = vrot.slane %v2337_v52, %v21455_v32  ;;  %v2360_v5 = vrot.slane %v2338_v53, %v21455_v32 }
 0x423   : > { %19825 = vmatmul.mubr.msk.f32.vlgmr.msra.gmra.mxu1 %vm24869_vm13, %v2572_v45  ;;  %19829 = vmatprep.subr.mxu0 %v21161_v2  ;;  %v2484_v0 = vpop.f32.mrf.mxu0  ;;  %v2587_v58 = vadd.f32 %v19812_v48, %v19804_v47  ;;  %v2368_v6 = vcombine.high %v2346_v55, %v2346_v55  ;;  %2380 = vst.msk [vmem:[%s21480_s25 + $0x6] sm:$0x1] %vm24874_vm9, %v2346_v55  ;;  %vm24879_vm13 = vmmov %vm24874_vm9  ;;  %v3631_v45 = vrot.slane %v3521_v34, 5  ;;  %v4089_v34 = vld [vmem:[%s21246_s27 + $0x27] sm:$0x1] }
 0x424   : > { %19835 = vmatpush3.msk.msra.mxu1 %vm24872_vm7, %v21162_v19  ;;  %v2581_v56 = vpop.f32.mrf.mxu1  ;;  %19830 = vmatpush3.msk.msra.mxu0 %vm24873_vm3, %v21162_v19  ;;  %v2367_v7 = vrot.slane %v2339_v1, %v21455_v32  ;;  %v2369_v8 = vcombine.high %v2353_v4, %v2353_v4  ;;  %v2370_v9 = vcombine.high %v2360_v5, %v2360_v5  ;;  %vm24882_vm9 = vmmov %vm24881_vm0 }
 0x425   : > { %v2582_v59 = vadd.f32 %v2581_v56, %v2484_v0  ;;  %19836 = vmatprep.subr.mxu1 %v21161_v2  ;;  %19838 = vmatprep.mubr.msk.f32.mxu1 %vm24831_vm15, %v21161_v2  ;;  %2381 = vst.msk [vmem:[%s21480_s25 + $0x26] sm:$0x1] %vm24878_vm10, %v2360_v5  ;;  %vm24885_vm3 = vmmov %vm24880_vm2  ;;  %vm24887_vm10 = vcmask 31744  }
 0x426   : > { %19837 = vmatpush3.msk.msra.mxu1 %vm24875_vm14, %v21162_v19  ;;  %19841 = vmatprep.subr.msk.mxu0 %vm24876_vm1, %v2970_v49  ;;  %2382 = vst.msk [vmem:[%s21480_s25 + $0x46] sm:$0x1] %vm24879_vm13, %v2368_v6  ;;  %vm24883_vm14 = vmmov %vm24876_vm1  ;;  %v2371_v10 = vcombine.high %v2367_v7, %v2367_v7 }
 0x427   : > { %19849 = vmatprep.subr.msk.mxu1 %vm24877_vm4, %v3067_v51  ;;  %2384 = vst.msk [vmem:[%s21480_s25 + $0x86] sm:$0x1] %vm24880_vm2, %v2353_v4  ;;  %19832 = vmatmul.mubr.msk.f32.vlgmr.msra.gmra.mxu0 %vm24881_vm0, %v2582_v59  ;;  %vm24884_vm4 = vmmov %vm24880_vm2 }
 0x428   : > { %19839 = vmatmul.mubr.msk.f32.vlgmr.msra.gmra.mxu1 %vm24882_vm9, %v2587_v58  ;;  %19842 = vmatpush3.msk.msra.mxu0 %vm24883_vm14, %v2970_v49  ;;  %2383 = vst.msk [vmem:[%s21480_s25 + $0x66] sm:$0x1] %vm24884_vm4, %v2370_v9  ;;  %vm24886_vm7 = vmmov %vm24880_vm2  ;;  %vm24896_vm4 = vcmask 1041409  }
 0x429   : > { %19850 = vmatpush3.msk.msra.mxu1 %vm24876_vm1, %v3067_v51  ;;  %2385 = vst.msk [vmem:[%s21480_s25 + $0xa6] sm:$0x1] %vm24885_vm3, %v2367_v7  ;;  %19843 = vmatprep.mubr.msk.f32.mxu0 %vm24887_vm10, %v21818_v11  ;;  %vm24888_vm13 = vmmov %vm24887_vm10 }
 0x42a   : > { %2386 = vst.msk [vmem:[%s21480_s25 + $0xc6] sm:$0x1] %vm24886_vm7, %v2369_v8  ;;  %19851 = vmatprep.mubr.msk.f32.mxu1 %vm24888_vm13, %v21389_v60  ;;  %19857 = vmatprep.subr.mxu0 %v21161_v2  ;;  %vm24889_vm14 = vmmov %vm24880_vm2  ;;  %v3523_v60 = vld [vmem:[%s21246_s27 + $0x16] sm:$0x1] }
 0x42b   : > { %19864 = vmatprep.subr.mxu1 %v21161_v2  ;;  %2387 = vst.msk [vmem:[%s21480_s25 + $0xe6] sm:$0x1] %vm24889_vm14, %v2371_v10  ;;  %vm24890_vm3 = vmmov %vm24887_vm10  ;;  %v3530_v13 = vrot.slane %v3523_v60, 7  ;;  %vm24898_vm14 = vcmask 1042434  }
 0x42c   : > { %19844 = vmatmul.mubr.msk.f32.vlgmr.msra.gmra.mxu0 %vm24890_vm3, %v21278_v21  ;;  %vm24891_vm7 = vmmov %vm24890_vm3 }
 0x42d   : > { %19852 = vmatmul.mubr.msk.f32.vlgmr.msra.gmra.mxu1 %vm24891_vm7, %v21399_v61  ;;  %vm24892_vm2 = vmmov %vm24890_vm3  ;;  %19858 = vmatpush3.msk.msra.mxu0 %vm21260_vm5, %v21162_v19  ;;  %v3519_v61 = vld [vmem:[%s21246_s27 + $0x15] sm:$0x1]  ;;  %v3531_v37 = vsel %vm24896_vm4, %v3530_v13, %v3522_v24  ;;  %vm24900_vm7 = vcmask 130048   ;;  %v21943_v13 = vld [vmem:[%s24758_s1 + $0x8] sm:$0xff] }
 0x42e   : > { %19846 = vmatprep.mubr.msk.f32.mxu0 %vm24892_vm2, %v21285_v22  ;;  %vm24893_vm0 = vmmov %vm24892_vm2  ;;  %19865 = vmatpush3.msk.msra.mxu1 %vm21339_vm11, %v21162_v19  ;;  %v3627_v15 = vrot.slane %v3519_v61, 7  ;;  %v3533_v47 = vsel %vm24898_vm14, %v3532_v33, %v3531_v37 }
 0x42f   : > { %19854 = vmatprep.mubr.msk.f32.mxu1 %vm24893_vm0, %v21408_v62  ;;  %19859 = vmatprep.subr.mxu0 %v21161_v2  ;;  %vm24894_vm9 = vmmov %vm24893_vm0 }
 0x430   : > { %19866 = vmatprep.subr.mxu1 %v21161_v2  ;;  %19847 = vmatmul.mubr.msk.f32.gmra.mxu0 %vm24894_vm9, %v21300_v23  ;;  %vm24895_vm1 = vmmov %vm24893_vm0  ;;  %vm24902_vm0 = vcmask 1043459  }
 0x431   : > { %19855 = vmatmul.mubr.msk.f32.gmra.mxu1 %vm24895_vm1, %v21421_v63  ;;  %19860 = vmatpush3.msk.msra.mxu0 %vm21266_vm6, %v21162_v19  ;;  %vm24897_vm10 = vmmov %vm24896_vm4  ;;  %v3535_v56 = vsel %vm24902_vm0, %v3534_v41, %v3533_v47  ;;  %vm24904_vm1 = vnez %v24793_v54  ;;  %vm24905_vm4 = vnez %v24787_v30  ;;  %v4083_v41 = vld [vmem:[%s21246_s27 + $0x6] sm:$0x1]  ;;  %v4086_v47 = vld [vmem:[%s21246_s27 + $0x36] sm:$0x1] }
 0x432   : > { %19867 = vmatpush3.msk.msra.mxu1 %vm21347_vm12, %v21162_v19  ;;  %19861 = vmatprep.mubr.msk.f32.mxu0 %vm24831_vm15, %v21161_v2  ;;  %v3628_v38 = vsel %vm24897_vm10, %v3627_v15, %v3518_v26  ;;  %vm24899_vm3 = vmmov %vm24898_vm14  ;;  %vm24906_vm10 = vcmask 253952   ;;  %vm24908_vm14 = vcmask 1043456   ;;  %v21957_v15 = vld [vmem:[%s24758_s1 + $0x10] sm:$0xff] }
 0x433   : > { %19868 = vmatprep.mubr.msk.f32.mxu1 %vm24831_vm15, %v21161_v2  ;;  %19871 = vmatprep.subr.mxu0 %v21161_v2  ;;  %v3630_v48 = vsel %vm24899_vm3, %v3629_v35, %v3628_v38  ;;  %vm24901_vm2 = vmmov %vm24900_vm7  ;;  %v4095_v35 = vrot.slane %v4088_v28, 7 }
 0x434   : > { %19878 = vmatprep.subr.mxu1 %v21161_v2  ;;  %vm24903_vm9 = vmmov %vm24902_vm0 }
 0x435   : > { %v3632_v58 = vsel %vm24903_vm9, %v3631_v45, %v3630_v48  ;;  %vm24909_vm3 = vmmov %vm24908_vm14  ;;  %vm24913_vm9 = vcmask 130048  }
 0x4e1   : > { %v2659_v21 = vpop.f32.mrf.mxu0 }
 0x4e3   : > { %v19819_v22 = vpop.f32.mrf.mxu0  ;;  %v2732_v23 = vpop.f32.mrf.mxu1 }
 0x4e4   : > { %v2733_v63 = vadd.f32 %v2732_v23, %v2659_v21 }
 0x4e5   : > { %v19826_v62 = vpop.f32.mrf.mxu1 }
 0x4e7   : > { %v2805_v18 = vpop.f32.mrf.mxu0 }
 0x4e8   : > { %v2879_v20 = vpop.f32.mrf.mxu1  ;;  %v2809_v27 = vadd.f32 %v2805_v18, %v2733_v63  ;;  %v21925_v63 = vld [vmem:[%s24758_s1] sm:$0xff]  ;;  %v21972_v18 = vld [vmem:[%s24758_s1 + $0x38] sm:$0xff] }
 0x4e9   : > { %v19833_v29 = vpop.f32.mrf.mxu0 }
 0x4ea   : > { %v19840_v31 = vpop.f32.mrf.mxu1  ;;  %v2883_v36 = vadd.f32 %v2879_v20, %v2809_v27  ;;  %v21979_v20 = vld [vmem:[%s24758_s1 + $0x18] sm:$0xff]  ;;  %v4084_v29 = vld [vmem:[%s21246_s27 + $0x16] sm:$0x1] }
 0x4eb   : > { %v4192_v37 = vrot.slane %v4084_v29, 7 }
 0x4ec   : > { %v19845_v39 = vpop.f32.mrf.mxu0  ;;  %vm2884_vm13 = vcmp.ge.f32.partialorder %v2883_v36, 0.0  ;;  %v2885_v42 = vmul.f32 0.2, %v2883_v36 }
 0x4ed   : > { %v19853_v40 = vpop.f32.mrf.mxu1 }
 0x4ee   : > { %v3142_v43 = vadd.f32 %v19853_v40, %v19845_v39  ;;  %v3039_v46 = vpop.f32.mrf.mxu0  ;;  %v2886_v49 = vsel %vm2884_vm13, %v2883_v36, %v2885_v42  ;;  %vm24907_vm13 = vnez %v24795_v57  ;;  %v4085_v36 = vld [vmem:[%s21246_s27 + $0x26] sm:$0x1]  ;;  %v4087_v40 = vld [vmem:[%s21246_s27 + $0x7] sm:$0x1] }
 0x4ef   : > { %v3136_v3 = vpop.f32.mrf.mxu1  ;;  %v2888_v52 = vcombine.high %v2886_v49, %v2886_v49  ;;  %v2895_v53 = vrot.slane %v2886_v49, %v21455_v32  ;;  %v4194_v48 = vrot.slane %v4085_v36, 6 }
 0x4f0   : > { %v3137_v51 = vadd.f32 %v3136_v3, %v3039_v46  ;;  %19862 = vmatmul.mubr.msk.f32.vlgmr.msra.gmra.mxu0 %vm24900_vm7, %v3142_v43  ;;  %v19848_v55 = vpop.f32.mrf.mxu0  ;;  %vm24910_vm7 = vmmov %vm24906_vm10  ;;  %v4090_v43 = vld [vmem:[%s21246_s27 + $0x37] sm:$0x1]  ;;  %v4097_v3 = vrot.slane %v4089_v34, 6 }
 0x4f1   : > { %v19856_v0 = vpop.f32.mrf.mxu1  ;;  %19872 = vmatpush3.msk.msra.mxu0 %vm21309_vm8, %v21162_v19  ;;  %19875 = vmatprep.mubr.msk.f32.mxu0 %vm24831_vm15, %v21161_v2  ;;  %v2902_v59 = vrot.slane %v2888_v52, %v21455_v32  ;;  %v2903_v1 = vcombine.high %v2895_v53, %v2895_v53  ;;  %v2911_v4 = vrot.slane %v2895_v53, %v21455_v32 }
 0x4f2   : > { %19869 = vmatmul.mubr.msk.f32.vlgmr.msra.gmra.mxu1 %vm24901_vm2, %v3137_v51  ;;  %19873 = vmatprep.subr.mxu0 %v21161_v2  ;;  %v3049_v5 = vpop.f32.mrf.mxu0  ;;  %v3152_v7 = vadd.f32 %v19856_v0, %v19848_v55  ;;  %vm24911_vm2 = vmmov %vm24910_vm7  ;;  %v4099_v0 = vrot.slane %v4090_v43, 5  ;;  %v4653_v43 = vld [vmem:[%s21246_s27 + $0x18] sm:$0x1] }
 0x4f3   : > { %19879 = vmatpush3.msk.msra.mxu1 %vm24904_vm1, %v21162_v19  ;;  %v3146_v6 = vpop.f32.mrf.mxu1  ;;  %19874 = vmatpush3.msk.msra.mxu0 %vm24905_vm4, %v21162_v19  ;;  %v2904_v9 = vcombine.high %v2902_v59, %v2902_v59  ;;  %v2918_v10 = vrot.slane %v2902_v59, %v21455_v32  ;;  %v2925_v21 = vrot.slane %v2903_v1, %v21455_v32  ;;  %vm24912_vm0 = vmmov %vm24911_vm2  ;;  %v4196_v59 = vrot.slane %v4086_v47, 5  ;;  %v4654_v47 = vld [vmem:[%s21246_s27 + $0x28] sm:$0x1] }
 0x4f4   : > { %v3147_v8 = vadd.f32 %v3146_v6, %v3049_v5  ;;  %19880 = vmatprep.subr.mxu1 %v21161_v2  ;;  %19882 = vmatprep.mubr.msk.f32.mxu1 %vm24831_vm15, %v21161_v2  ;;  %v2933_v22 = vcombine.high %v2911_v4, %v2911_v4  ;;  %2945 = vst.msk [vmem:[%s21480_s25 + $0x8] sm:$0x1] %vm24906_vm10, %v2911_v4  ;;  %vm24914_vm10 = vmmov %vm24913_vm9 }
 0x4f5   : > { %19881 = vmatpush3.msk.msra.mxu1 %vm24907_vm13, %v21162_v19  ;;  %19885 = vmatprep.subr.msk.mxu0 %vm24908_vm14, %v3535_v56  ;;  %v2932_v23 = vrot.slane %v2904_v9, %v21455_v32  ;;  %v2934_v60 = vcombine.high %v2918_v10, %v2918_v10  ;;  %v2935_v61 = vcombine.high %v2925_v21, %v2925_v21  ;;  %vm24915_vm13 = vmmov %vm24909_vm3 }
 0x4f6   : > { %19893 = vmatprep.subr.msk.mxu1 %vm24909_vm3, %v3632_v58  ;;  %2946 = vst.msk [vmem:[%s21480_s25 + $0x28] sm:$0x1] %vm24910_vm7, %v2925_v21  ;;  %19876 = vmatmul.mubr.msk.f32.vlgmr.msra.gmra.mxu0 %vm24913_vm9, %v3147_v8  ;;  %vm24916_vm14 = vmmov %vm24909_vm3  ;;  %vm24920_vm7 = vcmask 31744  }
 0x4f7   : > { %2947 = vst.msk [vmem:[%s21480_s25 + $0x48] sm:$0x1] %vm24911_vm2, %v2933_v22  ;;  %19883 = vmatmul.mubr.msk.f32.vlgmr.msra.gmra.mxu1 %vm24914_vm10, %v3152_v7  ;;  %19886 = vmatpush3.msk.msra.mxu0 %vm24915_vm13, %v3535_v56  ;;  %v2936_v62 = vcombine.high %v2932_v23, %v2932_v23  ;;  %vm24917_vm3 = vmmov %vm24912_vm0 }
 0x4f8   : > { %2949 = vst.msk [vmem:[%s21480_s25 + $0x88] sm:$0x1] %vm24912_vm0, %v2918_v10  ;;  %19894 = vmatpush3.msk.msra.mxu1 %vm24916_vm14, %v3632_v58  ;;  %vm24918_vm4 = vmmov %vm24912_vm0  ;;  %19887 = vmatprep.mubr.msk.f32.mxu0 %vm24920_vm7, %v21818_v11 }
 0x4f9   : > { %2948 = vst.msk [vmem:[%s21480_s25 + $0x68] sm:$0x1] %vm24917_vm3, %v2935_v61  ;;  %vm24919_vm1 = vmmov %vm24912_vm0  ;;  %19901 = vmatprep.subr.mxu0 %v21161_v2  ;;  %19908 = vmatprep.subr.mxu1 %v21161_v2  ;;  %vm24929_vm3 = vcmask 1041409  }
 0x4fa   : > { %2950 = vst.msk [vmem:[%s21480_s25 + $0xa8] sm:$0x1] %vm24918_vm4, %v2932_v23  ;;  %vm24921_vm2 = vmmov %vm24920_vm7  ;;  %v4096_v51 = vsel %vm24929_vm3, %v4095_v35, %v4087_v40 }
 0x4fb   : > { %2951 = vst.msk [vmem:[%s21480_s25 + $0xc8] sm:$0x1] %vm24919_vm1, %v2934_v60  ;;  %19895 = vmatprep.mubr.msk.f32.mxu1 %vm24921_vm2, %v21925_v63  ;;  %vm24922_vm13 = vmmov %vm24912_vm0 }
 0x4fc   : > { %2952 = vst.msk [vmem:[%s21480_s25 + $0xe8] sm:$0x1] %vm24922_vm13, %v2936_v62  ;;  %vm24923_vm1 = vmmov %vm24921_vm2  ;;  %vm24931_vm13 = vcmask 1042434  }
 0x4fd   : > { %19888 = vmatmul.mubr.msk.f32.vlgmr.msra.gmra.mxu0 %vm24923_vm1, %v21936_v12  ;;  %vm24924_vm4 = vmmov %vm24923_vm1  ;;  %v4098_v5 = vsel %vm24931_vm13, %v4097_v3, %v4096_v51 }
 0x4fe   : > { %19896 = vmatmul.mubr.msk.f32.vlgmr.msra.gmra.mxu1 %vm24924_vm4, %v21943_v13  ;;  %vm24925_vm0 = vmmov %vm24923_vm1  ;;  %19902 = vmatpush3.msk.msra.mxu0 %vm21260_vm5, %v21162_v19  ;;  %vm24933_vm4 = vcmask 130048  }
 0x4ff   : > { %19890 = vmatprep.mubr.msk.f32.mxu0 %vm24925_vm0, %v21950_v14  ;;  %vm24926_vm9 = vmmov %vm24925_vm0  ;;  %19909 = vmatpush3.msk.msra.mxu1 %vm21339_vm11, %v21162_v19 }
 0x500   : > { %19898 = vmatprep.mubr.msk.f32.mxu1 %vm24926_vm9, %v21957_v15  ;;  %19903 = vmatprep.subr.mxu0 %v21161_v2  ;;  %vm24927_vm10 = vmmov %vm24925_vm0  ;;  %vm24935_vm9 = vcmask 1043459  }
 0x501   : > { %19910 = vmatprep.subr.mxu1 %v21161_v2  ;;  %19891 = vmatmul.mubr.msk.f32.gmra.mxu0 %vm24927_vm10, %v21972_v18  ;;  %vm24928_vm14 = vmmov %vm24925_vm0  ;;  %v4100_v23 = vsel %vm24935_vm9, %v4099_v0, %v4098_v5  ;;  %v4648_v0 = vld [vmem:[%s21246_s27 + $0x7] sm:$0x1]  ;;  %v4651_v5 = vld [vmem:[%s21246_s27 + $0x37] sm:$0x1] }
 0x502   : > { %19899 = vmatmul.mubr.msk.f32.gmra.mxu1 %vm24928_vm14, %v21979_v20  ;;  %19904 = vmatpush3.msk.msra.mxu0 %vm21266_vm6, %v21162_v19  ;;  %vm24930_vm7 = vmmov %vm24929_vm3  ;;  %vm24937_vm14 = vnez %v24793_v54  ;;  %vm24938_vm3 = vnez %v24787_v30 }
 0x503   : > { %19911 = vmatpush3.msk.msra.mxu1 %vm21347_vm12, %v21162_v19  ;;  %19905 = vmatprep.mubr.msk.f32.mxu0 %vm24831_vm15, %v21161_v2  ;;  %v4193_v52 = vsel %vm24930_vm7, %v4192_v37, %v4083_v41  ;;  %vm24932_vm1 = vmmov %vm24931_vm13  ;;  %vm24939_vm7 = vcmask 253952   ;;  %vm24941_vm13 = vcmask 1043456  }
 0x504   : > { %19912 = vmatprep.mubr.msk.f32.mxu1 %vm24831_vm15, %v21161_v2  ;;  %19915 = vmatprep.subr.mxu0 %v21161_v2  ;;  %v4195_v6 = vsel %vm24932_vm1, %v4194_v48, %v4193_v52  ;;  %vm24934_vm0 = vmmov %vm24933_vm4  ;;  %v4660_v48 = vrot.slane %v4653_v43, 7 }
 0x505   : > { %19922 = vmatprep.subr.mxu1 %v21161_v2  ;;  %vm24936_vm10 = vmmov %vm24935_vm9 }
 0x506   : > { %v4197_v60 = vsel %vm24936_vm10, %v4196_v59, %v4195_v6  ;;  %vm24942_vm1 = vmmov %vm24941_vm13  ;;  %vm24946_vm10 = vcmask 130048  }
 0x5b0   : > { %v3224_v24 = vpop.f32.mrf.mxu0 }
 0x5b2   : > { %v19863_v26 = vpop.f32.mrf.mxu0  ;;  %v3297_v27 = vpop.f32.mrf.mxu1 }
 0x5b3   : > { %v3298_v33 = vadd.f32 %v3297_v27, %v3224_v24 }
 0x5b4   : > { %v19870_v31 = vpop.f32.mrf.mxu1 }
 0x5b6   : > { %v3370_v38 = vpop.f32.mrf.mxu0 }
 0x5b7   : > { %v3444_v39 = vpop.f32.mrf.mxu1  ;;  %v3374_v42 = vadd.f32 %v3370_v38, %v3298_v33 }
 0x5b8   : > { %v19877_v45 = vpop.f32.mrf.mxu0 }
 0x5b9   : > { %v19884_v46 = vpop.f32.mrf.mxu1  ;;  %v3448_v49 = vadd.f32 %v3444_v39, %v3374_v42  ;;  %v4649_v45 = vld [vmem:[%s21246_s27 + $0x17] sm:$0x1] }
 0x5ba   : > { %v4757_v51 = vrot.slane %v4649_v45, 7 }
 0x5bb   : > { %vm3449_vm2 = vcmp.ge.f32.partialorder %v3448_v49, 0.0  ;;  %v3450_v56 = vmul.f32 0.2, %v3448_v49 }
 0x5bd   : > { %v19889_v53 = vpop.f32.mrf.mxu0  ;;  %v3451_v7 = vsel %vm3449_vm2, %v3448_v49, %v3450_v56  ;;  %vm24940_vm2 = vnez %v24795_v57  ;;  %v4650_v49 = vld [vmem:[%s21246_s27 + $0x27] sm:$0x1] }
 0x5be   : > { %v19897_v55 = vpop.f32.mrf.mxu1  ;;  %v3453_v9 = vcombine.high %v3451_v7, %v3451_v7  ;;  %v3460_v10 = vrot.slane %v3451_v7, %v21455_v32  ;;  %v4759_v6 = vrot.slane %v4650_v49, 6 }
 0x5bf   : > { %v3707_v58 = vadd.f32 %v19897_v55, %v19889_v53  ;;  %v3604_v1 = vpop.f32.mrf.mxu0  ;;  %v4652_v55 = vld [vmem:[%s21246_s27 + $0x8] sm:$0x1] }
 0x5c0   : > { %v3701_v4 = vpop.f32.mrf.mxu1  ;;  %v3467_v61 = vrot.slane %v3453_v9, %v21455_v32  ;;  %v3468_v62 = vcombine.high %v3460_v10, %v3460_v10  ;;  %v3476_v24 = vrot.slane %v3460_v10, %v21455_v32 }
 0x5c1   : > { %v3702_v8 = vadd.f32 %v3701_v4, %v3604_v1  ;;  %19906 = vmatmul.mubr.msk.f32.vlgmr.msra.gmra.mxu0 %vm24933_vm4, %v3707_v58  ;;  %v19892_v21 = vpop.f32.mrf.mxu0  ;;  %vm24943_vm4 = vmmov %vm24939_vm7  ;;  %v4655_v58 = vld [vmem:[%s21246_s27 + $0x38] sm:$0x1]  ;;  %v4662_v4 = vrot.slane %v4654_v47, 6 }
 0x5c2   : > { %v19900_v22 = vpop.f32.mrf.mxu1  ;;  %19916 = vmatpush3.msk.msra.mxu0 %vm21309_vm8, %v21162_v19  ;;  %19919 = vmatprep.mubr.msk.f32.mxu0 %vm24831_vm15, %v21161_v2  ;;  %v3469_v31 = vcombine.high %v3467_v61, %v3467_v61  ;;  %v3483_v33 = vrot.slane %v3467_v61, %v21455_v32  ;;  %v3490_v34 = vrot.slane %v3468_v62, %v21455_v32  ;;  %v4761_v61 = vrot.slane %v4651_v5, 5  ;;  %v5219_v5 = vld [vmem:[%s21246_s27 + $0x29] sm:$0x1] }
 0x5c3   : > { %19913 = vmatmul.mubr.msk.f32.vlgmr.msra.gmra.mxu1 %vm24934_vm0, %v3702_v8  ;;  %19917 = vmatprep.subr.mxu0 %v21161_v2  ;;  %v3614_v26 = vpop.f32.mrf.mxu0  ;;  %v3717_v28 = vadd.f32 %v19900_v22, %v19892_v21  ;;  %v3498_v35 = vcombine.high %v3476_v24, %v3476_v24  ;;  %3510 = vst.msk [vmem:[%s21480_s25 + $0xa] sm:$0x1] %vm24939_vm7, %v3476_v24  ;;  %vm24944_vm0 = vmmov %vm24943_vm4  ;;  %v4664_v22 = vrot.slane %v4655_v58, 5  ;;  %v5218_v58 = vld [vmem:[%s21246_s27 + $0x19] sm:$0x1] }
 0x5c4   : > { %19923 = vmatpush3.msk.msra.mxu1 %vm24937_vm14, %v21162_v19  ;;  %v3711_v27 = vpop.f32.mrf.mxu1  ;;  %19918 = vmatpush3.msk.msra.mxu0 %vm24938_vm3, %v21162_v19  ;;  %v3497_v36 = vrot.slane %v3469_v31, %v21455_v32  ;;  %v3499_v37 = vcombine.high %v3483_v33, %v3483_v33  ;;  %v3500_v38 = vcombine.high %v3490_v34, %v3490_v34  ;;  %vm24945_vm9 = vmmov %vm24944_vm0 }
 0x5c5   : > { %v3712_v29 = vadd.f32 %v3711_v27, %v3614_v26  ;;  %19924 = vmatprep.subr.mxu1 %v21161_v2  ;;  %19926 = vmatprep.mubr.msk.f32.mxu1 %vm24831_vm15, %v21161_v2  ;;  %3511 = vst.msk [vmem:[%s21480_s25 + $0x2a] sm:$0x1] %vm24943_vm4, %v3490_v34  ;;  %vm24947_vm7 = vmmov %vm24946_vm10  ;;  %vm24953_vm4 = vcmask 31744  }
 0x5c6   : > { %19925 = vmatpush3.msk.msra.mxu1 %vm24940_vm2, %v21162_v19  ;;  %19929 = vmatprep.subr.msk.mxu0 %vm24941_vm13, %v4100_v23  ;;  %3512 = vst.msk [vmem:[%s21480_s25 + $0x4a] sm:$0x1] %vm24944_vm0, %v3498_v35  ;;  %vm24948_vm2 = vmmov %vm24942_vm1  ;;  %v3501_v39 = vcombine.high %v3497_v36, %v3497_v36 }
 0x5c7   : > { %19937 = vmatprep.subr.msk.mxu1 %vm24942_vm1, %v4197_v60  ;;  %3514 = vst.msk [vmem:[%s21480_s25 + $0x8a] sm:$0x1] %vm24945_vm9, %v3483_v33  ;;  %19920 = vmatmul.mubr.msk.f32.vlgmr.msra.gmra.mxu0 %vm24946_vm10, %v3712_v29  ;;  %vm24949_vm13 = vmmov %vm24942_vm1 }
 0x5c8   : > { %19927 = vmatmul.mubr.msk.f32.vlgmr.msra.gmra.mxu1 %vm24947_vm7, %v3717_v28  ;;  %19930 = vmatpush3.msk.msra.mxu0 %vm24948_vm2, %v4100_v23  ;;  %vm24950_vm1 = vmmov %vm24944_vm0 }
 0x5c9   : > { %19938 = vmatpush3.msk.msra.mxu1 %vm24949_vm13, %v4197_v60  ;;  %3513 = vst.msk [vmem:[%s21480_s25 + $0x6a] sm:$0x1] %vm24950_vm1, %v3500_v38  ;;  %vm24951_vm3 = vmmov %vm24944_vm0  ;;  %19931 = vmatprep.mubr.msk.f32.mxu0 %vm24953_vm4, %v21818_v11 }
 0x5ca   : > { %3515 = vst.msk [vmem:[%s21480_s25 + $0xaa] sm:$0x1] %vm24951_vm3, %v3497_v36  ;;  %vm24952_vm14 = vmmov %vm24944_vm0  ;;  %19945 = vmatprep.subr.mxu0 %v21161_v2  ;;  %19952 = vmatprep.subr.mxu1 %v21161_v2 }
 0x5cb   : > { %3516 = vst.msk [vmem:[%s21480_s25 + $0xca] sm:$0x1] %vm24952_vm14, %v3499_v37  ;;  %vm24954_vm0 = vmmov %vm24953_vm4 }
 0x5cc   : > { %19939 = vmatprep.mubr.msk.f32.mxu1 %vm24954_vm0, %v21925_v63  ;;  %vm24955_vm2 = vmmov %vm24950_vm1  ;;  %vm24962_vm1 = vcmask 1041409  }
 0x5cd   : > { %3517 = vst.msk [vmem:[%s21480_s25 + $0xea] sm:$0x1] %vm24955_vm2, %v3501_v39  ;;  %vm24956_vm9 = vmmov %vm24954_vm0  ;;  %v4661_v8 = vsel %vm24962_vm1, %v4660_v48, %v4652_v55  ;;  %vm24964_vm2 = vcmask 1042434  }
 0x5ce   : > { %19932 = vmatmul.mubr.msk.f32.vlgmr.msra.gmra.mxu0 %vm24956_vm9, %v21936_v12  ;;  %vm24957_vm10 = vmmov %vm24954_vm0  ;;  %v4663_v26 = vsel %vm24964_vm2, %v4662_v4, %v4661_v8 }
 0x5cf   : > { %19940 = vmatmul.mubr.msk.f32.vlgmr.msra.gmra.mxu1 %vm24957_vm10, %v21943_v13  ;;  %vm24958_vm14 = vmmov %vm24954_vm0  ;;  %19946 = vmatpush3.msk.msra.mxu0 %vm21260_vm5, %v21162_v19  ;;  %vm24966_vm10 = vcmask 130048  }
 0x5d0   : > { %19934 = vmatprep.mubr.msk.f32.mxu0 %vm24958_vm14, %v21950_v14  ;;  %vm24959_vm3 = vmmov %vm24954_vm0  ;;  %19953 = vmatpush3.msk.msra.mxu1 %vm21339_vm11, %v21162_v19 }
 0x5d1   : > { %19942 = vmatprep.mubr.msk.f32.mxu1 %vm24959_vm3, %v21957_v15  ;;  %19947 = vmatprep.subr.mxu0 %v21161_v2  ;;  %vm24960_vm7 = vmmov %vm24954_vm0  ;;  %vm24968_vm3 = vcmask 1043459  }
 0x5d2   : > { %19954 = vmatprep.subr.mxu1 %v21161_v2  ;;  %19935 = vmatmul.mubr.msk.f32.gmra.mxu0 %vm24960_vm7, %v21972_v18  ;;  %vm24961_vm13 = vmmov %vm24954_vm0  ;;  %v4665_v36 = vsel %vm24968_vm3, %v4664_v22, %v4663_v26  ;;  %v5213_v22 = vld [vmem:[%s21246_s27 + $0x8] sm:$0x1]  ;;  %v5216_v26 = vld [vmem:[%s21246_s27 + $0x38] sm:$0x1] }
 0x5d3   : > { %19943 = vmatmul.mubr.msk.f32.gmra.mxu1 %vm24961_vm13, %v21979_v20  ;;  %19948 = vmatpush3.msk.msra.mxu0 %vm21266_vm6, %v21162_v19  ;;  %vm24963_vm4 = vmmov %vm24962_vm1  ;;  %vm24970_vm13 = vnez %v24793_v54  ;;  %vm24971_vm1 = vnez %v24787_v30 }
 0x5d4   : > { %19955 = vmatpush3.msk.msra.mxu1 %vm21347_vm12, %v21162_v19  ;;  %19949 = vmatprep.mubr.msk.f32.mxu0 %vm24831_vm15, %v21161_v2  ;;  %v4758_v9 = vsel %vm24963_vm4, %v4757_v51, %v4648_v0  ;;  %vm24965_vm9 = vmmov %vm24964_vm2  ;;  %vm24972_vm4 = vcmask 253952   ;;  %vm24974_vm2 = vcmask 1043456  }
 0x5d5   : > { %19956 = vmatprep.mubr.msk.f32.mxu1 %vm24831_vm15, %v21161_v2  ;;  %19959 = vmatprep.subr.mxu0 %v21161_v2  ;;  %v4760_v27 = vsel %vm24965_vm9, %v4759_v6, %v4758_v9  ;;  %vm24967_vm14 = vmmov %vm24966_vm10  ;;  %v5225_v6 = vrot.slane %v5218_v58, 7 }
 0x5d6   : > { %19966 = vmatprep.subr.mxu1 %v21161_v2  ;;  %vm24969_vm7 = vmmov %vm24968_vm3 }
 0x5d7   : > { %v4762_v37 = vsel %vm24969_vm7, %v4761_v61, %v4760_v27  ;;  %vm24975_vm9 = vmmov %vm24974_vm2  ;;  %vm24979_vm7 = vcmask 130048  }
 0x5d8   : > { %vm24978_vm3 = vmmov %vm24972_vm4 }
 0x681   : > { %v3789_v40 = vpop.f32.mrf.mxu0 }
 0x683   : > { %v19907_v41 = vpop.f32.mrf.mxu0  ;;  %v3862_v42 = vpop.f32.mrf.mxu1 }
 0x684   : > { %v3863_v3 = vadd.f32 %v3862_v42, %v3789_v40 }
 0x685   : > { %v19914_v46 = vpop.f32.mrf.mxu1 }
 0x687   : > { %v3935_v52 = vpop.f32.mrf.mxu0 }
 0x688   : > { %v4009_v53 = vpop.f32.mrf.mxu1  ;;  %v3939_v56 = vadd.f32 %v3935_v52, %v3863_v3 }
 0x689   : > { %v19921_v59 = vpop.f32.mrf.mxu0 }
 0x68a   : > { %v19928_v1 = vpop.f32.mrf.mxu1  ;;  %v4013_v7 = vadd.f32 %v4009_v53, %v3939_v56  ;;  %v5214_v59 = vld [vmem:[%s21246_s27 + $0x18] sm:$0x1] }
 0x68b   : > { %v5322_v8 = vrot.slane %v5214_v59, 7 }
 0x68c   : > { %vm4014_vm0 = vcmp.ge.f32.partialorder %v4013_v7, 0.0  ;;  %v4015_v23 = vmul.f32 0.2, %v4013_v7 }
 0x68e   : > { %v19933_v10 = vpop.f32.mrf.mxu0  ;;  %v4016_v28 = vsel %vm4014_vm0, %v4013_v7, %v4015_v23  ;;  %vm24973_vm0 = vnez %v24795_v57  ;;  %v5215_v7 = vld [vmem:[%s21246_s27 + $0x28] sm:$0x1] }
 0x68f   : > { %v19941_v21 = vpop.f32.mrf.mxu1  ;;  %v4018_v31 = vcombine.high %v4016_v28, %v4016_v28  ;;  %v4025_v33 = vrot.slane %v4016_v28, %v21455_v32  ;;  %v5324_v27 = vrot.slane %v5215_v7, 6 }
 0x690   : > { %v4272_v60 = vadd.f32 %v19941_v21, %v19933_v10  ;;  %v4169_v62 = vpop.f32.mrf.mxu0  ;;  %v5217_v21 = vld [vmem:[%s21246_s27 + $0x9] sm:$0x1] }
 0x691   : > { %v4266_v24 = vpop.f32.mrf.mxu1  ;;  %v4032_v38 = vrot.slane %v4018_v31, %v21455_v32  ;;  %v4033_v39 = vcombine.high %v4025_v33, %v4025_v33  ;;  %v4041_v40 = vrot.slane %v4025_v33, %v21455_v32 }
 0x692   : > { %v4267_v29 = vadd.f32 %v4266_v24, %v4169_v62  ;;  %19950 = vmatmul.mubr.msk.f32.vlgmr.msra.gmra.mxu0 %vm24966_vm10, %v4272_v60  ;;  %v19936_v34 = vpop.f32.mrf.mxu0  ;;  %vm24976_vm10 = vmmov %vm24972_vm4  ;;  %v5220_v60 = vld [vmem:[%s21246_s27 + $0x39] sm:$0x1]  ;;  %v5227_v24 = vrot.slane %v5219_v5, 6 }
 0x693   : > { %v19944_v35 = vpop.f32.mrf.mxu1  ;;  %19960 = vmatpush3.msk.msra.mxu0 %vm21309_vm8, %v21162_v19  ;;  %19963 = vmatprep.mubr.msk.f32.mxu0 %vm24831_vm15, %v21161_v2  ;;  %v4034_v46 = vcombine.high %v4032_v38, %v4032_v38  ;;  %v4048_v3 = vrot.slane %v4032_v38, %v21455_v32  ;;  %v4055_v47 = vrot.slane %v4033_v39, %v21455_v32  ;;  %v5326_v38 = vrot.slane %v5216_v26, 5 }
 0x694   : > { %19957 = vmatmul.mubr.msk.f32.vlgmr.msra.gmra.mxu1 %vm24967_vm14, %v4267_v29  ;;  %19961 = vmatprep.subr.mxu0 %v21161_v2  ;;  %v4179_v41 = vpop.f32.mrf.mxu0  ;;  %v4282_v43 = vadd.f32 %v19944_v35, %v19936_v34  ;;  %v4063_v48 = vcombine.high %v4041_v40, %v4041_v40  ;;  %4075 = vst.msk [vmem:[%s21480_s25 + $0xc] sm:$0x1] %vm24972_vm4, %v4041_v40  ;;  %vm24977_vm14 = vmmov %vm24972_vm4  ;;  %v5229_v35 = vrot.slane %v5220_v60, 5  ;;  %v5779_v60 = vld [vmem:[%s21246_s27 + $0x19] sm:$0x1] }
 0x695   : > { %19967 = vmatpush3.msk.msra.mxu1 %vm24970_vm13, %v21162_v19  ;;  %v4276_v42 = vpop.f32.mrf.mxu1  ;;  %19962 = vmatpush3.msk.msra.mxu0 %vm24971_vm1, %v21162_v19  ;;  %v4062_v49 = vrot.slane %v4034_v46, %v21455_v32  ;;  %v4064_v51 = vcombine.high %v4048_v3, %v4048_v3  ;;  %v4065_v52 = vcombine.high %v4055_v47, %v4055_v47  ;;  %vm24980_vm4 = vmmov %vm24979_vm7 }
 0x696   : > { %v4277_v45 = vadd.f32 %v4276_v42, %v4179_v41  ;;  %19968 = vmatprep.subr.mxu1 %v21161_v2  ;;  %19970 = vmatprep.mubr.msk.f32.mxu1 %vm24831_vm15, %v21161_v2  ;;  %4076 = vst.msk [vmem:[%s21480_s25 + $0x2c] sm:$0x1] %vm24976_vm10, %v4055_v47  ;;  %vm24984_vm1 = vmmov %vm24978_vm3  ;;  %vm24986_vm10 = vcmask 31744  }
 0x697   : > { %19969 = vmatpush3.msk.msra.mxu1 %vm24973_vm0, %v21162_v19  ;;  %19973 = vmatprep.subr.msk.mxu0 %vm24974_vm2, %v4665_v36  ;;  %4077 = vst.msk [vmem:[%s21480_s25 + $0x4c] sm:$0x1] %vm24977_vm14, %v4063_v48  ;;  %vm24981_vm0 = vmmov %vm24974_vm2  ;;  %v4066_v53 = vcombine.high %v4062_v49, %v4062_v49 }
 0x698   : > { %19981 = vmatprep.subr.msk.mxu1 %vm24975_vm9, %v4762_v37  ;;  %4079 = vst.msk [vmem:[%s21480_s25 + $0x8c] sm:$0x1] %vm24978_vm3, %v4048_v3  ;;  %19964 = vmatmul.mubr.msk.f32.vlgmr.msra.gmra.mxu0 %vm24979_vm7, %v4277_v45  ;;  %vm24982_vm2 = vmmov %vm24981_vm0 }
 0x699   : > { %19971 = vmatmul.mubr.msk.f32.vlgmr.msra.gmra.mxu1 %vm24980_vm4, %v4282_v43  ;;  %19974 = vmatpush3.msk.msra.mxu0 %vm24981_vm0, %v4665_v36  ;;  %vm24983_vm9 = vmmov %vm24978_vm3  ;;  %4080 = vst.msk [vmem:[%s21480_s25 + $0xac] sm:$0x1] %vm24984_vm1, %v4062_v49 }
 0x69a   : > { %19982 = vmatpush3.msk.msra.mxu1 %vm24982_vm2, %v4762_v37  ;;  %4078 = vst.msk [vmem:[%s21480_s25 + $0x6c] sm:$0x1] %vm24983_vm9, %v4065_v52  ;;  %vm24985_vm13 = vmmov %vm24984_vm1  ;;  %19975 = vmatprep.mubr.msk.f32.mxu0 %vm24986_vm10, %v21818_v11  ;;  %vm24995_vm9 = vcmask 1041409  }
 0x69b   : > { %4081 = vst.msk [vmem:[%s21480_s25 + $0xcc] sm:$0x1] %vm24985_vm13, %v4064_v51  ;;  %vm24987_vm14 = vmmov %vm24986_vm10  ;;  %19989 = vmatprep.subr.mxu0 %v21161_v2  ;;  %19996 = vmatprep.subr.mxu1 %v21161_v2  ;;  %v5226_v29 = vsel %vm24995_vm9, %v5225_v6, %v5217_v21 }
 0x69c   : > { %19983 = vmatprep.mubr.msk.f32.mxu1 %vm24987_vm14, %v21925_v63  ;;  %vm24988_vm0 = vmmov %vm24984_vm1 }
 0x69d   : > { %4082 = vst.msk [vmem:[%s21480_s25 + $0xec] sm:$0x1] %vm24988_vm0, %v4066_v53  ;;  %vm24989_vm3 = vmmov %vm24986_vm10  ;;  %vm24997_vm0 = vcmask 1042434  }
 0x69e   : > { %19976 = vmatmul.mubr.msk.f32.vlgmr.msra.gmra.mxu0 %vm24989_vm3, %v21936_v12  ;;  %vm24990_vm7 = vmmov %vm24989_vm3  ;;  %v5228_v41 = vsel %vm24997_vm0, %v5227_v24, %v5226_v29  ;;  %v5784_v24 = vld [vmem:[%s21246_s27 + $0x2a] sm:$0x1] }
 0x69f   : > { %19984 = vmatmul.mubr.msk.f32.vlgmr.msra.gmra.mxu1 %vm24990_vm7, %v21943_v13  ;;  %vm24991_vm13 = vmmov %vm24989_vm3  ;;  %19990 = vmatpush3.msk.msra.mxu0 %vm21260_vm5, %v21162_v19  ;;  %vm24999_vm7 = vcmask 130048  }
 0x6a0   : > { %19978 = vmatprep.mubr.msk.f32.mxu0 %vm24991_vm13, %v21950_v14  ;;  %vm24992_vm1 = vmmov %vm24989_vm3  ;;  %19997 = vmatpush3.msk.msra.mxu1 %vm21339_vm11, %v21162_v19 }
 0x6a1   : > { %19986 = vmatprep.mubr.msk.f32.mxu1 %vm24992_vm1, %v21957_v15  ;;  %19991 = vmatprep.subr.mxu0 %v21161_v2  ;;  %vm24993_vm4 = vmmov %vm24992_vm1 }
 0x6a2   : > { %19998 = vmatprep.subr.mxu1 %v21161_v2  ;;  %19979 = vmatmul.mubr.msk.f32.gmra.mxu0 %vm24993_vm4, %v21972_v18  ;;  %vm24994_vm2 = vmmov %vm24992_vm1  ;;  %vm25001_vm1 = vcmask 1043459  }
 0x6a3   : > { %19987 = vmatmul.mubr.msk.f32.gmra.mxu1 %vm24994_vm2, %v21979_v20  ;;  %19992 = vmatpush3.msk.msra.mxu0 %vm21266_vm6, %v21162_v19  ;;  %vm24996_vm10 = vmmov %vm24995_vm9  ;;  %v5230_v49 = vsel %vm25001_vm1, %v5229_v35, %v5228_v41  ;;  %vm25003_vm2 = vnez %v24793_v54  ;;  %vm25004_vm9 = vnez %v24787_v30 }
 0x6a4   : > { %19999 = vmatpush3.msk.msra.mxu1 %vm21347_vm12, %v21162_v19  ;;  %19993 = vmatprep.mubr.msk.f32.mxu0 %vm24831_vm15, %v21161_v2  ;;  %v5323_v31 = vsel %vm24996_vm10, %v5322_v8, %v5213_v22  ;;  %vm24998_vm3 = vmmov %vm24997_vm0  ;;  %vm25005_vm10 = vcmask 253952   ;;  %vm25007_vm0 = vcmask 1043456  }
 0x6a5   : > { %20000 = vmatprep.mubr.msk.f32.mxu1 %vm24831_vm15, %v21161_v2  ;;  %20003 = vmatprep.subr.mxu0 %v21161_v2  ;;  %v5325_v42 = vsel %vm24998_vm3, %v5324_v27, %v5323_v31  ;;  %vm25000_vm13 = vmmov %vm24999_vm7  ;;  %v5780_v27 = vld [vmem:[%s21246_s27 + $0x29] sm:$0x1] }
 0x6a6   : > { %20010 = vmatprep.subr.mxu1 %v21161_v2  ;;  %vm25002_vm4 = vmmov %vm25001_vm1  ;;  %v5889_v41 = vrot.slane %v5780_v27, 6 }
 0x6a7   : > { %v5327_v51 = vsel %vm25002_vm4, %v5326_v38, %v5325_v42  ;;  %vm25008_vm3 = vmmov %vm25007_vm0  ;;  %vm25012_vm4 = vcmask 130048  }
 0x752   : > { %v4354_v55 = vpop.f32.mrf.mxu0 }
 0x754   : > { %v19951_v0 = vpop.f32.mrf.mxu0  ;;  %v4427_v56 = vpop.f32.mrf.mxu1 }
 0x755   : > { %v4428_v4 = vadd.f32 %v4427_v56, %v4354_v55 }
 0x756   : > { %v19958_v1 = vpop.f32.mrf.mxu1 }
 0x758   : > { %v4500_v9 = vpop.f32.mrf.mxu0 }
 0x759   : > { %v4574_v10 = vpop.f32.mrf.mxu1  ;;  %v4504_v23 = vadd.f32 %v4500_v9, %v4428_v4 }
 0x75a   : > { %v19965_v61 = vpop.f32.mrf.mxu0 }
 0x75b   : > { %v19972_v62 = vpop.f32.mrf.mxu1  ;;  %v4578_v28 = vadd.f32 %v4574_v10, %v4504_v23  ;;  %v5783_v23 = vld [vmem:[%s21246_s27 + $0x1a] sm:$0x1] }
 0x75c   : > { %v5790_v26 = vrot.slane %v5783_v23, 7 }
 0x75d   : > { %vm4579_vm14 = vcmp.ge.f32.partialorder %v4578_v28, 0.0  ;;  %v4580_v36 = vmul.f32 0.2, %v4578_v28 }
 0x75e   : > { %v19977_v33 = vpop.f32.mrf.mxu0 }
 0x75f   : > { %v19985_v34 = vpop.f32.mrf.mxu1  ;;  %v4581_v43 = vsel %vm4579_vm14, %v4578_v28, %v4580_v36  ;;  %vm25006_vm14 = vnez %v24795_v57  ;;  %v5887_v28 = vrot.slane %v5779_v60, 7  ;;  %v5785_v36 = vld [vmem:[%s21246_s27 + $0x3a] sm:$0x1] }
 0x760   : > { %v4837_v37 = vadd.f32 %v19985_v34, %v19977_v33  ;;  %v4734_v39 = vpop.f32.mrf.mxu0  ;;  %v4583_v46 = vcombine.high %v4581_v43, %v4581_v43  ;;  %v4590_v3 = vrot.slane %v4581_v43, %v21455_v32  ;;  %v5782_v33 = vld [vmem:[%s21246_s27 + $0xa] sm:$0x1]  ;;  %v5778_v34 = vld [vmem:[%s21246_s27 + $0x9] sm:$0x1] }
 0x761   : > { %v4831_v40 = vpop.f32.mrf.mxu1 }
 0x762   : > { %v4832_v45 = vadd.f32 %v4831_v40, %v4734_v39  ;;  %19994 = vmatmul.mubr.msk.f32.vlgmr.msra.gmra.mxu0 %vm24999_vm7, %v4837_v37  ;;  %v19980_v47 = vpop.f32.mrf.mxu0  ;;  %v4597_v52 = vrot.slane %v4583_v46, %v21455_v32  ;;  %v4598_v53 = vcombine.high %v4590_v3, %v4590_v3  ;;  %v4606_v55 = vrot.slane %v4590_v3, %v21455_v32  ;;  %vm25009_vm7 = vmmov %vm25005_vm10  ;;  %v5781_v40 = vld [vmem:[%s21246_s27 + $0x39] sm:$0x1] }
 0x763   : > { %v19988_v48 = vpop.f32.mrf.mxu1  ;;  %20004 = vmatpush3.msk.msra.mxu0 %vm21309_vm8, %v21162_v19  ;;  %20007 = vmatprep.mubr.msk.f32.mxu0 %vm24831_vm15, %v21161_v2  ;;  %vm25011_vm1 = vmmov %vm25009_vm7  ;;  %v5792_v39 = vrot.slane %v5784_v24, 6 }
 0x764   : > { %20001 = vmatmul.mubr.msk.f32.vlgmr.msra.gmra.mxu1 %vm25000_vm13, %v4832_v45  ;;  %20005 = vmatprep.subr.mxu0 %v21161_v2  ;;  %v4744_v0 = vpop.f32.mrf.mxu0  ;;  %v4847_v58 = vadd.f32 %v19988_v48, %v19980_v47  ;;  %v4599_v1 = vcombine.high %v4597_v52, %v4597_v52  ;;  %v4613_v4 = vrot.slane %v4597_v52, %v21455_v32  ;;  %vm25010_vm13 = vmmov %vm25009_vm7  ;;  %v5794_v47 = vrot.slane %v5785_v36, 5 }
 0x765   : > { %20011 = vmatpush3.msk.msra.mxu1 %vm25003_vm2, %v21162_v19  ;;  %v4841_v56 = vpop.f32.mrf.mxu1  ;;  %20006 = vmatpush3.msk.msra.mxu0 %vm25004_vm9, %v21162_v19  ;;  %v4620_v5 = vrot.slane %v4598_v53, %v21455_v32  ;;  %v4628_v6 = vcombine.high %v4606_v55, %v4606_v55  ;;  %4640 = vst.msk [vmem:[%s21480_s25 + $0xe] sm:$0x1] %vm25005_vm10, %v4606_v55  ;;  %vm25013_vm10 = vmmov %vm25012_vm4 }
 0x766   : > { %v4842_v59 = vadd.f32 %v4841_v56, %v4744_v0  ;;  %20012 = vmatprep.subr.mxu1 %v21161_v2  ;;  %20014 = vmatprep.mubr.msk.f32.mxu1 %vm24831_vm15, %v21161_v2  ;;  %v4627_v7 = vrot.slane %v4599_v1, %v21455_v32  ;;  %v4629_v8 = vcombine.high %v4613_v4, %v4613_v4  ;;  %vm25016_vm9 = vmmov %vm25011_vm1 }
 0x767   : > { %20013 = vmatpush3.msk.msra.mxu1 %vm25006_vm14, %v21162_v19  ;;  %20017 = vmatprep.subr.msk.mxu0 %vm25007_vm0, %v5230_v49  ;;  %v4630_v9 = vcombine.high %v4620_v5, %v4620_v5  ;;  %4641 = vst.msk [vmem:[%s21480_s25 + $0x2e] sm:$0x1] %vm25009_vm7, %v4620_v5  ;;  %vm25014_vm14 = vmmov %vm25007_vm0  ;;  %vm25018_vm7 = vcmask 31744  }
 0x768   : > { %20025 = vmatprep.subr.msk.mxu1 %vm25008_vm3, %v5327_v51  ;;  %4642 = vst.msk [vmem:[%s21480_s25 + $0x4e] sm:$0x1] %vm25010_vm13, %v4628_v6  ;;  %20008 = vmatmul.mubr.msk.f32.vlgmr.msra.gmra.mxu0 %vm25012_vm4, %v4842_v59  ;;  %v4631_v10 = vcombine.high %v4627_v7, %v4627_v7  ;;  %vm25015_vm3 = vmmov %vm25011_vm1 }
 0x769   : > { %4644 = vst.msk [vmem:[%s21480_s25 + $0x8e] sm:$0x1] %vm25011_vm1, %v4613_v4  ;;  %20015 = vmatmul.mubr.msk.f32.vlgmr.msra.gmra.mxu1 %vm25013_vm10, %v4847_v58  ;;  %20018 = vmatpush3.msk.msra.mxu0 %vm25014_vm14, %v5230_v49  ;;  %vm25017_vm2 = vmmov %vm25011_vm1 }
 0x76a   : > { %20026 = vmatpush3.msk.msra.mxu1 %vm25007_vm0, %v5327_v51  ;;  %4643 = vst.msk [vmem:[%s21480_s25 + $0x6e] sm:$0x1] %vm25015_vm3, %v4630_v9  ;;  %20019 = vmatprep.mubr.msk.f32.mxu0 %vm25018_vm7, %v21818_v11  ;;  %vm25019_vm13 = vmmov %vm25018_vm7  ;;  %vm25027_vm3 = vcmask 1041409   ;;  %v5891_v51 = vrot.slane %v5781_v40, 5  ;;  %v6343_v40 = vld [vmem:[%s21246_s27 + $0xa] sm:$0x1] }
 0x76b   : > { %4645 = vst.msk [vmem:[%s21480_s25 + $0xae] sm:$0x1] %vm25016_vm9, %v4627_v7  ;;  %20027 = vmatprep.mubr.msk.f32.mxu1 %vm25019_vm13, %v21925_v63  ;;  %20033 = vmatprep.subr.mxu0 %v21161_v2  ;;  %vm25020_vm14 = vmmov %vm25011_vm1  ;;  %v5791_v43 = vsel %vm25027_vm3, %v5790_v26, %v5782_v33  ;;  %v6349_v33 = vld [vmem:[%s21246_s27 + $0x2b] sm:$0x1] }
 0x76c   : > { %4646 = vst.msk [vmem:[%s21480_s25 + $0xce] sm:$0x1] %vm25017_vm2, %v4629_v8  ;;  %20040 = vmatprep.subr.mxu1 %v21161_v2  ;;  %vm25021_vm1 = vmmov %vm25018_vm7 }
 0x76d   : > { %4647 = vst.msk [vmem:[%s21480_s25 + $0xee] sm:$0x1] %vm25020_vm14, %v4631_v10  ;;  %20020 = vmatmul.mubr.msk.f32.vlgmr.msra.gmra.mxu0 %vm25021_vm1, %v21936_v12  ;;  %vm25022_vm4 = vmmov %vm25021_vm1  ;;  %vm25029_vm14 = vcmask 1042434  }
 0x76e   : > { %20028 = vmatmul.mubr.msk.f32.vlgmr.msra.gmra.mxu1 %vm25022_vm4, %v21943_v13  ;;  %vm25023_vm2 = vmmov %vm25021_vm1  ;;  %20034 = vmatpush3.msk.msra.mxu0 %vm21260_vm5, %v21162_v19  ;;  %v5793_v55 = vsel %vm25029_vm14, %v5792_v39, %v5791_v43  ;;  %vm25031_vm4 = vcmask 130048   ;;  %v6347_v39 = vld [vmem:[%s21246_s27 + $0xb] sm:$0x1] }
 0x76f   : > { %20022 = vmatprep.mubr.msk.f32.mxu0 %vm25023_vm2, %v21950_v14  ;;  %vm25024_vm9 = vmmov %vm25021_vm1  ;;  %20041 = vmatpush3.msk.msra.mxu1 %vm21339_vm11, %v21162_v19 }
 0x770   : > { %20030 = vmatprep.mubr.msk.f32.mxu1 %vm25024_vm9, %v21957_v15  ;;  %20035 = vmatprep.subr.mxu0 %v21161_v2  ;;  %vm25025_vm10 = vmmov %vm25021_vm1  ;;  %vm25033_vm9 = vcmask 1043459  }
 0x771   : > { %20042 = vmatprep.subr.mxu1 %v21161_v2  ;;  %20023 = vmatmul.mubr.msk.f32.gmra.mxu0 %vm25025_vm10, %v21972_v18  ;;  %vm25026_vm0 = vmmov %vm25021_vm1  ;;  %v5795_v6 = vsel %vm25033_vm9, %v5794_v47, %v5793_v55 }
 0x772   : > { %20031 = vmatmul.mubr.msk.f32.gmra.mxu1 %vm25026_vm0, %v21979_v20  ;;  %20036 = vmatpush3.msk.msra.mxu0 %vm21266_vm6, %v21162_v19  ;;  %vm25028_vm7 = vmmov %vm25027_vm3  ;;  %vm25035_vm0 = vnez %v24793_v54  ;;  %vm25036_vm3 = vnez %v24787_v30 }
 0x773   : > { %20043 = vmatpush3.msk.msra.mxu1 %vm21347_vm12, %v21162_v19  ;;  %20037 = vmatprep.mubr.msk.f32.mxu0 %vm24831_vm15, %v21161_v2  ;;  %v5888_v45 = vsel %vm25028_vm7, %v5887_v28, %v5778_v34  ;;  %vm25030_vm1 = vmmov %vm25029_vm14  ;;  %vm25037_vm7 = vcmask 253952   ;;  %vm25039_vm14 = vcmask 1043456  }
 0x774   : > { %20044 = vmatprep.mubr.msk.f32.mxu1 %vm24831_vm15, %v21161_v2  ;;  %20047 = vmatprep.subr.mxu0 %v21161_v2  ;;  %v5890_v0 = vsel %vm25030_vm1, %v5889_v41, %v5888_v45  ;;  %vm25032_vm2 = vmmov %vm25031_vm4 }
 0x775   : > { %20054 = vmatprep.subr.mxu1 %v21161_v2  ;;  %vm25034_vm10 = vmmov %vm25033_vm9 }
 0x776   : > { %v5892_v7 = vsel %vm25034_vm10, %v5891_v51, %v5890_v0  ;;  %vm25040_vm1 = vmmov %vm25039_vm14  ;;  %vm25044_vm10 = vcmask 130048  }
 0x822   : > { %v4919_v11 = vpop.f32.mrf.mxu0 }
 0x824   : > { %v19995_v21 = vpop.f32.mrf.mxu0  ;;  %v4992_v22 = vpop.f32.mrf.mxu1 }
 0x825   : > { %v4993_v62 = vadd.f32 %v4992_v22, %v4919_v11 }
 0x826   : > { %v20002_v61 = vpop.f32.mrf.mxu1 }
 0x828   : > { %v5065_v29 = vpop.f32.mrf.mxu0 }
 0x829   : > { %v5139_v31 = vpop.f32.mrf.mxu1  ;;  %v5069_v35 = vadd.f32 %v5065_v29, %v4993_v62 }
 0x82a   : > { %v20009_v37 = vpop.f32.mrf.mxu0 }
 0x82b   : > { %v20016_v38 = vpop.f32.mrf.mxu1  ;;  %v5143_v42 = vadd.f32 %v5139_v31, %v5069_v35  ;;  %v22358_v31 = vld [vmem:[%s24758_s1 + $0x20] sm:$0xff]  ;;  %v6345_v35 = vld [vmem:[%s21246_s27 + $0x2a] sm:$0x1] }
 0x82c   : > { %v6454_v47 = vrot.slane %v6345_v35, 6  ;;  %v22490_v35 = vld [vmem:[%s24758_s1 + $0x30] sm:$0xff] }
 0x82d   : > { %v20021_v46 = vpop.f32.mrf.mxu0  ;;  %vm5144_vm13 = vcmp.ge.f32.partialorder %v5143_v42, 0.0  ;;  %v5145_v48 = vmul.f32 0.2, %v5143_v42 }
 0x82e   : > { %v20029_v3 = vpop.f32.mrf.mxu1 }
 0x82f   : > { %v5402_v49 = vadd.f32 %v20029_v3, %v20021_v46  ;;  %v5299_v52 = vpop.f32.mrf.mxu0  ;;  %v5146_v56 = vsel %vm5144_vm13, %v5143_v42, %v5145_v48  ;;  %vm25038_vm13 = vnez %v24795_v57  ;;  %v6350_v42 = vld [vmem:[%s21246_s27 + $0x3b] sm:$0x1]  ;;  %v6357_v46 = vrot.slane %v6349_v33, 6  ;;  %v6346_v3 = vld [vmem:[%s21246_s27 + $0x3a] sm:$0x1]  ;;  %v22476_v33 = vld [vmem:[%s24758_s1 + $0x28] sm:$0xff] }
 0x830   : > { %v5396_v53 = vpop.f32.mrf.mxu1  ;;  %v5148_v59 = vcombine.high %v5146_v56, %v5146_v56  ;;  %v5155_v1 = vrot.slane %v5146_v56, %v21455_v32  ;;  %v6359_v55 = vrot.slane %v6350_v42, 5  ;;  %v6913_v42 = vld [vmem:[%s21246_s27 + $0x1c] sm:$0x1] }
 0x831   : > { %v5397_v58 = vadd.f32 %v5396_v53, %v5299_v52  ;;  %20038 = vmatmul.mubr.msk.f32.vlgmr.msra.gmra.mxu0 %vm25031_vm4, %v5402_v49  ;;  %v20024_v4 = vpop.f32.mrf.mxu0  ;;  %vm25041_vm4 = vmmov %vm25037_vm7 }
 0x832   : > { %v20032_v5 = vpop.f32.mrf.mxu1  ;;  %20048 = vmatpush3.msk.msra.mxu0 %vm21309_vm8, %v21162_v19  ;;  %20051 = vmatprep.mubr.msk.f32.mxu0 %vm24831_vm15, %v21161_v2  ;;  %v5162_v8 = vrot.slane %v5148_v59, %v21455_v32  ;;  %v5163_v9 = vcombine.high %v5155_v1, %v5155_v1  ;;  %v5171_v10 = vrot.slane %v5155_v1, %v21455_v32 }
 0x833   : > { %20045 = vmatmul.mubr.msk.f32.vlgmr.msra.gmra.mxu1 %vm25032_vm2, %v5397_v58  ;;  %20049 = vmatprep.subr.mxu0 %v21161_v2  ;;  %v5309_v11 = vpop.f32.mrf.mxu0  ;;  %v5412_v22 = vadd.f32 %v20032_v5, %v20024_v4  ;;  %vm25042_vm2 = vmmov %vm25041_vm4  ;;  %v6456_v58 = vrot.slane %v6346_v3, 5  ;;  %v6914_v3 = vld [vmem:[%s21246_s27 + $0x2c] sm:$0x1] }
 0x834   : > { %20055 = vmatpush3.msk.msra.mxu1 %vm25035_vm0, %v21162_v19  ;;  %v5406_v21 = vpop.f32.mrf.mxu1  ;;  %20050 = vmatpush3.msk.msra.mxu0 %vm25036_vm3, %v21162_v19  ;;  %v5164_v60 = vcombine.high %v5162_v8, %v5162_v8  ;;  %v5178_v61 = vrot.slane %v5162_v8, %v21455_v32  ;;  %v5185_v62 = vrot.slane %v5163_v9, %v21455_v32  ;;  %vm25043_vm9 = vmmov %vm25042_vm2 }
 0x835   : > { %v5407_v23 = vadd.f32 %v5406_v21, %v5309_v11  ;;  %20056 = vmatprep.subr.mxu1 %v21161_v2  ;;  %20058 = vmatprep.mubr.msk.f32.mxu1 %vm24831_vm15, %v21161_v2  ;;  %v5193_v24 = vcombine.high %v5171_v10, %v5171_v10  ;;  %5205 = vst.msk [vmem:[%s21480_s25 + $0x10] sm:$0x1] %vm25037_vm7, %v5171_v10  ;;  %vm25045_vm7 = vmmov %vm25044_vm10 }
 0x836   : > { %20057 = vmatpush3.msk.msra.mxu1 %vm25038_vm13, %v21162_v19  ;;  %20061 = vmatprep.subr.msk.mxu0 %vm25039_vm14, %v5795_v6  ;;  %v5192_v26 = vrot.slane %v5164_v60, %v21455_v32  ;;  %v5194_v27 = vcombine.high %v5178_v61, %v5178_v61  ;;  %v5195_v28 = vcombine.high %v5185_v62, %v5185_v62  ;;  %vm25046_vm13 = vmmov %vm25040_vm1 }
 0x837   : > { %20069 = vmatprep.subr.msk.mxu1 %vm25040_vm1, %v5892_v7  ;;  %5206 = vst.msk [vmem:[%s21480_s25 + $0x30] sm:$0x1] %vm25041_vm4, %v5185_v62  ;;  %20052 = vmatmul.mubr.msk.f32.vlgmr.msra.gmra.mxu0 %vm25044_vm10, %v5407_v23  ;;  %vm25047_vm14 = vmmov %vm25040_vm1  ;;  %vm25051_vm4 = vcmask 31744  }
 0x838   : > { %5207 = vst.msk [vmem:[%s21480_s25 + $0x50] sm:$0x1] %vm25042_vm2, %v5193_v24  ;;  %20059 = vmatmul.mubr.msk.f32.vlgmr.msra.gmra.mxu1 %vm25045_vm7, %v5412_v22  ;;  %20062 = vmatpush3.msk.msra.mxu0 %vm25046_vm13, %v5795_v6  ;;  %v5196_v29 = vcombine.high %v5192_v26, %v5192_v26  ;;  %vm25048_vm1 = vmmov %vm25042_vm2 }
 0x839   : > { %5209 = vst.msk [vmem:[%s21480_s25 + $0x90] sm:$0x1] %vm25043_vm9, %v5178_v61  ;;  %20070 = vmatpush3.msk.msra.mxu1 %vm25047_vm14, %v5892_v7  ;;  %vm25049_vm3 = vmmov %vm25048_vm1  ;;  %20063 = vmatprep.mubr.msk.f32.mxu0 %vm25051_vm4, %v22358_v31 }
 0x83a   : > { %5208 = vst.msk [vmem:[%s21480_s25 + $0x70] sm:$0x1] %vm25048_vm1, %v5195_v28  ;;  %vm25050_vm0 = vmmov %vm25048_vm1  ;;  %20077 = vmatprep.subr.mxu0 %v21161_v2  ;;  %20084 = vmatprep.subr.mxu1 %v21161_v2  ;;  %vm25060_vm1 = vcmask 1041409  }
 0x83b   : > { %5210 = vst.msk [vmem:[%s21480_s25 + $0xb0] sm:$0x1] %vm25049_vm3, %v5192_v26  ;;  %vm25052_vm2 = vmmov %vm25051_vm4 }
 0x83c   : > { %5211 = vst.msk [vmem:[%s21480_s25 + $0xd0] sm:$0x1] %vm25050_vm0, %v5194_v27  ;;  %20071 = vmatprep.mubr.msk.f32.mxu1 %vm25052_vm2, %v21925_v63  ;;  %vm25053_vm13 = vmmov %vm25050_vm0 }
 0x83d   : > { %5212 = vst.msk [vmem:[%s21480_s25 + $0xf0] sm:$0x1] %vm25053_vm13, %v5196_v29  ;;  %vm25054_vm3 = vmmov %vm25052_vm2  ;;  %vm25062_vm13 = vcmask 1042434  }
 0x83e   : > { %20064 = vmatmul.mubr.msk.f32.vlgmr.msra.gmra.mxu0 %vm25054_vm3, %v21936_v12  ;;  %vm25055_vm0 = vmmov %vm25052_vm2 }
 0x83f   : > { %20072 = vmatmul.mubr.msk.f32.vlgmr.msra.gmra.mxu1 %vm25055_vm0, %v21943_v13  ;;  %vm25056_vm9 = vmmov %vm25055_vm0  ;;  %20078 = vmatpush3.msk.msra.mxu0 %vm21260_vm5, %v21162_v19 }
 0x840   : > { %20066 = vmatprep.mubr.msk.f32.mxu0 %vm25056_vm9, %v21950_v14  ;;  %vm25057_vm10 = vmmov %vm25055_vm0  ;;  %20085 = vmatpush3.msk.msra.mxu1 %vm21339_vm11, %v21162_v19  ;;  %v6348_v14 = vld [vmem:[%s21246_s27 + $0x1b] sm:$0x1] }
 0x841   : > { %20074 = vmatprep.mubr.msk.f32.mxu1 %vm25057_vm10, %v21957_v15  ;;  %20079 = vmatprep.subr.mxu0 %v21161_v2  ;;  %vm25058_vm7 = vmmov %vm25055_vm0  ;;  %v6344_v15 = vld [vmem:[%s21246_s27 + $0x1a] sm:$0x1]  ;;  %v6355_v34 = vrot.slane %v6348_v14, 7  ;;  %vm25066_vm10 = vcmask 1043459  }
 0x842   : > { %20086 = vmatprep.subr.mxu1 %v21161_v2  ;;  %20067 = vmatmul.mubr.msk.f32.gmra.mxu0 %vm25058_vm7, %v21972_v18  ;;  %vm25059_vm14 = vmmov %vm25055_vm0  ;;  %v6452_v36 = vrot.slane %v6344_v15, 7  ;;  %vm25064_vm0 = vcmask 130048  }
 0x843   : > { %20075 = vmatmul.mubr.msk.f32.gmra.mxu1 %vm25059_vm14, %v21979_v20  ;;  %20080 = vmatpush3.msk.msra.mxu0 %vm21266_vm6, %v21162_v19  ;;  %v6356_v49 = vsel %vm25060_vm1, %v6355_v34, %v6347_v39  ;;  %vm25061_vm4 = vmmov %vm25060_vm1  ;;  %vm25068_vm14 = vnez %v24793_v54  ;;  %vm25069_vm1 = vnez %v24787_v30  ;;  %v22483_v34 = vld [vmem:[%s24758_s1 + $0x8] sm:$0xff] }
 0x844   : > { %20087 = vmatpush3.msk.msra.mxu1 %vm21347_vm12, %v21162_v19  ;;  %20081 = vmatprep.mubr.msk.f32.mxu0 %vm24831_vm15, %v21161_v2  ;;  %v6453_v51 = vsel %vm25061_vm4, %v6452_v36, %v6343_v40  ;;  %v6358_v4 = vsel %vm25062_vm13, %v6357_v46, %v6356_v49  ;;  %vm25063_vm3 = vmmov %vm25062_vm13  ;;  %vm25070_vm4 = vcmask 253952   ;;  %vm25072_vm13 = vcmask 1043456   ;;  %v22497_v36 = vld [vmem:[%s24758_s1 + $0x10] sm:$0xff] }
 0x845   : > { %20088 = vmatprep.mubr.msk.f32.mxu1 %vm24831_vm15, %v21161_v2  ;;  %20091 = vmatprep.subr.mxu0 %v21161_v2  ;;  %v6455_v5 = vsel %vm25063_vm3, %v6454_v47, %v6453_v51  ;;  %vm25065_vm9 = vmmov %vm25064_vm0  ;;  %v6360_v21 = vsel %vm25066_vm10, %v6359_v55, %v6358_v4  ;;  %v6920_v47 = vrot.slane %v6913_v42, 7  ;;  %v6908_v55 = vld [vmem:[%s21246_s27 + $0xb] sm:$0x1]  ;;  %v6911_v4 = vld [vmem:[%s21246_s27 + $0x3b] sm:$0x1] }
 0x846   : > { %20098 = vmatprep.subr.mxu1 %v21161_v2  ;;  %vm25067_vm7 = vmmov %vm25066_vm10 }
 0x847   : > { %v6457_v22 = vsel %vm25067_vm7, %v6456_v58, %v6455_v5  ;;  %vm25073_vm3 = vmmov %vm25072_vm13  ;;  %vm25077_vm7 = vcmask 130048  }
 0x8f1   : > { %v5484_v63 = vpop.f32.mrf.mxu0 }
 0x8f3   : > { %v20039_v12 = vpop.f32.mrf.mxu0  ;;  %v5557_v13 = vpop.f32.mrf.mxu1 }
 0x8f4   : > { %v5558_v20 = vadd.f32 %v5557_v13, %v5484_v63 }
 0x8f5   : > { %v20046_v18 = vpop.f32.mrf.mxu1 }
 0x8f7   : > { %v5630_v37 = vpop.f32.mrf.mxu0 }
 0x8f8   : > { %v5704_v38 = vpop.f32.mrf.mxu1  ;;  %v5634_v41 = vadd.f32 %v5630_v37, %v5558_v20  ;;  %v22465_v20 = vld [vmem:[%s24758_s1] sm:$0xff]  ;;  %v22512_v37 = vld [vmem:[%s24758_s1 + $0x38] sm:$0xff] }
 0x8f9   : > { %v20053_v43 = vpop.f32.mrf.mxu0 }
 0x8fa   : > { %v20060_v45 = vpop.f32.mrf.mxu1  ;;  %v5708_v48 = vadd.f32 %v5704_v38, %v5634_v41  ;;  %v22519_v38 = vld [vmem:[%s24758_s1 + $0x18] sm:$0xff] }
 0x8fb   : > { %v6909_v43 = vld [vmem:[%s21246_s27 + $0x1b] sm:$0x1] }
 0x8fc   : > { %vm5709_vm2 = vcmp.ge.f32.partialorder %v5708_v48, 0.0  ;;  %v5710_v0 = vmul.f32 0.2, %v5708_v48  ;;  %v7017_v49 = vrot.slane %v6909_v43, 7 }
 0x8fe   : > { %v20065_v52 = vpop.f32.mrf.mxu0  ;;  %v5711_v6 = vsel %vm5709_vm2, %v5708_v48, %v5710_v0  ;;  %vm25071_vm2 = vnez %v24795_v57  ;;  %v6910_v48 = vld [vmem:[%s21246_s27 + $0x2b] sm:$0x1] }
 0x8ff   : > { %v20073_v53 = vpop.f32.mrf.mxu1  ;;  %v5713_v8 = vcombine.high %v5711_v6, %v5711_v6  ;;  %v5720_v9 = vrot.slane %v5711_v6, %v21455_v32  ;;  %v7019_v5 = vrot.slane %v6910_v48, 6 }
 0x900   : > { %v5967_v56 = vadd.f32 %v20073_v53, %v20065_v52  ;;  %v5864_v59 = vpop.f32.mrf.mxu0  ;;  %v6912_v53 = vld [vmem:[%s21246_s27 + $0xc] sm:$0x1] }
 0x901   : > { %v5961_v1 = vpop.f32.mrf.mxu1  ;;  %v5727_v23 = vrot.slane %v5713_v8, %v21455_v32  ;;  %v5728_v60 = vcombine.high %v5720_v9, %v5720_v9  ;;  %v5736_v61 = vrot.slane %v5720_v9, %v21455_v32 }
 0x902   : > { %v5962_v7 = vadd.f32 %v5961_v1, %v5864_v59  ;;  %20082 = vmatmul.mubr.msk.f32.vlgmr.msra.gmra.mxu0 %vm25064_vm0, %v5967_v56  ;;  %v20068_v10 = vpop.f32.mrf.mxu0  ;;  %vm25074_vm0 = vmmov %vm25070_vm4  ;;  %v6915_v56 = vld [vmem:[%s21246_s27 + $0x3c] sm:$0x1]  ;;  %v6922_v1 = vrot.slane %v6914_v3, 6 }
 0x903   : > { %v20076_v11 = vpop.f32.mrf.mxu1  ;;  %20092 = vmatpush3.msk.msra.mxu0 %vm21309_vm8, %v21162_v19  ;;  %20095 = vmatprep.mubr.msk.f32.mxu0 %vm24831_vm15, %v21161_v2  ;;  %v5729_v28 = vcombine.high %v5727_v23, %v5727_v23  ;;  %v5743_v29 = vrot.slane %v5727_v23, %v21455_v32  ;;  %v5750_v63 = vrot.slane %v5728_v60, %v21455_v32  ;;  %vm25076_vm10 = vmmov %vm25074_vm0  ;;  %v7021_v23 = vrot.slane %v6911_v4, 5  ;;  %v7479_v4 = vld [vmem:[%s21246_s27 + $0x2d] sm:$0x1] }
 0x904   : > { %20089 = vmatmul.mubr.msk.f32.vlgmr.msra.gmra.mxu1 %vm25065_vm9, %v5962_v7  ;;  %20093 = vmatprep.subr.mxu0 %v21161_v2  ;;  %v5874_v62 = vpop.f32.mrf.mxu0  ;;  %v5977_v26 = vadd.f32 %v20076_v11, %v20068_v10  ;;  %v5758_v12 = vcombine.high %v5736_v61, %v5736_v61  ;;  %5770 = vst.msk [vmem:[%s21480_s25 + $0x12] sm:$0x1] %vm25070_vm4, %v5736_v61  ;;  %vm25075_vm9 = vmmov %vm25074_vm0  ;;  %v6924_v11 = vrot.slane %v6915_v56, 5  ;;  %v7478_v56 = vld [vmem:[%s21246_s27 + $0x1d] sm:$0x1] }
 0x905   : > { %20099 = vmatpush3.msk.msra.mxu1 %vm25068_vm14, %v21162_v19  ;;  %v5971_v24 = vpop.f32.mrf.mxu1  ;;  %20094 = vmatpush3.msk.msra.mxu0 %vm25069_vm1, %v21162_v19  ;;  %v5757_v13 = vrot.slane %v5729_v28, %v21455_v32  ;;  %v5759_v14 = vcombine.high %v5743_v29, %v5743_v29  ;;  %v5760_v15 = vcombine.high %v5750_v63, %v5750_v63  ;;  %vm25078_vm4 = vmmov %vm25077_vm7 }
 0x906   : > { %v5972_v27 = vadd.f32 %v5971_v24, %v5874_v62  ;;  %20100 = vmatprep.subr.mxu1 %v21161_v2  ;;  %20102 = vmatprep.mubr.msk.f32.mxu1 %vm24831_vm15, %v21161_v2  ;;  %5771 = vst.msk [vmem:[%s21480_s25 + $0x32] sm:$0x1] %vm25074_vm0, %v5750_v63  ;;  %vm25082_vm1 = vmmov %vm25074_vm0 }
 0x907   : > { %20101 = vmatpush3.msk.msra.mxu1 %vm25071_vm2, %v21162_v19  ;;  %20105 = vmatprep.subr.msk.mxu0 %vm25072_vm13, %v6360_v21  ;;  %5772 = vst.msk [vmem:[%s21480_s25 + $0x52] sm:$0x1] %vm25075_vm9, %v5758_v12  ;;  %vm25079_vm2 = vmmov %vm25073_vm3  ;;  %v5761_v18 = vcombine.high %v5757_v13, %v5757_v13 }
 0x908   : > { %20113 = vmatprep.subr.msk.mxu1 %vm25073_vm3, %v6457_v22  ;;  %5774 = vst.msk [vmem:[%s21480_s25 + $0x92] sm:$0x1] %vm25076_vm10, %v5743_v29  ;;  %20096 = vmatmul.mubr.msk.f32.vlgmr.msra.gmra.mxu0 %vm25077_vm7, %v5972_v27  ;;  %vm25080_vm13 = vmmov %vm25079_vm2 }
 0x909   : > { %20103 = vmatmul.mubr.msk.f32.vlgmr.msra.gmra.mxu1 %vm25078_vm4, %v5977_v26  ;;  %20106 = vmatpush3.msk.msra.mxu0 %vm25079_vm2, %v6360_v21  ;;  %vm25081_vm3 = vmmov %vm25074_vm0  ;;  %5775 = vst.msk [vmem:[%s21480_s25 + $0xb2] sm:$0x1] %vm25082_vm1, %v5757_v13 }
 0x90a   : > { %20114 = vmatpush3.msk.msra.mxu1 %vm25080_vm13, %v6457_v22  ;;  %5773 = vst.msk [vmem:[%s21480_s25 + $0x72] sm:$0x1] %vm25081_vm3, %v5760_v15  ;;  %vm25083_vm14 = vmmov %vm25074_vm0  ;;  %vm25084_vm0 = vcmask 31744   ;;  %20121 = vmatprep.subr.mxu0 %v21161_v2  ;;  %vm25093_vm3 = vcmask 1041409  }
 0x90b   : > { %5776 = vst.msk [vmem:[%s21480_s25 + $0xd2] sm:$0x1] %vm25083_vm14, %v5759_v14  ;;  %20107 = vmatprep.mubr.msk.f32.mxu0 %vm25084_vm0, %v22358_v31  ;;  %vm25085_vm9 = vmmov %vm25084_vm0  ;;  %20128 = vmatprep.subr.mxu1 %v21161_v2  ;;  %v6921_v7 = vsel %vm25093_vm3, %v6920_v47, %v6912_v53 }
 0x90c   : > { %20115 = vmatprep.mubr.msk.f32.mxu1 %vm25085_vm9, %v22465_v20  ;;  %vm25086_vm2 = vmmov %vm25082_vm1 }
 0x90d   : > { %5777 = vst.msk [vmem:[%s21480_s25 + $0xf2] sm:$0x1] %vm25086_vm2, %v5761_v18  ;;  %vm25087_vm14 = vmmov %vm25084_vm0  ;;  %vm25095_vm2 = vcmask 1042434  }
 0x90e   : > { %20108 = vmatmul.mubr.msk.f32.vlgmr.msra.gmra.mxu0 %vm25087_vm14, %v22476_v33  ;;  %vm25088_vm1 = vmmov %vm25084_vm0  ;;  %v6923_v62 = vsel %vm25095_vm2, %v6922_v1, %v6921_v7 }
 0x90f   : > { %20116 = vmatmul.mubr.msk.f32.vlgmr.msra.gmra.mxu1 %vm25088_vm1, %v22483_v34  ;;  %vm25089_vm10 = vmmov %vm25084_vm0  ;;  %20122 = vmatpush3.msk.msra.mxu0 %vm21260_vm5, %v21162_v19  ;;  %vm25097_vm1 = vcmask 130048  }
 0x910   : > { %20110 = vmatprep.mubr.msk.f32.mxu0 %vm25089_vm10, %v22490_v35  ;;  %vm25090_vm7 = vmmov %vm25084_vm0  ;;  %20129 = vmatpush3.msk.msra.mxu1 %vm21339_vm11, %v21162_v19 }
 0x911   : > { %20118 = vmatprep.mubr.msk.f32.mxu1 %vm25090_vm7, %v22497_v36  ;;  %20123 = vmatprep.subr.mxu0 %v21161_v2  ;;  %vm25091_vm4 = vmmov %vm25084_vm0  ;;  %vm25099_vm7 = vcmask 1043459  }
 0x912   : > { %20130 = vmatprep.subr.mxu1 %v21161_v2  ;;  %20111 = vmatmul.mubr.msk.f32.gmra.mxu0 %vm25091_vm4, %v22512_v37  ;;  %vm25092_vm13 = vmmov %vm25084_vm0  ;;  %v6925_v13 = vsel %vm25099_vm7, %v6924_v11, %v6923_v62  ;;  %v7473_v11 = vld [vmem:[%s21246_s27 + $0xc] sm:$0x1]  ;;  %v7476_v62 = vld [vmem:[%s21246_s27 + $0x3c] sm:$0x1] }
 0x913   : > { %20119 = vmatmul.mubr.msk.f32.gmra.mxu1 %vm25092_vm13, %v22519_v38  ;;  %20124 = vmatpush3.msk.msra.mxu0 %vm21266_vm6, %v21162_v19  ;;  %vm25094_vm0 = vmmov %vm25093_vm3  ;;  %vm25101_vm13 = vnez %v24793_v54  ;;  %vm25102_vm3 = vnez %v24787_v30 }
 0x914   : > { %20131 = vmatpush3.msk.msra.mxu1 %vm21347_vm12, %v21162_v19  ;;  %20125 = vmatprep.mubr.msk.f32.mxu0 %vm24831_vm15, %v21161_v2  ;;  %v7018_v8 = vsel %vm25094_vm0, %v7017_v49, %v6908_v55  ;;  %vm25096_vm14 = vmmov %vm25095_vm2  ;;  %vm25103_vm0 = vcmask 253952   ;;  %vm25105_vm2 = vcmask 1043456  }
 0x915   : > { %20132 = vmatprep.mubr.msk.f32.mxu1 %vm24831_vm15, %v21161_v2  ;;  %20135 = vmatprep.subr.mxu0 %v21161_v2  ;;  %v7020_v24 = vsel %vm25096_vm14, %v7019_v5, %v7018_v8  ;;  %vm25098_vm10 = vmmov %vm25097_vm1  ;;  %v7485_v5 = vrot.slane %v7478_v56, 7 }
 0x916   : > { %20142 = vmatprep.subr.mxu1 %v21161_v2  ;;  %vm25100_vm4 = vmmov %vm25099_vm7 }
 0x917   : > { %v7022_v14 = vsel %vm25100_vm4, %v7021_v23, %v7020_v24  ;;  %vm25106_vm14 = vmmov %vm25105_vm2  ;;  %vm25110_vm4 = vcmask 130048  }
 0x918   : > { %vm25109_vm7 = vmmov %vm25103_vm0 }
 0x9c2   : > { %v6049_v39 = vpop.f32.mrf.mxu0 }
 0x9c4   : > { %v20083_v40 = vpop.f32.mrf.mxu0  ;;  %v6122_v41 = vpop.f32.mrf.mxu1 }
 0x9c5   : > { %v6123_v46 = vadd.f32 %v6122_v41, %v6049_v39 }
 0x9c6   : > { %v20090_v45 = vpop.f32.mrf.mxu1 }
 0x9c8   : > { %v6195_v51 = vpop.f32.mrf.mxu0 }
 0x9c9   : > { %v6269_v52 = vpop.f32.mrf.mxu1  ;;  %v6199_v0 = vadd.f32 %v6195_v51, %v6123_v46 }
 0x9ca   : > { %v20097_v58 = vpop.f32.mrf.mxu0 }
 0x9cb   : > { %v20104_v59 = vpop.f32.mrf.mxu1  ;;  %v6273_v6 = vadd.f32 %v6269_v52, %v6199_v0  ;;  %v7474_v58 = vld [vmem:[%s21246_s27 + $0x1c] sm:$0x1] }
 0x9cc   : > { %v7582_v7 = vrot.slane %v7474_v58, 7 }
 0x9cd   : > { %vm6274_vm9 = vcmp.ge.f32.partialorder %v6273_v6, 0.0  ;;  %v6275_v21 = vmul.f32 0.2, %v6273_v6 }
 0x9ce   : > { %v20109_v9 = vpop.f32.mrf.mxu0 }
 0x9cf   : > { %v20117_v10 = vpop.f32.mrf.mxu1  ;;  %v6276_v26 = vsel %vm6274_vm9, %v6273_v6, %v6275_v21  ;;  %vm25104_vm9 = vnez %v24795_v57  ;;  %v7475_v6 = vld [vmem:[%s21246_s27 + $0x2c] sm:$0x1] }
 0x9d0   : > { %v6532_v22 = vadd.f32 %v20117_v10, %v20109_v9  ;;  %v6429_v60 = vpop.f32.mrf.mxu0  ;;  %v6278_v28 = vcombine.high %v6276_v26, %v6276_v26  ;;  %v6285_v29 = vrot.slane %v6276_v26, %v21455_v32  ;;  %v7477_v10 = vld [vmem:[%s21246_s27 + $0xd] sm:$0x1]  ;;  %v7584_v24 = vrot.slane %v7475_v6, 6 }
 0x9d1   : > { %v6526_v61 = vpop.f32.mrf.mxu1 }
 0x9d2   : > { %v6527_v27 = vadd.f32 %v6526_v61, %v6429_v60  ;;  %20126 = vmatmul.mubr.msk.f32.vlgmr.msra.gmra.mxu0 %vm25097_vm1, %v6532_v22  ;;  %v20112_v63 = vpop.f32.mrf.mxu0  ;;  %v6292_v15 = vrot.slane %v6278_v28, %v21455_v32  ;;  %v6293_v18 = vcombine.high %v6285_v29, %v6285_v29  ;;  %v6301_v39 = vrot.slane %v6285_v29, %v21455_v32  ;;  %vm25107_vm1 = vmmov %vm25103_vm0  ;;  %v7480_v22 = vld [vmem:[%s21246_s27 + $0x3d] sm:$0x1] }
 0x9d3   : > { %v20120_v12 = vpop.f32.mrf.mxu1  ;;  %20136 = vmatpush3.msk.msra.mxu0 %vm21309_vm8, %v21162_v19  ;;  %20139 = vmatprep.mubr.msk.f32.mxu0 %vm24831_vm15, %v21161_v2  ;;  %v7487_v61 = vrot.slane %v7479_v4, 6 }
 0x9d4   : > { %20133 = vmatmul.mubr.msk.f32.vlgmr.msra.gmra.mxu1 %vm25098_vm10, %v6527_v27  ;;  %20137 = vmatprep.subr.mxu0 %v21161_v2  ;;  %v6439_v40 = vpop.f32.mrf.mxu0  ;;  %v6542_v42 = vadd.f32 %v20120_v12, %v20112_v63  ;;  %v6294_v45 = vcombine.high %v6292_v15, %v6292_v15  ;;  %v6308_v46 = vrot.slane %v6292_v15, %v21455_v32  ;;  %vm25108_vm10 = vmmov %vm25103_vm0  ;;  %v7489_v12 = vrot.slane %v7480_v22, 5  ;;  %v8043_v22 = vld [vmem:[%s21246_s27 + $0x1e] sm:$0x1] }
 0x9d5   : > { %20143 = vmatpush3.msk.msra.mxu1 %vm25101_vm13, %v21162_v19  ;;  %v6536_v41 = vpop.f32.mrf.mxu1  ;;  %20138 = vmatpush3.msk.msra.mxu0 %vm25102_vm3, %v21162_v19  ;;  %v6315_v3 = vrot.slane %v6293_v18, %v21455_v32  ;;  %v6323_v47 = vcombine.high %v6301_v39, %v6301_v39  ;;  %6335 = vst.msk [vmem:[%s21480_s25 + $0x14] sm:$0x1] %vm25103_vm0, %v6301_v39  ;;  %vm25111_vm0 = vmmov %vm25110_vm4  ;;  %v7586_v15 = vrot.slane %v7476_v62, 5  ;;  %v8044_v62 = vld [vmem:[%s21246_s27 + $0x2e] sm:$0x1] }
 0x9d6   : > { %v6537_v43 = vadd.f32 %v6536_v41, %v6439_v40  ;;  %20144 = vmatprep.subr.mxu1 %v21161_v2  ;;  %20146 = vmatprep.mubr.msk.f32.mxu1 %vm24831_vm15, %v21161_v2  ;;  %v6322_v48 = vrot.slane %v6294_v45, %v21455_v32  ;;  %v6324_v49 = vcombine.high %v6308_v46, %v6308_v46  ;;  %vm25114_vm3 = vmmov %vm25107_vm1 }
 0x9d7   : > { %20145 = vmatpush3.msk.msra.mxu1 %vm25104_vm9, %v21162_v19  ;;  %20149 = vmatprep.subr.msk.mxu0 %vm25105_vm2, %v6925_v13  ;;  %v6325_v51 = vcombine.high %v6315_v3, %v6315_v3  ;;  %6336 = vst.msk [vmem:[%s21480_s25 + $0x34] sm:$0x1] %vm25107_vm1, %v6315_v3  ;;  %vm25112_vm9 = vmmov %vm25105_vm2 }
 0x9d8   : > { %20157 = vmatprep.subr.msk.mxu1 %vm25106_vm14, %v7022_v14  ;;  %6337 = vst.msk [vmem:[%s21480_s25 + $0x54] sm:$0x1] %vm25108_vm10, %v6323_v47  ;;  %20140 = vmatmul.mubr.msk.f32.vlgmr.msra.gmra.mxu0 %vm25110_vm4, %v6537_v43  ;;  %v6326_v52 = vcombine.high %v6322_v48, %v6322_v48  ;;  %vm25113_vm14 = vmmov %vm25107_vm1 }
 0x9d9   : > { %6339 = vst.msk [vmem:[%s21480_s25 + $0x94] sm:$0x1] %vm25109_vm7, %v6308_v46  ;;  %20147 = vmatmul.mubr.msk.f32.vlgmr.msra.gmra.mxu1 %vm25111_vm0, %v6542_v42  ;;  %20150 = vmatpush3.msk.msra.mxu0 %vm25112_vm9, %v6925_v13  ;;  %vm25115_vm13 = vmmov %vm25107_vm1  ;;  %vm25116_vm1 = vcmask 31744  }
 0x9da   : > { %20158 = vmatpush3.msk.msra.mxu1 %vm25105_vm2, %v7022_v14  ;;  %6338 = vst.msk [vmem:[%s21480_s25 + $0x74] sm:$0x1] %vm25113_vm14, %v6325_v51  ;;  %20151 = vmatprep.mubr.msk.f32.mxu0 %vm25116_vm1, %v22358_v31  ;;  %vm25117_vm10 = vmmov %vm25116_vm1  ;;  %vm25125_vm14 = vcmask 1041409  }
 0x9db   : > { %6340 = vst.msk [vmem:[%s21480_s25 + $0xb4] sm:$0x1] %vm25114_vm3, %v6322_v48  ;;  %20159 = vmatprep.mubr.msk.f32.mxu1 %vm25117_vm10, %v22465_v20  ;;  %20165 = vmatprep.subr.mxu0 %v21161_v2  ;;  %vm25118_vm9 = vmmov %vm25114_vm3  ;;  %v7486_v27 = vsel %vm25125_vm14, %v7485_v5, %v7477_v10 }
 0x9dc   : > { %6341 = vst.msk [vmem:[%s21480_s25 + $0xd4] sm:$0x1] %vm25115_vm13, %v6324_v49  ;;  %20172 = vmatprep.subr.mxu1 %v21161_v2  ;;  %vm25119_vm7 = vmmov %vm25116_vm1 }
 0x9dd   : > { %6342 = vst.msk [vmem:[%s21480_s25 + $0xf4] sm:$0x1] %vm25118_vm9, %v6326_v52  ;;  %20152 = vmatmul.mubr.msk.f32.vlgmr.msra.gmra.mxu0 %vm25119_vm7, %v22476_v33  ;;  %vm25120_vm4 = vmmov %vm25116_vm1  ;;  %vm25127_vm9 = vcmask 1042434  }
 0x9de   : > { %20160 = vmatmul.mubr.msk.f32.vlgmr.msra.gmra.mxu1 %vm25120_vm4, %v22483_v34  ;;  %vm25121_vm13 = vmmov %vm25116_vm1  ;;  %20166 = vmatpush3.msk.msra.mxu0 %vm21260_vm5, %v21162_v19  ;;  %v7488_v40 = vsel %vm25127_vm9, %v7487_v61, %v7486_v27  ;;  %vm25129_vm4 = vcmask 130048  }
 0x9df   : > { %20154 = vmatprep.mubr.msk.f32.mxu0 %vm25121_vm13, %v22490_v35  ;;  %vm25122_vm3 = vmmov %vm25116_vm1  ;;  %20173 = vmatpush3.msk.msra.mxu1 %vm21339_vm11, %v21162_v19 }
 0x9e0   : > { %20162 = vmatprep.mubr.msk.f32.mxu1 %vm25122_vm3, %v22497_v36  ;;  %20167 = vmatprep.subr.mxu0 %v21161_v2  ;;  %vm25123_vm0 = vmmov %vm25116_vm1  ;;  %vm25131_vm3 = vcmask 1043459  }
 0x9e1   : > { %20174 = vmatprep.subr.mxu1 %v21161_v2  ;;  %20155 = vmatmul.mubr.msk.f32.gmra.mxu0 %vm25123_vm0, %v22512_v37  ;;  %vm25124_vm2 = vmmov %vm25123_vm0  ;;  %v7490_v48 = vsel %vm25131_vm3, %v7489_v12, %v7488_v40  ;;  %v8038_v12 = vld [vmem:[%s21246_s27 + $0xd] sm:$0x1]  ;;  %v8041_v40 = vld [vmem:[%s21246_s27 + $0x3d] sm:$0x1] }
 0x9e2   : > { %20163 = vmatmul.mubr.msk.f32.gmra.mxu1 %vm25124_vm2, %v22519_v38  ;;  %20168 = vmatpush3.msk.msra.mxu0 %vm21266_vm6, %v21162_v19  ;;  %vm25126_vm1 = vmmov %vm25125_vm14  ;;  %vm25133_vm2 = vnez %v24793_v54  ;;  %vm25134_vm14 = vnez %v24787_v30 }
 0x9e3   : > { %20175 = vmatpush3.msk.msra.mxu1 %vm21347_vm12, %v21162_v19  ;;  %20169 = vmatprep.mubr.msk.f32.mxu0 %vm24831_vm15, %v21161_v2  ;;  %v7583_v28 = vsel %vm25126_vm1, %v7582_v7, %v7473_v11  ;;  %vm25128_vm7 = vmmov %vm25127_vm9  ;;  %vm25135_vm1 = vcmask 253952   ;;  %vm25137_vm9 = vcmask 1043456  }
 0x9e4   : > { %20176 = vmatprep.mubr.msk.f32.mxu1 %vm24831_vm15, %v21161_v2  ;;  %20179 = vmatprep.subr.mxu0 %v21161_v2  ;;  %v7585_v41 = vsel %vm25128_vm7, %v7584_v24, %v7583_v28  ;;  %vm25130_vm13 = vmmov %vm25129_vm4  ;;  %v8050_v24 = vrot.slane %v8043_v22, 7 }
 0x9e5   : > { %20186 = vmatprep.subr.mxu1 %v21161_v2  ;;  %vm25132_vm0 = vmmov %vm25131_vm3 }
 0x9e6   : > { %v7587_v49 = vsel %vm25132_vm0, %v7586_v15, %v7585_v41  ;;  %vm25138_vm7 = vmmov %vm25137_vm9  ;;  %vm25142_vm0 = vcmask 130048  }
 0x9e7   : > { %vm25141_vm3 = vmmov %vm25135_vm1 }
 0xa92   : > { %v6614_v53 = vpop.f32.mrf.mxu0 }
 0xa94   : > { %v20127_v55 = vpop.f32.mrf.mxu0  ;;  %v6687_v0 = vpop.f32.mrf.mxu1 }
 0xa95   : > { %v6688_v1 = vadd.f32 %v6687_v0, %v6614_v53 }
 0xa96   : > { %v20134_v59 = vpop.f32.mrf.mxu1 }
 0xa98   : > { %v6760_v8 = vpop.f32.mrf.mxu0 }
 0xa99   : > { %v6834_v9 = vpop.f32.mrf.mxu1  ;;  %v6764_v21 = vadd.f32 %v6760_v8, %v6688_v1 }
 0xa9a   : > { %v20141_v23 = vpop.f32.mrf.mxu0 }
 0xa9b   : > { %v20148_v60 = vpop.f32.mrf.mxu1  ;;  %v6838_v26 = vadd.f32 %v6834_v9, %v6764_v21  ;;  %v8039_v23 = vld [vmem:[%s21246_s27 + $0x1d] sm:$0x1] }
 0xa9c   : > { %v8147_v27 = vrot.slane %v8039_v23, 7 }
 0xa9d   : > { %v20153_v29 = vpop.f32.mrf.mxu0  ;;  %vm6839_vm10 = vcmp.ge.f32.partialorder %v6838_v26, 0.0  ;;  %v6840_v13 = vmul.f32 0.2, %v6838_v26 }
 0xa9e   : > { %v20161_v63 = vpop.f32.mrf.mxu1 }
 0xa9f   : > { %v7097_v14 = vadd.f32 %v20161_v63, %v20153_v29  ;;  %v6994_v18 = vpop.f32.mrf.mxu0  ;;  %v6841_v42 = vsel %vm6839_vm10, %v6838_v26, %v6840_v13  ;;  %vm25136_vm10 = vnez %v24795_v57  ;;  %v8040_v26 = vld [vmem:[%s21246_s27 + $0x2d] sm:$0x1]  ;;  %v8042_v63 = vld [vmem:[%s21246_s27 + $0xe] sm:$0x1] }
 0xaa0   : > { %v7091_v39 = vpop.f32.mrf.mxu1  ;;  %v6843_v45 = vcombine.high %v6841_v42, %v6841_v42  ;;  %v6850_v46 = vrot.slane %v6841_v42, %v21455_v32  ;;  %v8149_v41 = vrot.slane %v8040_v26, 6 }
 0xaa1   : > { %v7092_v43 = vadd.f32 %v7091_v39, %v6994_v18  ;;  %20170 = vmatmul.mubr.msk.f32.vlgmr.msra.gmra.mxu0 %vm25129_vm4, %v7097_v14  ;;  %v20156_v3 = vpop.f32.mrf.mxu0  ;;  %vm25139_vm4 = vmmov %vm25135_vm1  ;;  %v8045_v14 = vld [vmem:[%s21246_s27 + $0x3e] sm:$0x1]  ;;  %v8052_v39 = vrot.slane %v8044_v62, 6 }
 0xaa2   : > { %v20164_v47 = vpop.f32.mrf.mxu1  ;;  %20180 = vmatpush3.msk.msra.mxu0 %vm21309_vm8, %v21162_v19  ;;  %20183 = vmatprep.mubr.msk.f32.mxu0 %vm24831_vm15, %v21161_v2  ;;  %v6857_v51 = vrot.slane %v6843_v45, %v21455_v32  ;;  %v6858_v52 = vcombine.high %v6850_v46, %v6850_v46  ;;  %v6866_v53 = vrot.slane %v6850_v46, %v21455_v32 }
 0xaa3   : > { %20177 = vmatmul.mubr.msk.f32.vlgmr.msra.gmra.mxu1 %vm25130_vm13, %v7092_v43  ;;  %20181 = vmatprep.subr.mxu0 %v21161_v2  ;;  %v7004_v55 = vpop.f32.mrf.mxu0  ;;  %v7107_v56 = vadd.f32 %v20164_v47, %v20156_v3  ;;  %vm25140_vm13 = vmmov %vm25135_vm1  ;;  %v8054_v47 = vrot.slane %v8045_v14, 5  ;;  %v8604_v14 = vld [vmem:[%s21246_s27 + $0x1e] sm:$0x1] }
 0xaa4   : > { %20187 = vmatpush3.msk.msra.mxu1 %vm25133_vm2, %v21162_v19  ;;  %v7101_v0 = vpop.f32.mrf.mxu1  ;;  %20182 = vmatpush3.msk.msra.mxu0 %vm25134_vm14, %v21162_v19  ;;  %v6859_v59 = vcombine.high %v6857_v51, %v6857_v51  ;;  %v6873_v1 = vrot.slane %v6857_v51, %v21455_v32  ;;  %v6880_v4 = vrot.slane %v6858_v52, %v21455_v32  ;;  %vm25147_vm14 = vmmov %vm25141_vm3  ;;  %v8151_v51 = vrot.slane %v8041_v40, 5 }
 0xaa5   : > { %v7102_v58 = vadd.f32 %v7101_v0, %v7004_v55  ;;  %20188 = vmatprep.subr.mxu1 %v21161_v2  ;;  %20190 = vmatprep.mubr.msk.f32.mxu1 %vm24831_vm15, %v21161_v2  ;;  %v6888_v5 = vcombine.high %v6866_v53, %v6866_v53  ;;  %6900 = vst.msk [vmem:[%s21480_s25 + $0x16] sm:$0x1] %vm25135_vm1, %v6866_v53  ;;  %vm25143_vm1 = vmmov %vm25142_vm0 }
 0xaa6   : > { %20189 = vmatpush3.msk.msra.mxu1 %vm25136_vm10, %v21162_v19  ;;  %20193 = vmatprep.subr.msk.mxu0 %vm25137_vm9, %v7490_v48  ;;  %v6887_v6 = vrot.slane %v6859_v59, %v21455_v32  ;;  %v6889_v7 = vcombine.high %v6873_v1, %v6873_v1  ;;  %v6890_v8 = vcombine.high %v6880_v4, %v6880_v4  ;;  %vm25144_vm10 = vmmov %vm25138_vm7 }
 0xaa7   : > { %20201 = vmatprep.subr.msk.mxu1 %vm25138_vm7, %v7587_v49  ;;  %6901 = vst.msk [vmem:[%s21480_s25 + $0x36] sm:$0x1] %vm25139_vm4, %v6880_v4  ;;  %20184 = vmatmul.mubr.msk.f32.vlgmr.msra.gmra.mxu0 %vm25142_vm0, %v7102_v58  ;;  %vm25145_vm9 = vmmov %vm25138_vm7  ;;  %vm25149_vm4 = vcmask 31744  }
 0xaa8   : > { %6902 = vst.msk [vmem:[%s21480_s25 + $0x56] sm:$0x1] %vm25140_vm13, %v6888_v5  ;;  %20191 = vmatmul.mubr.msk.f32.vlgmr.msra.gmra.mxu1 %vm25143_vm1, %v7107_v56  ;;  %20194 = vmatpush3.msk.msra.mxu0 %vm25144_vm10, %v7490_v48  ;;  %v6891_v9 = vcombine.high %v6887_v6, %v6887_v6  ;;  %vm25146_vm7 = vmmov %vm25141_vm3 }
 0xaa9   : > { %6904 = vst.msk [vmem:[%s21480_s25 + $0x96] sm:$0x1] %vm25141_vm3, %v6873_v1  ;;  %20202 = vmatpush3.msk.msra.mxu1 %vm25145_vm9, %v7587_v49  ;;  %vm25148_vm2 = vmmov %vm25141_vm3  ;;  %20195 = vmatprep.mubr.msk.f32.mxu0 %vm25149_vm4, %v22358_v31 }
 0xaaa   : > { %6903 = vst.msk [vmem:[%s21480_s25 + $0x76] sm:$0x1] %vm25146_vm7, %v6890_v8  ;;  %vm25150_vm13 = vmmov %vm25149_vm4  ;;  %20209 = vmatprep.subr.mxu0 %v21161_v2  ;;  %20216 = vmatprep.subr.mxu1 %v21161_v2  ;;  %vm25158_vm7 = vcmask 1041409  }
 0xaab   : > { %6905 = vst.msk [vmem:[%s21480_s25 + $0xb6] sm:$0x1] %vm25147_vm14, %v6887_v6  ;;  %20203 = vmatprep.mubr.msk.f32.mxu1 %vm25150_vm13, %v22465_v20  ;;  %vm25151_vm10 = vmmov %vm25148_vm2  ;;  %v8051_v43 = vsel %vm25158_vm7, %v8050_v24, %v8042_v63 }
 0xaac   : > { %6906 = vst.msk [vmem:[%s21480_s25 + $0xd6] sm:$0x1] %vm25148_vm2, %v6889_v7  ;;  %vm25152_vm3 = vmmov %vm25149_vm4 }
 0xaad   : > { %6907 = vst.msk [vmem:[%s21480_s25 + $0xf6] sm:$0x1] %vm25151_vm10, %v6891_v9  ;;  %20196 = vmatmul.mubr.msk.f32.vlgmr.msra.gmra.mxu0 %vm25152_vm3, %v22476_v33  ;;  %vm25153_vm0 = vmmov %vm25152_vm3  ;;  %vm25160_vm10 = vcmask 1042434  }
 0xaae   : > { %20204 = vmatmul.mubr.msk.f32.vlgmr.msra.gmra.mxu1 %vm25153_vm0, %v22483_v34  ;;  %vm25154_vm2 = vmmov %vm25153_vm0  ;;  %20210 = vmatpush3.msk.msra.mxu0 %vm21260_vm5, %v21162_v19  ;;  %v8053_v55 = vsel %vm25160_vm10, %v8052_v39, %v8051_v43  ;;  %v8609_v39 = vld [vmem:[%s21246_s27 + $0x2f] sm:$0x1] }
 0xaaf   : > { %20198 = vmatprep.mubr.msk.f32.mxu0 %vm25154_vm2, %v22490_v35  ;;  %vm25155_vm14 = vmmov %vm25153_vm0  ;;  %20217 = vmatpush3.msk.msra.mxu1 %vm21339_vm11, %v21162_v19 }
 0xab0   : > { %20206 = vmatprep.mubr.msk.f32.mxu1 %vm25155_vm14, %v22497_v36  ;;  %20211 = vmatprep.subr.mxu0 %v21161_v2  ;;  %vm25156_vm1 = vmmov %vm25153_vm0  ;;  %vm25164_vm14 = vcmask 1043459  }
 0xab1   : > { %20218 = vmatprep.subr.mxu1 %v21161_v2  ;;  %20199 = vmatmul.mubr.msk.f32.gmra.mxu0 %vm25156_vm1, %v22512_v37  ;;  %vm25157_vm9 = vmmov %vm25153_vm0  ;;  %vm25162_vm0 = vcmask 130048   ;;  %v8055_v6 = vsel %vm25164_vm14, %v8054_v47, %v8053_v55 }
 0xab2   : > { %20207 = vmatmul.mubr.msk.f32.gmra.mxu1 %vm25157_vm9, %v22519_v38  ;;  %20212 = vmatpush3.msk.msra.mxu0 %vm21266_vm6, %v21162_v19  ;;  %vm25159_vm4 = vmmov %vm25158_vm7  ;;  %vm25166_vm9 = vnez %v24793_v54  ;;  %vm25167_vm7 = vnez %v24787_v30 }
 0xab3   : > { %20219 = vmatpush3.msk.msra.mxu1 %vm21347_vm12, %v21162_v19  ;;  %20213 = vmatprep.mubr.msk.f32.mxu0 %vm24831_vm15, %v21161_v2  ;;  %v8148_v45 = vsel %vm25159_vm4, %v8147_v27, %v8038_v12  ;;  %vm25161_vm3 = vmmov %vm25160_vm10  ;;  %vm25168_vm4 = vcmask 253952   ;;  %vm25170_vm10 = vcmask 1043456  }
 0xab4   : > { %20220 = vmatprep.mubr.msk.f32.mxu1 %vm24831_vm15, %v21161_v2  ;;  %20223 = vmatprep.subr.mxu0 %v21161_v2  ;;  %v8150_v0 = vsel %vm25161_vm3, %v8149_v41, %v8148_v45  ;;  %vm25163_vm2 = vmmov %vm25162_vm0  ;;  %v8605_v41 = vld [vmem:[%s21246_s27 + $0x2e] sm:$0x1] }
 0xab5   : > { %20230 = vmatprep.subr.mxu1 %v21161_v2  ;;  %vm25165_vm1 = vmmov %vm25164_vm14  ;;  %v8714_v55 = vrot.slane %v8605_v41, 6 }
 0xab6   : > { %v8152_v7 = vsel %vm25165_vm1, %v8151_v51, %v8150_v0  ;;  %vm25171_vm3 = vmmov %vm25170_vm10  ;;  %vm25175_vm1 = vcmask 130048  }
 0xb61   : > { %v7179_v10 = vpop.f32.mrf.mxu0 }
 0xb63   : > { %v20171_v11 = vpop.f32.mrf.mxu0  ;;  %v7252_v21 = vpop.f32.mrf.mxu1 }
 0xb64   : > { %v7253_v61 = vadd.f32 %v7252_v21, %v7179_v10 }
 0xb65   : > { %v20178_v60 = vpop.f32.mrf.mxu1 }
 0xb67   : > { %v7325_v28 = vpop.f32.mrf.mxu0 }
 0xb68   : > { %v7399_v29 = vpop.f32.mrf.mxu1  ;;  %v7329_v13 = vadd.f32 %v7325_v28, %v7253_v61 }
 0xb69   : > { %v20185_v15 = vpop.f32.mrf.mxu0 }
 0xb6a   : > { %v20192_v18 = vpop.f32.mrf.mxu1  ;;  %v7403_v42 = vadd.f32 %v7399_v29, %v7329_v13  ;;  %v8608_v13 = vld [vmem:[%s21246_s27 + $0x1f] sm:$0x1] }
 0xb6b   : > { %v8615_v40 = vrot.slane %v8608_v13, 7 }
 0xb6c   : > { %vm7404_vm13 = vcmp.ge.f32.partialorder %v7403_v42, 0.0  ;;  %v7405_v48 = vmul.f32 0.2, %v7403_v42 }
 0xb6d   : > { %v20197_v46 = vpop.f32.mrf.mxu0 }
 0xb6e   : > { %v20205_v3 = vpop.f32.mrf.mxu1  ;;  %v7406_v56 = vsel %vm7404_vm13, %v7403_v42, %v7405_v48  ;;  %vm25169_vm13 = vnez %v24795_v57  ;;  %v8712_v42 = vrot.slane %v8604_v14, 7  ;;  %v8610_v48 = vld [vmem:[%s21246_s27 + $0x3f] sm:$0x1] }
 0xb6f   : > { %v7662_v49 = vadd.f32 %v20205_v3, %v20197_v46  ;;  %v7559_v52 = vpop.f32.mrf.mxu0  ;;  %v7408_v59 = vcombine.high %v7406_v56, %v7406_v56  ;;  %v7415_v1 = vrot.slane %v7406_v56, %v21455_v32  ;;  %v8607_v46 = vld [vmem:[%s21246_s27 + $0xf] sm:$0x1]  ;;  %v8603_v3 = vld [vmem:[%s21246_s27 + $0xe] sm:$0x1] }
 0xb70   : > { %v7656_v53 = vpop.f32.mrf.mxu1 }
 0xb71   : > { %v7657_v58 = vadd.f32 %v7656_v53, %v7559_v52  ;;  %20214 = vmatmul.mubr.msk.f32.vlgmr.msra.gmra.mxu0 %vm25162_vm0, %v7662_v49  ;;  %v20200_v4 = vpop.f32.mrf.mxu0  ;;  %v7422_v8 = vrot.slane %v7408_v59, %v21455_v32  ;;  %v7423_v9 = vcombine.high %v7415_v1, %v7415_v1  ;;  %v7431_v10 = vrot.slane %v7415_v1, %v21455_v32  ;;  %vm25172_vm0 = vmmov %vm25168_vm4  ;;  %v8606_v53 = vld [vmem:[%s21246_s27 + $0x3e] sm:$0x1] }
 0xb72   : > { %v20208_v5 = vpop.f32.mrf.mxu1  ;;  %20224 = vmatpush3.msk.msra.mxu0 %vm21309_vm8, %v21162_v19  ;;  %20227 = vmatprep.mubr.msk.f32.mxu0 %vm24831_vm15, %v21161_v2  ;;  %vm25174_vm14 = vmmov %vm25172_vm0  ;;  %v8617_v52 = vrot.slane %v8609_v39, 6 }
 0xb73   : > { %20221 = vmatmul.mubr.msk.f32.vlgmr.msra.gmra.mxu1 %vm25163_vm2, %v7657_v58  ;;  %20225 = vmatprep.subr.mxu0 %v21161_v2  ;;  %v7569_v11 = vpop.f32.mrf.mxu0  ;;  %v7672_v22 = vadd.f32 %v20208_v5, %v20200_v4  ;;  %v7424_v60 = vcombine.high %v7422_v8, %v7422_v8  ;;  %v7438_v61 = vrot.slane %v7422_v8, %v21455_v32  ;;  %vm25173_vm2 = vmmov %vm25172_vm0  ;;  %v8619_v4 = vrot.slane %v8610_v48, 5 }
 0xb74   : > { %20231 = vmatpush3.msk.msra.mxu1 %vm25166_vm9, %v21162_v19  ;;  %v7666_v21 = vpop.f32.mrf.mxu1  ;;  %20226 = vmatpush3.msk.msra.mxu0 %vm25167_vm7, %v21162_v19  ;;  %v7445_v62 = vrot.slane %v7423_v9, %v21455_v32  ;;  %v7453_v24 = vcombine.high %v7431_v10, %v7431_v10  ;;  %7465 = vst.msk [vmem:[%s21480_s25 + $0x18] sm:$0x1] %vm25168_vm4, %v7431_v10  ;;  %vm25176_vm4 = vmmov %vm25175_vm1 }
 0xb75   : > { %v7667_v23 = vadd.f32 %v7666_v21, %v7569_v11  ;;  %20232 = vmatprep.subr.mxu1 %v21161_v2  ;;  %20234 = vmatprep.mubr.msk.f32.mxu1 %vm24831_vm15, %v21161_v2  ;;  %v7452_v26 = vrot.slane %v7424_v60, %v21455_v32  ;;  %v7454_v27 = vcombine.high %v7438_v61, %v7438_v61  ;;  %vm25180_vm7 = vmmov %vm25172_vm0 }
 0xb76   : > { %20233 = vmatpush3.msk.msra.mxu1 %vm25169_vm13, %v21162_v19  ;;  %20237 = vmatprep.subr.msk.mxu0 %vm25170_vm10, %v8055_v6  ;;  %v7455_v28 = vcombine.high %v7445_v62, %v7445_v62  ;;  %7466 = vst.msk [vmem:[%s21480_s25 + $0x38] sm:$0x1] %vm25172_vm0, %v7445_v62  ;;  %vm25177_vm13 = vmmov %vm25171_vm3 }
 0xb77   : > { %20245 = vmatprep.subr.msk.mxu1 %vm25171_vm3, %v8152_v7  ;;  %7467 = vst.msk [vmem:[%s21480_s25 + $0x58] sm:$0x1] %vm25173_vm2, %v7453_v24  ;;  %20228 = vmatmul.mubr.msk.f32.vlgmr.msra.gmra.mxu0 %vm25175_vm1, %v7667_v23  ;;  %vm25178_vm10 = vmmov %vm25171_vm3  ;;  %v7456_v29 = vcombine.high %v7452_v26, %v7452_v26 }
 0xb78   : > { %7469 = vst.msk [vmem:[%s21480_s25 + $0x98] sm:$0x1] %vm25174_vm14, %v7438_v61  ;;  %20235 = vmatmul.mubr.msk.f32.vlgmr.msra.gmra.mxu1 %vm25176_vm4, %v7672_v22  ;;  %20238 = vmatpush3.msk.msra.mxu0 %vm25177_vm13, %v8055_v6  ;;  %vm25179_vm3 = vmmov %vm25172_vm0 }
 0xb79   : > { %20246 = vmatpush3.msk.msra.mxu1 %vm25178_vm10, %v8152_v7  ;;  %7468 = vst.msk [vmem:[%s21480_s25 + $0x78] sm:$0x1] %vm25179_vm3, %v7455_v28  ;;  %vm25181_vm9 = vmmov %vm25172_vm0  ;;  %vm25182_vm0 = vcmask 31744   ;;  %20253 = vmatprep.subr.mxu0 %v21161_v2  ;;  %v8716_v7 = vrot.slane %v8606_v53, 5  ;;  %v9168_v53 = vld [vmem:[%s21246_s27] sm:$0x1] }
 0xb7a   : > { %7470 = vst.msk [vmem:[%s21480_s25 + $0xb8] sm:$0x1] %vm25180_vm7, %v7452_v26  ;;  %20239 = vmatprep.mubr.msk.f32.mxu0 %vm25182_vm0, %v22358_v31  ;;  %vm25183_vm2 = vmmov %vm25182_vm0  ;;  %20260 = vmatprep.subr.mxu1 %v21161_v2 }
 0xb7b   : > { %7471 = vst.msk [vmem:[%s21480_s25 + $0xd8] sm:$0x1] %vm25181_vm9, %v7454_v27  ;;  %20247 = vmatprep.mubr.msk.f32.mxu1 %vm25183_vm2, %v22465_v20  ;;  %vm25184_vm13 = vmmov %vm25179_vm3  ;;  %vm25191_vm3 = vcmask 1041409  }
 0xb7c   : > { %7472 = vst.msk [vmem:[%s21480_s25 + $0xf8] sm:$0x1] %vm25184_vm13, %v7456_v29  ;;  %vm25185_vm14 = vmmov %vm25182_vm0  ;;  %v8616_v56 = vsel %vm25191_vm3, %v8615_v40, %v8607_v46  ;;  %vm25193_vm13 = vcmask 1042434   ;;  %v9174_v46 = vld [vmem:[%s21246_s27 + $0x21] sm:$0x1] }
 0xb7d   : > { %20240 = vmatmul.mubr.msk.f32.vlgmr.msra.gmra.mxu0 %vm25185_vm14, %v22476_v33  ;;  %vm25186_vm1 = vmmov %vm25182_vm0  ;;  %v8618_v10 = vsel %vm25193_vm13, %v8617_v52, %v8616_v56  ;;  %v9172_v52 = vld [vmem:[%s21246_s27 + $0x1] sm:$0x1] }
 0xb7e   : > { %20248 = vmatmul.mubr.msk.f32.vlgmr.msra.gmra.mxu1 %vm25186_vm1, %v22483_v34  ;;  %vm25187_vm9 = vmmov %vm25182_vm0  ;;  %20254 = vmatpush3.msk.msra.mxu0 %vm21260_vm5, %v21162_v19  ;;  %vm25195_vm1 = vcmask 130048  }
 0xb7f   : > { %20242 = vmatprep.mubr.msk.f32.mxu0 %vm25187_vm9, %v22490_v35  ;;  %vm25188_vm7 = vmmov %vm25182_vm0  ;;  %20261 = vmatpush3.msk.msra.mxu1 %vm21339_vm11, %v21162_v19 }
 0xb80   : > { %20250 = vmatprep.mubr.msk.f32.mxu1 %vm25188_vm7, %v22497_v36  ;;  %20255 = vmatprep.subr.mxu0 %v21161_v2  ;;  %vm25189_vm4 = vmmov %vm25182_vm0  ;;  %vm25197_vm7 = vcmask 1043459  }
 0xb81   : > { %20262 = vmatprep.subr.mxu1 %v21161_v2  ;;  %20243 = vmatmul.mubr.msk.f32.gmra.mxu0 %vm25189_vm4, %v22512_v37  ;;  %vm25190_vm10 = vmmov %vm25182_vm0  ;;  %v8620_v24 = vsel %vm25197_vm7, %v8619_v4, %v8618_v10 }
 0xb82   : > { %20251 = vmatmul.mubr.msk.f32.gmra.mxu1 %vm25190_vm10, %v22519_v38  ;;  %20256 = vmatpush3.msk.msra.mxu0 %vm21266_vm6, %v21162_v19  ;;  %vm25192_vm0 = vmmov %vm25191_vm3  ;;  %vm25199_vm10 = vnez %v24793_v54  ;;  %vm25200_vm3 = vnez %v24787_v30 }
 0xb83   : > { %20263 = vmatpush3.msk.msra.mxu1 %vm21347_vm12, %v21162_v19  ;;  %20257 = vmatprep.mubr.msk.f32.mxu0 %vm24831_vm15, %v21161_v2  ;;  %v8713_v58 = vsel %vm25192_vm0, %v8712_v42, %v8603_v3  ;;  %vm25194_vm14 = vmmov %vm25193_vm13  ;;  %vm25201_vm0 = vcmask 253952   ;;  %vm25203_vm13 = vcmask 1043456  }
 0xb84   : > { %20264 = vmatprep.mubr.msk.f32.mxu1 %vm24831_vm15, %v21161_v2  ;;  %20267 = vmatprep.subr.mxu0 %v21161_v2  ;;  %v8715_v11 = vsel %vm25194_vm14, %v8714_v55, %v8713_v58  ;;  %vm25196_vm9 = vmmov %vm25195_vm1 }
 0xb85   : > { %20274 = vmatprep.subr.mxu1 %v21161_v2  ;;  %vm25198_vm4 = vmmov %vm25197_vm7 }
 0xb86   : > { %v8717_v26 = vsel %vm25198_vm4, %v8716_v7, %v8715_v11  ;;  %vm25204_vm14 = vmmov %vm25203_vm13  ;;  %vm25208_vm4 = vcmask 130048  }
 0xb87   : > { %vm25207_vm7 = vmmov %vm25201_vm0 }
 0xc31   : > { %v7744_v31 = vpop.f32.mrf.mxu0 }
 0xc33   : > { %v20215_v63 = vpop.f32.mrf.mxu0  ;;  %v7817_v12 = vpop.f32.mrf.mxu1 }
 0xc34   : > { %v7818_v18 = vadd.f32 %v7817_v12, %v7744_v31 }
 0xc35   : > { %v20222_v15 = vpop.f32.mrf.mxu1 }
 0xc37   : > { %v7890_v43 = vpop.f32.mrf.mxu0 }
 0xc38   : > { %v7964_v45 = vpop.f32.mrf.mxu1  ;;  %v7894_v47 = vadd.f32 %v7890_v43, %v7818_v18 }
 0xc39   : > { %v20229_v49 = vpop.f32.mrf.mxu0 }
 0xc3a   : > { %v20236_v51 = vpop.f32.mrf.mxu1  ;;  %v7968_v0 = vadd.f32 %v7964_v45, %v7894_v47  ;;  %v21082_v45 = vld [vmem:[%s24758_s1 + $0x20] sm:$0xff] }
 0xc3b   : > { %v9170_v47 = vld [vmem:[%s21246_s27 + $0x20] sm:$0x1] }
 0xc3c   : > { %vm7969_vm2 = vcmp.ge.f32.partialorder %v7968_v0, 0.0  ;;  %v7970_v5 = vmul.f32 0.2, %v7968_v0  ;;  %v9291_v4 = vrot.slane %v9170_v47, 6  ;;  %v23024_v47 = vld [vmem:[%s24758_s1 + $0x70] sm:$0xff] }
 0xc3d   : > { %v20241_v59 = vpop.f32.mrf.mxu0 }
 0xc3e   : > { %v20249_v1 = vpop.f32.mrf.mxu1  ;;  %v7971_v21 = vsel %vm7969_vm2, %v7968_v0, %v7970_v5  ;;  %vm25202_vm2 = vnez %v24795_v57  ;;  %v9175_v0 = vld [vmem:[%s21246_s27 + $0x31] sm:$0x1] }
 0xc3f   : > { %v8227_v6 = vadd.f32 %v20249_v1, %v20241_v59  ;;  %v8124_v8 = vpop.f32.mrf.mxu0  ;;  %v7973_v23 = vcombine.high %v7971_v21, %v7971_v21  ;;  %v7980_v60 = vrot.slane %v7971_v21, %v21455_v32  ;;  %v9182_v59 = vrot.slane %v9174_v46, 6  ;;  %v9171_v1 = vld [vmem:[%s21246_s27 + $0x30] sm:$0x1]  ;;  %v23009_v46 = vld [vmem:[%s24758_s1 + $0x48] sm:$0xff] }
 0xc40   : > { %v8221_v9 = vpop.f32.mrf.mxu1  ;;  %v9184_v10 = vrot.slane %v9175_v0, 5  ;;  %v9762_v0 = vld [vmem:[%s21246_s27 + $0x12] sm:$0x1] }
 0xc41   : > { %v8222_v22 = vadd.f32 %v8221_v9, %v8124_v8  ;;  %20258 = vmatmul.mubr.msk.f32.vlgmr.msra.gmra.mxu0 %vm25195_vm1, %v8227_v6  ;;  %v20244_v61 = vpop.f32.mrf.mxu0  ;;  %v7987_v27 = vrot.slane %v7973_v23, %v21455_v32  ;;  %v7988_v28 = vcombine.high %v7980_v60, %v7980_v60  ;;  %v7996_v29 = vrot.slane %v7980_v60, %v21455_v32  ;;  %vm25205_vm1 = vmmov %vm25201_vm0 }
 0xc42   : > { %v20252_v62 = vpop.f32.mrf.mxu1  ;;  %20268 = vmatpush3.msk.msra.mxu0 %vm21309_vm8, %v21162_v19  ;;  %20271 = vmatprep.mubr.msk.f32.mxu0 %vm24831_vm15, %v21161_v2 }
 0xc43   : > { %20265 = vmatmul.mubr.msk.f32.vlgmr.msra.gmra.mxu1 %vm25196_vm9, %v8222_v22  ;;  %20269 = vmatprep.subr.mxu0 %v21161_v2  ;;  %v8134_v31 = vpop.f32.mrf.mxu0  ;;  %v8237_v12 = vadd.f32 %v20252_v62, %v20244_v61  ;;  %v7989_v14 = vcombine.high %v7987_v27, %v7987_v27  ;;  %v8003_v15 = vrot.slane %v7987_v27, %v21455_v32  ;;  %vm25206_vm9 = vmmov %vm25201_vm0  ;;  %v9293_v22 = vrot.slane %v9171_v1, 5  ;;  %v9763_v1 = vld [vmem:[%s21246_s27 + $0x22] sm:$0x1] }
 0xc44   : > { %20275 = vmatpush3.msk.msra.mxu1 %vm25199_vm10, %v21162_v19  ;;  %v8231_v63 = vpop.f32.mrf.mxu1  ;;  %20270 = vmatpush3.msk.msra.mxu0 %vm25200_vm3, %v21162_v19  ;;  %v8010_v18 = vrot.slane %v7988_v28, %v21455_v32  ;;  %v8018_v39 = vcombine.high %v7996_v29, %v7996_v29  ;;  %8030 = vst.msk [vmem:[%s21480_s25 + $0x1a] sm:$0x1] %vm25201_vm0, %v7996_v29  ;;  %vm25209_vm0 = vmmov %vm25208_vm4 }
 0xc45   : > { %v8232_v13 = vadd.f32 %v8231_v63, %v8134_v31  ;;  %20276 = vmatprep.subr.mxu1 %v21161_v2  ;;  %20278 = vmatprep.mubr.msk.f32.mxu1 %vm24831_vm15, %v21161_v2  ;;  %v8017_v40 = vrot.slane %v7989_v14, %v21455_v32  ;;  %v8019_v41 = vcombine.high %v8003_v15, %v8003_v15  ;;  %vm25213_vm3 = vmmov %vm25205_vm1 }
 0xc46   : > { %20277 = vmatpush3.msk.msra.mxu1 %vm25202_vm2, %v21162_v19  ;;  %20281 = vmatprep.subr.msk.mxu0 %vm25203_vm13, %v8620_v24  ;;  %v8020_v42 = vcombine.high %v8010_v18, %v8010_v18  ;;  %8031 = vst.msk [vmem:[%s21480_s25 + $0x3a] sm:$0x1] %vm25205_vm1, %v8010_v18  ;;  %vm25210_vm2 = vmmov %vm25203_vm13 }
 0xc47   : > { %20289 = vmatprep.subr.msk.mxu1 %vm25204_vm14, %v8717_v26  ;;  %8032 = vst.msk [vmem:[%s21480_s25 + $0x5a] sm:$0x1] %vm25206_vm9, %v8018_v39  ;;  %20272 = vmatmul.mubr.msk.f32.vlgmr.msra.gmra.mxu0 %vm25208_vm4, %v8232_v13  ;;  %vm25211_vm13 = vmmov %vm25210_vm2  ;;  %v8021_v43 = vcombine.high %v8017_v40, %v8017_v40 }
 0xc48   : > { %8034 = vst.msk [vmem:[%s21480_s25 + $0x9a] sm:$0x1] %vm25207_vm7, %v8003_v15  ;;  %20279 = vmatmul.mubr.msk.f32.vlgmr.msra.gmra.mxu1 %vm25209_vm0, %v8237_v12  ;;  %20282 = vmatpush3.msk.msra.mxu0 %vm25210_vm2, %v8620_v24  ;;  %vm25212_vm14 = vmmov %vm25205_vm1 }
 0xc49   : > { %20290 = vmatpush3.msk.msra.mxu1 %vm25211_vm13, %v8717_v26  ;;  %8033 = vst.msk [vmem:[%s21480_s25 + $0x7a] sm:$0x1] %vm25212_vm14, %v8020_v42  ;;  %vm25214_vm10 = vmmov %vm25205_vm1  ;;  %vm25215_vm1 = vcmask 31744   ;;  %20297 = vmatprep.subr.mxu0 %v21161_v2  ;;  %vm25224_vm14 = vcmask 1041409  }
 0xc4a   : > { %8035 = vst.msk [vmem:[%s21480_s25 + $0xba] sm:$0x1] %vm25213_vm3, %v8017_v40  ;;  %20283 = vmatprep.mubr.msk.f32.mxu0 %vm25215_vm1, %v21082_v45  ;;  %vm25216_vm9 = vmmov %vm25215_vm1  ;;  %20304 = vmatprep.subr.mxu1 %v21161_v2 }
 0xc4b   : > { %8036 = vst.msk [vmem:[%s21480_s25 + $0xda] sm:$0x1] %vm25214_vm10, %v8019_v41  ;;  %20291 = vmatprep.mubr.msk.f32.mxu1 %vm25216_vm9, %v22465_v20  ;;  %vm25217_vm2 = vmmov %vm25213_vm3 }
 0xc4c   : > { %8037 = vst.msk [vmem:[%s21480_s25 + $0xfa] sm:$0x1] %vm25217_vm2, %v8021_v43  ;;  %vm25218_vm7 = vmmov %vm25215_vm1  ;;  %vm25226_vm2 = vcmask 1042434  }
 0xc4d   : > { %20284 = vmatmul.mubr.msk.f32.vlgmr.msra.gmra.mxu0 %vm25218_vm7, %v22476_v33  ;;  %vm25219_vm10 = vmmov %vm25215_vm1 }
 0xc4e   : > { %20292 = vmatmul.mubr.msk.f32.vlgmr.msra.gmra.mxu1 %vm25219_vm10, %v22483_v34  ;;  %vm25220_vm3 = vmmov %vm25215_vm1  ;;  %20298 = vmatpush3.msk.msra.mxu0 %vm21260_vm5, %v21162_v19  ;;  %vm25228_vm10 = vcmask 130048  }
 0xc4f   : > { %20286 = vmatprep.mubr.msk.f32.mxu0 %vm25220_vm3, %v22490_v35  ;;  %vm25221_vm4 = vmmov %vm25215_vm1  ;;  %20305 = vmatpush3.msk.msra.mxu1 %vm21339_vm11, %v21162_v19  ;;  %v9173_v35 = vld [vmem:[%s21246_s27 + $0x11] sm:$0x1] }
 0xc50   : > { %20294 = vmatprep.mubr.msk.f32.mxu1 %vm25221_vm4, %v22497_v36  ;;  %20299 = vmatprep.subr.mxu0 %v21161_v2  ;;  %vm25222_vm0 = vmmov %vm25215_vm1  ;;  %v9169_v36 = vld [vmem:[%s21246_s27 + $0x10] sm:$0x1]  ;;  %v9180_v3 = vrot.slane %v9173_v35, 7  ;;  %vm25230_vm4 = vcmask 1043459  }
 0xc51   : > { %20306 = vmatprep.subr.mxu1 %v21161_v2  ;;  %20287 = vmatmul.mubr.msk.f32.gmra.mxu0 %vm25222_vm0, %v22512_v37  ;;  %vm25223_vm13 = vmmov %vm25222_vm0  ;;  %v9289_v48 = vrot.slane %v9169_v36, 7 }
 0xc52   : > { %20295 = vmatmul.mubr.msk.f32.gmra.mxu1 %vm25223_vm13, %v22519_v38  ;;  %20300 = vmatpush3.msk.msra.mxu0 %vm21266_vm6, %v21162_v19  ;;  %v9181_v6 = vsel %vm25224_vm14, %v9180_v3, %v9172_v52  ;;  %vm25225_vm1 = vmmov %vm25224_vm14  ;;  %vm25232_vm13 = vnez %v24793_v54  ;;  %vm25233_vm14 = vnez %v24787_v30 }
 0xc53   : > { %20307 = vmatpush3.msk.msra.mxu1 %vm21347_vm12, %v21162_v19  ;;  %20301 = vmatprep.mubr.msk.f32.mxu0 %vm24831_vm15, %v21161_v2  ;;  %v9290_v7 = vsel %vm25225_vm1, %v9289_v48, %v9168_v53  ;;  %v9183_v61 = vsel %vm25226_vm2, %v9182_v59, %v9181_v6  ;;  %vm25227_vm7 = vmmov %vm25226_vm2  ;;  %vm25234_vm1 = vcmask 253952   ;;  %vm25236_vm2 = vcmask 1043456   ;;  %v23029_v48 = vld [vmem:[%s24758_s1 + $0x50] sm:$0xff] }
 0xc54   : > { %20308 = vmatprep.mubr.msk.f32.mxu1 %vm24831_vm15, %v21161_v2  ;;  %20311 = vmatprep.subr.mxu0 %v21161_v2  ;;  %v9292_v62 = vsel %vm25227_vm7, %v9291_v4, %v9290_v7  ;;  %vm25229_vm3 = vmmov %vm25228_vm10  ;;  %v9185_v63 = vsel %vm25230_vm4, %v9184_v10, %v9183_v61  ;;  %v9769_v4 = vrot.slane %v9762_v0, 7  ;;  %v9757_v10 = vld [vmem:[%s21246_s27 + $0x1] sm:$0x1]  ;;  %v9760_v61 = vld [vmem:[%s21246_s27 + $0x31] sm:$0x1] }
 0xc55   : > { %20318 = vmatprep.subr.mxu1 %v21161_v2  ;;  %vm25231_vm0 = vmmov %vm25230_vm4 }
 0xc56   : > { %v9294_v12 = vsel %vm25231_vm0, %v9293_v22, %v9292_v62  ;;  %vm25237_vm7 = vmmov %vm25236_vm2  ;;  %vm25241_vm0 = vcmask 130048  }
 0xc57   : > { %vm25240_vm4 = vmmov %vm25234_vm1 }
 0xd01   : > { %v8309_v20 = vpop.f32.mrf.mxu0 }
 0xd03   : > { %v20259_v33 = vpop.f32.mrf.mxu0  ;;  %v8382_v34 = vpop.f32.mrf.mxu1 }
 0xd04   : > { %v8383_v38 = vadd.f32 %v8382_v34, %v8309_v20  ;;  %v22983_v33 = vld [vmem:[%s24758_s1 + $0x60] sm:$0xff] }
 0xd05   : > { %v20266_v37 = vpop.f32.mrf.mxu1  ;;  %v22988_v34 = vld [vmem:[%s24758_s1 + $0x40] sm:$0xff] }
 0xd07   : > { %v8455_v49 = vpop.f32.mrf.mxu0 }
 0xd08   : > { %v8529_v51 = vpop.f32.mrf.mxu1  ;;  %v8459_v55 = vadd.f32 %v8455_v49, %v8383_v38  ;;  %v23004_v38 = vld [vmem:[%s24758_s1 + $0x68] sm:$0xff]  ;;  %v23046_v49 = vld [vmem:[%s24758_s1 + $0x78] sm:$0xff] }
 0xd09   : > { %v20273_v56 = vpop.f32.mrf.mxu0 }
 0xd0a   : > { %v20280_v58 = vpop.f32.mrf.mxu1  ;;  %v8533_v5 = vadd.f32 %v8529_v51, %v8459_v55  ;;  %v23051_v51 = vld [vmem:[%s24758_s1 + $0x58] sm:$0xff]  ;;  %v9758_v56 = vld [vmem:[%s21246_s27 + $0x11] sm:$0x1] }
 0xd0b   : > { %v9866_v6 = vrot.slane %v9758_v56, 7 }
 0xd0c   : > { %vm8534_vm9 = vcmp.ge.f32.partialorder %v8533_v5, 0.0  ;;  %v8535_v11 = vmul.f32 0.2, %v8533_v5 }
 0xd0d   : > { %v20285_v8 = vpop.f32.mrf.mxu0 }
 0xd0e   : > { %v20293_v9 = vpop.f32.mrf.mxu1  ;;  %v8536_v24 = vsel %vm8534_vm9, %v8533_v5, %v8535_v11  ;;  %vm25235_vm9 = vnez %v24795_v57  ;;  %v9759_v5 = vld [vmem:[%s21246_s27 + $0x21] sm:$0x1] }
 0xd0f   : > { %v8792_v21 = vadd.f32 %v20293_v9, %v20285_v8  ;;  %v8689_v23 = vpop.f32.mrf.mxu0  ;;  %v8538_v27 = vcombine.high %v8536_v24, %v8536_v24  ;;  %v8545_v28 = vrot.slane %v8536_v24, %v21455_v32  ;;  %v9761_v9 = vld [vmem:[%s21246_s27 + $0x2] sm:$0x1]  ;;  %v9868_v62 = vrot.slane %v9759_v5, 6 }
 0xd10   : > { %v8786_v60 = vpop.f32.mrf.mxu1 }
 0xd11   : > { %v8787_v26 = vadd.f32 %v8786_v60, %v8689_v23  ;;  %20302 = vmatmul.mubr.msk.f32.vlgmr.msra.gmra.mxu0 %vm25228_vm10, %v8792_v21  ;;  %v20288_v29 = vpop.f32.mrf.mxu0  ;;  %v8552_v13 = vrot.slane %v8538_v27, %v21455_v32  ;;  %v8553_v14 = vcombine.high %v8545_v28, %v8545_v28  ;;  %v8561_v15 = vrot.slane %v8545_v28, %v21455_v32  ;;  %vm25238_vm10 = vmmov %vm25234_vm1  ;;  %v9764_v21 = vld [vmem:[%s21246_s27 + $0x32] sm:$0x1] }
 0xd12   : > { %v20296_v31 = vpop.f32.mrf.mxu1  ;;  %20312 = vmatpush3.msk.msra.mxu0 %vm21309_vm8, %v21162_v19  ;;  %20315 = vmatprep.mubr.msk.f32.mxu0 %vm24831_vm15, %v21161_v2  ;;  %v9771_v60 = vrot.slane %v9763_v1, 6 }
 0xd13   : > { %20309 = vmatmul.mubr.msk.f32.vlgmr.msra.gmra.mxu1 %vm25229_vm3, %v8787_v26  ;;  %20313 = vmatprep.subr.mxu0 %v21161_v2  ;;  %v8699_v18 = vpop.f32.mrf.mxu0  ;;  %v8802_v40 = vadd.f32 %v20296_v31, %v20288_v29  ;;  %v8554_v42 = vcombine.high %v8552_v13, %v8552_v13  ;;  %v8568_v43 = vrot.slane %v8552_v13, %v21455_v32  ;;  %vm25239_vm3 = vmmov %vm25234_vm1  ;;  %v9773_v31 = vrot.slane %v9764_v21, 5  ;;  %v10327_v21 = vld [vmem:[%s21246_s27 + $0x13] sm:$0x1] }
 0xd14   : > { %20319 = vmatpush3.msk.msra.mxu1 %vm25232_vm13, %v21162_v19  ;;  %v8796_v39 = vpop.f32.mrf.mxu1  ;;  %20314 = vmatpush3.msk.msra.mxu0 %vm25233_vm14, %v21162_v19  ;;  %v8575_v45 = vrot.slane %v8553_v14, %v21455_v32  ;;  %v8583_v20 = vcombine.high %v8561_v15, %v8561_v15  ;;  %8595 = vst.msk [vmem:[%s21480_s25 + $0x1c] sm:$0x1] %vm25234_vm1, %v8561_v15  ;;  %vm25242_vm1 = vmmov %vm25241_vm0  ;;  %v9870_v13 = vrot.slane %v9760_v61, 5  ;;  %v10328_v61 = vld [vmem:[%s21246_s27 + $0x23] sm:$0x1] }
 0xd15   : > { %v8797_v41 = vadd.f32 %v8796_v39, %v8699_v18  ;;  %20320 = vmatprep.subr.mxu1 %v21161_v2  ;;  %20322 = vmatprep.mubr.msk.f32.mxu1 %vm24831_vm15, %v21161_v2  ;;  %v8582_v35 = vrot.slane %v8554_v42, %v21455_v32  ;;  %v8584_v36 = vcombine.high %v8568_v43, %v8568_v43 }
 0xd16   : > { %20321 = vmatpush3.msk.msra.mxu1 %vm25235_vm9, %v21162_v19  ;;  %20325 = vmatprep.subr.msk.mxu0 %vm25236_vm2, %v9185_v63  ;;  %v8585_v37 = vcombine.high %v8575_v45, %v8575_v45  ;;  %8596 = vst.msk [vmem:[%s21480_s25 + $0x3c] sm:$0x1] %vm25238_vm10, %v8575_v45  ;;  %vm25244_vm10 = vmmov %vm25239_vm3 }
 0xd17   : > { %20333 = vmatprep.subr.msk.mxu1 %vm25237_vm7, %v9294_v12  ;;  %8597 = vst.msk [vmem:[%s21480_s25 + $0x5c] sm:$0x1] %vm25239_vm3, %v8583_v20  ;;  %20316 = vmatmul.mubr.msk.f32.vlgmr.msra.gmra.mxu0 %vm25241_vm0, %v8797_v41  ;;  %vm25243_vm7 = vmmov %vm25236_vm2  ;;  %v8586_v3 = vcombine.high %v8582_v35, %v8582_v35  ;;  %vm25246_vm0 = vcmask 31744  }
 0xd18   : > { %8599 = vst.msk [vmem:[%s21480_s25 + $0x9c] sm:$0x1] %vm25240_vm4, %v8568_v43  ;;  %20323 = vmatmul.mubr.msk.f32.vlgmr.msra.gmra.mxu1 %vm25242_vm1, %v8802_v40  ;;  %20326 = vmatpush3.msk.msra.mxu0 %vm25236_vm2, %v9185_v63  ;;  %vm25245_vm4 = vmmov %vm25239_vm3 }
 0xd19   : > { %20334 = vmatpush3.msk.msra.mxu1 %vm25243_vm7, %v9294_v12  ;;  %8598 = vst.msk [vmem:[%s21480_s25 + $0x7c] sm:$0x1] %vm25244_vm10, %v8585_v37  ;;  %20327 = vmatprep.mubr.msk.f32.mxu0 %vm25246_vm0, %v22983_v33  ;;  %vm25247_vm1 = vmmov %vm25246_vm0 }
 0xd1a   : > { %8600 = vst.msk [vmem:[%s21480_s25 + $0xbc] sm:$0x1] %vm25239_vm3, %v8582_v35  ;;  %20335 = vmatprep.mubr.msk.f32.mxu1 %vm25247_vm1, %v22988_v34  ;;  %20341 = vmatprep.subr.mxu0 %v21161_v2  ;;  %vm25248_vm2 = vmmov %vm25239_vm3 }
 0xd1b   : > { %8601 = vst.msk [vmem:[%s21480_s25 + $0xdc] sm:$0x1] %vm25245_vm4, %v8584_v36  ;;  %20348 = vmatprep.subr.mxu1 %v21161_v2  ;;  %vm25249_vm7 = vmmov %vm25246_vm0 }
 0xd1c   : > { %8602 = vst.msk [vmem:[%s21480_s25 + $0xfc] sm:$0x1] %vm25248_vm2, %v8586_v3  ;;  %20328 = vmatmul.mubr.msk.f32.vlgmr.msra.gmra.mxu0 %vm25249_vm7, %v23004_v38  ;;  %vm25250_vm10 = vmmov %vm25246_vm0  ;;  %vm25254_vm2 = vcmask 1041409  }
 0xd1d   : > { %20336 = vmatmul.mubr.msk.f32.vlgmr.msra.gmra.mxu1 %vm25250_vm10, %v23009_v46  ;;  %vm25251_vm3 = vmmov %vm25246_vm0  ;;  %20342 = vmatpush3.msk.msra.mxu0 %vm21260_vm5, %v21162_v19  ;;  %v9770_v26 = vsel %vm25254_vm2, %v9769_v4, %v9761_v9 }
 0xd1e   : > { %20330 = vmatprep.mubr.msk.f32.mxu0 %vm25251_vm3, %v23024_v47  ;;  %vm25252_vm4 = vmmov %vm25246_vm0  ;;  %20349 = vmatpush3.msk.msra.mxu1 %vm21339_vm11, %v21162_v19  ;;  %vm25256_vm3 = vcmask 1042434  }
 0xd1f   : > { %20338 = vmatprep.mubr.msk.f32.mxu1 %vm25252_vm4, %v23029_v48  ;;  %20343 = vmatprep.subr.mxu0 %v21161_v2  ;;  %vm25253_vm1 = vmmov %vm25246_vm0  ;;  %v9772_v18 = vsel %vm25256_vm3, %v9771_v60, %v9770_v26 }
 0xd20   : > { %20350 = vmatprep.subr.mxu1 %v21161_v2  ;;  %20331 = vmatmul.mubr.msk.f32.gmra.mxu0 %vm25246_vm0, %v23046_v49  ;;  %vm25255_vm7 = vmmov %vm25254_vm2  ;;  %vm25258_vm0 = vcmask 130048   ;;  %vm25260_vm2 = vcmask 1043459  }
 0xd21   : > { %20339 = vmatmul.mubr.msk.f32.gmra.mxu1 %vm25253_vm1, %v23051_v51  ;;  %20344 = vmatpush3.msk.msra.mxu0 %vm21266_vm6, %v21162_v19  ;;  %v9867_v27 = vsel %vm25255_vm7, %v9866_v6, %v9757_v10  ;;  %vm25257_vm4 = vmmov %vm25256_vm3  ;;  %v9774_v35 = vsel %vm25260_vm2, %v9773_v31, %v9772_v18  ;;  %vm25263_vm3 = vcmask 1043456   ;;  %v10322_v31 = vld [vmem:[%s21246_s27 + $0x2] sm:$0x1]  ;;  %v10325_v18 = vld [vmem:[%s21246_s27 + $0x32] sm:$0x1] }
 0xd22   : > { %20351 = vmatpush3.msk.msra.mxu1 %vm21347_vm12, %v21162_v19  ;;  %20345 = vmatprep.mubr.msk.f32.mxu0 %vm24831_vm15, %v21161_v2  ;;  %v9869_v39 = vsel %vm25257_vm4, %v9868_v62, %v9867_v27  ;;  %vm25259_vm1 = vmmov %vm25258_vm0  ;;  %v10334_v62 = vrot.slane %v10327_v21, 7 }
 0xd23   : > { %20352 = vmatprep.mubr.msk.f32.mxu1 %vm24831_vm15, %v21161_v2  ;;  %20355 = vmatprep.subr.mxu0 %v21161_v2  ;;  %vm25261_vm7 = vmmov %vm25260_vm2 }
 0xd24   : > { %20362 = vmatprep.subr.mxu1 %v21161_v2  ;;  %v9871_v36 = vsel %vm25261_vm7, %v9870_v13, %v9869_v39  ;;  %vm25264_vm4 = vmmov %vm25263_vm3  ;;  %vm25268_vm7 = vcmask 130048  }
 0xdd1   : > { %v8874_v52 = vpop.f32.mrf.mxu0 }
 0xdd3   : > { %v20303_v53 = vpop.f32.mrf.mxu0  ;;  %v8947_v55 = vpop.f32.mrf.mxu1 }
 0xdd4   : > { %v8948_v59 = vadd.f32 %v8947_v55, %v8874_v52 }
 0xdd5   : > { %v20310_v58 = vpop.f32.mrf.mxu1 }
 0xdd7   : > { %v9020_v7 = vpop.f32.mrf.mxu0 }
 0xdd8   : > { %v9094_v8 = vpop.f32.mrf.mxu1  ;;  %v9024_v11 = vadd.f32 %v9020_v7, %v8948_v59 }
 0xdd9   : > { %v20317_v22 = vpop.f32.mrf.mxu0 }
 0xdda   : > { %v20324_v23 = vpop.f32.mrf.mxu1  ;;  %v9098_v24 = vadd.f32 %v9094_v8, %v9024_v11  ;;  %v10323_v22 = vld [vmem:[%s21246_s27 + $0x12] sm:$0x1] }
 0xddb   : > { %v10431_v26 = vrot.slane %v10323_v22, 7 }
 0xddc   : > { %v20329_v28 = vpop.f32.mrf.mxu0  ;;  %vm9099_vm10 = vcmp.ge.f32.partialorder %v9098_v24, 0.0  ;;  %v9100_v63 = vmul.f32 0.2, %v9098_v24 }
 0xddd   : > { %v20337_v29 = vpop.f32.mrf.mxu1 }
 0xdde   : > { %v9381_v12 = vadd.f32 %v20337_v29, %v20329_v28  ;;  %v9266_v14 = vpop.f32.mrf.mxu0  ;;  %v9101_v40 = vsel %vm9099_vm10, %v9098_v24, %v9100_v63  ;;  %vm25262_vm10 = vcmask 253952   ;;  %v10324_v24 = vld [vmem:[%s21246_s27 + $0x22] sm:$0x1]  ;;  %v10326_v29 = vld [vmem:[%s21246_s27 + $0x3] sm:$0x1] }
 0xddf   : > { %v9375_v15 = vpop.f32.mrf.mxu1  ;;  %v9103_v42 = vcombine.high %v9101_v40, %v9101_v40  ;;  %v9110_v43 = vrot.slane %v9101_v40, %v21455_v32  ;;  %v10433_v39 = vrot.slane %v10324_v24, 6 }
 0xde0   : > { %v9376_v41 = vadd.f32 %v9375_v15, %v9266_v14  ;;  %20346 = vmatmul.mubr.msk.f32.vlgmr.msra.gmra.mxu0 %vm25258_vm0, %v9381_v12  ;;  %v20332_v45 = vpop.f32.mrf.mxu0  ;;  %vm25265_vm0 = vmmov %vm25262_vm10  ;;  %v10329_v12 = vld [vmem:[%s21246_s27 + $0x33] sm:$0x1]  ;;  %v10336_v15 = vrot.slane %v10328_v61, 6 }
 0xde1   : > { %v20340_v20 = vpop.f32.mrf.mxu1  ;;  %20356 = vmatpush3.msk.msra.mxu0 %vm21309_vm8, %v21162_v19  ;;  %20359 = vmatprep.mubr.msk.f32.mxu0 %vm24831_vm15, %v21161_v2  ;;  %v9117_v37 = vrot.slane %v9103_v42, %v21455_v32  ;;  %v9118_v3 = vcombine.high %v9110_v43, %v9110_v43  ;;  %v9126_v52 = vrot.slane %v9110_v43, %v21455_v32  ;;  %vm25267_vm2 = vmmov %vm25265_vm0 }
 0xde2   : > { %20353 = vmatmul.mubr.msk.f32.vlgmr.msra.gmra.mxu1 %vm25259_vm1, %v9376_v41  ;;  %20357 = vmatprep.subr.mxu0 %v21161_v2  ;;  %v9276_v53 = vpop.f32.mrf.mxu0  ;;  %v9391_v0 = vadd.f32 %v20340_v20, %v20332_v45  ;;  %vm25266_vm1 = vmmov %vm25265_vm0  ;;  %v10338_v20 = vrot.slane %v10329_v12, 5  ;;  %v10892_v12 = vld [vmem:[%s21246_s27 + $0x14] sm:$0x1] }
 0xde3   : > { %20363 = vmatpush3.msk.msra.mxu1 %vm25232_vm13, %v21162_v19  ;;  %v9385_v55 = vpop.f32.mrf.mxu1  ;;  %20358 = vmatpush3.msk.msra.mxu0 %vm25233_vm14, %v21162_v19  ;;  %v9119_v58 = vcombine.high %v9117_v37, %v9117_v37  ;;  %v9133_v59 = vrot.slane %v9117_v37, %v21455_v32  ;;  %v9140_v1 = vrot.slane %v9118_v3, %v21455_v32  ;;  %vm25272_vm14 = vmmov %vm25265_vm0  ;;  %v10435_v37 = vrot.slane %v10325_v18, 5  ;;  %v10893_v18 = vld [vmem:[%s21246_s27 + $0x24] sm:$0x1] }
 0xde4   : > { %v9386_v56 = vadd.f32 %v9385_v55, %v9276_v53  ;;  %20364 = vmatprep.subr.mxu1 %v21161_v2  ;;  %20366 = vmatprep.mubr.msk.f32.mxu1 %vm24831_vm15, %v21161_v2  ;;  %v9148_v4 = vcombine.high %v9126_v52, %v9126_v52  ;;  %9160 = vst.msk [vmem:[%s21480_s25 + $0x1e] sm:$0x1] %vm25262_vm10, %v9126_v52  ;;  %vm25269_vm10 = vmmov %vm25268_vm7 }
 0xde5   : > { %20365 = vmatpush3.msk.msra.mxu1 %vm25235_vm9, %v21162_v19  ;;  %20369 = vmatprep.subr.msk.mxu0 %vm25263_vm3, %v9774_v35  ;;  %v9147_v5 = vrot.slane %v9119_v58, %v21455_v32  ;;  %v9149_v6 = vcombine.high %v9133_v59, %v9133_v59  ;;  %v9150_v7 = vcombine.high %v9140_v1, %v9140_v1  ;;  %vm25270_vm9 = vmmov %vm25263_vm3 }
 0xde6   : > { %20377 = vmatprep.subr.msk.mxu1 %vm25264_vm4, %v9871_v36  ;;  %9161 = vst.msk [vmem:[%s21480_s25 + $0x3e] sm:$0x1] %vm25265_vm0, %v9140_v1  ;;  %20360 = vmatmul.mubr.msk.f32.vlgmr.msra.gmra.mxu0 %vm25268_vm7, %v9386_v56  ;;  %vm25271_vm4 = vmmov %vm25265_vm0 }
 0xde7   : > { %9162 = vst.msk [vmem:[%s21480_s25 + $0x5e] sm:$0x1] %vm25266_vm1, %v9148_v4  ;;  %20367 = vmatmul.mubr.msk.f32.vlgmr.msra.gmra.mxu1 %vm25269_vm10, %v9391_v0  ;;  %20370 = vmatpush3.msk.msra.mxu0 %vm25270_vm9, %v9774_v35  ;;  %v9151_v8 = vcombine.high %v9147_v5, %v9147_v5  ;;  %vm25273_vm13 = vmmov %vm25265_vm0  ;;  %vm25274_vm0 = vcmask 31744  }
 0xde8   : > { %9164 = vst.msk [vmem:[%s21480_s25 + $0x9e] sm:$0x1] %vm25267_vm2, %v9133_v59  ;;  %20378 = vmatpush3.msk.msra.mxu1 %vm25263_vm3, %v9871_v36  ;;  %20371 = vmatprep.mubr.msk.f32.mxu0 %vm25274_vm0, %v22983_v33  ;;  %vm25275_vm1 = vmmov %vm25274_vm0 }
 0xde9   : > { %9163 = vst.msk [vmem:[%s21480_s25 + $0x7e] sm:$0x1] %vm25271_vm4, %v9150_v7  ;;  %20379 = vmatprep.mubr.msk.f32.mxu1 %vm25275_vm1, %v22988_v34  ;;  %20385 = vmatprep.subr.mxu0 %v21161_v2  ;;  %vm25276_vm9 = vmmov %vm25267_vm2  ;;  %vm25283_vm4 = vcmask 1041409  }
 0xdea   : > { %9165 = vst.msk [vmem:[%s21480_s25 + $0xbe] sm:$0x1] %vm25272_vm14, %v9147_v5  ;;  %20392 = vmatprep.subr.mxu1 %v21161_v2  ;;  %vm25277_vm2 = vmmov %vm25274_vm0  ;;  %v10335_v41 = vsel %vm25283_vm4, %v10334_v62, %v10326_v29 }
 0xdeb   : > { %9166 = vst.msk [vmem:[%s21480_s25 + $0xde] sm:$0x1] %vm25273_vm13, %v9149_v6  ;;  %20372 = vmatmul.mubr.msk.f32.vlgmr.msra.gmra.mxu0 %vm25277_vm2, %v23004_v38  ;;  %vm25278_vm7 = vmmov %vm25274_vm0 }
 0xdec   : > { %9167 = vst.msk [vmem:[%s21480_s25 + $0xfe] sm:$0x1] %vm25276_vm9, %v9151_v8  ;;  %20380 = vmatmul.mubr.msk.f32.vlgmr.msra.gmra.mxu1 %vm25278_vm7, %v23009_v46  ;;  %vm25279_vm13 = vmmov %vm25274_vm0  ;;  %20386 = vmatpush3.msk.msra.mxu0 %vm21260_vm5, %v21162_v19  ;;  %vm25285_vm9 = vcmask 1042434   ;;  %vm25287_vm7 = vcmask 130048  }
 0xded   : > { %20374 = vmatprep.mubr.msk.f32.mxu0 %vm25279_vm13, %v23024_v47  ;;  %vm25280_vm14 = vmmov %vm25274_vm0  ;;  %20393 = vmatpush3.msk.msra.mxu1 %vm21339_vm11, %v21162_v19  ;;  %v10337_v53 = vsel %vm25285_vm9, %v10336_v15, %v10335_v41 }
 0xdee   : > { %20382 = vmatprep.mubr.msk.f32.mxu1 %vm25280_vm14, %v23029_v48  ;;  %20387 = vmatprep.subr.mxu0 %v21161_v2  ;;  %vm25281_vm10 = vmmov %vm25274_vm0  ;;  %vm25289_vm14 = vcmask 1043459  }
 0xdef   : > { %20394 = vmatprep.subr.mxu1 %v21161_v2  ;;  %20375 = vmatmul.mubr.msk.f32.gmra.mxu0 %vm25281_vm10, %v23046_v49  ;;  %vm25282_vm3 = vmmov %vm25274_vm0  ;;  %v10339_v5 = vsel %vm25289_vm14, %v10338_v20, %v10337_v53  ;;  %v10887_v20 = vld [vmem:[%s21246_s27 + $0x3] sm:$0x1]  ;;  %v10890_v53 = vld [vmem:[%s21246_s27 + $0x33] sm:$0x1] }
 0xdf0   : > { %20383 = vmatmul.mubr.msk.f32.gmra.mxu1 %vm25282_vm3, %v23051_v51  ;;  %20388 = vmatpush3.msk.msra.mxu0 %vm21266_vm6, %v21162_v19  ;;  %vm25284_vm0 = vmmov %vm25283_vm4  ;;  %vm25291_vm3 = vnez %v24793_v54  ;;  %vm25292_vm4 = vnez %v24787_v30 }
 0xdf1   : > { %20395 = vmatpush3.msk.msra.mxu1 %vm21347_vm12, %v21162_v19  ;;  %20389 = vmatprep.mubr.msk.f32.mxu0 %vm24831_vm15, %v21161_v2  ;;  %v10432_v42 = vsel %vm25284_vm0, %v10431_v26, %v10322_v31  ;;  %vm25286_vm2 = vmmov %vm25285_vm9  ;;  %vm25293_vm0 = vcmask 253952   ;;  %vm25295_vm9 = vcmask 1043456  }
 0xdf2   : > { %20396 = vmatprep.mubr.msk.f32.mxu1 %vm24831_vm15, %v21161_v2  ;;  %20399 = vmatprep.subr.mxu0 %v21161_v2  ;;  %v10434_v55 = vsel %vm25286_vm2, %v10433_v39, %v10432_v42  ;;  %vm25288_vm13 = vmmov %vm25287_vm7  ;;  %v10899_v39 = vrot.slane %v10892_v12, 7 }
 0xdf3   : > { %20406 = vmatprep.subr.mxu1 %v21161_v2  ;;  %vm25290_vm10 = vmmov %vm25289_vm14 }
 0xdf4   : > { %v10436_v6 = vsel %vm25290_vm10, %v10435_v37, %v10434_v55  ;;  %vm25296_vm2 = vmmov %vm25295_vm9  ;;  %vm25300_vm10 = vcmask 130048  }
 0xdf5   : > { %vm25299_vm14 = vmmov %vm25293_vm0 }
 0xea0   : > { %v9463_v9 = vpop.f32.mrf.mxu0 }
 0xea2   : > { %v20347_v10 = vpop.f32.mrf.mxu0  ;;  %v9536_v11 = vpop.f32.mrf.mxu1 }
 0xea3   : > { %v9537_v60 = vadd.f32 %v9536_v11, %v9463_v9 }
 0xea4   : > { %v20354_v23 = vpop.f32.mrf.mxu1 }
 0xea6   : > { %v9609_v27 = vpop.f32.mrf.mxu0 }
 0xea7   : > { %v9683_v28 = vpop.f32.mrf.mxu1  ;;  %v9613_v63 = vadd.f32 %v9609_v27, %v9537_v60 }
 0xea8   : > { %v20361_v13 = vpop.f32.mrf.mxu0 }
 0xea9   : > { %v20368_v14 = vpop.f32.mrf.mxu1  ;;  %v9687_v40 = vadd.f32 %v9683_v28, %v9613_v63  ;;  %v10888_v13 = vld [vmem:[%s21246_s27 + $0x13] sm:$0x1] }
 0xeaa   : > { %v10996_v41 = vrot.slane %v10888_v13, 7 }
 0xeab   : > { %v20373_v43 = vpop.f32.mrf.mxu0  ;;  %vm9688_vm1 = vcmp.ge.f32.partialorder %v9687_v40, 0.0  ;;  %v9689_v35 = vmul.f32 0.2, %v9687_v40 }
 0xeac   : > { %v20381_v45 = vpop.f32.mrf.mxu1 }
 0xead   : > { %v9946_v36 = vadd.f32 %v20381_v45, %v20373_v43  ;;  %v9843_v3 = vpop.f32.mrf.mxu0  ;;  %v9690_v0 = vsel %vm9688_vm1, %v9687_v40, %v9689_v35  ;;  %vm25294_vm1 = vnez %v24795_v57  ;;  %v10889_v40 = vld [vmem:[%s21246_s27 + $0x23] sm:$0x1]  ;;  %v10891_v45 = vld [vmem:[%s21246_s27 + $0x4] sm:$0x1] }
 0xeae   : > { %v9940_v52 = vpop.f32.mrf.mxu1  ;;  %v9692_v58 = vcombine.high %v9690_v0, %v9690_v0  ;;  %v9699_v59 = vrot.slane %v9690_v0, %v21455_v32  ;;  %v10998_v55 = vrot.slane %v10889_v40, 6 }
 0xeaf   : > { %v9941_v56 = vadd.f32 %v9940_v52, %v9843_v3  ;;  %20390 = vmatmul.mubr.msk.f32.vlgmr.msra.gmra.mxu0 %vm25287_vm7, %v9946_v36  ;;  %v20376_v1 = vpop.f32.mrf.mxu0  ;;  %vm25297_vm7 = vmmov %vm25293_vm0  ;;  %v10894_v36 = vld [vmem:[%s21246_s27 + $0x34] sm:$0x1]  ;;  %v10901_v52 = vrot.slane %v10893_v18, 6 }
 0xeb0   : > { %v20384_v4 = vpop.f32.mrf.mxu1  ;;  %20400 = vmatpush3.msk.msra.mxu0 %vm21309_vm8, %v21162_v19  ;;  %20403 = vmatprep.mubr.msk.f32.mxu0 %vm24831_vm15, %v21161_v2  ;;  %v9706_v7 = vrot.slane %v9692_v58, %v21455_v32  ;;  %v9707_v8 = vcombine.high %v9699_v59, %v9699_v59  ;;  %v9715_v9 = vrot.slane %v9699_v59, %v21455_v32 }
 0xeb1   : > { %20397 = vmatmul.mubr.msk.f32.vlgmr.msra.gmra.mxu1 %vm25288_vm13, %v9941_v56  ;;  %20401 = vmatprep.subr.mxu0 %v21161_v2  ;;  %v9853_v10 = vpop.f32.mrf.mxu0  ;;  %v9956_v21 = vadd.f32 %v20384_v4, %v20376_v1  ;;  %vm25298_vm13 = vmmov %vm25293_vm0  ;;  %v10903_v4 = vrot.slane %v10894_v36, 5  ;;  %v11457_v36 = vld [vmem:[%s21246_s27 + $0x15] sm:$0x1] }
 0xeb2   : > { %20407 = vmatpush3.msk.msra.mxu1 %vm25291_vm3, %v21162_v19  ;;  %v9950_v11 = vpop.f32.mrf.mxu1  ;;  %20402 = vmatpush3.msk.msra.mxu0 %vm25292_vm4, %v21162_v19  ;;  %v9708_v23 = vcombine.high %v9706_v7, %v9706_v7  ;;  %v9722_v60 = vrot.slane %v9706_v7, %v21455_v32  ;;  %v9729_v61 = vrot.slane %v9707_v8, %v21455_v32  ;;  %v11000_v7 = vrot.slane %v10890_v53, 5  ;;  %v11458_v53 = vld [vmem:[%s21246_s27 + $0x25] sm:$0x1] }
 0xeb3   : > { %v9951_v22 = vadd.f32 %v9950_v11, %v9853_v10  ;;  %20408 = vmatprep.subr.mxu1 %v21161_v2  ;;  %20410 = vmatprep.mubr.msk.f32.mxu1 %vm24831_vm15, %v21161_v2  ;;  %v9737_v62 = vcombine.high %v9715_v9, %v9715_v9  ;;  %9749 = vst.msk [vmem:[%s21480_s25 + $0x1] sm:$0x1] %vm25293_vm0, %v9715_v9  ;;  %vm25301_vm0 = vmmov %vm25300_vm10 }
 0xeb4   : > { %20409 = vmatpush3.msk.msra.mxu1 %vm25294_vm1, %v21162_v19  ;;  %20413 = vmatprep.subr.msk.mxu0 %vm25295_vm9, %v10339_v5  ;;  %v9736_v24 = vrot.slane %v9708_v23, %v21455_v32  ;;  %v9738_v26 = vcombine.high %v9722_v60, %v9722_v60  ;;  %v9739_v27 = vcombine.high %v9729_v61, %v9729_v61  ;;  %vm25302_vm1 = vmmov %vm25296_vm2 }
 0xeb5   : > { %20421 = vmatprep.subr.msk.mxu1 %vm25296_vm2, %v10436_v6  ;;  %9750 = vst.msk [vmem:[%s21480_s25 + $0x21] sm:$0x1] %vm25297_vm7, %v9729_v61  ;;  %20404 = vmatmul.mubr.msk.f32.vlgmr.msra.gmra.mxu0 %vm25300_vm10, %v9951_v22  ;;  %vm25303_vm9 = vmmov %vm25302_vm1 }
 0xeb6   : > { %9751 = vst.msk [vmem:[%s21480_s25 + $0x41] sm:$0x1] %vm25298_vm13, %v9737_v62  ;;  %20411 = vmatmul.mubr.msk.f32.vlgmr.msra.gmra.mxu1 %vm25301_vm0, %v9956_v21  ;;  %20414 = vmatpush3.msk.msra.mxu0 %vm25302_vm1, %v10339_v5  ;;  %v9740_v28 = vcombine.high %v9736_v24, %v9736_v24  ;;  %vm25304_vm2 = vmmov %vm25297_vm7  ;;  %vm25307_vm7 = vcmask 31744  }
 0xeb7   : > { %9753 = vst.msk [vmem:[%s21480_s25 + $0x81] sm:$0x1] %vm25299_vm14, %v9722_v60  ;;  %20422 = vmatpush3.msk.msra.mxu1 %vm25303_vm9, %v10436_v6  ;;  %vm25305_vm4 = vmmov %vm25304_vm2  ;;  %20415 = vmatprep.mubr.msk.f32.mxu0 %vm25307_vm7, %v22983_v33 }
 0xeb8   : > { %9752 = vst.msk [vmem:[%s21480_s25 + $0x61] sm:$0x1] %vm25304_vm2, %v9739_v27  ;;  %vm25306_vm3 = vmmov %vm25304_vm2  ;;  %20429 = vmatprep.subr.mxu0 %v21161_v2  ;;  %20436 = vmatprep.subr.mxu1 %v21161_v2 }
 0xeb9   : > { %9754 = vst.msk [vmem:[%s21480_s25 + $0xa1] sm:$0x1] %vm25305_vm4, %v9736_v24  ;;  %vm25308_vm13 = vmmov %vm25307_vm7 }
 0xeba   : > { %9755 = vst.msk [vmem:[%s21480_s25 + $0xc1] sm:$0x1] %vm25306_vm3, %v9738_v26  ;;  %20423 = vmatprep.mubr.msk.f32.mxu1 %vm25308_vm13, %v22988_v34  ;;  %vm25309_vm1 = vmmov %vm25304_vm2  ;;  %vm25316_vm2 = vcmask 1041409  }
 0xebb   : > { %9756 = vst.msk [vmem:[%s21480_s25 + $0xe1] sm:$0x1] %vm25309_vm1, %v9740_v28  ;;  %vm25310_vm14 = vmmov %vm25307_vm7  ;;  %v10900_v56 = vsel %vm25316_vm2, %v10899_v39, %v10891_v45  ;;  %vm25318_vm1 = vcmask 1042434  }
 0xebc   : > { %20416 = vmatmul.mubr.msk.f32.vlgmr.msra.gmra.mxu0 %vm25310_vm14, %v23004_v38  ;;  %vm25311_vm10 = vmmov %vm25307_vm7  ;;  %v10902_v10 = vsel %vm25318_vm1, %v10901_v52, %v10900_v56 }
 0xebd   : > { %20424 = vmatmul.mubr.msk.f32.vlgmr.msra.gmra.mxu1 %vm25311_vm10, %v23009_v46  ;;  %vm25312_vm3 = vmmov %vm25307_vm7  ;;  %20430 = vmatpush3.msk.msra.mxu0 %vm21260_vm5, %v21162_v19  ;;  %vm25320_vm10 = vcmask 130048  }
 0xebe   : > { %20418 = vmatprep.mubr.msk.f32.mxu0 %vm25312_vm3, %v23024_v47  ;;  %vm25313_vm4 = vmmov %vm25312_vm3  ;;  %20437 = vmatpush3.msk.msra.mxu1 %vm21339_vm11, %v21162_v19 }
 0xebf   : > { %20426 = vmatprep.mubr.msk.f32.mxu1 %vm25313_vm4, %v23029_v48  ;;  %20431 = vmatprep.subr.mxu0 %v21161_v2  ;;  %vm25314_vm0 = vmmov %vm25312_vm3  ;;  %vm25322_vm4 = vcmask 1043459  }
 0xec0   : > { %20438 = vmatprep.subr.mxu1 %v21161_v2  ;;  %20419 = vmatmul.mubr.msk.f32.gmra.mxu0 %vm25314_vm0, %v23046_v49  ;;  %vm25315_vm9 = vmmov %vm25314_vm0  ;;  %v10904_v24 = vsel %vm25322_vm4, %v10903_v4, %v10902_v10  ;;  %v11452_v4 = vld [vmem:[%s21246_s27 + $0x4] sm:$0x1]  ;;  %v11455_v10 = vld [vmem:[%s21246_s27 + $0x34] sm:$0x1] }
 0xec1   : > { %20427 = vmatmul.mubr.msk.f32.gmra.mxu1 %vm25315_vm9, %v23051_v51  ;;  %20432 = vmatpush3.msk.msra.mxu0 %vm21266_vm6, %v21162_v19  ;;  %vm25317_vm7 = vmmov %vm25316_vm2  ;;  %vm25324_vm9 = vnez %v24793_v54  ;;  %vm25325_vm2 = vnez %v24787_v30 }
 0xec2   : > { %20439 = vmatpush3.msk.msra.mxu1 %vm21347_vm12, %v21162_v19  ;;  %20433 = vmatprep.mubr.msk.f32.mxu0 %vm24831_vm15, %v21161_v2  ;;  %v10997_v58 = vsel %vm25317_vm7, %v10996_v41, %v10887_v20  ;;  %vm25319_vm14 = vmmov %vm25318_vm1  ;;  %vm25326_vm7 = vcmask 253952   ;;  %vm25328_vm1 = vcmask 1043456  }
 0xec3   : > { %20440 = vmatprep.mubr.msk.f32.mxu1 %vm24831_vm15, %v21161_v2  ;;  %20443 = vmatprep.subr.mxu0 %v21161_v2  ;;  %v10999_v11 = vsel %vm25319_vm14, %v10998_v55, %v10997_v58  ;;  %vm25321_vm3 = vmmov %vm25320_vm10  ;;  %v11464_v55 = vrot.slane %v11457_v36, 7 }
 0xec4   : > { %20450 = vmatprep.subr.mxu1 %v21161_v2  ;;  %vm25323_vm0 = vmmov %vm25322_vm4 }
 0xec5   : > { %v11001_v26 = vsel %vm25323_vm0, %v11000_v7, %v10999_v11  ;;  %vm25329_vm14 = vmmov %vm25328_vm1  ;;  %vm25333_vm0 = vcmask 130048  }
 0xf6f   : > { %v10028_v29 = vpop.f32.mrf.mxu0 }
 0xf71   : > { %v20391_v31 = vpop.f32.mrf.mxu0  ;;  %v10101_v63 = vpop.f32.mrf.mxu1 }
 0xf72   : > { %v10102_v15 = vadd.f32 %v10101_v63, %v10028_v29 }
 0xf73   : > { %v20398_v14 = vpop.f32.mrf.mxu1 }
 0xf75   : > { %v10174_v42 = vpop.f32.mrf.mxu0 }
 0xf76   : > { %v10248_v43 = vpop.f32.mrf.mxu1  ;;  %v10178_v35 = vadd.f32 %v10174_v42, %v10102_v15 }
 0xf77   : > { %v20405_v37 = vpop.f32.mrf.mxu0 }
 0xf78   : > { %v20412_v3 = vpop.f32.mrf.mxu1  ;;  %v10252_v0 = vadd.f32 %v10248_v43, %v10178_v35  ;;  %v11453_v37 = vld [vmem:[%s21246_s27 + $0x14] sm:$0x1] }
 0xf79   : > { %v11561_v56 = vrot.slane %v11453_v37, 7 }
 0xf7a   : > { %vm10253_vm13 = vcmp.ge.f32.partialorder %v10252_v0, 0.0  ;;  %v10254_v5 = vmul.f32 0.2, %v10252_v0 }
 0xf7c   : > { %v20417_v59 = vpop.f32.mrf.mxu0  ;;  %v10255_v21 = vsel %vm10253_vm13, %v10252_v0, %v10254_v5  ;;  %vm25327_vm13 = vnez %v24795_v57  ;;  %v11454_v0 = vld [vmem:[%s21246_s27 + $0x24] sm:$0x1] }
 0xf7d   : > { %v20425_v1 = vpop.f32.mrf.mxu1  ;;  %v10257_v23 = vcombine.high %v10255_v21, %v10255_v21  ;;  %v10264_v60 = vrot.slane %v10255_v21, %v21455_v32  ;;  %v11563_v11 = vrot.slane %v11454_v0, 6 }
 0xf7e   : > { %v10511_v6 = vadd.f32 %v20425_v1, %v20417_v59  ;;  %v10408_v8 = vpop.f32.mrf.mxu0  ;;  %v11456_v1 = vld [vmem:[%s21246_s27 + $0x5] sm:$0x1] }
 0xf7f   : > { %v10505_v9 = vpop.f32.mrf.mxu1  ;;  %v10271_v27 = vrot.slane %v10257_v23, %v21455_v32  ;;  %v10272_v28 = vcombine.high %v10264_v60, %v10264_v60  ;;  %v10280_v29 = vrot.slane %v10264_v60, %v21455_v32 }
 0xf80   : > { %v10506_v22 = vadd.f32 %v10505_v9, %v10408_v8  ;;  %20434 = vmatmul.mubr.msk.f32.vlgmr.msra.gmra.mxu0 %vm25320_vm10, %v10511_v6  ;;  %v20420_v61 = vpop.f32.mrf.mxu0  ;;  %vm25330_vm10 = vmmov %vm25326_vm7  ;;  %v11459_v6 = vld [vmem:[%s21246_s27 + $0x35] sm:$0x1]  ;;  %v11466_v9 = vrot.slane %v11458_v53, 6 }
 0xf81   : > { %v20428_v62 = vpop.f32.mrf.mxu1  ;;  %20444 = vmatpush3.msk.msra.mxu0 %vm21309_vm8, %v21162_v19  ;;  %20447 = vmatprep.mubr.msk.f32.mxu0 %vm24831_vm15, %v21161_v2  ;;  %v10273_v14 = vcombine.high %v10271_v27, %v10271_v27  ;;  %v10287_v15 = vrot.slane %v10271_v27, %v21455_v32  ;;  %v10294_v18 = vrot.slane %v10272_v28, %v21455_v32  ;;  %v11565_v27 = vrot.slane %v11455_v10, 5 }
 0xf82   : > { %20441 = vmatmul.mubr.msk.f32.vlgmr.msra.gmra.mxu1 %vm25321_vm3, %v10506_v22  ;;  %20445 = vmatprep.subr.mxu0 %v21161_v2  ;;  %v10418_v31 = vpop.f32.mrf.mxu0  ;;  %v10521_v12 = vadd.f32 %v20428_v62, %v20420_v61  ;;  %v10302_v39 = vcombine.high %v10280_v29, %v10280_v29  ;;  %10314 = vst.msk [vmem:[%s21480_s25 + $0x3] sm:$0x1] %vm25326_vm7, %v10280_v29  ;;  %vm25331_vm3 = vmmov %vm25326_vm7  ;;  %v11468_v62 = vrot.slane %v11459_v6, 5 }
 0xf83   : > { %20451 = vmatpush3.msk.msra.mxu1 %vm25324_vm9, %v21162_v19  ;;  %v10515_v63 = vpop.f32.mrf.mxu1  ;;  %20446 = vmatpush3.msk.msra.mxu0 %vm25325_vm2, %v21162_v19  ;;  %v10301_v40 = vrot.slane %v10273_v14, %v21455_v32  ;;  %v10303_v41 = vcombine.high %v10287_v15, %v10287_v15  ;;  %v10304_v42 = vcombine.high %v10294_v18, %v10294_v18  ;;  %vm25332_vm4 = vmmov %vm25331_vm3 }
 0xf84   : > { %v10516_v13 = vadd.f32 %v10515_v63, %v10418_v31  ;;  %20452 = vmatprep.subr.mxu1 %v21161_v2  ;;  %20454 = vmatprep.mubr.msk.f32.mxu1 %vm24831_vm15, %v21161_v2  ;;  %10315 = vst.msk [vmem:[%s21480_s25 + $0x23] sm:$0x1] %vm25330_vm10, %v10294_v18  ;;  %vm25334_vm7 = vmmov %vm25333_vm0  ;;  %vm25339_vm10 = vcmask 31744  }
 0xf85   : > { %20453 = vmatpush3.msk.msra.mxu1 %vm25327_vm13, %v21162_v19  ;;  %20457 = vmatprep.subr.msk.mxu0 %vm25328_vm1, %v10904_v24  ;;  %10316 = vst.msk [vmem:[%s21480_s25 + $0x43] sm:$0x1] %vm25331_vm3, %v10302_v39  ;;  %vm25335_vm13 = vmmov %vm25328_vm1  ;;  %v10305_v43 = vcombine.high %v10301_v40, %v10301_v40 }
 0xf86   : > { %20465 = vmatprep.subr.msk.mxu1 %vm25329_vm14, %v11001_v26  ;;  %10318 = vst.msk [vmem:[%s21480_s25 + $0x83] sm:$0x1] %vm25332_vm4, %v10287_v15  ;;  %20448 = vmatmul.mubr.msk.f32.vlgmr.msra.gmra.mxu0 %vm25333_vm0, %v10516_v13  ;;  %vm25336_vm14 = vmmov %vm25331_vm3 }
 0xf87   : > { %20455 = vmatmul.mubr.msk.f32.vlgmr.msra.gmra.mxu1 %vm25334_vm7, %v10521_v12  ;;  %20458 = vmatpush3.msk.msra.mxu0 %vm25335_vm13, %v10904_v24  ;;  %10317 = vst.msk [vmem:[%s21480_s25 + $0x63] sm:$0x1] %vm25336_vm14, %v10304_v42  ;;  %vm25337_vm2 = vmmov %vm25331_vm3  ;;  %vm25348_vm14 = vcmask 1041409  }
 0xf88   : > { %20466 = vmatpush3.msk.msra.mxu1 %vm25328_vm1, %v11001_v26  ;;  %10319 = vst.msk [vmem:[%s21480_s25 + $0xa3] sm:$0x1] %vm25337_vm2, %v10301_v40  ;;  %vm25338_vm9 = vmmov %vm25337_vm2  ;;  %20459 = vmatprep.mubr.msk.f32.mxu0 %vm25339_vm10, %v22983_v33  ;;  %v11465_v22 = vsel %vm25348_vm14, %v11464_v55, %v11456_v1 }
 0xf89   : > { %10320 = vst.msk [vmem:[%s21480_s25 + $0xc3] sm:$0x1] %vm25338_vm9, %v10303_v41  ;;  %vm25340_vm3 = vmmov %vm25339_vm10  ;;  %20473 = vmatprep.subr.mxu0 %v21161_v2  ;;  %20480 = vmatprep.subr.mxu1 %v21161_v2 }
 0xf8a   : > { %20467 = vmatprep.mubr.msk.f32.mxu1 %vm25340_vm3, %v22988_v34  ;;  %vm25341_vm13 = vmmov %vm25337_vm2 }
 0xf8b   : > { %10321 = vst.msk [vmem:[%s21480_s25 + $0xe3] sm:$0x1] %vm25341_vm13, %v10305_v43  ;;  %vm25342_vm4 = vmmov %vm25340_vm3  ;;  %vm25350_vm13 = vcmask 1042434  }
 0xf8c   : > { %20460 = vmatmul.mubr.msk.f32.vlgmr.msra.gmra.mxu0 %vm25342_vm4, %v23004_v38  ;;  %vm25343_vm0 = vmmov %vm25340_vm3  ;;  %v11467_v31 = vsel %vm25350_vm13, %v11466_v9, %v11465_v22  ;;  %v12017_v9 = vld [vmem:[%s21246_s27 + $0x5] sm:$0x1] }
 0xf8d   : > { %20468 = vmatmul.mubr.msk.f32.vlgmr.msra.gmra.mxu1 %vm25343_vm0, %v23009_v46  ;;  %vm25344_vm9 = vmmov %vm25343_vm0  ;;  %20474 = vmatpush3.msk.msra.mxu0 %vm21260_vm5, %v21162_v19 }
 0xf8e   : > { %20462 = vmatprep.mubr.msk.f32.mxu0 %vm25344_vm9, %v23024_v47  ;;  %vm25345_vm2 = vmmov %vm25343_vm0  ;;  %20481 = vmatpush3.msk.msra.mxu1 %vm21339_vm11, %v21162_v19 }
 0xf8f   : > { %20470 = vmatprep.mubr.msk.f32.mxu1 %vm25345_vm2, %v23029_v48  ;;  %20475 = vmatprep.subr.mxu0 %v21161_v2  ;;  %vm25346_vm7 = vmmov %vm25343_vm0  ;;  %vm25354_vm2 = vcmask 1043459  }
 0xf90   : > { %20482 = vmatprep.subr.mxu1 %v21161_v2  ;;  %20463 = vmatmul.mubr.msk.f32.gmra.mxu0 %vm25346_vm7, %v23046_v49  ;;  %vm25347_vm1 = vmmov %vm25343_vm0  ;;  %vm25352_vm0 = vcmask 130048   ;;  %v11469_v40 = vsel %vm25354_vm2, %v11468_v62, %v11467_v31 }
 0xf91   : > { %20471 = vmatmul.mubr.msk.f32.gmra.mxu1 %vm25347_vm1, %v23051_v51  ;;  %20476 = vmatpush3.msk.msra.mxu0 %vm21266_vm6, %v21162_v19  ;;  %vm25349_vm10 = vmmov %vm25348_vm14  ;;  %vm25356_vm1 = vnez %v24793_v54  ;;  %vm25357_vm14 = vnez %v24787_v30 }
 0xf92   : > { %20483 = vmatpush3.msk.msra.mxu1 %vm21347_vm12, %v21162_v19  ;;  %20477 = vmatprep.mubr.msk.f32.mxu0 %vm24831_vm15, %v21161_v2  ;;  %v11562_v23 = vsel %vm25349_vm10, %v11561_v56, %v11452_v4  ;;  %vm25351_vm4 = vmmov %vm25350_vm13  ;;  %vm25358_vm10 = vcmask 253952   ;;  %vm25360_vm13 = vcmask 1043456   ;;  %v12019_v4 = vld [vmem:[%s21246_s27 + $0x25] sm:$0x1] }
 0xf93   : > { %20484 = vmatprep.mubr.msk.f32.mxu1 %vm24831_vm15, %v21161_v2  ;;  %20487 = vmatprep.subr.mxu0 %v21161_v2  ;;  %v11564_v63 = vsel %vm25351_vm4, %v11563_v11, %v11562_v23  ;;  %vm25353_vm9 = vmmov %vm25352_vm0  ;;  %v12024_v11 = vld [vmem:[%s21246_s27 + $0x36] sm:$0x1] }
 0xf94   : > { %20494 = vmatprep.subr.mxu1 %v21161_v2  ;;  %vm25355_vm7 = vmmov %vm25354_vm2 }
 0xf95   : > { %v11566_v41 = vsel %vm25355_vm7, %v11565_v27, %v11564_v63  ;;  %vm25361_vm4 = vmmov %vm25360_vm13  ;;  %vm25365_vm7 = vcmask 130048  }
0x1040   : > { %v10593_v45 = vpop.f32.mrf.mxu0 }
0x1042   : > { %v20435_v20 = vpop.f32.mrf.mxu0  ;;  %v10666_v35 = vpop.f32.mrf.mxu1 }
0x1043   : > { %v10667_v52 = vadd.f32 %v10666_v35, %v10593_v45 }
0x1044   : > { %v20442_v3 = vpop.f32.mrf.mxu1 }
0x1046   : > { %v10739_v58 = vpop.f32.mrf.mxu0 }
0x1047   : > { %v10813_v59 = vpop.f32.mrf.mxu1  ;;  %v10743_v5 = vadd.f32 %v10739_v58, %v10667_v52 }
0x1048   : > { %v20449_v7 = vpop.f32.mrf.mxu0 }
0x1049   : > { %v20456_v8 = vpop.f32.mrf.mxu1  ;;  %v10817_v21 = vadd.f32 %v10813_v59, %v10743_v5 }
0x104a   : > { %v12021_v8 = vld [vmem:[%s21246_s27 + $0x6] sm:$0x1] }
0x104b   : > { %vm10818_vm3 = vcmp.ge.f32.partialorder %v10817_v21, 0.0  ;;  %v10819_v24 = vmul.f32 0.2, %v10817_v21 }
0x104c   : > { %v20461_v60 = vpop.f32.mrf.mxu0 }
0x104d   : > { %v20469_v61 = vpop.f32.mrf.mxu1  ;;  %v10820_v12 = vsel %vm10818_vm3, %v10817_v21, %v10819_v24  ;;  %vm25359_vm3 = vnez %v24795_v57 }
0x104e   : > { %v11076_v26 = vadd.f32 %v20469_v61, %v20461_v60  ;;  %v10973_v28 = vpop.f32.mrf.mxu0  ;;  %v10822_v14 = vcombine.high %v10820_v12, %v10820_v12  ;;  %v10829_v15 = vrot.slane %v10820_v12, %v21455_v32  ;;  %v12020_v60 = vld [vmem:[%s21246_s27 + $0x35] sm:$0x1]  ;;  %v12128_v61 = vrot.slane %v12019_v4, 6 }
0x104f   : > { %v11070_v29 = vpop.f32.mrf.mxu1  ;;  %v12130_v12 = vrot.slane %v12020_v60, 5  ;;  %v23572_v4 = vld [vmem:[%s24758_s1 + $0x70] sm:$0xff]  ;;  %v12588_v60 = vld [vmem:[%s21246_s27 + $0x27] sm:$0x1] }
0x1050   : > { %v11071_v13 = vadd.f32 %v11070_v29, %v10973_v28  ;;  %20478 = vmatmul.mubr.msk.f32.vlgmr.msra.gmra.mxu0 %vm25352_vm0, %v11076_v26  ;;  %v20464_v18 = vpop.f32.mrf.mxu0  ;;  %v10836_v42 = vrot.slane %v10822_v14, %v21455_v32  ;;  %v10837_v43 = vcombine.high %v10829_v15, %v10829_v15  ;;  %v10845_v45 = vrot.slane %v10829_v15, %v21455_v32  ;;  %vm25362_vm0 = vmmov %vm25358_vm10 }
0x1051   : > { %v20472_v39 = vpop.f32.mrf.mxu1  ;;  %20488 = vmatpush3.msk.msra.mxu0 %vm21309_vm8, %v21162_v19  ;;  %20491 = vmatprep.mubr.msk.f32.mxu0 %vm24831_vm15, %v21161_v2  ;;  %vm25364_vm2 = vmmov %vm25362_vm0  ;;  %v12033_v29 = vrot.slane %v12024_v11, 5  ;;  %v12587_v11 = vld [vmem:[%s21246_s27 + $0x17] sm:$0x1] }
0x1052   : > { %20485 = vmatmul.mubr.msk.f32.vlgmr.msra.gmra.mxu1 %vm25353_vm9, %v11071_v13  ;;  %20489 = vmatprep.subr.mxu0 %v21161_v2  ;;  %v10983_v20 = vpop.f32.mrf.mxu0  ;;  %v11086_v36 = vadd.f32 %v20472_v39, %v20464_v18  ;;  %v10838_v3 = vcombine.high %v10836_v42, %v10836_v42  ;;  %v10852_v52 = vrot.slane %v10836_v42, %v21455_v32  ;;  %vm25363_vm9 = vmmov %vm25362_vm0 }
0x1053   : > { %20495 = vmatpush3.msk.msra.mxu1 %vm25356_vm1, %v21162_v19  ;;  %v11080_v35 = vpop.f32.mrf.mxu1  ;;  %20490 = vmatpush3.msk.msra.mxu0 %vm25357_vm14, %v21162_v19  ;;  %v10859_v53 = vrot.slane %v10837_v43, %v21455_v32  ;;  %v10867_v55 = vcombine.high %v10845_v45, %v10845_v45  ;;  %10879 = vst.msk [vmem:[%s21480_s25 + $0x5] sm:$0x1] %vm25358_vm10, %v10845_v45  ;;  %vm25366_vm10 = vmmov %vm25365_vm7 }
0x1054   : > { %v11081_v37 = vadd.f32 %v11080_v35, %v10983_v20  ;;  %20496 = vmatprep.subr.mxu1 %v21161_v2  ;;  %20498 = vmatprep.mubr.msk.f32.mxu1 %vm24831_vm15, %v21161_v2  ;;  %v10866_v0 = vrot.slane %v10838_v3, %v21455_v32  ;;  %v10868_v56 = vcombine.high %v10852_v52, %v10852_v52  ;;  %vm25370_vm14 = vmmov %vm25362_vm0 }
0x1055   : > { %20497 = vmatpush3.msk.msra.mxu1 %vm25359_vm3, %v21162_v19  ;;  %20501 = vmatprep.subr.msk.mxu0 %vm25360_vm13, %v11469_v40  ;;  %v10869_v58 = vcombine.high %v10859_v53, %v10859_v53  ;;  %10880 = vst.msk [vmem:[%s21480_s25 + $0x25] sm:$0x1] %vm25362_vm0, %v10859_v53  ;;  %vm25367_vm3 = vmmov %vm25361_vm4 }
0x1056   : > { %20509 = vmatprep.subr.msk.mxu1 %vm25361_vm4, %v11566_v41  ;;  %10881 = vst.msk [vmem:[%s21480_s25 + $0x45] sm:$0x1] %vm25363_vm9, %v10867_v55  ;;  %20492 = vmatmul.mubr.msk.f32.vlgmr.msra.gmra.mxu0 %vm25365_vm7, %v11081_v37  ;;  %vm25368_vm13 = vmmov %vm25367_vm3  ;;  %v10870_v59 = vcombine.high %v10866_v0, %v10866_v0 }
0x1057   : > { %10883 = vst.msk [vmem:[%s21480_s25 + $0x85] sm:$0x1] %vm25364_vm2, %v10852_v52  ;;  %20499 = vmatmul.mubr.msk.f32.vlgmr.msra.gmra.mxu1 %vm25366_vm10, %v11086_v36  ;;  %20502 = vmatpush3.msk.msra.mxu0 %vm25367_vm3, %v11469_v40  ;;  %vm25369_vm4 = vmmov %vm25362_vm0 }
0x1058   : > { %20510 = vmatpush3.msk.msra.mxu1 %vm25368_vm13, %v11566_v41  ;;  %10882 = vst.msk [vmem:[%s21480_s25 + $0x65] sm:$0x1] %vm25369_vm4, %v10869_v58  ;;  %vm25371_vm1 = vmmov %vm25362_vm0  ;;  %vm25372_vm0 = vcmask 31744   ;;  %20517 = vmatprep.subr.mxu0 %v21161_v2  ;;  %vm25381_vm4 = vcmask 1041409  }
0x1059   : > { %10884 = vst.msk [vmem:[%s21480_s25 + $0xa5] sm:$0x1] %vm25370_vm14, %v10866_v0  ;;  %20503 = vmatprep.mubr.msk.f32.mxu0 %vm25372_vm0, %v22983_v33  ;;  %vm25373_vm9 = vmmov %vm25372_vm0  ;;  %20524 = vmatprep.subr.mxu1 %v21161_v2 }
0x105a   : > { %10885 = vst.msk [vmem:[%s21480_s25 + $0xc5] sm:$0x1] %vm25371_vm1, %v10868_v56  ;;  %20511 = vmatprep.mubr.msk.f32.mxu1 %vm25373_vm9, %v22988_v34  ;;  %vm25374_vm3 = vmmov %vm25371_vm1 }
0x105b   : > { %10886 = vst.msk [vmem:[%s21480_s25 + $0xe5] sm:$0x1] %vm25374_vm3, %v10870_v59  ;;  %vm25375_vm2 = vmmov %vm25372_vm0  ;;  %vm25383_vm3 = vcmask 1042434  }
0x105c   : > { %20504 = vmatmul.mubr.msk.f32.vlgmr.msra.gmra.mxu0 %vm25375_vm2, %v23004_v38  ;;  %vm25376_vm7 = vmmov %vm25372_vm0 }
0x105d   : > { %20512 = vmatmul.mubr.msk.f32.vlgmr.msra.gmra.mxu1 %vm25376_vm7, %v23009_v46  ;;  %vm25377_vm1 = vmmov %vm25372_vm0  ;;  %20518 = vmatpush3.msk.msra.mxu0 %vm21260_vm5, %v21162_v19  ;;  %v12022_v46 = vld [vmem:[%s21246_s27 + $0x16] sm:$0x1]  ;;  %vm25385_vm7 = vcmask 130048  }
0x105e   : > { %20506 = vmatprep.mubr.msk.f32.mxu0 %vm25377_vm1, %v23024_v47  ;;  %vm25378_vm14 = vmmov %vm25372_vm0  ;;  %20525 = vmatpush3.msk.msra.mxu1 %vm21339_vm11, %v21162_v19  ;;  %v12018_v47 = vld [vmem:[%s21246_s27 + $0x15] sm:$0x1]  ;;  %v12029_v1 = vrot.slane %v12022_v46, 7 }
0x105f   : > { %20514 = vmatprep.mubr.msk.f32.mxu1 %vm25378_vm14, %v23029_v48  ;;  %20519 = vmatprep.subr.mxu0 %v21161_v2  ;;  %vm25379_vm10 = vmmov %vm25372_vm0  ;;  %v12126_v5 = vrot.slane %v12018_v47, 7  ;;  %vm25387_vm14 = vcmask 1043459  }
0x1060   : > { %20526 = vmatprep.subr.mxu1 %v21161_v2  ;;  %20507 = vmatmul.mubr.msk.f32.gmra.mxu0 %vm25379_vm10, %v23046_v49  ;;  %vm25380_vm13 = vmmov %vm25372_vm0  ;;  %v12030_v24 = vsel %vm25381_vm4, %v12029_v1, %v12021_v8  ;;  %v23565_v1 = vld [vmem:[%s24758_s1 + $0x48] sm:$0xff] }
0x1061   : > { %20515 = vmatmul.mubr.msk.f32.gmra.mxu1 %vm25380_vm13, %v23051_v51  ;;  %20520 = vmatpush3.msk.msra.mxu0 %vm21266_vm6, %v21162_v19  ;;  %v12023_v51 = vld [vmem:[%s21246_s27 + $0x26] sm:$0x1]  ;;  %vm25382_vm0 = vmmov %vm25381_vm4  ;;  %vm25389_vm13 = vnez %v24793_v54  ;;  %vm25390_vm4 = vnez %v24787_v30 }
0x1062   : > { %20527 = vmatpush3.msk.msra.mxu1 %vm21347_vm12, %v21162_v19  ;;  %20521 = vmatprep.mubr.msk.f32.mxu0 %vm24831_vm15, %v21161_v2  ;;  %v12031_v23 = vrot.slane %v12023_v51, 6  ;;  %v12127_v26 = vsel %vm25382_vm0, %v12126_v5, %v12017_v9  ;;  %vm25384_vm2 = vmmov %vm25383_vm3  ;;  %vm25391_vm0 = vcmask 253952   ;;  %v23558_v51 = vld [vmem:[%s24758_s1 + $0x68] sm:$0xff]  ;;  %v23579_v5 = vld [vmem:[%s24758_s1 + $0x50] sm:$0xff] }
0x1063   : > { %20528 = vmatprep.mubr.msk.f32.mxu1 %vm24831_vm15, %v21161_v2  ;;  %20531 = vmatprep.subr.mxu0 %v21161_v2  ;;  %v12129_v18 = vsel %vm25384_vm2, %v12128_v61, %v12127_v26  ;;  %vm25386_vm1 = vmmov %vm25385_vm7  ;;  %v12594_v61 = vrot.slane %v12587_v11, 7 }
0x1064   : > { %20538 = vmatprep.subr.mxu1 %v21161_v2  ;;  %v12032_v15 = vsel %vm25383_vm3, %v12031_v23, %v12030_v24  ;;  %vm25388_vm10 = vmmov %vm25387_vm14  ;;  %vm25393_vm3 = vcmask 1043456  }
0x1065   : > { %v12034_v20 = vsel %vm25387_vm14, %v12033_v29, %v12032_v15  ;;  %v12131_v35 = vsel %vm25388_vm10, %v12130_v12, %v12129_v18  ;;  %vm25394_vm2 = vmmov %vm25393_vm3  ;;  %vm25398_vm10 = vcmask 130048   ;;  %v12582_v29 = vld [vmem:[%s21246_s27 + $0x6] sm:$0x1]  ;;  %v12585_v15 = vld [vmem:[%s21246_s27 + $0x36] sm:$0x1] }
0x1066   : > { %vm25397_vm14 = vmmov %vm25391_vm0 }
0x1110   : > { %v11158_v33 = vpop.f32.mrf.mxu0 }
0x1112   : > { %v20479_v34 = vpop.f32.mrf.mxu0  ;;  %v11231_v38 = vpop.f32.mrf.mxu1 }
0x1113   : > { %v11232_v49 = vadd.f32 %v11231_v38, %v11158_v33 }
0x1114   : > { %v20486_v48 = vpop.f32.mrf.mxu1 }
0x1115   : > { %v23540_v48 = vld [vmem:[%s24758_s1 + $0x60] sm:$0xff] }
0x1116   : > { %v11304_v6 = vpop.f32.mrf.mxu0 }
0x1117   : > { %v11378_v7 = vpop.f32.mrf.mxu1  ;;  %v11308_v10 = vadd.f32 %v11304_v6, %v11232_v49  ;;  %v23547_v49 = vld [vmem:[%s24758_s1 + $0x40] sm:$0xff]  ;;  %v23594_v6 = vld [vmem:[%s24758_s1 + $0x78] sm:$0xff] }
0x1118   : > { %v20493_v21 = vpop.f32.mrf.mxu0 }
0x1119   : > { %v20500_v22 = vpop.f32.mrf.mxu1  ;;  %v11382_v62 = vadd.f32 %v11378_v7, %v11308_v10  ;;  %v23601_v7 = vld [vmem:[%s24758_s1 + $0x58] sm:$0xff]  ;;  %v12583_v21 = vld [vmem:[%s21246_s27 + $0x16] sm:$0x1] }
0x111a   : > { %v12691_v24 = vrot.slane %v12583_v21, 7 }
0x111b   : > { %vm11383_vm9 = vcmp.ge.f32.partialorder %v11382_v62, 0.0  ;;  %v11384_v31 = vmul.f32 0.2, %v11382_v62 }
0x111c   : > { %v20505_v27 = vpop.f32.mrf.mxu0 }
0x111d   : > { %v20513_v28 = vpop.f32.mrf.mxu1  ;;  %v11385_v39 = vsel %vm11383_vm9, %v11382_v62, %v11384_v31  ;;  %vm25392_vm9 = vnez %v24795_v57  ;;  %v12584_v62 = vld [vmem:[%s21246_s27 + $0x26] sm:$0x1] }
0x111e   : > { %v11641_v63 = vadd.f32 %v20513_v28, %v20505_v27  ;;  %v11538_v13 = vpop.f32.mrf.mxu0  ;;  %v11387_v41 = vcombine.high %v11385_v39, %v11385_v39  ;;  %v11394_v42 = vrot.slane %v11385_v39, %v21455_v32  ;;  %v12586_v28 = vld [vmem:[%s21246_s27 + $0x7] sm:$0x1]  ;;  %v12693_v18 = vrot.slane %v12584_v62, 6 }
0x111f   : > { %v11635_v14 = vpop.f32.mrf.mxu1 }
0x1120   : > { %v11636_v40 = vadd.f32 %v11635_v14, %v11538_v13  ;;  %20522 = vmatmul.mubr.msk.f32.vlgmr.msra.gmra.mxu0 %vm25385_vm7, %v11641_v63  ;;  %v20508_v43 = vpop.f32.mrf.mxu0  ;;  %v11401_v36 = vrot.slane %v11387_v41, %v21455_v32  ;;  %v11402_v37 = vcombine.high %v11394_v42, %v11394_v42  ;;  %v11410_v3 = vrot.slane %v11394_v42, %v21455_v32  ;;  %vm25395_vm7 = vmmov %vm25391_vm0  ;;  %v12589_v63 = vld [vmem:[%s21246_s27 + $0x37] sm:$0x1] }
0x1121   : > { %v20516_v45 = vpop.f32.mrf.mxu1  ;;  %20532 = vmatpush3.msk.msra.mxu0 %vm21309_vm8, %v21162_v19  ;;  %20535 = vmatprep.mubr.msk.f32.mxu0 %vm24831_vm15, %v21161_v2  ;;  %v12596_v14 = vrot.slane %v12588_v60, 6 }
0x1122   : > { %20529 = vmatmul.mubr.msk.f32.vlgmr.msra.gmra.mxu1 %vm25386_vm1, %v11636_v40  ;;  %20533 = vmatprep.subr.mxu0 %v21161_v2  ;;  %v11548_v52 = vpop.f32.mrf.mxu0  ;;  %v11651_v55 = vadd.f32 %v20516_v45, %v20508_v43  ;;  %v11403_v56 = vcombine.high %v11401_v36, %v11401_v36  ;;  %v11417_v58 = vrot.slane %v11401_v36, %v21455_v32  ;;  %vm25396_vm1 = vmmov %vm25391_vm0  ;;  %v12598_v45 = vrot.slane %v12589_v63, 5  ;;  %v13152_v63 = vld [vmem:[%s21246_s27 + $0x18] sm:$0x1] }
0x1123   : > { %20539 = vmatpush3.msk.msra.mxu1 %vm25389_vm13, %v21162_v19  ;;  %v11645_v53 = vpop.f32.mrf.mxu1  ;;  %20534 = vmatpush3.msk.msra.mxu0 %vm25390_vm4, %v21162_v19  ;;  %v11424_v59 = vrot.slane %v11402_v37, %v21455_v32  ;;  %v11432_v33 = vcombine.high %v11410_v3, %v11410_v3  ;;  %11444 = vst.msk [vmem:[%s21480_s25 + $0x7] sm:$0x1] %vm25391_vm0, %v11410_v3  ;;  %vm25399_vm0 = vmmov %vm25398_vm10  ;;  %v12695_v36 = vrot.slane %v12585_v15, 5  ;;  %v13153_v15 = vld [vmem:[%s21246_s27 + $0x28] sm:$0x1] }
0x1124   : > { %v11646_v0 = vadd.f32 %v11645_v53, %v11548_v52  ;;  %20540 = vmatprep.subr.mxu1 %v21161_v2  ;;  %20542 = vmatprep.mubr.msk.f32.mxu1 %vm24831_vm15, %v21161_v2  ;;  %v11431_v34 = vrot.slane %v11403_v56, %v21455_v32  ;;  %v11433_v38 = vcombine.high %v11417_v58, %v11417_v58  ;;  %vm25403_vm4 = vmmov %vm25396_vm1 }
0x1125   : > { %20541 = vmatpush3.msk.msra.mxu1 %vm25392_vm9, %v21162_v19  ;;  %20545 = vmatprep.subr.msk.mxu0 %vm25393_vm3, %v12034_v20  ;;  %v11434_v46 = vcombine.high %v11424_v59, %v11424_v59  ;;  %11445 = vst.msk [vmem:[%s21480_s25 + $0x27] sm:$0x1] %vm25395_vm7, %v11424_v59  ;;  %vm25400_vm9 = vmmov %vm25394_vm2  ;;  %vm25405_vm7 = vcmask 31744  }
0x1126   : > { %20553 = vmatprep.subr.msk.mxu1 %vm25394_vm2, %v12131_v35  ;;  %11446 = vst.msk [vmem:[%s21480_s25 + $0x47] sm:$0x1] %vm25396_vm1, %v11432_v33  ;;  %20536 = vmatmul.mubr.msk.f32.vlgmr.msra.gmra.mxu0 %vm25398_vm10, %v11646_v0  ;;  %vm25401_vm3 = vmmov %vm25394_vm2  ;;  %v11435_v47 = vcombine.high %v11431_v34, %v11431_v34 }
0x1127   : > { %11448 = vst.msk [vmem:[%s21480_s25 + $0x87] sm:$0x1] %vm25397_vm14, %v11417_v58  ;;  %20543 = vmatmul.mubr.msk.f32.vlgmr.msra.gmra.mxu1 %vm25399_vm0, %v11651_v55  ;;  %20546 = vmatpush3.msk.msra.mxu0 %vm25400_vm9, %v12034_v20  ;;  %vm25402_vm2 = vmmov %vm25396_vm1 }
0x1128   : > { %20554 = vmatpush3.msk.msra.mxu1 %vm25401_vm3, %v12131_v35  ;;  %11447 = vst.msk [vmem:[%s21480_s25 + $0x67] sm:$0x1] %vm25402_vm2, %v11434_v46  ;;  %vm25404_vm13 = vmmov %vm25396_vm1  ;;  %20547 = vmatprep.mubr.msk.f32.mxu0 %vm25405_vm7, %v23540_v48  ;;  %vm25414_vm2 = vcmask 1041409  }
0x1129   : > { %11449 = vst.msk [vmem:[%s21480_s25 + $0xa7] sm:$0x1] %vm25403_vm4, %v11431_v34  ;;  %vm25406_vm9 = vmmov %vm25405_vm7  ;;  %20561 = vmatprep.subr.mxu0 %v21161_v2  ;;  %20568 = vmatprep.subr.mxu1 %v21161_v2  ;;  %v12595_v40 = vsel %vm25414_vm2, %v12594_v61, %v12586_v28 }
0x112a   : > { %11450 = vst.msk [vmem:[%s21480_s25 + $0xc7] sm:$0x1] %vm25404_vm13, %v11433_v38  ;;  %20555 = vmatprep.mubr.msk.f32.mxu1 %vm25406_vm9, %v23547_v49  ;;  %vm25407_vm13 = vmmov %vm25396_vm1 }
0x112b   : > { %11451 = vst.msk [vmem:[%s21480_s25 + $0xe7] sm:$0x1] %vm25407_vm13, %v11435_v47  ;;  %vm25408_vm4 = vmmov %vm25405_vm7  ;;  %vm25416_vm13 = vcmask 1042434  }
0x112c   : > { %20548 = vmatmul.mubr.msk.f32.vlgmr.msra.gmra.mxu0 %vm25408_vm4, %v23558_v51  ;;  %vm25409_vm1 = vmmov %vm25408_vm4  ;;  %v12597_v52 = vsel %vm25416_vm13, %v12596_v14, %v12595_v40 }
0x112d   : > { %20556 = vmatmul.mubr.msk.f32.vlgmr.msra.gmra.mxu1 %vm25409_vm1, %v23565_v1  ;;  %vm25410_vm14 = vmmov %vm25409_vm1  ;;  %20562 = vmatpush3.msk.msra.mxu0 %vm21260_vm5, %v21162_v19 }
0x112e   : > { %20550 = vmatprep.mubr.msk.f32.mxu0 %vm25410_vm14, %v23572_v4  ;;  %vm25411_vm10 = vmmov %vm25409_vm1  ;;  %20569 = vmatpush3.msk.msra.mxu1 %vm21339_vm11, %v21162_v19 }
0x112f   : > { %20558 = vmatprep.mubr.msk.f32.mxu1 %vm25411_vm10, %v23579_v5  ;;  %20563 = vmatprep.subr.mxu0 %v21161_v2  ;;  %vm25412_vm0 = vmmov %vm25409_vm1  ;;  %vm25418_vm1 = vcmask 130048   ;;  %vm25420_vm10 = vcmask 1043459  }
0x1130   : > { %20570 = vmatprep.subr.mxu1 %v21161_v2  ;;  %20551 = vmatmul.mubr.msk.f32.gmra.mxu0 %vm25412_vm0, %v23594_v6  ;;  %vm25413_vm3 = vmmov %vm25412_vm0  ;;  %v12599_v34 = vsel %vm25420_vm10, %v12598_v45, %v12597_v52  ;;  %v13147_v45 = vld [vmem:[%s21246_s27 + $0x7] sm:$0x1]  ;;  %v13150_v52 = vld [vmem:[%s21246_s27 + $0x37] sm:$0x1] }
0x1131   : > { %20559 = vmatmul.mubr.msk.f32.gmra.mxu1 %vm25413_vm3, %v23601_v7  ;;  %20564 = vmatpush3.msk.msra.mxu0 %vm21266_vm6, %v21162_v19  ;;  %vm25415_vm7 = vmmov %vm25414_vm2  ;;  %vm25422_vm3 = vnez %v24793_v54  ;;  %vm25423_vm2 = vnez %v24787_v30 }
0x1132   : > { %20571 = vmatpush3.msk.msra.mxu1 %vm21347_vm12, %v21162_v19  ;;  %20565 = vmatprep.mubr.msk.f32.mxu0 %vm24831_vm15, %v21161_v2  ;;  %v12692_v41 = vsel %vm25415_vm7, %v12691_v24, %v12582_v29  ;;  %vm25417_vm4 = vmmov %vm25416_vm13  ;;  %vm25424_vm7 = vcmask 253952   ;;  %vm25426_vm13 = vcmask 1043456  }
0x1133   : > { %20572 = vmatprep.mubr.msk.f32.mxu1 %vm24831_vm15, %v21161_v2  ;;  %20575 = vmatprep.subr.mxu0 %v21161_v2  ;;  %v12694_v53 = vsel %vm25417_vm4, %v12693_v18, %v12692_v41  ;;  %vm25419_vm14 = vmmov %vm25418_vm1  ;;  %v13159_v18 = vrot.slane %v13152_v63, 7 }
0x1134   : > { %20582 = vmatprep.subr.mxu1 %v21161_v2  ;;  %vm25421_vm0 = vmmov %vm25420_vm10 }
0x1135   : > { %v12696_v38 = vsel %vm25421_vm0, %v12695_v36, %v12694_v53  ;;  %vm25427_vm4 = vmmov %vm25426_vm13  ;;  %vm25431_vm0 = vcmask 130048  }
0x11e0   : > { %v11723_v8 = vpop.f32.mrf.mxu0 }
0x11e2   : > { %v20523_v9 = vpop.f32.mrf.mxu0  ;;  %v11796_v10 = vpop.f32.mrf.mxu1 }
0x11e3   : > { %v11797_v23 = vadd.f32 %v11796_v10, %v11723_v8 }
0x11e4   : > { %v20530_v22 = vpop.f32.mrf.mxu1 }
0x11e6   : > { %v11869_v26 = vpop.f32.mrf.mxu0 }
0x11e7   : > { %v11943_v27 = vpop.f32.mrf.mxu1  ;;  %v11873_v31 = vadd.f32 %v11869_v26, %v11797_v23 }
0x11e8   : > { %v20537_v12 = vpop.f32.mrf.mxu0 }
0x11e9   : > { %v20544_v13 = vpop.f32.mrf.mxu1  ;;  %v11947_v39 = vadd.f32 %v11943_v27, %v11873_v31  ;;  %v13148_v12 = vld [vmem:[%s21246_s27 + $0x17] sm:$0x1] }
0x11ea   : > { %v13256_v40 = vrot.slane %v13148_v12, 7 }
0x11eb   : > { %vm11948_vm9 = vcmp.ge.f32.partialorder %v11947_v39, 0.0  ;;  %v11949_v20 = vmul.f32 0.2, %v11947_v39 }
0x11ec   : > { %v20549_v42 = vpop.f32.mrf.mxu0 }
0x11ed   : > { %v20557_v43 = vpop.f32.mrf.mxu1  ;;  %v11950_v55 = vsel %vm11948_vm9, %v11947_v39, %v11949_v20  ;;  %vm25425_vm9 = vnez %v24795_v57  ;;  %v13149_v39 = vld [vmem:[%s21246_s27 + $0x27] sm:$0x1] }
0x11ee   : > { %v12206_v35 = vadd.f32 %v20557_v43, %v20549_v42  ;;  %v12103_v37 = vpop.f32.mrf.mxu0  ;;  %v11952_v56 = vcombine.high %v11950_v55, %v11950_v55  ;;  %v11959_v58 = vrot.slane %v11950_v55, %v21455_v32  ;;  %v13151_v43 = vld [vmem:[%s21246_s27 + $0x8] sm:$0x1]  ;;  %v13258_v53 = vrot.slane %v13149_v39, 6 }
0x11ef   : > { %v12200_v3 = vpop.f32.mrf.mxu1 }
0x11f0   : > { %v12201_v0 = vadd.f32 %v12200_v3, %v12103_v37  ;;  %20566 = vmatmul.mubr.msk.f32.vlgmr.msra.gmra.mxu0 %vm25418_vm1, %v12206_v35  ;;  %v20552_v59 = vpop.f32.mrf.mxu0  ;;  %v11966_v46 = vrot.slane %v11952_v56, %v21455_v32  ;;  %v11967_v47 = vcombine.high %v11959_v58, %v11959_v58  ;;  %v11975_v8 = vrot.slane %v11959_v58, %v21455_v32  ;;  %vm25428_vm1 = vmmov %vm25424_vm7  ;;  %v13154_v35 = vld [vmem:[%s21246_s27 + $0x38] sm:$0x1] }
0x11f1   : > { %v20560_v33 = vpop.f32.mrf.mxu1  ;;  %20576 = vmatpush3.msk.msra.mxu0 %vm21309_vm8, %v21162_v19  ;;  %20579 = vmatprep.mubr.msk.f32.mxu0 %vm24831_vm15, %v21161_v2  ;;  %vm25430_vm10 = vmmov %vm25428_vm1  ;;  %v13161_v3 = vrot.slane %v13153_v15, 6 }
0x11f2   : > { %20573 = vmatmul.mubr.msk.f32.vlgmr.msra.gmra.mxu1 %vm25419_vm14, %v12201_v0  ;;  %20577 = vmatprep.subr.mxu0 %v21161_v2  ;;  %v12113_v9 = vpop.f32.mrf.mxu0  ;;  %v12216_v11 = vadd.f32 %v20560_v33, %v20552_v59  ;;  %v11968_v22 = vcombine.high %v11966_v46, %v11966_v46  ;;  %v11982_v23 = vrot.slane %v11966_v46, %v21455_v32  ;;  %vm25429_vm14 = vmmov %vm25428_vm1  ;;  %v13163_v33 = vrot.slane %v13154_v35, 5  ;;  %v13717_v35 = vld [vmem:[%s21246_s27 + $0x19] sm:$0x1] }
0x11f3   : > { %20583 = vmatpush3.msk.msra.mxu1 %vm25422_vm3, %v21162_v19  ;;  %v12210_v10 = vpop.f32.mrf.mxu1  ;;  %20578 = vmatpush3.msk.msra.mxu0 %vm25423_vm2, %v21162_v19  ;;  %v11989_v60 = vrot.slane %v11967_v47, %v21455_v32  ;;  %v11997_v61 = vcombine.high %v11975_v8, %v11975_v8  ;;  %12009 = vst.msk [vmem:[%s21480_s25 + $0x9] sm:$0x1] %vm25424_vm7, %v11975_v8  ;;  %vm25432_vm7 = vmmov %vm25431_vm0  ;;  %v13260_v46 = vrot.slane %v13150_v52, 5  ;;  %v13718_v52 = vld [vmem:[%s21246_s27 + $0x29] sm:$0x1] }
0x11f4   : > { %v12211_v21 = vadd.f32 %v12210_v10, %v12113_v9  ;;  %20584 = vmatprep.subr.mxu1 %v21161_v2  ;;  %20586 = vmatprep.mubr.msk.f32.mxu1 %vm24831_vm15, %v21161_v2  ;;  %v11996_v62 = vrot.slane %v11968_v22, %v21455_v32  ;;  %v11998_v24 = vcombine.high %v11982_v23, %v11982_v23  ;;  %vm25436_vm2 = vmmov %vm25428_vm1 }
0x11f5   : > { %20585 = vmatpush3.msk.msra.mxu1 %vm25425_vm9, %v21162_v19  ;;  %20589 = vmatprep.subr.msk.mxu0 %vm25426_vm13, %v12599_v34  ;;  %v11999_v26 = vcombine.high %v11989_v60, %v11989_v60  ;;  %12010 = vst.msk [vmem:[%s21480_s25 + $0x29] sm:$0x1] %vm25428_vm1, %v11989_v60  ;;  %vm25433_vm9 = vmmov %vm25427_vm4 }
0x11f6   : > { %20597 = vmatprep.subr.msk.mxu1 %vm25427_vm4, %v12696_v38  ;;  %12011 = vst.msk [vmem:[%s21480_s25 + $0x49] sm:$0x1] %vm25429_vm14, %v11997_v61  ;;  %20580 = vmatmul.mubr.msk.f32.vlgmr.msra.gmra.mxu0 %vm25431_vm0, %v12211_v21  ;;  %vm25434_vm13 = vmmov %vm25427_vm4  ;;  %v12000_v27 = vcombine.high %v11996_v62, %v11996_v62 }
0x11f7   : > { %12013 = vst.msk [vmem:[%s21480_s25 + $0x89] sm:$0x1] %vm25430_vm10, %v11982_v23  ;;  %20587 = vmatmul.mubr.msk.f32.vlgmr.msra.gmra.mxu1 %vm25432_vm7, %v12216_v11  ;;  %20590 = vmatpush3.msk.msra.mxu0 %vm25433_vm9, %v12599_v34  ;;  %vm25435_vm4 = vmmov %vm25428_vm1 }
0x11f8   : > { %20598 = vmatpush3.msk.msra.mxu1 %vm25434_vm13, %v12696_v38  ;;  %12012 = vst.msk [vmem:[%s21480_s25 + $0x69] sm:$0x1] %vm25435_vm4, %v11999_v26  ;;  %vm25437_vm3 = vmmov %vm25428_vm1  ;;  %vm25438_vm1 = vcmask 31744   ;;  %20605 = vmatprep.subr.mxu0 %v21161_v2  ;;  %vm25447_vm4 = vcmask 1041409  }
0x11f9   : > { %12014 = vst.msk [vmem:[%s21480_s25 + $0xa9] sm:$0x1] %vm25436_vm2, %v11996_v62  ;;  %20591 = vmatprep.mubr.msk.f32.mxu0 %vm25438_vm1, %v23540_v48  ;;  %vm25439_vm14 = vmmov %vm25438_vm1  ;;  %20612 = vmatprep.subr.mxu1 %v21161_v2  ;;  %v13160_v0 = vsel %vm25447_vm4, %v13159_v18, %v13151_v43 }
0x11fa   : > { %12015 = vst.msk [vmem:[%s21480_s25 + $0xc9] sm:$0x1] %vm25437_vm3, %v11998_v24  ;;  %20599 = vmatprep.mubr.msk.f32.mxu1 %vm25439_vm14, %v23547_v49  ;;  %vm25440_vm9 = vmmov %vm25436_vm2 }
0x11fb   : > { %12016 = vst.msk [vmem:[%s21480_s25 + $0xe9] sm:$0x1] %vm25440_vm9, %v12000_v27  ;;  %vm25441_vm10 = vmmov %vm25438_vm1  ;;  %vm25449_vm9 = vcmask 1042434  }
0x11fc   : > { %20592 = vmatmul.mubr.msk.f32.vlgmr.msra.gmra.mxu0 %vm25441_vm10, %v23558_v51  ;;  %vm25442_vm0 = vmmov %vm25438_vm1  ;;  %v13162_v9 = vsel %vm25449_vm9, %v13161_v3, %v13160_v0 }
0x11fd   : > { %20600 = vmatmul.mubr.msk.f32.vlgmr.msra.gmra.mxu1 %vm25442_vm0, %v23565_v1  ;;  %vm25443_vm3 = vmmov %vm25442_vm0  ;;  %20606 = vmatpush3.msk.msra.mxu0 %vm21260_vm5, %v21162_v19 }
0x11fe   : > { %20594 = vmatprep.mubr.msk.f32.mxu0 %vm25443_vm3, %v23572_v4  ;;  %vm25444_vm2 = vmmov %vm25442_vm0  ;;  %20613 = vmatpush3.msk.msra.mxu1 %vm21339_vm11, %v21162_v19 }
0x11ff   : > { %20602 = vmatprep.mubr.msk.f32.mxu1 %vm25444_vm2, %v23579_v5  ;;  %20607 = vmatprep.subr.mxu0 %v21161_v2  ;;  %vm25445_vm7 = vmmov %vm25442_vm0  ;;  %vm25453_vm2 = vcmask 1043459  }
0x1200   : > { %20614 = vmatprep.subr.mxu1 %v21161_v2  ;;  %20595 = vmatmul.mubr.msk.f32.gmra.mxu0 %vm25445_vm7, %v23594_v6  ;;  %vm25446_vm13 = vmmov %vm25442_vm0  ;;  %vm25451_vm0 = vcmask 130048   ;;  %v13164_v62 = vsel %vm25453_vm2, %v13163_v33, %v13162_v9  ;;  %v13712_v33 = vld [vmem:[%s21246_s27 + $0x8] sm:$0x1]  ;;  %v13715_v9 = vld [vmem:[%s21246_s27 + $0x38] sm:$0x1] }
0x1201   : > { %20603 = vmatmul.mubr.msk.f32.gmra.mxu1 %vm25446_vm13, %v23601_v7  ;;  %20608 = vmatpush3.msk.msra.mxu0 %vm21266_vm6, %v21162_v19  ;;  %vm25448_vm1 = vmmov %vm25447_vm4  ;;  %vm25455_vm13 = vnez %v24793_v54  ;;  %vm25456_vm4 = vnez %v24787_v30 }
0x1202   : > { %20615 = vmatpush3.msk.msra.mxu1 %vm21347_vm12, %v21162_v19  ;;  %20609 = vmatprep.mubr.msk.f32.mxu0 %vm24831_vm15, %v21161_v2  ;;  %v13257_v56 = vsel %vm25448_vm1, %v13256_v40, %v13147_v45  ;;  %vm25450_vm10 = vmmov %vm25449_vm9  ;;  %vm25457_vm1 = vcmask 253952   ;;  %vm25459_vm9 = vcmask 1043456  }
0x1203   : > { %20616 = vmatprep.mubr.msk.f32.mxu1 %vm24831_vm15, %v21161_v2  ;;  %20619 = vmatprep.subr.mxu0 %v21161_v2  ;;  %v13259_v10 = vsel %vm25450_vm10, %v13258_v53, %v13257_v56  ;;  %vm25452_vm3 = vmmov %vm25451_vm0  ;;  %v13724_v53 = vrot.slane %v13717_v35, 7 }
0x1204   : > { %20626 = vmatprep.subr.mxu1 %v21161_v2  ;;  %vm25454_vm7 = vmmov %vm25453_vm2 }
0x1205   : > { %v13261_v24 = vsel %vm25454_vm7, %v13260_v46, %v13259_v10  ;;  %vm25460_vm10 = vmmov %vm25459_vm9  ;;  %vm25464_vm7 = vcmask 130048  }
0x12b0   : > { %v12288_v28 = vpop.f32.mrf.mxu0 }
0x12b2   : > { %v20567_v29 = vpop.f32.mrf.mxu0  ;;  %v12361_v31 = vpop.f32.mrf.mxu1 }
0x12b3   : > { %v12362_v14 = vadd.f32 %v12361_v31, %v12288_v28 }
0x12b4   : > { %v20574_v13 = vpop.f32.mrf.mxu1 }
0x12b6   : > { %v12434_v41 = vpop.f32.mrf.mxu0 }
0x12b7   : > { %v12508_v42 = vpop.f32.mrf.mxu1  ;;  %v12438_v20 = vadd.f32 %v12434_v41, %v12362_v14 }
0x12b8   : > { %v20581_v36 = vpop.f32.mrf.mxu0 }
0x12b9   : > { %v20588_v37 = vpop.f32.mrf.mxu1  ;;  %v12512_v55 = vadd.f32 %v12508_v42, %v12438_v20  ;;  %v13713_v36 = vld [vmem:[%s21246_s27 + $0x18] sm:$0x1] }
0x12ba   : > { %v13821_v0 = vrot.slane %v13713_v36, 7 }
0x12bb   : > { %vm12513_vm14 = vcmp.ge.f32.partialorder %v12512_v55, 0.0  ;;  %v12514_v34 = vmul.f32 0.2, %v12512_v55 }
0x12bc   : > { %v20593_v58 = vpop.f32.mrf.mxu0 }
0x12bd   : > { %v20601_v59 = vpop.f32.mrf.mxu1  ;;  %v12515_v11 = vsel %vm12513_vm14, %v12512_v55, %v12514_v34  ;;  %vm25458_vm14 = vnez %v24795_v57  ;;  %v13714_v55 = vld [vmem:[%s21246_s27 + $0x28] sm:$0x1] }
0x12be   : > { %v12771_v38 = vadd.f32 %v20601_v59, %v20593_v58  ;;  %v12668_v47 = vpop.f32.mrf.mxu0  ;;  %v12517_v22 = vcombine.high %v12515_v11, %v12515_v11  ;;  %v12524_v23 = vrot.slane %v12515_v11, %v21455_v32  ;;  %v13716_v59 = vld [vmem:[%s21246_s27 + $0x9] sm:$0x1]  ;;  %v13823_v10 = vrot.slane %v13714_v55, 6 }
0x12bf   : > { %v12765_v8 = vpop.f32.mrf.mxu1 }
0x12c0   : > { %v12766_v21 = vadd.f32 %v12765_v8, %v12668_v47  ;;  %20610 = vmatmul.mubr.msk.f32.vlgmr.msra.gmra.mxu0 %vm25451_vm0, %v12771_v38  ;;  %v20596_v60 = vpop.f32.mrf.mxu0  ;;  %v12531_v26 = vrot.slane %v12517_v22, %v21455_v32  ;;  %v12532_v27 = vcombine.high %v12524_v23, %v12524_v23  ;;  %v12540_v28 = vrot.slane %v12524_v23, %v21455_v32  ;;  %vm25461_vm0 = vmmov %vm25457_vm1  ;;  %v13719_v38 = vld [vmem:[%s21246_s27 + $0x39] sm:$0x1] }
0x12c1   : > { %v20604_v61 = vpop.f32.mrf.mxu1  ;;  %20620 = vmatpush3.msk.msra.mxu0 %vm21309_vm8, %v21162_v19  ;;  %20623 = vmatprep.mubr.msk.f32.mxu0 %vm24831_vm15, %v21161_v2  ;;  %vm25463_vm2 = vmmov %vm25461_vm0  ;;  %v13726_v8 = vrot.slane %v13718_v52, 6 }
0x12c2   : > { %20617 = vmatmul.mubr.msk.f32.vlgmr.msra.gmra.mxu1 %vm25452_vm3, %v12766_v21  ;;  %20621 = vmatprep.subr.mxu0 %v21161_v2  ;;  %v12678_v29 = vpop.f32.mrf.mxu0  ;;  %v12781_v63 = vadd.f32 %v20604_v61, %v20596_v60  ;;  %v12533_v13 = vcombine.high %v12531_v26, %v12531_v26  ;;  %v12547_v14 = vrot.slane %v12531_v26, %v21455_v32  ;;  %vm25462_vm3 = vmmov %vm25461_vm0  ;;  %v13728_v61 = vrot.slane %v13719_v38, 5  ;;  %v14282_v38 = vld [vmem:[%s21246_s27 + $0x1a] sm:$0x1] }
0x12c3   : > { %20627 = vmatpush3.msk.msra.mxu1 %vm25455_vm13, %v21162_v19  ;;  %v12775_v31 = vpop.f32.mrf.mxu1  ;;  %20622 = vmatpush3.msk.msra.mxu0 %vm25456_vm4, %v21162_v19  ;;  %v12554_v15 = vrot.slane %v12532_v27, %v21455_v32  ;;  %v12562_v18 = vcombine.high %v12540_v28, %v12540_v28  ;;  %12574 = vst.msk [vmem:[%s21480_s25 + $0xb] sm:$0x1] %vm25457_vm1, %v12540_v28  ;;  %vm25465_vm1 = vmmov %vm25464_vm7  ;;  %v13825_v26 = vrot.slane %v13715_v9, 5  ;;  %v14283_v9 = vld [vmem:[%s21246_s27 + $0x2a] sm:$0x1] }
0x12c4   : > { %v12776_v12 = vadd.f32 %v12775_v31, %v12678_v29  ;;  %20628 = vmatprep.subr.mxu1 %v21161_v2  ;;  %20630 = vmatprep.mubr.msk.f32.mxu1 %vm24831_vm15, %v21161_v2  ;;  %v12561_v39 = vrot.slane %v12533_v13, %v21455_v32  ;;  %v12563_v40 = vcombine.high %v12547_v14, %v12547_v14  ;;  %vm25468_vm4 = vmmov %vm25461_vm0 }
0x12c5   : > { %20629 = vmatpush3.msk.msra.mxu1 %vm25458_vm14, %v21162_v19  ;;  %20633 = vmatprep.subr.msk.mxu0 %vm25459_vm9, %v13164_v62  ;;  %v12564_v41 = vcombine.high %v12554_v15, %v12554_v15  ;;  %12575 = vst.msk [vmem:[%s21480_s25 + $0x2b] sm:$0x1] %vm25461_vm0, %v12554_v15  ;;  %vm25466_vm14 = vmmov %vm25459_vm9 }
0x12c6   : > { %20641 = vmatprep.subr.msk.mxu1 %vm25460_vm10, %v13261_v24  ;;  %12576 = vst.msk [vmem:[%s21480_s25 + $0x4b] sm:$0x1] %vm25462_vm3, %v12562_v18  ;;  %20624 = vmatmul.mubr.msk.f32.vlgmr.msra.gmra.mxu0 %vm25464_vm7, %v12776_v12  ;;  %v12565_v42 = vcombine.high %v12561_v39, %v12561_v39  ;;  %vm25467_vm10 = vmmov %vm25461_vm0 }
0x12c7   : > { %12578 = vst.msk [vmem:[%s21480_s25 + $0x8b] sm:$0x1] %vm25463_vm2, %v12547_v14  ;;  %20631 = vmatmul.mubr.msk.f32.vlgmr.msra.gmra.mxu1 %vm25465_vm1, %v12781_v63  ;;  %20634 = vmatpush3.msk.msra.mxu0 %vm25466_vm14, %v13164_v62  ;;  %vm25469_vm13 = vmmov %vm25461_vm0  ;;  %vm25470_vm0 = vcmask 31744  }
0x12c8   : > { %20642 = vmatpush3.msk.msra.mxu1 %vm25459_vm9, %v13261_v24  ;;  %12577 = vst.msk [vmem:[%s21480_s25 + $0x6b] sm:$0x1] %vm25467_vm10, %v12564_v41  ;;  %20635 = vmatprep.mubr.msk.f32.mxu0 %vm25470_vm0, %v23540_v48  ;;  %vm25471_vm3 = vmmov %vm25470_vm0  ;;  %vm25479_vm10 = vcmask 1041409  }
0x12c9   : > { %12579 = vst.msk [vmem:[%s21480_s25 + $0xab] sm:$0x1] %vm25468_vm4, %v12561_v39  ;;  %20643 = vmatprep.mubr.msk.f32.mxu1 %vm25471_vm3, %v23547_v49  ;;  %20649 = vmatprep.subr.mxu0 %v21161_v2  ;;  %vm25472_vm14 = vmmov %vm25463_vm2  ;;  %v13725_v21 = vsel %vm25479_vm10, %v13724_v53, %v13716_v59 }
0x12ca   : > { %12580 = vst.msk [vmem:[%s21480_s25 + $0xcb] sm:$0x1] %vm25469_vm13, %v12563_v40  ;;  %20656 = vmatprep.subr.mxu1 %v21161_v2  ;;  %vm25473_vm2 = vmmov %vm25470_vm0 }
0x12cb   : > { %12581 = vst.msk [vmem:[%s21480_s25 + $0xeb] sm:$0x1] %vm25472_vm14, %v12565_v42  ;;  %20636 = vmatmul.mubr.msk.f32.vlgmr.msra.gmra.mxu0 %vm25473_vm2, %v23558_v51  ;;  %vm25474_vm7 = vmmov %vm25470_vm0  ;;  %vm25481_vm14 = vcmask 1042434  }
0x12cc   : > { %20644 = vmatmul.mubr.msk.f32.vlgmr.msra.gmra.mxu1 %vm25474_vm7, %v23565_v1  ;;  %vm25475_vm13 = vmmov %vm25470_vm0  ;;  %20650 = vmatpush3.msk.msra.mxu0 %vm21260_vm5, %v21162_v19  ;;  %v13727_v29 = vsel %vm25481_vm14, %v13726_v8, %v13725_v21  ;;  %vm25483_vm7 = vcmask 130048  }
0x12cd   : > { %20638 = vmatprep.mubr.msk.f32.mxu0 %vm25475_vm13, %v23572_v4  ;;  %vm25476_vm4 = vmmov %vm25470_vm0  ;;  %20657 = vmatpush3.msk.msra.mxu1 %vm21339_vm11, %v21162_v19 }
0x12ce   : > { %20646 = vmatprep.mubr.msk.f32.mxu1 %vm25476_vm4, %v23579_v5  ;;  %20651 = vmatprep.subr.mxu0 %v21161_v2  ;;  %vm25477_vm1 = vmmov %vm25470_vm0  ;;  %vm25485_vm4 = vcmask 1043459  }
0x12cf   : > { %20658 = vmatprep.subr.mxu1 %v21161_v2  ;;  %20639 = vmatmul.mubr.msk.f32.gmra.mxu0 %vm25477_vm1, %v23594_v6  ;;  %vm25478_vm9 = vmmov %vm25470_vm0  ;;  %v13729_v39 = vsel %vm25485_vm4, %v13728_v61, %v13727_v29  ;;  %v14277_v61 = vld [vmem:[%s21246_s27 + $0x9] sm:$0x1]  ;;  %v14280_v29 = vld [vmem:[%s21246_s27 + $0x39] sm:$0x1] }
0x12d0   : > { %20647 = vmatmul.mubr.msk.f32.gmra.mxu1 %vm25478_vm9, %v23601_v7  ;;  %20652 = vmatpush3.msk.msra.mxu0 %vm21266_vm6, %v21162_v19  ;;  %vm25480_vm0 = vmmov %vm25479_vm10  ;;  %vm25487_vm9 = vnez %v24793_v54  ;;  %vm25488_vm10 = vnez %v24787_v30 }
0x12d1   : > { %20659 = vmatpush3.msk.msra.mxu1 %vm21347_vm12, %v21162_v19  ;;  %20653 = vmatprep.mubr.msk.f32.mxu0 %vm24831_vm15, %v21161_v2  ;;  %v13822_v22 = vsel %vm25480_vm0, %v13821_v0, %v13712_v33  ;;  %vm25482_vm2 = vmmov %vm25481_vm14  ;;  %vm25489_vm0 = vcmask 253952   ;;  %vm25491_vm14 = vcmask 1043456  }
0x12d2   : > { %20660 = vmatprep.mubr.msk.f32.mxu1 %vm24831_vm15, %v21161_v2  ;;  %20663 = vmatprep.subr.mxu0 %v21161_v2  ;;  %v13824_v31 = vsel %vm25482_vm2, %v13823_v10, %v13822_v22  ;;  %vm25484_vm13 = vmmov %vm25483_vm7  ;;  %v14289_v10 = vrot.slane %v14282_v38, 7 }
0x12d3   : > { %20670 = vmatprep.subr.mxu1 %v21161_v2  ;;  %vm25486_vm1 = vmmov %vm25485_vm4 }
0x12d4   : > { %v13826_v40 = vsel %vm25486_vm1, %v13825_v26, %v13824_v31  ;;  %vm25492_vm2 = vmmov %vm25491_vm14  ;;  %vm25496_vm1 = vcmask 130048  }
0x12d5   : > { %vm25495_vm4 = vmmov %vm25489_vm0 }
0x1380   : > { %v12853_v43 = vpop.f32.mrf.mxu0 }
0x1382   : > { %v20611_v45 = vpop.f32.mrf.mxu0  ;;  %v12926_v20 = vpop.f32.mrf.mxu1 }
0x1383   : > { %v12927_v3 = vadd.f32 %v12926_v20, %v12853_v43 }
0x1384   : > { %v20618_v37 = vpop.f32.mrf.mxu1 }
0x1386   : > { %v12999_v56 = vpop.f32.mrf.mxu0 }
0x1387   : > { %v13073_v58 = vpop.f32.mrf.mxu1  ;;  %v13003_v34 = vadd.f32 %v12999_v56, %v12927_v3 }
0x1388   : > { %v20625_v46 = vpop.f32.mrf.mxu0 }
0x1389   : > { %v20632_v47 = vpop.f32.mrf.mxu1  ;;  %v13077_v11 = vadd.f32 %v13073_v58, %v13003_v34  ;;  %v14278_v46 = vld [vmem:[%s21246_s27 + $0x19] sm:$0x1] }
0x138a   : > { %v14386_v21 = vrot.slane %v14278_v46, 7 }
0x138b   : > { %v20637_v23 = vpop.f32.mrf.mxu0  ;;  %vm13078_vm3 = vcmp.ge.f32.partialorder %v13077_v11, 0.0  ;;  %v13079_v62 = vmul.f32 0.2, %v13077_v11 }
0x138c   : > { %v20645_v60 = vpop.f32.mrf.mxu1 }
0x138d   : > { %v13336_v24 = vadd.f32 %v20645_v60, %v20637_v23  ;;  %v13233_v27 = vpop.f32.mrf.mxu0  ;;  %v13080_v63 = vsel %vm13078_vm3, %v13077_v11, %v13079_v62  ;;  %vm25490_vm3 = vnez %v24795_v57  ;;  %v14279_v11 = vld [vmem:[%s21246_s27 + $0x29] sm:$0x1]  ;;  %v14281_v60 = vld [vmem:[%s21246_s27 + $0xa] sm:$0x1] }
0x138e   : > { %v13330_v28 = vpop.f32.mrf.mxu1  ;;  %v13082_v13 = vcombine.high %v13080_v63, %v13080_v63  ;;  %v13089_v14 = vrot.slane %v13080_v63, %v21455_v32  ;;  %v14388_v31 = vrot.slane %v14279_v11, 6 }
0x138f   : > { %v13331_v12 = vadd.f32 %v13330_v28, %v13233_v27  ;;  %20654 = vmatmul.mubr.msk.f32.vlgmr.msra.gmra.mxu0 %vm25483_vm7, %v13336_v24  ;;  %v20640_v15 = vpop.f32.mrf.mxu0  ;;  %vm25493_vm7 = vmmov %vm25489_vm0  ;;  %v14284_v24 = vld [vmem:[%s21246_s27 + $0x3a] sm:$0x1]  ;;  %v14291_v28 = vrot.slane %v14283_v9, 6 }
0x1390   : > { %v20648_v18 = vpop.f32.mrf.mxu1  ;;  %20664 = vmatpush3.msk.msra.mxu0 %vm21309_vm8, %v21162_v19  ;;  %20667 = vmatprep.mubr.msk.f32.mxu0 %vm24831_vm15, %v21161_v2  ;;  %v13096_v41 = vrot.slane %v13082_v13, %v21455_v32  ;;  %v13097_v42 = vcombine.high %v13089_v14, %v13089_v14  ;;  %v13105_v43 = vrot.slane %v13089_v14, %v21455_v32 }
0x1391   : > { %20661 = vmatmul.mubr.msk.f32.vlgmr.msra.gmra.mxu1 %vm25484_vm13, %v13331_v12  ;;  %20665 = vmatprep.subr.mxu0 %v21161_v2  ;;  %v13243_v45 = vpop.f32.mrf.mxu0  ;;  %v13346_v35 = vadd.f32 %v20648_v18, %v20640_v15  ;;  %vm25494_vm13 = vmmov %vm25489_vm0  ;;  %v14293_v18 = vrot.slane %v14284_v24, 5 }
0x1392   : > { %20671 = vmatpush3.msk.msra.mxu1 %vm25487_vm9, %v21162_v19  ;;  %v13340_v20 = vpop.f32.mrf.mxu1  ;;  %20666 = vmatpush3.msk.msra.mxu0 %vm25488_vm10, %v21162_v19  ;;  %v13098_v37 = vcombine.high %v13096_v41, %v13096_v41  ;;  %v13112_v3 = vrot.slane %v13096_v41, %v21455_v32  ;;  %v13119_v52 = vrot.slane %v13097_v42, %v21455_v32  ;;  %v14390_v41 = vrot.slane %v14280_v29, 5 }
0x1393   : > { %v13341_v36 = vadd.f32 %v13340_v20, %v13243_v45  ;;  %20672 = vmatprep.subr.mxu1 %v21161_v2  ;;  %20674 = vmatprep.mubr.msk.f32.mxu1 %vm24831_vm15, %v21161_v2  ;;  %v13127_v53 = vcombine.high %v13105_v43, %v13105_v43  ;;  %13139 = vst.msk [vmem:[%s21480_s25 + $0xd] sm:$0x1] %vm25489_vm0, %v13105_v43  ;;  %vm25497_vm0 = vmmov %vm25496_vm1 }
0x1394   : > { %20673 = vmatpush3.msk.msra.mxu1 %vm25490_vm3, %v21162_v19  ;;  %20677 = vmatprep.subr.msk.mxu0 %vm25491_vm14, %v13729_v39  ;;  %v13126_v55 = vrot.slane %v13098_v37, %v21455_v32  ;;  %v13128_v0 = vcombine.high %v13112_v3, %v13112_v3  ;;  %v13129_v56 = vcombine.high %v13119_v52, %v13119_v52  ;;  %vm25498_vm3 = vmmov %vm25492_vm2 }
0x1395   : > { %20685 = vmatprep.subr.msk.mxu1 %vm25492_vm2, %v13826_v40  ;;  %13140 = vst.msk [vmem:[%s21480_s25 + $0x2d] sm:$0x1] %vm25493_vm7, %v13119_v52  ;;  %20668 = vmatmul.mubr.msk.f32.vlgmr.msra.gmra.mxu0 %vm25496_vm1, %v13341_v36  ;;  %vm25499_vm14 = vmmov %vm25492_vm2  ;;  %vm25503_vm7 = vcmask 31744  }
0x1396   : > { %13141 = vst.msk [vmem:[%s21480_s25 + $0x4d] sm:$0x1] %vm25494_vm13, %v13127_v53  ;;  %20675 = vmatmul.mubr.msk.f32.vlgmr.msra.gmra.mxu1 %vm25497_vm0, %v13346_v35  ;;  %20678 = vmatpush3.msk.msra.mxu0 %vm25498_vm3, %v13729_v39  ;;  %v13130_v58 = vcombine.high %v13126_v55, %v13126_v55  ;;  %vm25500_vm2 = vmmov %vm25495_vm4 }
0x1397   : > { %13143 = vst.msk [vmem:[%s21480_s25 + $0x8d] sm:$0x1] %vm25495_vm4, %v13112_v3  ;;  %20686 = vmatpush3.msk.msra.mxu1 %vm25499_vm14, %v13826_v40  ;;  %vm25501_vm10 = vmmov %vm25500_vm2  ;;  %20679 = vmatprep.mubr.msk.f32.mxu0 %vm25503_vm7, %v23540_v48 }
0x1398   : > { %13142 = vst.msk [vmem:[%s21480_s25 + $0x6d] sm:$0x1] %vm25500_vm2, %v13129_v56  ;;  %vm25502_vm9 = vmmov %vm25500_vm2  ;;  %20693 = vmatprep.subr.mxu0 %v21161_v2  ;;  %20700 = vmatprep.subr.mxu1 %v21161_v2 }
0x1399   : > { %13144 = vst.msk [vmem:[%s21480_s25 + $0xad] sm:$0x1] %vm25501_vm10, %v13126_v55  ;;  %vm25504_vm13 = vmmov %vm25503_vm7 }
0x139a   : > { %13145 = vst.msk [vmem:[%s21480_s25 + $0xcd] sm:$0x1] %vm25502_vm9, %v13128_v0  ;;  %20687 = vmatprep.mubr.msk.f32.mxu1 %vm25504_vm13, %v23547_v49  ;;  %vm25505_vm3 = vmmov %vm25500_vm2  ;;  %vm25512_vm2 = vcmask 1041409  }
0x139b   : > { %13146 = vst.msk [vmem:[%s21480_s25 + $0xed] sm:$0x1] %vm25505_vm3, %v13130_v58  ;;  %vm25506_vm4 = vmmov %vm25503_vm7  ;;  %v14290_v12 = vsel %vm25512_vm2, %v14289_v10, %v14281_v60  ;;  %vm25514_vm3 = vcmask 1042434  }
0x139c   : > { %20680 = vmatmul.mubr.msk.f32.vlgmr.msra.gmra.mxu0 %vm25506_vm4, %v23558_v51  ;;  %vm25507_vm1 = vmmov %vm25506_vm4  ;;  %v14292_v45 = vsel %vm25514_vm3, %v14291_v28, %v14290_v12  ;;  %v14842_v28 = vld [vmem:[%s21246_s27 + $0xa] sm:$0x1] }
0x139d   : > { %20688 = vmatmul.mubr.msk.f32.vlgmr.msra.gmra.mxu1 %vm25507_vm1, %v23565_v1  ;;  %vm25508_vm9 = vmmov %vm25507_vm1  ;;  %20694 = vmatpush3.msk.msra.mxu0 %vm21260_vm5, %v21162_v19 }
0x139e   : > { %20682 = vmatprep.mubr.msk.f32.mxu0 %vm25508_vm9, %v23572_v4  ;;  %vm25509_vm10 = vmmov %vm25507_vm1  ;;  %20701 = vmatpush3.msk.msra.mxu1 %vm21339_vm11, %v21162_v19 }
0x139f   : > { %20690 = vmatprep.mubr.msk.f32.mxu1 %vm25509_vm10, %v23579_v5  ;;  %20695 = vmatprep.subr.mxu0 %v21161_v2  ;;  %vm25510_vm0 = vmmov %vm25507_vm1  ;;  %vm25516_vm1 = vcmask 130048   ;;  %vm25518_vm10 = vcmask 1043459  }
0x13a0   : > { %20702 = vmatprep.subr.mxu1 %v21161_v2  ;;  %20683 = vmatmul.mubr.msk.f32.gmra.mxu0 %vm25510_vm0, %v23594_v6  ;;  %vm25511_vm14 = vmmov %vm25510_vm0  ;;  %v14294_v55 = vsel %vm25518_vm10, %v14293_v18, %v14292_v45 }
0x13a1   : > { %20691 = vmatmul.mubr.msk.f32.gmra.mxu1 %vm25511_vm14, %v23601_v7  ;;  %20696 = vmatpush3.msk.msra.mxu0 %vm21266_vm6, %v21162_v19  ;;  %vm25513_vm7 = vmmov %vm25512_vm2  ;;  %vm25520_vm14 = vnez %v24793_v54  ;;  %vm25521_vm2 = vnez %v24787_v30 }
0x13a2   : > { %20703 = vmatpush3.msk.msra.mxu1 %vm21347_vm12, %v21162_v19  ;;  %20697 = vmatprep.mubr.msk.f32.mxu0 %vm24831_vm15, %v21161_v2  ;;  %v14387_v13 = vsel %vm25513_vm7, %v14386_v21, %v14277_v61  ;;  %vm25515_vm4 = vmmov %vm25514_vm3  ;;  %vm25522_vm7 = vcmask 253952   ;;  %vm25524_vm3 = vcmask 1043456   ;;  %v14844_v61 = vld [vmem:[%s21246_s27 + $0x2a] sm:$0x1] }
0x13a3   : > { %20704 = vmatprep.mubr.msk.f32.mxu1 %vm24831_vm15, %v21161_v2  ;;  %20707 = vmatprep.subr.mxu0 %v21161_v2  ;;  %v14389_v20 = vsel %vm25515_vm4, %v14388_v31, %v14387_v13  ;;  %vm25517_vm9 = vmmov %vm25516_vm1  ;;  %v14849_v31 = vld [vmem:[%s21246_s27 + $0x3b] sm:$0x1] }
0x13a4   : > { %20714 = vmatprep.subr.mxu1 %v21161_v2  ;;  %vm25519_vm0 = vmmov %vm25518_vm10 }
0x13a5   : > { %v14391_v0 = vsel %vm25519_vm0, %v14390_v41, %v14389_v20  ;;  %vm25525_vm4 = vmmov %vm25524_vm3  ;;  %vm25529_vm0 = vcmask 130048  }
0x144f   : > { %v13418_v59 = vpop.f32.mrf.mxu0 }
0x1451   : > { %v20655_v33 = vpop.f32.mrf.mxu0  ;;  %v13491_v34 = vpop.f32.mrf.mxu1 }
0x1452   : > { %v13492_v8 = vadd.f32 %v13491_v34, %v13418_v59 }
0x1453   : > { %v20662_v47 = vpop.f32.mrf.mxu1 }
0x1455   : > { %v13564_v22 = vpop.f32.mrf.mxu0 }
0x1456   : > { %v13638_v23 = vpop.f32.mrf.mxu1  ;;  %v13568_v62 = vadd.f32 %v13564_v22, %v13492_v8 }
0x1457   : > { %v20669_v26 = vpop.f32.mrf.mxu0 }
0x1458   : > { %v20676_v27 = vpop.f32.mrf.mxu1  ;;  %v13642_v63 = vadd.f32 %v13638_v23, %v13568_v62 }
0x1459   : > { %v14846_v27 = vld [vmem:[%s21246_s27 + $0xb] sm:$0x1] }
0x145a   : > { %vm13643_vm13 = vcmp.ge.f32.partialorder %v13642_v63, 0.0  ;;  %v13644_v39 = vmul.f32 0.2, %v13642_v63 }
0x145c   : > { %v20681_v14 = vpop.f32.mrf.mxu0  ;;  %v13645_v35 = vsel %vm13643_vm13, %v13642_v63, %v13644_v39  ;;  %vm25523_vm13 = vnez %v24795_v57 }
0x145d   : > { %v20689_v15 = vpop.f32.mrf.mxu1  ;;  %v13647_v37 = vcombine.high %v13645_v35, %v13645_v35  ;;  %v13654_v3 = vrot.slane %v13645_v35, %v21455_v32 }
0x145e   : > { %v13901_v40 = vadd.f32 %v20689_v15, %v20681_v14  ;;  %v13798_v42 = vpop.f32.mrf.mxu0  ;;  %v14845_v14 = vld [vmem:[%s21246_s27 + $0x3a] sm:$0x1]  ;;  %v14953_v15 = vrot.slane %v14844_v61, 6  ;;  %v24112_v61 = vld [vmem:[%s24758_s1 + $0x70] sm:$0xff] }
0x145f   : > { %v13895_v43 = vpop.f32.mrf.mxu1  ;;  %v13661_v56 = vrot.slane %v13647_v37, %v21455_v32  ;;  %v13662_v58 = vcombine.high %v13654_v3, %v13654_v3  ;;  %v13670_v59 = vrot.slane %v13654_v3, %v21455_v32  ;;  %v14955_v35 = vrot.slane %v14845_v14, 5  ;;  %v15413_v14 = vld [vmem:[%s21246_s27 + $0x2c] sm:$0x1] }
0x1460   : > { %v13896_v36 = vadd.f32 %v13895_v43, %v13798_v42  ;;  %20698 = vmatmul.mubr.msk.f32.vlgmr.msra.gmra.mxu0 %vm25516_vm1, %v13901_v40  ;;  %v20684_v52 = vpop.f32.mrf.mxu0  ;;  %vm25526_vm1 = vmmov %vm25522_vm7  ;;  %v14858_v43 = vrot.slane %v14849_v31, 5  ;;  %v15412_v31 = vld [vmem:[%s21246_s27 + $0x1c] sm:$0x1] }
0x1461   : > { %v20692_v53 = vpop.f32.mrf.mxu1  ;;  %20708 = vmatpush3.msk.msra.mxu0 %vm21309_vm8, %v21162_v19  ;;  %20711 = vmatprep.mubr.msk.f32.mxu0 %vm24831_vm15, %v21161_v2  ;;  %v13663_v47 = vcombine.high %v13661_v56, %v13661_v56  ;;  %v13677_v8 = vrot.slane %v13661_v56, %v21455_v32  ;;  %v13684_v9 = vrot.slane %v13662_v58, %v21455_v32  ;;  %vm25528_vm10 = vmmov %vm25526_vm1 }
0x1462   : > { %20705 = vmatmul.mubr.msk.f32.vlgmr.msra.gmra.mxu1 %vm25517_vm9, %v13896_v36  ;;  %20709 = vmatprep.subr.mxu0 %v21161_v2  ;;  %v13808_v33 = vpop.f32.mrf.mxu0  ;;  %v13911_v38 = vadd.f32 %v20692_v53, %v20684_v52  ;;  %v13692_v10 = vcombine.high %v13670_v59, %v13670_v59  ;;  %13704 = vst.msk [vmem:[%s21480_s25 + $0xf] sm:$0x1] %vm25522_vm7, %v13670_v59  ;;  %vm25527_vm9 = vmmov %vm25526_vm1 }
0x1463   : > { %20715 = vmatpush3.msk.msra.mxu1 %vm25520_vm14, %v21162_v19  ;;  %v13905_v34 = vpop.f32.mrf.mxu1  ;;  %20710 = vmatpush3.msk.msra.mxu0 %vm25521_vm2, %v21162_v19  ;;  %v13691_v11 = vrot.slane %v13663_v47, %v21455_v32  ;;  %v13693_v21 = vcombine.high %v13677_v8, %v13677_v8  ;;  %v13694_v22 = vcombine.high %v13684_v9, %v13684_v9  ;;  %vm25530_vm7 = vmmov %vm25529_vm0 }
0x1464   : > { %v13906_v46 = vadd.f32 %v13905_v34, %v13808_v33  ;;  %20716 = vmatprep.subr.mxu1 %v21161_v2  ;;  %20718 = vmatprep.mubr.msk.f32.mxu1 %vm24831_vm15, %v21161_v2  ;;  %13705 = vst.msk [vmem:[%s21480_s25 + $0x2f] sm:$0x1] %vm25526_vm1, %v13684_v9  ;;  %vm25533_vm2 = vmmov %vm25526_vm1 }
0x1465   : > { %20717 = vmatpush3.msk.msra.mxu1 %vm25523_vm13, %v21162_v19  ;;  %20721 = vmatprep.subr.msk.mxu0 %vm25524_vm3, %v14294_v55  ;;  %13706 = vst.msk [vmem:[%s21480_s25 + $0x4f] sm:$0x1] %vm25527_vm9, %v13692_v10  ;;  %vm25531_vm13 = vmmov %vm25524_vm3  ;;  %v13695_v23 = vcombine.high %v13691_v11, %v13691_v11 }
0x1466   : > { %20729 = vmatprep.subr.msk.mxu1 %vm25525_vm4, %v14391_v0  ;;  %13708 = vst.msk [vmem:[%s21480_s25 + $0x8f] sm:$0x1] %vm25528_vm10, %v13677_v8  ;;  %20712 = vmatmul.mubr.msk.f32.vlgmr.msra.gmra.mxu0 %vm25529_vm0, %v13906_v46  ;;  %vm25532_vm4 = vmmov %vm25526_vm1 }
0x1467   : > { %20719 = vmatmul.mubr.msk.f32.vlgmr.msra.gmra.mxu1 %vm25530_vm7, %v13911_v38  ;;  %20722 = vmatpush3.msk.msra.mxu0 %vm25531_vm13, %v14294_v55  ;;  %13707 = vst.msk [vmem:[%s21480_s25 + $0x6f] sm:$0x1] %vm25532_vm4, %v13694_v22  ;;  %vm25534_vm14 = vmmov %vm25526_vm1  ;;  %vm25535_vm1 = vcmask 31744   ;;  %vm25544_vm4 = vcmask 1041409  }
0x1468   : > { %20730 = vmatpush3.msk.msra.mxu1 %vm25524_vm3, %v14391_v0  ;;  %13709 = vst.msk [vmem:[%s21480_s25 + $0xaf] sm:$0x1] %vm25533_vm2, %v13691_v11  ;;  %20723 = vmatprep.mubr.msk.f32.mxu0 %vm25535_vm1, %v23540_v48  ;;  %vm25536_vm9 = vmmov %vm25535_vm1 }
0x1469   : > { %13710 = vst.msk [vmem:[%s21480_s25 + $0xcf] sm:$0x1] %vm25534_vm14, %v13693_v21  ;;  %20731 = vmatprep.mubr.msk.f32.mxu1 %vm25536_vm9, %v23547_v49  ;;  %20737 = vmatprep.subr.mxu0 %v21161_v2  ;;  %vm25537_vm13 = vmmov %vm25533_vm2 }
0x146a   : > { %20744 = vmatprep.subr.mxu1 %v21161_v2  ;;  %13711 = vst.msk [vmem:[%s21480_s25 + $0xef] sm:$0x1] %vm25537_vm13, %v13695_v23  ;;  %vm25538_vm10 = vmmov %vm25535_vm1  ;;  %vm25546_vm13 = vcmask 1042434  }
0x146b   : > { %20724 = vmatmul.mubr.msk.f32.vlgmr.msra.gmra.mxu0 %vm25538_vm10, %v23558_v51  ;;  %vm25539_vm0 = vmmov %vm25535_vm1 }
0x146c   : > { %20732 = vmatmul.mubr.msk.f32.vlgmr.msra.gmra.mxu1 %vm25539_vm0, %v23565_v1  ;;  %vm25540_vm14 = vmmov %vm25539_vm0  ;;  %20738 = vmatpush3.msk.msra.mxu0 %vm21260_vm5, %v21162_v19  ;;  %v14847_v1 = vld [vmem:[%s21246_s27 + $0x1b] sm:$0x1] }
0x146d   : > { %20726 = vmatprep.mubr.msk.f32.mxu0 %vm25540_vm14, %v23572_v4  ;;  %vm25541_vm2 = vmmov %vm25539_vm0  ;;  %20745 = vmatpush3.msk.msra.mxu1 %vm21339_vm11, %v21162_v19  ;;  %v14843_v4 = vld [vmem:[%s21246_s27 + $0x1a] sm:$0x1]  ;;  %v14854_v60 = vrot.slane %v14847_v1, 7 }
0x146e   : > { %20734 = vmatprep.mubr.msk.f32.mxu1 %vm25541_vm2, %v23579_v5  ;;  %20739 = vmatprep.subr.mxu0 %v21161_v2  ;;  %vm25542_vm7 = vmmov %vm25539_vm0  ;;  %v14951_v62 = vrot.slane %v14843_v4, 7  ;;  %vm25550_vm2 = vcmask 1043459  }
0x146f   : > { %20746 = vmatprep.subr.mxu1 %v21161_v2  ;;  %20727 = vmatmul.mubr.msk.f32.gmra.mxu0 %vm25542_vm7, %v23594_v6  ;;  %vm25543_vm3 = vmmov %vm25539_vm0  ;;  %v14855_v39 = vsel %vm25544_vm4, %v14854_v60, %v14846_v27  ;;  %vm25548_vm0 = vcmask 130048   ;;  %v24105_v60 = vld [vmem:[%s24758_s1 + $0x48] sm:$0xff] }
0x1470   : > { %20735 = vmatmul.mubr.msk.f32.gmra.mxu1 %vm25543_vm3, %v23601_v7  ;;  %20740 = vmatpush3.msk.msra.mxu0 %vm21266_vm6, %v21162_v19  ;;  %v14848_v7 = vld [vmem:[%s21246_s27 + $0x2b] sm:$0x1]  ;;  %vm25545_vm1 = vmmov %vm25544_vm4  ;;  %vm25552_vm3 = vnez %v24793_v54  ;;  %vm25553_vm4 = vnez %v24787_v30 }
0x1471   : > { %20747 = vmatpush3.msk.msra.mxu1 %vm21347_vm12, %v21162_v19  ;;  %20741 = vmatprep.mubr.msk.f32.mxu0 %vm24831_vm15, %v21161_v2  ;;  %v14856_v13 = vrot.slane %v14848_v7, 6  ;;  %v14952_v40 = vsel %vm25545_vm1, %v14951_v62, %v14842_v28  ;;  %vm25547_vm10 = vmmov %vm25546_vm13  ;;  %vm25554_vm1 = vcmask 253952   ;;  %v24098_v7 = vld [vmem:[%s24758_s1 + $0x68] sm:$0xff]  ;;  %v24119_v62 = vld [vmem:[%s24758_s1 + $0x50] sm:$0xff] }
0x1472   : > { %20748 = vmatprep.mubr.msk.f32.mxu1 %vm24831_vm15, %v21161_v2  ;;  %20751 = vmatprep.subr.mxu0 %v21161_v2  ;;  %v14954_v52 = vsel %vm25547_vm10, %v14953_v15, %v14952_v40  ;;  %vm25549_vm14 = vmmov %vm25548_vm0  ;;  %v15419_v15 = vrot.slane %v15412_v31, 7 }
0x1473   : > { %20758 = vmatprep.subr.mxu1 %v21161_v2  ;;  %v14857_v3 = vsel %vm25546_vm13, %v14856_v13, %v14855_v39  ;;  %vm25551_vm7 = vmmov %vm25550_vm2  ;;  %vm25556_vm13 = vcmask 1043456  }
0x1474   : > { %v14859_v33 = vsel %vm25550_vm2, %v14858_v43, %v14857_v3  ;;  %v14956_v34 = vsel %vm25551_vm7, %v14955_v35, %v14954_v52  ;;  %vm25557_vm10 = vmmov %vm25556_vm13  ;;  %vm25561_vm7 = vcmask 130048   ;;  %v15407_v43 = vld [vmem:[%s21246_s27 + $0xb] sm:$0x1]  ;;  %v15410_v3 = vld [vmem:[%s21246_s27 + $0x3b] sm:$0x1] }
0x1520   : > { %v13983_v48 = vpop.f32.mrf.mxu0 }
0x1522   : > { %v20699_v49 = vpop.f32.mrf.mxu0  ;;  %v14056_v51 = vpop.f32.mrf.mxu1 }
0x1523   : > { %v14057_v6 = vadd.f32 %v14056_v51, %v13983_v48 }
0x1524   : > { %v20706_v5 = vpop.f32.mrf.mxu1 }
0x1525   : > { %v24080_v5 = vld [vmem:[%s24758_s1 + $0x60] sm:$0xff] }
0x1526   : > { %v14129_v24 = vpop.f32.mrf.mxu0 }
0x1527   : > { %v14203_v26 = vpop.f32.mrf.mxu1  ;;  %v14133_v29 = vadd.f32 %v14129_v24, %v14057_v6  ;;  %v24087_v6 = vld [vmem:[%s24758_s1 + $0x40] sm:$0xff]  ;;  %v24134_v24 = vld [vmem:[%s24758_s1 + $0x78] sm:$0xff] }
0x1528   : > { %v20713_v63 = vpop.f32.mrf.mxu0 }
0x1529   : > { %v20720_v12 = vpop.f32.mrf.mxu1  ;;  %v14207_v18 = vadd.f32 %v14203_v26, %v14133_v29  ;;  %v24141_v26 = vld [vmem:[%s24758_s1 + $0x58] sm:$0xff] }
0x152a   : > { %v15408_v63 = vld [vmem:[%s21246_s27 + $0x1b] sm:$0x1] }
0x152b   : > { %v20725_v41 = vpop.f32.mrf.mxu0  ;;  %vm14208_vm9 = vcmp.ge.f32.partialorder %v14207_v18, 0.0  ;;  %v14209_v45 = vmul.f32 0.2, %v14207_v18  ;;  %v15516_v39 = vrot.slane %v15408_v63, 7 }
0x152c   : > { %v20733_v42 = vpop.f32.mrf.mxu1 }
0x152d   : > { %v14466_v20 = vadd.f32 %v20733_v42, %v20725_v41  ;;  %v14363_v36 = vpop.f32.mrf.mxu0  ;;  %v14210_v53 = vsel %vm14208_vm9, %v14207_v18, %v14209_v45  ;;  %vm25555_vm9 = vnez %v24795_v57  ;;  %v15409_v18 = vld [vmem:[%s21246_s27 + $0x2b] sm:$0x1]  ;;  %v15411_v42 = vld [vmem:[%s21246_s27 + $0xc] sm:$0x1] }
0x152e   : > { %v14460_v37 = vpop.f32.mrf.mxu1  ;;  %v14212_v0 = vcombine.high %v14210_v53, %v14210_v53  ;;  %v14219_v56 = vrot.slane %v14210_v53, %v21455_v32  ;;  %v15518_v52 = vrot.slane %v15409_v18, 6 }
0x152f   : > { %v14461_v55 = vadd.f32 %v14460_v37, %v14363_v36  ;;  %20742 = vmatmul.mubr.msk.f32.vlgmr.msra.gmra.mxu0 %vm25548_vm0, %v14466_v20  ;;  %v20728_v58 = vpop.f32.mrf.mxu0  ;;  %vm25558_vm0 = vmmov %vm25554_vm1  ;;  %v15414_v20 = vld [vmem:[%s21246_s27 + $0x3c] sm:$0x1]  ;;  %v15421_v37 = vrot.slane %v15413_v14, 6 }
0x1530   : > { %v20736_v59 = vpop.f32.mrf.mxu1  ;;  %20752 = vmatpush3.msk.msra.mxu0 %vm21309_vm8, %v21162_v19  ;;  %20755 = vmatprep.mubr.msk.f32.mxu0 %vm24831_vm15, %v21161_v2  ;;  %v14226_v38 = vrot.slane %v14212_v0, %v21455_v32  ;;  %v14227_v46 = vcombine.high %v14219_v56, %v14219_v56  ;;  %v14235_v47 = vrot.slane %v14219_v56, %v21455_v32  ;;  %vm25560_vm2 = vmmov %vm25558_vm0 }
0x1531   : > { %20749 = vmatmul.mubr.msk.f32.vlgmr.msra.gmra.mxu1 %vm25549_vm14, %v14461_v55  ;;  %20753 = vmatprep.subr.mxu0 %v21161_v2  ;;  %v14373_v8 = vpop.f32.mrf.mxu0  ;;  %v14476_v10 = vadd.f32 %v20736_v59, %v20728_v58  ;;  %vm25559_vm14 = vmmov %vm25558_vm0  ;;  %v15423_v59 = vrot.slane %v15414_v20, 5  ;;  %v15977_v20 = vld [vmem:[%s21246_s27 + $0x1d] sm:$0x1] }
0x1532   : > { %20759 = vmatpush3.msk.msra.mxu1 %vm25552_vm3, %v21162_v19  ;;  %v14470_v9 = vpop.f32.mrf.mxu1  ;;  %20754 = vmatpush3.msk.msra.mxu0 %vm25553_vm4, %v21162_v19  ;;  %v14228_v21 = vcombine.high %v14226_v38, %v14226_v38  ;;  %v14242_v22 = vrot.slane %v14226_v38, %v21455_v32  ;;  %v14249_v23 = vrot.slane %v14227_v46, %v21455_v32  ;;  %vm25566_vm4 = vmmov %vm25558_vm0  ;;  %v15520_v38 = vrot.slane %v15410_v3, 5  ;;  %v15978_v3 = vld [vmem:[%s21246_s27 + $0x2d] sm:$0x1] }
0x1533   : > { %v14471_v11 = vadd.f32 %v14470_v9, %v14373_v8  ;;  %20760 = vmatprep.subr.mxu1 %v21161_v2  ;;  %20762 = vmatprep.mubr.msk.f32.mxu1 %vm24831_vm15, %v21161_v2  ;;  %v14257_v48 = vcombine.high %v14235_v47, %v14235_v47  ;;  %14269 = vst.msk [vmem:[%s21480_s25 + $0x11] sm:$0x1] %vm25554_vm1, %v14235_v47  ;;  %vm25562_vm1 = vmmov %vm25561_vm7 }
0x1534   : > { %20761 = vmatpush3.msk.msra.mxu1 %vm25555_vm9, %v21162_v19  ;;  %20765 = vmatprep.subr.msk.mxu0 %vm25556_vm13, %v14859_v33  ;;  %v14256_v49 = vrot.slane %v14228_v21, %v21455_v32  ;;  %v14258_v51 = vcombine.high %v14242_v22, %v14242_v22  ;;  %v14259_v1 = vcombine.high %v14249_v23, %v14249_v23  ;;  %vm25563_vm9 = vmmov %vm25557_vm10 }
0x1535   : > { %20773 = vmatprep.subr.msk.mxu1 %vm25557_vm10, %v14956_v34  ;;  %14270 = vst.msk [vmem:[%s21480_s25 + $0x31] sm:$0x1] %vm25558_vm0, %v14249_v23  ;;  %20756 = vmatmul.mubr.msk.f32.vlgmr.msra.gmra.mxu0 %vm25561_vm7, %v14471_v11  ;;  %vm25564_vm13 = vmmov %vm25563_vm9 }
0x1536   : > { %14271 = vst.msk [vmem:[%s21480_s25 + $0x51] sm:$0x1] %vm25559_vm14, %v14257_v48  ;;  %20763 = vmatmul.mubr.msk.f32.vlgmr.msra.gmra.mxu1 %vm25562_vm1, %v14476_v10  ;;  %20766 = vmatpush3.msk.msra.mxu0 %vm25563_vm9, %v14859_v33  ;;  %v14260_v4 = vcombine.high %v14256_v49, %v14256_v49  ;;  %vm25565_vm10 = vmmov %vm25558_vm0 }
0x1537   : > { %14273 = vst.msk [vmem:[%s21480_s25 + $0x91] sm:$0x1] %vm25560_vm2, %v14242_v22  ;;  %20774 = vmatpush3.msk.msra.mxu1 %vm25564_vm13, %v14956_v34  ;;  %vm25567_vm3 = vmmov %vm25558_vm0  ;;  %vm25568_vm0 = vcmask 31744   ;;  %20781 = vmatprep.subr.mxu0 %v21161_v2 }
0x1538   : > { %14272 = vst.msk [vmem:[%s21480_s25 + $0x71] sm:$0x1] %vm25565_vm10, %v14259_v1  ;;  %20767 = vmatprep.mubr.msk.f32.mxu0 %vm25568_vm0, %v24080_v5  ;;  %vm25569_vm9 = vmmov %vm25568_vm0  ;;  %20788 = vmatprep.subr.mxu1 %v21161_v2  ;;  %vm25577_vm10 = vcmask 1041409  }
0x1539   : > { %14274 = vst.msk [vmem:[%s21480_s25 + $0xb1] sm:$0x1] %vm25566_vm4, %v14256_v49  ;;  %20775 = vmatprep.mubr.msk.f32.mxu1 %vm25569_vm9, %v24087_v6  ;;  %vm25571_vm4 = vmmov %vm25568_vm0  ;;  %v15420_v55 = vsel %vm25577_vm10, %v15419_v15, %v15411_v42 }
0x153a   : > { %14275 = vst.msk [vmem:[%s21480_s25 + $0xd1] sm:$0x1] %vm25567_vm3, %v14258_v51  ;;  %vm25570_vm3 = vmmov %vm25560_vm2  ;;  %20768 = vmatmul.mubr.msk.f32.vlgmr.msra.gmra.mxu0 %vm25571_vm4, %v24098_v7 }
0x153b   : > { %14276 = vst.msk [vmem:[%s21480_s25 + $0xf1] sm:$0x1] %vm25570_vm3, %v14260_v4  ;;  %vm25572_vm14 = vmmov %vm25568_vm0  ;;  %20782 = vmatpush3.msk.msra.mxu0 %vm21260_vm5, %v21162_v19  ;;  %vm25579_vm3 = vcmask 1042434  }
0x153c   : > { %20776 = vmatmul.mubr.msk.f32.vlgmr.msra.gmra.mxu1 %vm25572_vm14, %v24105_v60  ;;  %vm25573_vm2 = vmmov %vm25568_vm0  ;;  %20783 = vmatprep.subr.mxu0 %v21161_v2  ;;  %v15422_v8 = vsel %vm25579_vm3, %v15421_v37, %v15420_v55  ;;  %vm25581_vm14 = vcmask 130048  }
0x153d   : > { %20770 = vmatprep.mubr.msk.f32.mxu0 %vm25573_vm2, %v24112_v61  ;;  %vm25574_vm7 = vmmov %vm25568_vm0  ;;  %20789 = vmatpush3.msk.msra.mxu1 %vm21339_vm11, %v21162_v19 }
0x153e   : > { %20778 = vmatprep.mubr.msk.f32.mxu1 %vm25574_vm7, %v24119_v62  ;;  %20790 = vmatprep.subr.mxu1 %v21161_v2  ;;  %vm25575_vm1 = vmmov %vm25568_vm0  ;;  %vm25583_vm7 = vcmask 1043459  }
0x153f   : > { %20771 = vmatmul.mubr.msk.f32.gmra.mxu0 %vm25575_vm1, %v24134_v24  ;;  %vm25576_vm13 = vmmov %vm25568_vm0  ;;  %20791 = vmatpush3.msk.msra.mxu1 %vm21347_vm12, %v21162_v19  ;;  %v15424_v49 = vsel %vm25583_vm7, %v15423_v59, %v15422_v8  ;;  %v15972_v59 = vld [vmem:[%s21246_s27 + $0xc] sm:$0x1]  ;;  %v15975_v8 = vld [vmem:[%s21246_s27 + $0x3c] sm:$0x1] }
0x1540   : > { %20779 = vmatmul.mubr.msk.f32.gmra.mxu1 %vm25576_vm13, %v24141_v26  ;;  %20784 = vmatpush3.msk.msra.mxu0 %vm21266_vm6, %v21162_v19  ;;  %vm25578_vm0 = vmmov %vm25577_vm10  ;;  %vm25585_vm13 = vnez %v24793_v54  ;;  %vm25586_vm10 = vnez %v24787_v30 }
0x1541   : > { %20785 = vmatprep.mubr.msk.f32.mxu0 %vm24831_vm15, %v21161_v2  ;;  %20792 = vmatprep.mubr.msk.f32.mxu1 %vm24831_vm15, %v21161_v2  ;;  %v15517_v0 = vsel %vm25578_vm0, %v15516_v39, %v15407_v43  ;;  %vm25580_vm4 = vmmov %vm25579_vm3  ;;  %vm25587_vm0 = vcmask 253952   ;;  %vm25589_vm3 = vcmask 1043456  }
0x1542   : > { %20795 = vmatprep.subr.mxu0 %v21161_v2  ;;  %20802 = vmatprep.subr.mxu1 %v21161_v2  ;;  %v15519_v9 = vsel %vm25580_vm4, %v15518_v52, %v15517_v0  ;;  %vm25582_vm2 = vmmov %vm25581_vm14  ;;  %v15984_v52 = vrot.slane %v15977_v20, 7 }
0x1543   : > { %vm25584_vm1 = vmmov %vm25583_vm7 }
0x1544   : > { %v15521_v51 = vsel %vm25584_vm1, %v15520_v38, %v15519_v9  ;;  %vm25590_vm4 = vmmov %vm25589_vm3  ;;  %vm25594_vm1 = vcmask 130048  }
0x1545   : > { %vm25593_vm7 = vmmov %vm25587_vm0 }
0x15ef   : > { %v14548_v27 = vpop.f32.mrf.mxu0 }
0x15f1   : > { %v20743_v28 = vpop.f32.mrf.mxu0  ;;  %v14621_v29 = vpop.f32.mrf.mxu1 }
0x15f2   : > { %v14622_v13 = vadd.f32 %v14621_v29, %v14548_v27 }
0x15f3   : > { %v20750_v12 = vpop.f32.mrf.mxu1 }
0x15f5   : > { %v14694_v40 = vpop.f32.mrf.mxu0 }
0x15f6   : > { %v14768_v41 = vpop.f32.mrf.mxu1  ;;  %v14698_v45 = vadd.f32 %v14694_v40, %v14622_v13 }
0x15f7   : > { %v20757_v35 = vpop.f32.mrf.mxu0 }
0x15f8   : > { %v20764_v36 = vpop.f32.mrf.mxu1  ;;  %v14772_v53 = vadd.f32 %v14768_v41, %v14698_v45  ;;  %v15973_v35 = vld [vmem:[%s21246_s27 + $0x1c] sm:$0x1] }
0x15f9   : > { %v16081_v55 = vrot.slane %v15973_v35, 7 }
0x15fa   : > { %v20769_v56 = vpop.f32.mrf.mxu0  ;;  %vm14773_vm9 = vcmp.ge.f32.partialorder %v14772_v53, 0.0  ;;  %v14774_v33 = vmul.f32 0.2, %v14772_v53 }
0x15fc   : > { %v20777_v58 = vpop.f32.mrf.mxu1  ;;  %v14928_v46 = vpop.f32.mrf.mxu0  ;;  %v14775_v10 = vsel %vm14773_vm9, %v14772_v53, %v14774_v33  ;;  %vm25588_vm9 = vnez %v24795_v57  ;;  %v15974_v53 = vld [vmem:[%s21246_s27 + $0x2c] sm:$0x1] }
0x15fd   : > { %v15031_v34 = vadd.f32 %v20777_v58, %v20769_v56  ;;  %v14777_v21 = vcombine.high %v14775_v10, %v14775_v10  ;;  %v14784_v22 = vrot.slane %v14775_v10, %v21455_v32  ;;  %v15976_v58 = vld [vmem:[%s21246_s27 + $0xd] sm:$0x1]  ;;  %v16083_v9 = vrot.slane %v15974_v53, 6 }
0x15fe   : > { %v15025_v47 = vpop.f32.mrf.mxu1 }
0x15ff   : > { %v15026_v11 = vadd.f32 %v15025_v47, %v14928_v46  ;;  %20786 = vmatmul.mubr.msk.f32.vlgmr.msra.gmra.mxu0 %vm25581_vm14, %v15031_v34  ;;  %v20772_v23 = vpop.f32.mrf.mxu0  ;;  %v14791_v1 = vrot.slane %v14777_v21, %v21455_v32  ;;  %v14792_v4 = vcombine.high %v14784_v22, %v14784_v22  ;;  %v14800_v27 = vrot.slane %v14784_v22, %v21455_v32  ;;  %vm25591_vm14 = vmmov %vm25587_vm0  ;;  %v15979_v34 = vld [vmem:[%s21246_s27 + $0x3d] sm:$0x1] }
0x1600   : > { %v20780_v48 = vpop.f32.mrf.mxu1  ;;  %20796 = vmatpush3.msk.msra.mxu0 %vm21309_vm8, %v21162_v19  ;;  %20799 = vmatprep.mubr.msk.f32.mxu0 %vm24831_vm15, %v21161_v2  ;;  %v15986_v47 = vrot.slane %v15978_v3, 6 }
0x1601   : > { %20793 = vmatmul.mubr.msk.f32.vlgmr.msra.gmra.mxu1 %vm25582_vm2, %v15026_v11  ;;  %20797 = vmatprep.subr.mxu0 %v21161_v2  ;;  %v14938_v28 = vpop.f32.mrf.mxu0  ;;  %v15041_v31 = vadd.f32 %v20780_v48, %v20772_v23  ;;  %v14793_v12 = vcombine.high %v14791_v1, %v14791_v1  ;;  %v14807_v13 = vrot.slane %v14791_v1, %v21455_v32  ;;  %vm25592_vm2 = vmmov %vm25587_vm0  ;;  %v15988_v48 = vrot.slane %v15979_v34, 5  ;;  %v16542_v34 = vld [vmem:[%s21246_s27 + $0x1e] sm:$0x1] }
0x1602   : > { %20803 = vmatpush3.msk.msra.mxu1 %vm25585_vm13, %v21162_v19  ;;  %v15035_v29 = vpop.f32.mrf.mxu1  ;;  %20798 = vmatpush3.msk.msra.mxu0 %vm25586_vm10, %v21162_v19  ;;  %v14814_v14 = vrot.slane %v14792_v4, %v21455_v32  ;;  %v14822_v15 = vcombine.high %v14800_v27, %v14800_v27  ;;  %14834 = vst.msk [vmem:[%s21480_s25 + $0x13] sm:$0x1] %vm25587_vm0, %v14800_v27  ;;  %vm25595_vm0 = vmmov %vm25594_vm1  ;;  %v16085_v1 = vrot.slane %v15975_v8, 5  ;;  %v16543_v8 = vld [vmem:[%s21246_s27 + $0x2e] sm:$0x1] }
0x1603   : > { %v15036_v63 = vadd.f32 %v15035_v29, %v14938_v28  ;;  %20804 = vmatprep.subr.mxu1 %v21161_v2  ;;  %20806 = vmatprep.mubr.msk.f32.mxu1 %vm24831_vm15, %v21161_v2  ;;  %v14821_v18 = vrot.slane %v14793_v12, %v21455_v32  ;;  %v14823_v39 = vcombine.high %v14807_v13, %v14807_v13  ;;  %vm25598_vm10 = vmmov %vm25592_vm2 }
0x1604   : > { %20805 = vmatpush3.msk.msra.mxu1 %vm25588_vm9, %v21162_v19  ;;  %20809 = vmatprep.subr.msk.mxu0 %vm25589_vm3, %v15424_v49  ;;  %v14824_v40 = vcombine.high %v14814_v14, %v14814_v14  ;;  %14835 = vst.msk [vmem:[%s21480_s25 + $0x33] sm:$0x1] %vm25591_vm14, %v14814_v14  ;;  %vm25596_vm9 = vmmov %vm25589_vm3  ;;  %vm25600_vm14 = vcmask 31744  }
0x1605   : > { %20817 = vmatprep.subr.msk.mxu1 %vm25590_vm4, %v15521_v51  ;;  %14836 = vst.msk [vmem:[%s21480_s25 + $0x53] sm:$0x1] %vm25592_vm2, %v14822_v15  ;;  %20800 = vmatmul.mubr.msk.f32.vlgmr.msra.gmra.mxu0 %vm25594_vm1, %v15036_v63  ;;  %v14825_v41 = vcombine.high %v14821_v18, %v14821_v18  ;;  %vm25597_vm4 = vmmov %vm25592_vm2 }
0x1606   : > { %14838 = vst.msk [vmem:[%s21480_s25 + $0x93] sm:$0x1] %vm25593_vm7, %v14807_v13  ;;  %20807 = vmatmul.mubr.msk.f32.vlgmr.msra.gmra.mxu1 %vm25595_vm0, %v15041_v31  ;;  %20810 = vmatpush3.msk.msra.mxu0 %vm25596_vm9, %v15424_v49  ;;  %vm25599_vm13 = vmmov %vm25592_vm2 }
0x1607   : > { %20818 = vmatpush3.msk.msra.mxu1 %vm25589_vm3, %v15521_v51  ;;  %14837 = vst.msk [vmem:[%s21480_s25 + $0x73] sm:$0x1] %vm25597_vm4, %v14824_v40  ;;  %20811 = vmatprep.mubr.msk.f32.mxu0 %vm25600_vm14, %v24080_v5  ;;  %vm25601_vm2 = vmmov %vm25600_vm14 }
0x1608   : > { %14839 = vst.msk [vmem:[%s21480_s25 + $0xb3] sm:$0x1] %vm25598_vm10, %v14821_v18  ;;  %20819 = vmatprep.mubr.msk.f32.mxu1 %vm25601_vm2, %v24087_v6  ;;  %20825 = vmatprep.subr.mxu0 %v21161_v2  ;;  %vm25602_vm9 = vmmov %vm25597_vm4  ;;  %vm25609_vm4 = vcmask 1041409  }
0x1609   : > { %14840 = vst.msk [vmem:[%s21480_s25 + $0xd3] sm:$0x1] %vm25599_vm13, %v14823_v39  ;;  %20832 = vmatprep.subr.mxu1 %v21161_v2  ;;  %vm25603_vm7 = vmmov %vm25601_vm2  ;;  %v15985_v11 = vsel %vm25609_vm4, %v15984_v52, %v15976_v58 }
0x160a   : > { %14841 = vst.msk [vmem:[%s21480_s25 + $0xf3] sm:$0x1] %vm25602_vm9, %v14825_v41  ;;  %20812 = vmatmul.mubr.msk.f32.vlgmr.msra.gmra.mxu0 %vm25603_vm7, %v24098_v7  ;;  %vm25604_vm1 = vmmov %vm25601_vm2  ;;  %vm25611_vm9 = vcmask 1042434  }
0x160b   : > { %20820 = vmatmul.mubr.msk.f32.vlgmr.msra.gmra.mxu1 %vm25604_vm1, %v24105_v60  ;;  %vm25605_vm13 = vmmov %vm25604_vm1  ;;  %20826 = vmatpush3.msk.msra.mxu0 %vm21260_vm5, %v21162_v19  ;;  %v15987_v28 = vsel %vm25611_vm9, %v15986_v47, %v15985_v11 }
0x160c   : > { %20814 = vmatprep.mubr.msk.f32.mxu0 %vm25605_vm13, %v24112_v61  ;;  %vm25606_vm10 = vmmov %vm25604_vm1  ;;  %20833 = vmatpush3.msk.msra.mxu1 %vm21339_vm11, %v21162_v19 }
0x160d   : > { %20822 = vmatprep.mubr.msk.f32.mxu1 %vm25606_vm10, %v24119_v62  ;;  %20827 = vmatprep.subr.mxu0 %v21161_v2  ;;  %vm25607_vm0 = vmmov %vm25604_vm1  ;;  %vm25613_vm1 = vcmask 130048   ;;  %vm25615_vm10 = vcmask 1043459  }
0x160e   : > { %20834 = vmatprep.subr.mxu1 %v21161_v2  ;;  %20815 = vmatmul.mubr.msk.f32.gmra.mxu0 %vm25607_vm0, %v24134_v24  ;;  %vm25608_vm3 = vmmov %vm25607_vm0  ;;  %v15989_v18 = vsel %vm25615_vm10, %v15988_v48, %v15987_v28  ;;  %v16537_v48 = vld [vmem:[%s21246_s27 + $0xd] sm:$0x1]  ;;  %v16540_v28 = vld [vmem:[%s21246_s27 + $0x3d] sm:$0x1] }
0x160f   : > { %20823 = vmatmul.mubr.msk.f32.gmra.mxu1 %vm25608_vm3, %v24141_v26  ;;  %20828 = vmatpush3.msk.msra.mxu0 %vm21266_vm6, %v21162_v19  ;;  %vm25610_vm14 = vmmov %vm25609_vm4  ;;  %vm25617_vm3 = vnez %v24793_v54  ;;  %vm25618_vm4 = vnez %v24787_v30 }
0x1610   : > { %20835 = vmatpush3.msk.msra.mxu1 %vm21347_vm12, %v21162_v19  ;;  %20829 = vmatprep.mubr.msk.f32.mxu0 %vm24831_vm15, %v21161_v2  ;;  %v16082_v21 = vsel %vm25610_vm14, %v16081_v55, %v15972_v59  ;;  %vm25612_vm7 = vmmov %vm25611_vm9  ;;  %vm25619_vm14 = vcmask 253952   ;;  %vm25621_vm9 = vcmask 1043456  }
0x1611   : > { %20836 = vmatprep.mubr.msk.f32.mxu1 %vm24831_vm15, %v21161_v2  ;;  %20839 = vmatprep.subr.mxu0 %v21161_v2  ;;  %v16084_v29 = vsel %vm25612_vm7, %v16083_v9, %v16082_v21  ;;  %vm25614_vm13 = vmmov %vm25613_vm1  ;;  %v16549_v9 = vrot.slane %v16542_v34, 7 }
0x1612   : > { %20846 = vmatprep.subr.mxu1 %v21161_v2  ;;  %vm25616_vm0 = vmmov %vm25615_vm10 }
0x1613   : > { %v16086_v39 = vsel %vm25616_vm0, %v16085_v1, %v16084_v29  ;;  %vm25622_vm7 = vmmov %vm25621_vm9  ;;  %vm25626_vm0 = vcmask 130048  }
0x16bf   : > { %v15113_v42 = vpop.f32.mrf.mxu0 }
0x16c1   : > { %v20787_v43 = vpop.f32.mrf.mxu0  ;;  %v15186_v45 = vpop.f32.mrf.mxu1 }
0x16c2   : > { %v15187_v37 = vadd.f32 %v15186_v45, %v15113_v42 }
0x16c3   : > { %v20794_v36 = vpop.f32.mrf.mxu1 }
0x16c5   : > { %v15259_v0 = vpop.f32.mrf.mxu0 }
0x16c6   : > { %v15333_v56 = vpop.f32.mrf.mxu1  ;;  %v15263_v33 = vadd.f32 %v15259_v0, %v15187_v37 }
0x16c7   : > { %v20801_v38 = vpop.f32.mrf.mxu0 }
0x16c8   : > { %v20808_v46 = vpop.f32.mrf.mxu1  ;;  %v15337_v10 = vadd.f32 %v15333_v56, %v15263_v33  ;;  %v16538_v38 = vld [vmem:[%s21246_s27 + $0x1d] sm:$0x1] }
0x16c9   : > { %v16646_v11 = vrot.slane %v16538_v38, 7 }
0x16ca   : > { %v20813_v22 = vpop.f32.mrf.mxu0  ;;  %vm15338_vm2 = vcmp.ge.f32.partialorder %v15337_v10, 0.0  ;;  %v15339_v49 = vmul.f32 0.2, %v15337_v10 }
0x16cb   : > { %v20821_v23 = vpop.f32.mrf.mxu1 }
0x16cc   : > { %v15596_v51 = vadd.f32 %v20821_v23, %v20813_v22  ;;  %v15493_v4 = vpop.f32.mrf.mxu0  ;;  %v15340_v31 = vsel %vm15338_vm2, %v15337_v10, %v15339_v49  ;;  %vm25620_vm2 = vnez %v24795_v57  ;;  %v16539_v10 = vld [vmem:[%s21246_s27 + $0x2d] sm:$0x1]  ;;  %v16541_v23 = vld [vmem:[%s21246_s27 + $0xe] sm:$0x1] }
0x16cd   : > { %v15590_v27 = vpop.f32.mrf.mxu1  ;;  %v15342_v12 = vcombine.high %v15340_v31, %v15340_v31  ;;  %v15349_v13 = vrot.slane %v15340_v31, %v21455_v32  ;;  %v16648_v29 = vrot.slane %v16539_v10, 6 }
0x16ce   : > { %v15591_v63 = vadd.f32 %v15590_v27, %v15493_v4  ;;  %20830 = vmatmul.mubr.msk.f32.vlgmr.msra.gmra.mxu0 %vm25613_vm1, %v15596_v51  ;;  %v20816_v14 = vpop.f32.mrf.mxu0  ;;  %vm25623_vm1 = vmmov %vm25619_vm14  ;;  %v16544_v51 = vld [vmem:[%s21246_s27 + $0x3e] sm:$0x1]  ;;  %v16551_v27 = vrot.slane %v16543_v8, 6 }
0x16cf   : > { %v20824_v15 = vpop.f32.mrf.mxu1  ;;  %20840 = vmatpush3.msk.msra.mxu0 %vm21309_vm8, %v21162_v19  ;;  %20843 = vmatprep.mubr.msk.f32.mxu0 %vm24831_vm15, %v21161_v2  ;;  %v15356_v40 = vrot.slane %v15342_v12, %v21455_v32  ;;  %v15357_v41 = vcombine.high %v15349_v13, %v15349_v13  ;;  %v15365_v42 = vrot.slane %v15349_v13, %v21455_v32  ;;  %vm25625_vm10 = vmmov %vm25623_vm1 }
0x16d0   : > { %20837 = vmatmul.mubr.msk.f32.vlgmr.msra.gmra.mxu1 %vm25614_vm13, %v15591_v63  ;;  %20841 = vmatprep.subr.mxu0 %v21161_v2  ;;  %v15503_v43 = vpop.f32.mrf.mxu0  ;;  %v15606_v20 = vadd.f32 %v20824_v15, %v20816_v14  ;;  %vm25624_vm13 = vmmov %vm25623_vm1  ;;  %v16553_v15 = vrot.slane %v16544_v51, 5  ;;  %v17107_v51 = vld [vmem:[%s21246_s27 + $0x1f] sm:$0x1] }
0x16d1   : > { %20847 = vmatpush3.msk.msra.mxu1 %vm25617_vm3, %v21162_v19  ;;  %v15600_v45 = vpop.f32.mrf.mxu1  ;;  %20842 = vmatpush3.msk.msra.mxu0 %vm25618_vm4, %v21162_v19  ;;  %v15358_v36 = vcombine.high %v15356_v40, %v15356_v40  ;;  %v15372_v37 = vrot.slane %v15356_v40, %v21455_v32  ;;  %v15379_v3 = vrot.slane %v15357_v41, %v21455_v32  ;;  %vm25631_vm4 = vmmov %vm25623_vm1  ;;  %v16650_v40 = vrot.slane %v16540_v28, 5  ;;  %v17108_v28 = vld [vmem:[%s21246_s27 + $0x2f] sm:$0x1] }
0x16d2   : > { %v15601_v35 = vadd.f32 %v15600_v45, %v15503_v43  ;;  %20848 = vmatprep.subr.mxu1 %v21161_v2  ;;  %20850 = vmatprep.mubr.msk.f32.mxu1 %vm24831_vm15, %v21161_v2  ;;  %v15387_v52 = vcombine.high %v15365_v42, %v15365_v42  ;;  %15399 = vst.msk [vmem:[%s21480_s25 + $0x15] sm:$0x1] %vm25619_vm14, %v15365_v42  ;;  %vm25627_vm14 = vmmov %vm25626_vm0 }
0x16d3   : > { %20849 = vmatpush3.msk.msra.mxu1 %vm25620_vm2, %v21162_v19  ;;  %20853 = vmatprep.subr.msk.mxu0 %vm25621_vm9, %v15989_v18  ;;  %v15386_v53 = vrot.slane %v15358_v36, %v21455_v32  ;;  %v15388_v55 = vcombine.high %v15372_v37, %v15372_v37  ;;  %v15389_v0 = vcombine.high %v15379_v3, %v15379_v3  ;;  %vm25628_vm2 = vmmov %vm25622_vm7 }
0x16d4   : > { %20861 = vmatprep.subr.msk.mxu1 %vm25622_vm7, %v16086_v39  ;;  %15400 = vst.msk [vmem:[%s21480_s25 + $0x35] sm:$0x1] %vm25623_vm1, %v15379_v3  ;;  %20844 = vmatmul.mubr.msk.f32.vlgmr.msra.gmra.mxu0 %vm25626_vm0, %v15601_v35  ;;  %vm25629_vm9 = vmmov %vm25628_vm2 }
0x16d5   : > { %15401 = vst.msk [vmem:[%s21480_s25 + $0x55] sm:$0x1] %vm25624_vm13, %v15387_v52  ;;  %20851 = vmatmul.mubr.msk.f32.vlgmr.msra.gmra.mxu1 %vm25627_vm14, %v15606_v20  ;;  %20854 = vmatpush3.msk.msra.mxu0 %vm25628_vm2, %v15989_v18  ;;  %v15390_v56 = vcombine.high %v15386_v53, %v15386_v53  ;;  %vm25630_vm7 = vmmov %vm25623_vm1 }
0x16d6   : > { %15403 = vst.msk [vmem:[%s21480_s25 + $0x95] sm:$0x1] %vm25625_vm10, %v15372_v37  ;;  %20862 = vmatpush3.msk.msra.mxu1 %vm25629_vm9, %v16086_v39  ;;  %vm25632_vm3 = vmmov %vm25623_vm1  ;;  %vm25633_vm1 = vcmask 31744   ;;  %20869 = vmatprep.subr.mxu0 %v21161_v2 }
0x16d7   : > { %15402 = vst.msk [vmem:[%s21480_s25 + $0x75] sm:$0x1] %vm25630_vm7, %v15389_v0  ;;  %20855 = vmatprep.mubr.msk.f32.mxu0 %vm25633_vm1, %v24080_v5  ;;  %vm25634_vm13 = vmmov %vm25633_vm1  ;;  %20876 = vmatprep.subr.mxu1 %v21161_v2  ;;  %vm25642_vm7 = vcmask 1041409  }
0x16d8   : > { %15404 = vst.msk [vmem:[%s21480_s25 + $0xb5] sm:$0x1] %vm25631_vm4, %v15386_v53  ;;  %20863 = vmatprep.mubr.msk.f32.mxu1 %vm25634_vm13, %v24087_v6  ;;  %vm25635_vm2 = vmmov %vm25632_vm3  ;;  %v16550_v63 = vsel %vm25642_vm7, %v16549_v9, %v16541_v23 }
0x16d9   : > { %15405 = vst.msk [vmem:[%s21480_s25 + $0xd5] sm:$0x1] %vm25632_vm3, %v15388_v55  ;;  %vm25636_vm10 = vmmov %vm25633_vm1 }
0x16da   : > { %15406 = vst.msk [vmem:[%s21480_s25 + $0xf5] sm:$0x1] %vm25635_vm2, %v15390_v56  ;;  %20856 = vmatmul.mubr.msk.f32.vlgmr.msra.gmra.mxu0 %vm25636_vm10, %v24098_v7  ;;  %vm25637_vm0 = vmmov %vm25633_vm1  ;;  %vm25644_vm2 = vcmask 1042434  }
0x16db   : > { %20864 = vmatmul.mubr.msk.f32.vlgmr.msra.gmra.mxu1 %vm25637_vm0, %v24105_v60  ;;  %vm25638_vm3 = vmmov %vm25637_vm0  ;;  %20870 = vmatpush3.msk.msra.mxu0 %vm21260_vm5, %v21162_v19  ;;  %v16552_v43 = vsel %vm25644_vm2, %v16551_v27, %v16550_v63 }
0x16dc   : > { %20858 = vmatprep.mubr.msk.f32.mxu0 %vm25638_vm3, %v24112_v61  ;;  %vm25639_vm4 = vmmov %vm25637_vm0  ;;  %20877 = vmatpush3.msk.msra.mxu1 %vm21339_vm11, %v21162_v19 }
0x16dd   : > { %20866 = vmatprep.mubr.msk.f32.mxu1 %vm25639_vm4, %v24119_v62  ;;  %20871 = vmatprep.subr.mxu0 %v21161_v2  ;;  %vm25640_vm14 = vmmov %vm25637_vm0  ;;  %vm25648_vm4 = vcmask 1043459  }
0x16de   : > { %20878 = vmatprep.subr.mxu1 %v21161_v2  ;;  %20859 = vmatmul.mubr.msk.f32.gmra.mxu0 %vm25640_vm14, %v24134_v24  ;;  %vm25641_vm9 = vmmov %vm25637_vm0  ;;  %vm25646_vm0 = vcmask 130048   ;;  %v16554_v53 = vsel %vm25648_vm4, %v16553_v15, %v16552_v43  ;;  %v17102_v15 = vld [vmem:[%s21246_s27 + $0xe] sm:$0x1]  ;;  %v17105_v43 = vld [vmem:[%s21246_s27 + $0x3e] sm:$0x1] }
0x16df   : > { %20867 = vmatmul.mubr.msk.f32.gmra.mxu1 %vm25641_vm9, %v24141_v26  ;;  %20872 = vmatpush3.msk.msra.mxu0 %vm21266_vm6, %v21162_v19  ;;  %vm25643_vm1 = vmmov %vm25642_vm7  ;;  %vm25650_vm9 = vnez %v24793_v54  ;;  %vm25651_vm7 = vnez %v24787_v30 }
0x16e0   : > { %20879 = vmatpush3.msk.msra.mxu1 %vm21347_vm12, %v21162_v19  ;;  %20873 = vmatprep.mubr.msk.f32.mxu0 %vm24831_vm15, %v21161_v2  ;;  %v16647_v12 = vsel %vm25643_vm1, %v16646_v11, %v16537_v48  ;;  %vm25645_vm10 = vmmov %vm25644_vm2  ;;  %vm25652_vm1 = vcmask 253952   ;;  %vm25654_vm2 = vcmask 1043456  }
0x16e1   : > { %20880 = vmatprep.mubr.msk.f32.mxu1 %vm24831_vm15, %v21161_v2  ;;  %20883 = vmatprep.subr.mxu0 %v21161_v2  ;;  %v16649_v45 = vsel %vm25645_vm10, %v16648_v29, %v16647_v12  ;;  %vm25647_vm3 = vmmov %vm25646_vm0  ;;  %v17114_v29 = vrot.slane %v17107_v51, 7 }
0x16e2   : > { %20890 = vmatprep.subr.mxu1 %v21161_v2  ;;  %vm25649_vm14 = vmmov %vm25648_vm4 }
0x16e3   : > { %v16651_v55 = vsel %vm25649_vm14, %v16650_v40, %v16649_v45  ;;  %vm25655_vm10 = vmmov %vm25654_vm2  ;;  %vm25659_vm14 = vcmask 130048  }
0x178e   : > { %v15678_v58 = vpop.f32.mrf.mxu0 }
0x1790   : > { %v20831_v59 = vpop.f32.mrf.mxu0  ;;  %v15751_v33 = vpop.f32.mrf.mxu1 }
0x1791   : > { %v15752_v47 = vadd.f32 %v15751_v33, %v15678_v58 }
0x1792   : > { %v20838_v46 = vpop.f32.mrf.mxu1 }
0x1794   : > { %v15824_v21 = vpop.f32.mrf.mxu0 }
0x1795   : > { %v15898_v22 = vpop.f32.mrf.mxu1  ;;  %v15828_v49 = vadd.f32 %v15824_v21, %v15752_v47 }
0x1796   : > { %v20845_v1 = vpop.f32.mrf.mxu0 }
0x1797   : > { %v20852_v4 = vpop.f32.mrf.mxu1  ;;  %v15902_v31 = vadd.f32 %v15898_v22, %v15828_v49  ;;  %v17103_v1 = vld [vmem:[%s21246_s27 + $0x1e] sm:$0x1] }
0x1798   : > { %v17211_v63 = vrot.slane %v17103_v1, 7 }
0x1799   : > { %vm15903_vm13 = vcmp.ge.f32.partialorder %v15902_v31, 0.0  ;;  %v15904_v18 = vmul.f32 0.2, %v15902_v31 }
0x179a   : > { %v20857_v13 = vpop.f32.mrf.mxu0 }
0x179b   : > { %v20865_v14 = vpop.f32.mrf.mxu1  ;;  %v15905_v20 = vsel %vm15903_vm13, %v15902_v31, %v15904_v18  ;;  %vm25653_vm13 = vnez %v24795_v57  ;;  %v17104_v31 = vld [vmem:[%s21246_s27 + $0x2e] sm:$0x1] }
0x179c   : > { %v16161_v39 = vadd.f32 %v20865_v14, %v20857_v13  ;;  %v16058_v41 = vpop.f32.mrf.mxu0  ;;  %v15907_v36 = vcombine.high %v15905_v20, %v15905_v20  ;;  %v15914_v37 = vrot.slane %v15905_v20, %v21455_v32  ;;  %v17106_v14 = vld [vmem:[%s21246_s27 + $0xf] sm:$0x1]  ;;  %v17213_v45 = vrot.slane %v17104_v31, 6 }
0x179d   : > { %v16155_v42 = vpop.f32.mrf.mxu1 }
0x179e   : > { %v16156_v35 = vadd.f32 %v16155_v42, %v16058_v41  ;;  %20874 = vmatmul.mubr.msk.f32.vlgmr.msra.gmra.mxu0 %vm25646_vm0, %v16161_v39  ;;  %v20860_v3 = vpop.f32.mrf.mxu0  ;;  %v15921_v0 = vrot.slane %v15907_v36, %v21455_v32  ;;  %v15922_v56 = vcombine.high %v15914_v37, %v15914_v37  ;;  %v15930_v58 = vrot.slane %v15914_v37, %v21455_v32  ;;  %vm25656_vm0 = vmmov %vm25652_vm1  ;;  %v17109_v39 = vld [vmem:[%s21246_s27 + $0x3f] sm:$0x1] }
0x179f   : > { %v20868_v52 = vpop.f32.mrf.mxu1  ;;  %20884 = vmatpush3.msk.msra.mxu0 %vm21309_vm8, %v21162_v19  ;;  %20887 = vmatprep.mubr.msk.f32.mxu0 %vm24831_vm15, %v21161_v2  ;;  %vm25658_vm4 = vmmov %vm25656_vm0  ;;  %v17116_v42 = vrot.slane %v17108_v28, 6 }
0x17a0   : > { %20881 = vmatmul.mubr.msk.f32.vlgmr.msra.gmra.mxu1 %vm25647_vm3, %v16156_v35  ;;  %20885 = vmatprep.subr.mxu0 %v21161_v2  ;;  %v16068_v59 = vpop.f32.mrf.mxu0  ;;  %v16171_v34 = vadd.f32 %v20868_v52, %v20860_v3  ;;  %v15923_v46 = vcombine.high %v15921_v0, %v15921_v0  ;;  %v15937_v47 = vrot.slane %v15921_v0, %v21455_v32  ;;  %vm25657_vm3 = vmmov %vm25656_vm0  ;;  %v17118_v52 = vrot.slane %v17109_v39, 5 }
0x17a1   : > { %20891 = vmatpush3.msk.msra.mxu1 %vm25650_vm9, %v21162_v19  ;;  %v16165_v33 = vpop.f32.mrf.mxu1  ;;  %20886 = vmatpush3.msk.msra.mxu0 %vm25651_vm7, %v21162_v19  ;;  %v15944_v8 = vrot.slane %v15922_v56, %v21455_v32  ;;  %v15952_v9 = vcombine.high %v15930_v58, %v15930_v58  ;;  %15964 = vst.msk [vmem:[%s21480_s25 + $0x17] sm:$0x1] %vm25652_vm1, %v15930_v58  ;;  %vm25660_vm1 = vmmov %vm25659_vm14  ;;  %v17215_v0 = vrot.slane %v17105_v43, 5 }
0x17a2   : > { %v16166_v38 = vadd.f32 %v16165_v33, %v16068_v59  ;;  %20892 = vmatprep.subr.mxu1 %v21161_v2  ;;  %20894 = vmatprep.mubr.msk.f32.mxu1 %vm24831_vm15, %v21161_v2  ;;  %v15951_v10 = vrot.slane %v15923_v46, %v21455_v32  ;;  %v15953_v11 = vcombine.high %v15937_v47, %v15937_v47  ;;  %vm25663_vm7 = vmmov %vm25656_vm0 }
0x17a3   : > { %20893 = vmatpush3.msk.msra.mxu1 %vm25653_vm13, %v21162_v19  ;;  %20897 = vmatprep.subr.msk.mxu0 %vm25654_vm2, %v16554_v53  ;;  %v15954_v21 = vcombine.high %v15944_v8, %v15944_v8  ;;  %15965 = vst.msk [vmem:[%s21480_s25 + $0x37] sm:$0x1] %vm25656_vm0, %v15944_v8  ;;  %vm25661_vm13 = vmmov %vm25654_vm2 }
0x17a4   : > { %20905 = vmatprep.subr.msk.mxu1 %vm25655_vm10, %v16651_v55  ;;  %15966 = vst.msk [vmem:[%s21480_s25 + $0x57] sm:$0x1] %vm25657_vm3, %v15952_v9  ;;  %20888 = vmatmul.mubr.msk.f32.vlgmr.msra.gmra.mxu0 %vm25659_vm14, %v16166_v38  ;;  %v15955_v22 = vcombine.high %v15951_v10, %v15951_v10  ;;  %vm25662_vm10 = vmmov %vm25656_vm0 }
0x17a5   : > { %15968 = vst.msk [vmem:[%s21480_s25 + $0x97] sm:$0x1] %vm25658_vm4, %v15937_v47  ;;  %20895 = vmatmul.mubr.msk.f32.vlgmr.msra.gmra.mxu1 %vm25660_vm1, %v16171_v34  ;;  %20898 = vmatpush3.msk.msra.mxu0 %vm25661_vm13, %v16554_v53  ;;  %vm25664_vm9 = vmmov %vm25656_vm0  ;;  %vm25665_vm0 = vcmask 31744  }
0x17a6   : > { %20906 = vmatpush3.msk.msra.mxu1 %vm25654_vm2, %v16651_v55  ;;  %15967 = vst.msk [vmem:[%s21480_s25 + $0x77] sm:$0x1] %vm25662_vm10, %v15954_v21  ;;  %20899 = vmatprep.mubr.msk.f32.mxu0 %vm25665_vm0, %v24080_v5  ;;  %vm25666_vm3 = vmmov %vm25665_vm0  ;;  %vm25674_vm10 = vcmask 1041409  }
0x17a7   : > { %15969 = vst.msk [vmem:[%s21480_s25 + $0xb7] sm:$0x1] %vm25663_vm7, %v15951_v10  ;;  %20907 = vmatprep.mubr.msk.f32.mxu1 %vm25666_vm3, %v24087_v6  ;;  %20913 = vmatprep.subr.mxu0 %v21161_v2  ;;  %vm25667_vm13 = vmmov %vm25658_vm4  ;;  %v17115_v35 = vsel %vm25674_vm10, %v17114_v29, %v17106_v14 }
0x17a8   : > { %15970 = vst.msk [vmem:[%s21480_s25 + $0xd7] sm:$0x1] %vm25664_vm9, %v15953_v11  ;;  %20920 = vmatprep.subr.mxu1 %v21161_v2  ;;  %vm25668_vm4 = vmmov %vm25665_vm0 }
0x17a9   : > { %15971 = vst.msk [vmem:[%s21480_s25 + $0xf7] sm:$0x1] %vm25667_vm13, %v15955_v22  ;;  %20900 = vmatmul.mubr.msk.f32.vlgmr.msra.gmra.mxu0 %vm25668_vm4, %v24098_v7  ;;  %vm25669_vm14 = vmmov %vm25665_vm0  ;;  %vm25676_vm13 = vcmask 1042434  }
0x17aa   : > { %20908 = vmatmul.mubr.msk.f32.vlgmr.msra.gmra.mxu1 %vm25669_vm14, %v24105_v60  ;;  %vm25670_vm9 = vmmov %vm25665_vm0  ;;  %20914 = vmatpush3.msk.msra.mxu0 %vm21260_vm5, %v21162_v19  ;;  %v17117_v59 = vsel %vm25676_vm13, %v17116_v42, %v17115_v35  ;;  %vm25678_vm14 = vcmask 130048   ;;  %v17667_v42 = vld [vmem:[%s21246_s27 + $0xf] sm:$0x1]  ;;  %v17670_v35 = vld [vmem:[%s21246_s27 + $0x3f] sm:$0x1] }
0x17ab   : > { %20902 = vmatprep.mubr.msk.f32.mxu0 %vm25670_vm9, %v24112_v61  ;;  %vm25671_vm7 = vmmov %vm25665_vm0  ;;  %20921 = vmatpush3.msk.msra.mxu1 %vm21339_vm11, %v21162_v19 }
0x17ac   : > { %20910 = vmatprep.mubr.msk.f32.mxu1 %vm25671_vm7, %v24119_v62  ;;  %20915 = vmatprep.subr.mxu0 %v21161_v2  ;;  %vm25672_vm1 = vmmov %vm25665_vm0  ;;  %vm25680_vm7 = vcmask 1043459  }
0x17ad   : > { %20922 = vmatprep.subr.mxu1 %v21161_v2  ;;  %20903 = vmatmul.mubr.msk.f32.gmra.mxu0 %vm25672_vm1, %v24134_v24  ;;  %vm25673_vm2 = vmmov %vm25665_vm0  ;;  %v17119_v10 = vsel %vm25680_vm7, %v17118_v52, %v17117_v59 }
0x17ae   : > { %20911 = vmatmul.mubr.msk.f32.gmra.mxu1 %vm25673_vm2, %v24141_v26  ;;  %20916 = vmatpush3.msk.msra.mxu0 %vm21266_vm6, %v21162_v19  ;;  %vm25675_vm0 = vmmov %vm25674_vm10  ;;  %vm25682_vm2 = vnez %v24793_v54  ;;  %vm25683_vm10 = vnez %v24787_v30 }
0x17af   : > { %20923 = vmatpush3.msk.msra.mxu1 %vm21347_vm12, %v21162_v19  ;;  %20917 = vmatprep.mubr.msk.f32.mxu0 %vm24831_vm15, %v21161_v2  ;;  %v17212_v36 = vsel %vm25675_vm0, %v17211_v63, %v17102_v15  ;;  %vm25677_vm4 = vmmov %vm25676_vm13  ;;  %vm25684_vm0 = vcmask 253952   ;;  %vm25686_vm13 = vcmask 1043456  }
0x17b0   : > { %20924 = vmatprep.mubr.msk.f32.mxu1 %vm24831_vm15, %v21161_v2  ;;  %20927 = vmatprep.subr.mxu0 %v21161_v2  ;;  %v17214_v33 = vsel %vm25677_vm4, %v17213_v45, %v17212_v36  ;;  %vm25679_vm9 = vmmov %vm25678_vm14 }
0x17b1   : > { %20934 = vmatprep.subr.mxu1 %v21161_v2  ;;  %vm25681_vm1 = vmmov %vm25680_vm7 }
0x17b2   : > { %v17216_v11 = vsel %vm25681_vm1, %v17215_v0, %v17214_v33  ;;  %vm25687_vm4 = vmmov %vm25686_vm13  ;;  %vm25691_vm1 = vcmask 130048  }
0x17b3   : > { %vm25690_vm7 = vmmov %vm25684_vm0 }
0x185e   : > { %v16243_v23 = vpop.f32.mrf.mxu0 }
0x1860   : > { %v20875_v48 = vpop.f32.mrf.mxu0  ;;  %v16316_v49 = vpop.f32.mrf.mxu1 }
0x1861   : > { %v16317_v27 = vadd.f32 %v16316_v49, %v16243_v23 }
0x1862   : > { %v20882_v4 = vpop.f32.mrf.mxu1 }
0x1864   : > { %v16389_v12 = vpop.f32.mrf.mxu0 }
0x1865   : > { %v16463_v13 = vpop.f32.mrf.mxu1  ;;  %v16393_v18 = vadd.f32 %v16389_v12, %v16317_v27 }
0x1866   : > { %v20889_v40 = vpop.f32.mrf.mxu0 }
0x1867   : > { %v20896_v41 = vpop.f32.mrf.mxu1  ;;  %v16467_v20 = vadd.f32 %v16463_v13, %v16393_v18  ;;  %v17669_v18 = vld [vmem:[%s21246_s27 + $0x2f] sm:$0x1] }
0x1868   : > { %v17677_v36 = vrot.slane %v17669_v18, 6 }
0x1869   : > { %v20901_v37 = vpop.f32.mrf.mxu0  ;;  %vm16468_vm3 = vcmp.ge.f32.partialorder %v16467_v20, 0.0  ;;  %v16469_v53 = vmul.f32 0.2, %v16467_v20 }
0x186a   : > { %v20909_v3 = vpop.f32.mrf.mxu1 }
0x186b   : > { %v16726_v55 = vadd.f32 %v20909_v3, %v20901_v37  ;;  %v16623_v56 = vpop.f32.mrf.mxu0  ;;  %v16470_v34 = vsel %vm16468_vm3, %v16467_v20, %v16469_v53  ;;  %vm25685_vm3 = vnez %v24795_v57 }
0x186c   : > { %v16720_v58 = vpop.f32.mrf.mxu1  ;;  %v16472_v46 = vcombine.high %v16470_v34, %v16470_v34  ;;  %v16479_v47 = vrot.slane %v16470_v34, %v21455_v32 }
0x186d   : > { %v16721_v38 = vadd.f32 %v16720_v58, %v16623_v56  ;;  %20918 = vmatmul.mubr.msk.f32.vlgmr.msra.gmra.mxu0 %vm25678_vm14, %v16726_v55  ;;  %v20904_v8 = vpop.f32.mrf.mxu0  ;;  %vm25688_vm14 = vmmov %vm25684_vm0  ;;  %v17679_v56 = vrot.slane %v17670_v35, 5 }
0x186e   : > { %v20912_v9 = vpop.f32.mrf.mxu1  ;;  %20928 = vmatpush3.msk.msra.mxu0 %vm21309_vm8, %v21162_v19  ;;  %20931 = vmatprep.mubr.msk.f32.mxu0 %vm24831_vm15, %v21161_v2  ;;  %v16486_v21 = vrot.slane %v16472_v46, %v21455_v32  ;;  %v16487_v22 = vcombine.high %v16479_v47, %v16479_v47  ;;  %v16495_v23 = vrot.slane %v16479_v47, %v21455_v32 }
0x186f   : > { %20925 = vmatmul.mubr.msk.f32.vlgmr.msra.gmra.mxu1 %vm25679_vm9, %v16721_v38  ;;  %20929 = vmatprep.subr.mxu0 %v21161_v2  ;;  %v16633_v48 = vpop.f32.mrf.mxu0  ;;  %v16736_v51 = vadd.f32 %v20912_v9, %v20904_v8  ;;  %vm25689_vm9 = vmmov %vm25684_vm0 }
0x1870   : > { %20935 = vmatpush3.msk.msra.mxu1 %vm25682_vm2, %v21162_v19  ;;  %v16730_v49 = vpop.f32.mrf.mxu1  ;;  %20930 = vmatpush3.msk.msra.mxu0 %vm25683_vm10, %v21162_v19  ;;  %v16488_v4 = vcombine.high %v16486_v21, %v16486_v21  ;;  %v16502_v27 = vrot.slane %v16486_v21, %v21455_v32  ;;  %v16509_v28 = vrot.slane %v16487_v22, %v21455_v32 }
0x1871   : > { %v16731_v1 = vadd.f32 %v16730_v49, %v16633_v48  ;;  %20936 = vmatprep.subr.mxu1 %v21161_v2  ;;  %20938 = vmatprep.mubr.msk.f32.mxu1 %vm24831_vm15, %v21161_v2  ;;  %v16517_v29 = vcombine.high %v16495_v23, %v16495_v23  ;;  %16529 = vst.msk [vmem:[%s21480_s25 + $0x19] sm:$0x1] %vm25684_vm0, %v16495_v23  ;;  %vm25692_vm0 = vmmov %vm25691_vm1 }
0x1872   : > { %20937 = vmatpush3.msk.msra.mxu1 %vm25685_vm3, %v21162_v19  ;;  %20941 = vmatprep.subr.msk.mxu0 %vm25686_vm13, %v17119_v10  ;;  %v16516_v31 = vrot.slane %v16488_v4, %v21455_v32  ;;  %v16518_v63 = vcombine.high %v16502_v27, %v16502_v27  ;;  %v16519_v12 = vcombine.high %v16509_v28, %v16509_v28  ;;  %vm25693_vm3 = vmmov %vm25687_vm4 }
0x1873   : > { %20949 = vmatprep.subr.msk.mxu1 %vm25687_vm4, %v17216_v11  ;;  %16530 = vst.msk [vmem:[%s21480_s25 + $0x39] sm:$0x1] %vm25688_vm14, %v16509_v28  ;;  %20932 = vmatmul.mubr.msk.f32.vlgmr.msra.gmra.mxu0 %vm25691_vm1, %v16731_v1  ;;  %vm25694_vm13 = vmmov %vm25693_vm3  ;;  %vm25698_vm14 = vcmask 31744  }
0x1874   : > { %16531 = vst.msk [vmem:[%s21480_s25 + $0x59] sm:$0x1] %vm25689_vm9, %v16517_v29  ;;  %20939 = vmatmul.mubr.msk.f32.vlgmr.msra.gmra.mxu1 %vm25692_vm0, %v16736_v51  ;;  %20942 = vmatpush3.msk.msra.mxu0 %vm25693_vm3, %v17119_v10  ;;  %v16520_v13 = vcombine.high %v16516_v31, %v16516_v31  ;;  %vm25695_vm4 = vmmov %vm25690_vm7 }
0x1875   : > { %16533 = vst.msk [vmem:[%s21480_s25 + $0x99] sm:$0x1] %vm25690_vm7, %v16502_v27  ;;  %20950 = vmatpush3.msk.msra.mxu1 %vm25694_vm13, %v17216_v11  ;;  %vm25696_vm10 = vmmov %vm25695_vm4  ;;  %20943 = vmatprep.mubr.msk.f32.mxu0 %vm25698_vm14, %v24080_v5 }
0x1876   : > { %16532 = vst.msk [vmem:[%s21480_s25 + $0x79] sm:$0x1] %vm25695_vm4, %v16519_v12  ;;  %vm25697_vm2 = vmmov %vm25695_vm4  ;;  %20957 = vmatprep.subr.mxu0 %v21161_v2  ;;  %20964 = vmatprep.subr.mxu1 %v21161_v2  ;;  %vm25707_vm4 = vcmask 1041409  }
0x1877   : > { %16534 = vst.msk [vmem:[%s21480_s25 + $0xb9] sm:$0x1] %vm25696_vm10, %v16516_v31  ;;  %vm25699_vm9 = vmmov %vm25698_vm14 }
0x1878   : > { %16535 = vst.msk [vmem:[%s21480_s25 + $0xd9] sm:$0x1] %vm25697_vm2, %v16518_v63  ;;  %20951 = vmatprep.mubr.msk.f32.mxu1 %vm25699_vm9, %v24087_v6  ;;  %vm25700_vm3 = vmmov %vm25697_vm2 }
0x1879   : > { %16536 = vst.msk [vmem:[%s21480_s25 + $0xf9] sm:$0x1] %vm25700_vm3, %v16520_v13  ;;  %vm25701_vm7 = vmmov %vm25699_vm9  ;;  %vm25708_vm9 = vcmask 1042434   ;;  %vm25709_vm3 = vcmask 130048  }
0x187a   : > { %20944 = vmatmul.mubr.msk.f32.vlgmr.msra.gmra.mxu0 %vm25701_vm7, %v24098_v7  ;;  %vm25702_vm1 = vmmov %vm25701_vm7 }
0x187b   : > { %20952 = vmatmul.mubr.msk.f32.vlgmr.msra.gmra.mxu1 %vm25702_vm1, %v24105_v60  ;;  %vm25703_vm2 = vmmov %vm25702_vm1  ;;  %20958 = vmatpush3.msk.msra.mxu0 %vm21260_vm5, %v21162_v19 }
0x187c   : > { %20946 = vmatprep.mubr.msk.f32.mxu0 %vm25703_vm2, %v24112_v61  ;;  %vm25704_vm10 = vmmov %vm25702_vm1  ;;  %20965 = vmatpush3.msk.msra.mxu1 %vm21339_vm11, %v21162_v19  ;;  %vm25712_vm2 = vnez %v24793_v54 }
0x187d   : > { %20954 = vmatprep.mubr.msk.f32.mxu1 %vm25704_vm10, %v24119_v62  ;;  %20959 = vmatprep.subr.mxu0 %v21161_v2  ;;  %vm25705_vm0 = vmmov %vm25702_vm1  ;;  %vm25711_vm1 = vcmask 1043459   ;;  %vm25713_vm10 = vnez %v24787_v30 }
0x187e   : > { %20966 = vmatprep.subr.mxu1 %v21161_v2  ;;  %20947 = vmatmul.mubr.msk.f32.gmra.mxu0 %vm25705_vm0, %v24134_v24  ;;  %vm25706_vm13 = vmmov %vm25705_vm0  ;;  %v17668_v24 = vld [vmem:[%s21246_s27 + $0x1f] sm:$0x1]  ;;  %vm25714_vm0 = vcmask 253952   ;;  %s18934_s27 = sshll.u32 %s21204_s13, 12  ;;  %s24717_s13 = scalar_lea.sflag [#allocation3], %s134_s23 }
0x187f   : > { %20955 = vmatmul.mubr.msk.f32.gmra.mxu1 %vm25706_vm13, %v24141_v26  ;;  %20960 = vmatpush3.msk.msra.mxu0 %vm21266_vm6, %v21162_v19  ;;  %v17675_v39 = vrot.slane %v17668_v24, 7  ;;  %vm25710_vm7 = vmmov %vm25709_vm3  ;;  %vm25715_vm13 = vnez %v24795_v57  ;;  %s24703_s4 = scalar_lea.hbm %s24759_s2, %s18934_s27 }
0x1880   : > { %20961 = vmatprep.mubr.msk.f32.mxu0 %vm24831_vm15, %v21161_v2  ;;  %20967 = vmatpush3.msk.msra.mxu1 %vm21347_vm12, %v21162_v19 }
0x1881   : > { %20968 = vmatprep.mubr.msk.f32.mxu1 %vm24831_vm15, %v21161_v2  ;;  %20971 = vmatprep.subr.mxu0 %v21161_v2  ;;  %v17676_v3 = vsel %vm25707_vm4, %v17675_v39, %v17667_v42  ;;  %vm25716_vm4 = vcmask 1043456  }
0x1882   : > { %20978 = vmatprep.subr.mxu1 %v21161_v2  ;;  %v17678_v33 = vsel %vm25708_vm9, %v17677_v36, %v17676_v3  ;;  %vm25718_vm9 = vmmov %vm25714_vm0 }
0x1883   : > { %v17680_v10 = vsel %vm25711_vm1, %v17679_v56, %v17678_v33 }
0x192d   : > { %v16808_v5 = vpop.f32.mrf.mxu0 }
0x192f   : > { %v20919_v7 = vpop.f32.mrf.mxu0  ;;  %v16881_v61 = vpop.f32.mrf.mxu1 }
0x1930   : > { %v16882_v15 = vadd.f32 %v16881_v61, %v16808_v5 }
0x1931   : > { %v20926_v14 = vpop.f32.mrf.mxu1 }
0x1933   : > { %v16954_v40 = vpop.f32.mrf.mxu0 }
0x1934   : > { %v17028_v41 = vpop.f32.mrf.mxu1  ;;  %v16958_v43 = vadd.f32 %v16954_v40, %v16882_v15 }
0x1935   : > { %v20933_v45 = vpop.f32.mrf.mxu0 }
0x1936   : > { %v20940_v20 = vpop.f32.mrf.mxu1  ;;  %v17032_v37 = vadd.f32 %v17028_v41, %v16958_v43 }
0x1938   : > { %vm17033_vm14 = vcmp.ge.f32.partialorder %v17032_v37, 0.0  ;;  %v17034_v55 = vmul.f32 0.2, %v17032_v37 }
0x193a   : > { %v20945_v52 = vpop.f32.mrf.mxu0  ;;  %v17035_v34 = vsel %vm17033_vm14, %v17032_v37, %v17034_v55  ;;  %vm25717_vm14 = vmmov %vm25709_vm3 }
0x193b   : > { %v20953_v53 = vpop.f32.mrf.mxu1  ;;  %v17037_v46 = vcombine.high %v17035_v34, %v17035_v34  ;;  %v17044_v47 = vrot.slane %v17035_v34, %v21455_v32  ;;  %vm25721_vm1 = vmmov %vm25717_vm14 }
0x193c   : > { %v17291_v0 = vadd.f32 %v20953_v53, %v20945_v52  ;;  %v17188_v58 = vpop.f32.mrf.mxu0 }
0x193d   : > { %v17285_v59 = vpop.f32.mrf.mxu1  ;;  %v17051_v11 = vrot.slane %v17037_v46, %v21455_v32  ;;  %v17052_v21 = vcombine.high %v17044_v47, %v17044_v47  ;;  %v17060_v22 = vrot.slane %v17044_v47, %v21455_v32 }
0x193e   : > { %v17286_v38 = vadd.f32 %v17285_v59, %v17188_v58  ;;  %20962 = vmatmul.mubr.msk.f32.vlgmr.msra.gmra.mxu0 %vm25709_vm3, %v17291_v0  ;;  %v20948_v8 = vpop.f32.mrf.mxu0  ;;  %vm25719_vm3 = vmmov %vm25714_vm0 }
0x193f   : > { %v20956_v9 = vpop.f32.mrf.mxu1  ;;  %20972 = vmatpush3.msk.msra.mxu0 %vm21309_vm8, %v21162_v19  ;;  %20975 = vmatprep.mubr.msk.f32.mxu0 %vm24831_vm15, %v21161_v2  ;;  %v17053_v1 = vcombine.high %v17051_v11, %v17051_v11  ;;  %v17067_v4 = vrot.slane %v17051_v11, %v21455_v32  ;;  %v17074_v27 = vrot.slane %v17052_v21, %v21455_v32 }
0x1940   : > { %20969 = vmatmul.mubr.msk.f32.vlgmr.msra.gmra.mxu1 %vm25710_vm7, %v17286_v38  ;;  %20973 = vmatprep.subr.mxu0 %v21161_v2  ;;  %v17198_v23 = vpop.f32.mrf.mxu0  ;;  %v17301_v49 = vadd.f32 %v20956_v9, %v20948_v8  ;;  %v17082_v28 = vcombine.high %v17060_v22, %v17060_v22  ;;  %17094 = vst.msk [vmem:[%s21480_s25 + $0x1b] sm:$0x1] %vm25714_vm0, %v17060_v22  ;;  %vm25720_vm7 = vmmov %vm25714_vm0 }
0x1941   : > { %v17295_v48 = vpop.f32.mrf.mxu1  ;;  %20979 = vmatpush3.msk.msra.mxu1 %vm25712_vm2, %v21162_v19  ;;  %20974 = vmatpush3.msk.msra.mxu0 %vm25713_vm10, %v21162_v19  ;;  %v17081_v29 = vrot.slane %v17053_v1, %v21455_v32  ;;  %v17083_v31 = vcombine.high %v17067_v4, %v17067_v4  ;;  %v17084_v63 = vcombine.high %v17074_v27, %v17074_v27  ;;  %vm25722_vm0 = vmmov %vm25716_vm4 }
0x1942   : > { %v17296_v51 = vadd.f32 %v17295_v48, %v17198_v23  ;;  %20980 = vmatprep.subr.mxu1 %v21161_v2  ;;  %20982 = vmatprep.mubr.msk.f32.mxu1 %vm24831_vm15, %v21161_v2  ;;  %17095 = vst.msk [vmem:[%s21480_s25 + $0x3b] sm:$0x1] %vm25718_vm9, %v17074_v27  ;;  %vm25726_vm2 = vmmov %vm25719_vm3 }
0x1943   : > { %20981 = vmatpush3.msk.msra.mxu1 %vm25715_vm13, %v21162_v19  ;;  %20985 = vmatprep.subr.msk.mxu0 %vm25716_vm4, %v17680_v10  ;;  %17096 = vst.msk [vmem:[%s21480_s25 + $0x5b] sm:$0x1] %vm25719_vm3, %v17082_v28  ;;  %vm25723_vm13 = vcmask 31744   ;;  %v17085_v12 = vcombine.high %v17081_v29, %v17081_v29  ;;  %vm25724_vm4 = vmmov %vm25719_vm3 }
0x1944   : > { %20976 = vmatmul.mubr.msk.f32.vlgmr.msra.gmra.mxu0 %vm25717_vm14, %v17296_v51  ;;  %17098 = vst.msk [vmem:[%s21480_s25 + $0x9b] sm:$0x1] %vm25720_vm7, %v17067_v4  ;;  %20983 = vmatmul.mubr.msk.f32.vlgmr.msra.gmra.mxu1 %vm25721_vm1, %v17301_v49  ;;  %vm25725_vm14 = vmmov %vm25719_vm3  ;;  %vm25736_vm7 = vnez %v24795_v57 }
0x1945   : > { %20986 = vmatpush3.msk.msra.mxu0 %vm25722_vm0, %v17680_v10  ;;  %20987 = vmatprep.mubr.msk.f32.mxu0 %vm25723_vm13, %v24087_v6  ;;  %17097 = vst.msk [vmem:[%s21480_s25 + $0x7b] sm:$0x1] %vm25724_vm4, %v17084_v63  ;;  %vm25727_vm9 = vmmov %vm25723_vm13 }
0x1946   : > { %20993 = vmatprep.subr.mxu1 %v21161_v2  ;;  %17099 = vst.msk [vmem:[%s21480_s25 + $0xbb] sm:$0x1] %vm25725_vm14, %v17081_v29  ;;  %21007 = vmatprep.subr.mxu0 %v21161_v2  ;;  %vm25728_vm13 = vmmov %vm25726_vm2 }
0x1947   : > { %17100 = vst.msk [vmem:[%s21480_s25 + $0xdb] sm:$0x1] %vm25726_vm2, %v17083_v31  ;;  %20994 = vmatpush3.msk.msra.mxu1 %vm21260_vm5, %v21162_v19  ;;  %vm25729_vm3 = vmmov %vm25727_vm9  ;;  %20997 = vmatprep.mubr.msk.f32.mxu1 %vm24831_vm15, %v21161_v2 }
0x1948   : > { %20988 = vmatmul.mubr.msk.f32.vlgmr.msra.gmra.mxu0 %vm25727_vm9, %v24105_v60  ;;  %20995 = vmatprep.subr.mxu1 %v21161_v2  ;;  %17101 = vst.msk [vmem:[%s21480_s25 + $0xfb] sm:$0x1] %vm25728_vm13, %v17085_v12  ;;  %vm25730_vm5 = vmmov %vm25729_vm3 }
0x1949   : > { %20990 = vmatprep.mubr.msk.f32.mxu0 %vm25729_vm3, %v24119_v62  ;;  %20996 = vmatpush3.msk.msra.mxu1 %vm21266_vm6, %v21162_v19  ;;  %vm25732_vm2 = vmmov %vm25721_vm1 }
0x194a   : > { %21008 = vmatpush3.msk.msra.mxu0 %vm21309_vm8, %v21162_v19  ;;  %21000 = vmatprep.subr.mxu1 %v21161_v2  ;;  %vm25731_vm8 = vmmov %vm25721_vm1 }
0x194b   : > { %21009 = vmatprep.subr.mxu0 %v21161_v2 }
0x194c   : > { %20991 = vmatmul.mubr.msk.f32.gmra.mxu0 %vm25730_vm5, %v24141_v26 }
0x194d   : > { %21010 = vmatpush3.msk.msra.mxu0 %vm25713_vm10, %v21162_v19  ;;  %21011 = vmatprep.mubr.msk.f32.mxu0 %vm24831_vm15, %v21161_v2  ;;  %vm25735_vm10 = vmmov %vm25724_vm4 }
0x19fe   : > { %v17373_v16 = vpop.f32.mrf.mxu0 }
0x1a00   : > { %v20963_v17 = vpop.f32.mrf.mxu0  ;;  %v17446_v25 = vpop.f32.mrf.mxu1 }
0x1a01   : > { %v17447_v60 = vadd.f32 %v17446_v25, %v17373_v16 }
0x1a02   : > { %v20970_v6 = vpop.f32.mrf.mxu1 }
0x1a04   : > { %v17519_v62 = vpop.f32.mrf.mxu0  ;;  %v17593_v5 = vpop.f32.mrf.mxu1 }
0x1a05   : > { %v17523_v13 = vadd.f32 %v17519_v62, %v17447_v60 }
0x1a06   : > { %v20977_v7 = vpop.f32.mrf.mxu0  ;;  %v20984_v24 = vpop.f32.mrf.mxu1 }
0x1a07   : > { %v17597_v61 = vadd.f32 %v17593_v5, %v17523_v13 }
0x1a08   : > { %v20989_v14 = vpop.f32.mrf.mxu0 }
0x1a09   : > { %vm17598_vm6 = vcmp.ge.f32.partialorder %v17597_v61, 0.0  ;;  %v17599_v26 = vmul.f32 0.2, %v17597_v61  ;;  %20998 = vmatmul.mubr.msk.f32.vlgmr.msra.gmra.mxu1 %vm25731_vm8, %v20989_v14 }
0x1a0a   : > { %21001 = vmatpush3.msk.msra.mxu1 %vm21339_vm11, %v21162_v19  ;;  %v17749_v30 = vpop.f32.mrf.mxu0  ;;  %21004 = vmatprep.mubr.msk.f32.mxu1 %vm24831_vm15, %v21161_v2  ;;  %vm25733_vm11 = vnez %v24793_v54 }
0x1a0b   : > { %v17600_v15 = vsel %vm17598_vm6, %v17597_v61, %v17599_v26  ;;  %21002 = vmatprep.subr.mxu1 %v21161_v2 }
0x1a0c   : > { %v17602_v18 = vcombine.high %v17600_v15, %v17600_v15  ;;  %v17609_v39 = vrot.slane %v17600_v15, %v21455_v32  ;;  %21003 = vmatpush3.msk.msra.mxu1 %vm21347_vm12, %v21162_v19  ;;  %v20992_v40 = vpop.f32.mrf.mxu0  ;;  %vm25734_vm12 = vmmov %vm25721_vm1 }
0x1a0d   : > { %21014 = vmatprep.subr.mxu1 %v21161_v2  ;;  %21005 = vmatmul.mubr.msk.f32.vlgmr.msra.gmra.mxu1 %vm25732_vm2, %v17749_v30 }
0x1a0e   : > { %v17616_v44 = vrot.slane %v17602_v18, %v21455_v32  ;;  %v17617_v41 = vcombine.high %v17609_v39, %v17609_v39  ;;  %v17625_v42 = vrot.slane %v17609_v39, %v21455_v32  ;;  %21015 = vmatpush3.msk.msra.mxu1 %vm25733_vm11, %v21162_v19  ;;  %v17759_v43 = vpop.f32.mrf.mxu0  ;;  %21018 = vmatprep.mubr.msk.f32.mxu1 %vm24831_vm15, %v21161_v2  ;;  %vm25737_vm15 = vmmov %vm25721_vm1 }
0x1a0f   : > { %21016 = vmatprep.subr.mxu1 %v21161_v2  ;;  %21012 = vmatmul.mubr.msk.f32.vlgmr.msra.gmra.mxu0 %vm25734_vm12, %v17759_v43  ;;  %vm25738_vm1 = vmmov %vm25724_vm4 }
0x1a10   : > { %v17618_v50 = vcombine.high %v17616_v44, %v17616_v44  ;;  %v17632_v45 = vrot.slane %v17616_v44, %v21455_v32  ;;  %v17639_v54 = vrot.slane %v17617_v41, %v21455_v32  ;;  %v17647_v20 = vcombine.high %v17625_v42, %v17625_v42  ;;  %17659 = vst.msk [vmem:[%s21480_s25 + $0x1d] sm:$0x1] %vm25735_vm10, %v17625_v42  ;;  %vm25739_vm0 = vmmov %vm25738_vm1 }
0x1a11   : > { %21017 = vmatpush3.msk.msra.mxu1 %vm25736_vm7, %v21162_v19  ;;  %vm25740_vm4 = vmmov %vm25739_vm0 }
0x1a12   : > { %21019 = vmatmul.mubr.msk.f32.vlgmr.msra.gmra.mxu1 %vm25737_vm15, %v20992_v40  ;;  %v17646_v2 = vrot.slane %v17618_v50, %v21455_v32  ;;  %v17648_v35 = vcombine.high %v17632_v45, %v17632_v45  ;;  %v17649_v36 = vcombine.high %v17639_v54, %v17639_v54  ;;  %17660 = vst.msk [vmem:[%s21480_s25 + $0x3d] sm:$0x1] %vm25738_vm1, %v17639_v54  ;;  %vm25741_vm14 = vmmov %vm25739_vm0 }
0x1a13   : > { %17661 = vst.msk [vmem:[%s21480_s25 + $0x5d] sm:$0x1] %vm25739_vm0, %v17647_v20  ;;  %vm25742_vm9 = vmmov %vm25739_vm0 }
0x1a14   : > { %17663 = vst.msk [vmem:[%s21480_s25 + $0x9d] sm:$0x1] %vm25740_vm4, %v17632_v45  ;;  %v17650_v37 = vcombine.high %v17646_v2, %v17646_v2  ;;  %vm25743_vm13 = vmmov %vm25739_vm0 }
0x1a15   : > { %17662 = vst.msk [vmem:[%s21480_s25 + $0x7d] sm:$0x1] %vm25741_vm14, %v17649_v36  ;;  %vm25744_vm3 = vmmov %vm25739_vm0 }
0x1a16   : > { %17664 = vst.msk [vmem:[%s21480_s25 + $0xbd] sm:$0x1] %vm25742_vm9, %v17646_v2  ;;  %vm25745_vm6 = vmmov %vm25739_vm0 }
0x1a17   : > { %17665 = vst.msk [vmem:[%s21480_s25 + $0xdd] sm:$0x1] %vm25743_vm13, %v17648_v35  ;;  %vm25746_vm8 = vmmov %vm25739_vm0 }
0x1a18   : > { %17666 = vst.msk [vmem:[%s21480_s25 + $0xfd] sm:$0x1] %vm25744_vm3, %v17650_v37  ;;  %vm25747_vm2 = vmmov %vm25739_vm0 }
0x1a19   : > { %vm25748_vm11 = vmmov %vm25739_vm0 }
0x1a1a   : > { %vm25749_vm12 = vmmov %vm25739_vm0 }
0x1a1b   : > { %vm25750_vm10 = vmmov %vm25739_vm0 }
0x1a1c   : > { %vm25751_vm7 = vmmov %vm25739_vm0 }
0x1a1d   : > { %vm25752_vm15 = vmmov %vm25739_vm0 }
0x1ac9   : > { %v17837_v19 = vpop.f32.mrf.mxu1 }
0x1acb   : > { %v20999_v57 = vpop.f32.mrf.mxu1 }
0x1acd   : > { %v17910_v3 = vpop.f32.mrf.mxu1 }
0x1ace   : > { %v17911_v52 = vadd.f32 %v17910_v3, %v17837_v19 }
0x1acf   : > { %v21006_v53 = vpop.f32.mrf.mxu1  ;;  %v17983_v55 = vpop.f32.mrf.mxu0 }
0x1ad0   : > { %v17987_v0 = vadd.f32 %v17983_v55, %v17911_v52 }
0x1ad1   : > { %v21013_v56 = vpop.f32.mrf.mxu0 }
0x1ad2   : > { %v18057_v58 = vpop.f32.mrf.mxu1 }
0x1ad3   : > { %v18061_v59 = vadd.f32 %v18057_v58, %v17987_v0 }
0x1ad4   : > { %v21020_v33 = vpop.f32.mrf.mxu1 }
0x1ad5   : > { %vm18062_vm5 = vcmp.ge.f32.partialorder %v18061_v59, 0.0  ;;  %v18063_v34 = vmul.f32 0.2, %v18061_v59 }
0x1ad7   : > { %v18064_v38 = vsel %vm18062_vm5, %v18061_v59, %v18063_v34 }
0x1ad8   : > { %v18066_v46 = vcombine.high %v18064_v38, %v18064_v38  ;;  %v18073_v47 = vrot.slane %v18064_v38, %v21455_v32 }
0x1ada   : > { %v18080_v8 = vrot.slane %v18066_v46, %v21455_v32  ;;  %v18081_v9 = vcombine.high %v18073_v47, %v18073_v47  ;;  %v18089_v10 = vrot.slane %v18073_v47, %v21455_v32 }
0x1adc   : > { %v18082_v11 = vcombine.high %v18080_v8, %v18080_v8  ;;  %v18096_v21 = vrot.slane %v18080_v8, %v21455_v32  ;;  %v18103_v22 = vrot.slane %v18081_v9, %v21455_v32  ;;  %v18111_v23 = vcombine.high %v18089_v10, %v18089_v10  ;;  %18123 = vst.msk [vmem:[%s21480_s25 + $0x1f] sm:$0x1] %vm25745_vm6, %v18089_v10 }
0x1ade   : > { %v18110_v48 = vrot.slane %v18082_v11, %v21455_v32  ;;  %v18112_v49 = vcombine.high %v18096_v21, %v18096_v21  ;;  %v18113_v51 = vcombine.high %v18103_v22, %v18103_v22  ;;  %18124 = vst.msk [vmem:[%s21480_s25 + $0x3f] sm:$0x1] %vm25746_vm8, %v18103_v22 }
0x1adf   : > { %18125 = vst.msk [vmem:[%s21480_s25 + $0x5f] sm:$0x1] %vm25747_vm2, %v18111_v23 }
0x1ae0   : > { %18127 = vst.msk [vmem:[%s21480_s25 + $0x9f] sm:$0x1] %vm25748_vm11, %v18096_v21  ;;  %v18114_v32 = vcombine.high %v18110_v48, %v18110_v48 }
0x1ae1   : > { %18126 = vst.msk [vmem:[%s21480_s25 + $0x7f] sm:$0x1] %vm25749_vm12, %v18113_v51 }
0x1ae2   : > { %18128 = vst.msk [vmem:[%s21480_s25 + $0xbf] sm:$0x1] %vm25750_vm10, %v18110_v48 }
0x1ae3   : > { %18129 = vst.msk [vmem:[%s21480_s25 + $0xdf] sm:$0x1] %vm25751_vm7, %v18112_v49 }
0x1ae4   : > { %18130 = vst.msk [vmem:[%s21480_s25 + $0xff] sm:$0x1] %vm25752_vm15, %v18114_v32 }
0x1ae5   : > { %21112 = shalt.err (!%p21109_p3)
}
0x1ae6   : > { %s21113_s23 = scalar_lea.hbm %s24703_s4, 4096  ;;  %s21117_s16 = scalar_lea.hbm %s24759_s2, 8192 }
0x1ae7   : > { %p21114_p4 = scmp.ne.s32.totalorder %s24703_s4, %s21113_s23  ;;  %p21118_p9 = scmp.lt.s32.totalorder %s24703_s4, %s24759_s2 }
0x1ae8   : > { %p21119_p10 = scmp.lt.s32.totalorder %s21117_s16, %s21113_s23 }
0x1ae9   : > { %p21115_p7 = pnand %p21114_p4, %p21221_p5 }
0x1aea   : > { %p21120_p11 = por %p21119_p10, %p21118_p9 }
0x1aeb   : > { %p21116_p8 = pneg %p21115_p7 }
0x1aed   : > { %p21121_p12 = pnand %p21120_p11, %p21116_p8 }
0x1aef   : > { %21124 = shalt.err (!%p21121_p12)
}
0x1af0   : > { %s21166_s22 = smov 128   ;;  %s21167_s24 = smov 8  }
0x1af1   : > { %21021 = dma.vmem_to_hbm [thread:$0]  (%p21221_p5), %s24705_s29, 4096, %s24703_s4, %s24717_s13, %s21166_s22, %s21166_s22, %s21167_s24  }
0x1af2 PF: > { %p21027_p13 = scmp.ge.s32.totalorder %s21159_s12, 2  ;;  %s18160_s26 = sand.u32 1, %s21147_s9  }
0x1af3   : > { %s18161_s28 = scalar_lea.sflag [#allocation3], %s18160_s26 }
0x1af4   : > { %p21024_p0 = pnand %p21027_p13, %p21225_p6 }
0x1af6   : > { %p21025_p1 = pneg %p21024_p0 }
0x1af8   : > { %21142 = dma.done.wait (%p21025_p1), %s18161_s28, 4096  }
0x1af9   : > { %21144 = vsyncadd (%p21025_p1), %s18161_s28, 4294963200  ;;  %p12_p2 = scmp.ge.s32.totalorder %s21208_s15, 4   ;;  %s25753_s9 = smov %s21151_s10 }
0x1afa   : > { %s25754_s10 = smov %s21155_s11  ;;  %s25755_s11 = smov %s21219_s18 }
0x1afb   : > { %s25756_s12 = smov %s21208_s15  ;;  %14 = sbr.rel (!%p12_p2) target bundleno = 3 (0x3), region = 66 }
0x1b00   :  { %18166 = vsyncpa [#allocation3], 1 }
0x1b01   :  { %18168 = vsyncpa [#allocation3 + $0x1], 1 }

</bundles_post_ra>
